<compile_context>
chip_gen: v6e
topology: v6e:2x2x1
jax: 0.10.0
libtpu: 0.0.40
codegen_flags: <defaults>
</compile_context>

<pallas_src>
import math

import jax
import jax.numpy as jnp
from jax.experimental import pallas as pl
from jax.experimental.pallas import tpu as pltpu


# ---------------------------------------------------------------------------
# Fused per-level head kernel: cv2 branch + cv3 branch + ContrastiveHead
# ---------------------------------------------------------------------------

def world_level_fused(x, p, tmat, logit_scale, ch_bias, nc, reg_max=16):
    """One FPN level of WorldDetect.

    x:    (B, H, W, Cin)  NHWC float32 input feature map
    p:    per-level params dict (BN already folded to scale/shift)
    tmat: (B, K, E)       l2-normalized text embeddings (bf16), K == nc
    returns (B, no, H*W)  channel-major, no = 4*reg_max + nc
    """
    B, H, W, Cin = x.shape
    N = H * W
    K, E = tmat.shape[1], tmat.shape[2]
    c2 = p["cv2_0"][0].shape[-1]
    c3 = p["cv3_0"][0].shape[-1]
    nbox = 4 * reg_max
    no = nbox + nc
    assert K == nc

    # Single zero-padded slab (the only HBM-side conv prep; no 9x im2col blowup).
    xp = jnp.pad(x, ((0, 0), (1, 1), (1, 1), (0, 0)))       # (B, H+2, W+2, Cin)

    def prep3(wb):
        w, s, sh = wb
        cin, cout = w.shape[2], w.shape[3]
        # (3,3,cin,cout) -> (9*cin, cout): tap-major, channel-minor (matches im2col).
        return (w.reshape(9 * cin, cout).astype(jnp.bfloat16),
                s.reshape(1, cout), sh.reshape(1, cout))

    w20, s20, sh20 = prep3(p["cv2_0"])
    w21, s21, sh21 = prep3(p["cv2_1"])
    w30, s30, sh30 = prep3(p["cv3_0"])
    w31, s31, sh31 = prep3(p["cv3_1"])
    w22t = p["cv2_2"][0].T.astype(jnp.bfloat16)             # (nbox, c2)
    b22c = p["cv2_2"][1].reshape(nbox, 1)                   # column bias
    w32 = p["cv3_2"][0].astype(jnp.bfloat16)                # (c3, E)
    b32 = p["cv3_2"][1].reshape(1, E)

    ls = float(math.exp(logit_scale))                       # ContrastiveHead scale
    bs = float(ch_bias)                                     # ContrastiveHead bias

    def kernel(xp_ref,
               w20r, s20r, sh20r, w21r, s21r, sh21r, w22r, b22r,
               w30r, s30r, sh30r, w31r, s31r, sh31r, w32r, b32r,
               txt_ref,
               o_ref,
               px_ref, pad2_ref, p2_ref, pad3_ref, p3_ref):

        def im2col(src_ref, patch_ref, C):
            # src_ref: (H+2, W+2, C) padded; patch_ref: (N, 9*C).
            # Pure static ref slicing (no in-kernel reshapes); unrolls for small H.
            for ky in range(3):
                for kx in range(3):
                    t = ky * 3 + kx
                    for yy in range(H):
                        patch_ref[yy * W:(yy + 1) * W, t * C:(t + 1) * C] = (
                            src_ref[yy + ky, kx:kx + W, :])

        def conv_bn_silu(patch_ref, w_ref, s_ref, sh_ref):
            # Single K=9*C bf16 MXU matmul + folded BN + SiLU (f32 epilogue).
            pm = patch_ref[...].astype(jnp.bfloat16)
            y = jnp.dot(pm, w_ref[...], preferred_element_type=jnp.float32)
            y = y * s_ref[...] + sh_ref[...]
            return y * pl.reciprocal(1.0 + jnp.exp(-y), approx=True)   # SiLU

        def scatter_pad(h, pad_ref):
            # Write (N, C) activation back into a zero-padded (H+2, W+2, C) slab.
            pad_ref[...] = jnp.zeros_like(pad_ref)
            for yy in range(H):
                pad_ref[yy + 1, 1:W + 1, :] = h[yy * W:(yy + 1) * W, :]

        # Shared im2col of the level input (used by both branches).
        im2col(xp_ref, px_ref, Cin)

        # ---------------- cv2 branch: box regression (4*reg_max ch) ----------
        h = conv_bn_silu(px_ref, w20r, s20r, sh20r)          # (N, c2)
        scatter_pad(h, pad2_ref)
        im2col(pad2_ref, p2_ref, c2)
        h = conv_bn_silu(p2_ref, w21r, s21r, sh21r)          # (N, c2)
        # 1x1 conv, output transposed (nbox, N) -> lane-dense store, N last.
        box_t = jax.lax.dot_general(
            w22r[...], h.astype(jnp.bfloat16),
            (((1,), (1,)), ((), ())), preferred_element_type=jnp.float32)
        o_ref[0:nbox, :] = box_t + b22r[...]

        # ---------------- cv3 branch + ContrastiveHead (class logits) --------
        g = conv_bn_silu(px_ref, w30r, s30r, sh30r)          # (N, c3)
        scatter_pad(g, pad3_ref)
        im2col(pad3_ref, p3_ref, c3)
        g = conv_bn_silu(p3_ref, w31r, s31r, sh31r)          # (N, c3)
        emb = jnp.dot(g.astype(jnp.bfloat16), w32r[...],
                      preferred_element_type=jnp.float32) + b32r[...]  # (N, E)
        # F.normalize(emb, dim=-1) with 1e-12 clamp, via rsqrt (EUP).
        inv = jax.lax.rsqrt(
            jnp.maximum(jnp.sum(emb * emb, axis=-1, keepdims=True), 1e-24))
        fn = (emb * inv).astype(jnp.bfloat16)
        # similarity, output transposed (K, N); text already normalized in glue.
        sim_t = jax.lax.dot_general(
            txt_ref[...], fn, (((1,), (1,)), ((), ())),
            preferred_element_type=jnp.float32)
        o_ref[nbox:, :] = sim_t * ls + bs

    def _full(a):
        nd = a.ndim
        return pl.BlockSpec(a.shape, lambda b, _nd=nd: (0,) * _nd)

    in_specs = [
        pl.BlockSpec((None, H + 2, W + 2, Cin), lambda b: (b, 0, 0, 0)),
        _full(w20), _full(s20), _full(sh20),
        _full(w21), _full(s21), _full(sh21),
        _full(w22t), _full(b22c),
        _full(w30), _full(s30), _full(sh30),
        _full(w31), _full(s31), _full(sh31),
        _full(w32), _full(b32),
        pl.BlockSpec((None, K, E), lambda b: (b, 0, 0)),
    ]

    return pl.pallas_call(
        kernel,
        out_shape=jax.ShapeDtypeStruct((B, no, N), jnp.float32),
        grid=(B,),
        in_specs=in_specs,
        out_specs=pl.BlockSpec((None, no, N), lambda b: (b, 0, 0)),
        scratch_shapes=[
            pltpu.VMEM((N, 9 * Cin), jnp.float32),           # input patches
            pltpu.VMEM((H + 2, W + 2, c2), jnp.float32),     # cv2 padded mid
            pltpu.VMEM((N, 9 * c2), jnp.float32),            # cv2 mid patches
            pltpu.VMEM((H + 2, W + 2, c3), jnp.float32),     # cv3 padded mid
            pltpu.VMEM((N, 9 * c3), jnp.float32),            # cv3 mid patches
        ],
        compiler_params=pltpu.CompilerParams(
            dimension_semantics=("parallel",)),
    )(xp, w20, s20, sh20, w21, s21, sh21, w22t, b22c,
      w30, s30, sh30, w31, s31, sh31, w32, b32, tmat)


# ---------------------------------------------------------------------------
# Decode kernel: DFL softmax expectation + dist2bbox(xywh)*stride + cls sigmoid
# ---------------------------------------------------------------------------

def decode_boxes(box, cls, anchors, strides, reg_max=16):
    """box (B, 4*reg_max, A), cls (B, nc, A), anchors (2, A), strides (1, A)
    -> (B, 4 + nc, A)."""
    B, _, A = box.shape
    nc = cls.shape[1]
    box4 = box.reshape(B, 4, reg_max, A)                     # matches DFL .view

    def kernel(box_ref, cls_ref, anc_ref, str_ref, o_ref):
        p = box_ref[...]                                     # (4, reg_max, A)
        p = p - jnp.max(p, axis=1, keepdims=True)
        e = jnp.exp(p)
        denom = jnp.sum(e, axis=1, keepdims=True)
        prob = e * pl.reciprocal(denom, approx=True)         # softmax over bins
        bins = jax.lax.broadcasted_iota(jnp.float32, (4, reg_max, A), 1)
        dist = jnp.sum(prob * bins, axis=1)                  # (4, A) expectation
        anc = anc_ref[...]                                   # (2, A)
        st = str_ref[...]                                    # (1, A)
        lt = dist[0:2]
        rb = dist[2:4]
        x1y1 = anc - lt
        x2y2 = anc + rb
        o_ref[0:2, :] = (x1y1 + x2y2) * 0.5 * st              # cxcy * stride
        o_ref[2:4, :] = (x2y2 - x1y1) * st                    # wh   * stride
        c = cls_ref[...]
        o_ref[4:, :] = pl.reciprocal(1.0 + jnp.exp(-c), approx=True)  # sigmoid

    return pl.pallas_call(
        kernel,
        out_shape=jax.ShapeDtypeStruct((B, 4 + nc, A), jnp.float32),
        grid=(B,),
        in_specs=[
            pl.BlockSpec((None, 4, reg_max, A), lambda b: (b, 0, 0, 0)),
            pl.BlockSpec((None, nc, A), lambda b: (b, 0, 0)),
            pl.BlockSpec((2, A), lambda b: (0, 0)),
            pl.BlockSpec((1, A), lambda b: (0, 0)),
        ],
        out_specs=pl.BlockSpec((None, 4 + nc, A), lambda b: (b, 0, 0)),
        compiler_params=pltpu.CompilerParams(
            dimension_semantics=("parallel",)),
    )(box4, cls, anchors, strides)


# ---------------------------------------------------------------------------
# Parameter init (deterministic, synthetic — BN folded to scale/shift)
# ---------------------------------------------------------------------------

def init_params(key, nc, embed, ch, reg_max=16):
    keys = iter(jax.random.split(key, 512))

    def randn(shape, s=0.1):
        return jax.random.normal(next(keys), shape, jnp.float32) * s

    c2 = max(16, ch[0] // 4, reg_max * 4)
    c3 = max(ch[0], min(nc, 100))

    def conv_bn(cin, cout):
        w = randn((3, 3, cin, cout))
        gamma = 1.0 + randn((cout,), 0.05)
        beta = randn((cout,), 0.05)
        mean = randn((cout,), 0.05)
        var = 1.0 + jnp.abs(randn((cout,), 0.05))
        eps = 1e-3                                           # ultralytics Conv BN eps
        scale = gamma / jnp.sqrt(var + eps)
        shift = beta - mean * scale
        return (w, scale, shift)

    def conv1(cin, cout):
        return (randn((cin, cout)), randn((cout,), 0.05))

    levels = []
    for cin in ch:
        levels.append(dict(
            cv2_0=conv_bn(cin, c2),
            cv2_1=conv_bn(c2, c2),
            cv2_2=conv1(c2, 4 * reg_max),
            cv3_0=conv_bn(cin, c3),
            cv3_1=conv_bn(c3, c3),
            cv3_2=conv1(c3, embed),
        ))
    return dict(levels=levels,
                logit_scale=math.log(1.0 / 0.07),            # ContrastiveHead init
                ch_bias=-10.0)                               # ContrastiveHead init


# ---------------------------------------------------------------------------
# WorldDetect forward (eval mode, export=False): returns (y, x_list)
# ---------------------------------------------------------------------------

def world_detect_forward(xs_nchw, text, params, nc, stride, reg_max=16):
    nl = len(xs_nchw)
    no = nc + reg_max * 4

    # ContrastiveHead text side: normalize once in glue (reused by all levels).
    tnorm = text / jnp.maximum(
        jnp.sqrt(jnp.sum(text * text, axis=-1, keepdims=True)), 1e-12)
    tmat = tnorm.astype(jnp.bfloat16)                        # (B, K, E)

    lvl_outs = []                                            # (B, no, N) per level
    feats_out = []                                           # NCHW feature maps
    hw = []
    for i in range(nl):
        x = jnp.transpose(xs_nchw[i], (0, 2, 3, 1))          # NCHW -> NHWC
        B, H, W, _ = x.shape
        out = world_level_fused(x, params["levels"][i], tmat,
                                params["logit_scale"], params["ch_bias"],
                                nc, reg_max)                 # (B, no, H*W)
        lvl_outs.append(out)
        feats_out.append(out.reshape(B, no, H, W))           # matches torch x[i]
        hw.append((H, W))

    # x_cat: (B, no, A) — channel-major layout comes straight from the kernels.
    x_cat = jnp.concatenate(lvl_outs, axis=-1)

    # make_anchors (glue, index generation)
    anchor_list, stride_list = [], []
    for (H, W), s in zip(hw, stride):
        sx = jnp.arange(W, dtype=jnp.float32) + 0.5
        sy = jnp.arange(H, dtype=jnp.float32) + 0.5
        syy, sxx = jnp.meshgrid(sy, sx, indexing="ij")
        anchor_list.append(jnp.stack([sxx, syy], -1).reshape(-1, 2))
        stride_list.append(jnp.full((H * W, 1), s, jnp.float32))
    anchors = jnp.concatenate(anchor_list, 0).T              # (2, A)
    strides_t = jnp.concatenate(stride_list, 0).T            # (1, A)

    box = x_cat[:, : reg_max * 4]
    cls = x_cat[:, reg_max * 4:]
    y = decode_boxes(box, cls, anchors, strides_t, reg_max)  # (B, 4+nc, A)
    return y, feats_out


# ---------------------------------------------------------------------------
# Main
# ---------------------------------------------------------------------------

if __name__ == "__main__":
    B = 2
    nc = 8                      # number of classes / text embeddings
    embed = 32                  # text embedding dim
    ch = (16, 32)               # per-level input channels
    hw = ((8, 8), (4, 4))       # per-level spatial sizes
    stride = (8.0, 16.0)        # TODO(synk): stride buffer is normally set by the model builder

    key = jax.random.PRNGKey(0)
    k_in, k_text, k_par = jax.random.split(key, 3)
    xs = [jax.random.normal(jax.random.fold_in(k_in, i),
                            (B, ch[i], hw[i][0], hw[i][1]), jnp.float32)
          for i in range(len(ch))]
    text = jax.random.normal(k_text, (B, nc, embed), jnp.float32)
    params = init_params(k_par, nc, embed, ch)

    y, feats = world_detect_forward(xs, text, params, nc=nc, stride=stride)
    y = jax.block_until_ready(y)
    feats = [jax.block_until_ready(f) for f in feats]

    A = sum(h * w for h, w in hw)
    assert y.shape == (B, 4 + nc, A), y.shape
    assert feats[0].shape == (B, nc + 64, hw[0][0], hw[0][1]), feats[0].shape
    assert feats[1].shape == (B, nc + 64, hw[1][0], hw[1][1]), feats[1].shape
    assert bool(jnp.all(jnp.isfinite(y)))

    print("KERNEL_OK")
</pallas_src>

<mosaic_0001>
module attributes {stable_mosaic.version = 11 : i64} {
  func.func @kernel(%arg0: i32, %arg1: memref<1x10x10x16xf32, #tpu.memory_space<vmem>>, %arg2: memref<144x64xbf16, #tpu.memory_space<vmem>>, %arg3: memref<1x64xf32, #tpu.memory_space<vmem>>, %arg4: memref<1x64xf32, #tpu.memory_space<vmem>>, %arg5: memref<576x64xbf16, #tpu.memory_space<vmem>>, %arg6: memref<1x64xf32, #tpu.memory_space<vmem>>, %arg7: memref<1x64xf32, #tpu.memory_space<vmem>>, %arg8: memref<64x64xbf16, #tpu.memory_space<vmem>>, %arg9: memref<64x1xf32, #tpu.memory_space<vmem>>, %arg10: memref<144x16xbf16, #tpu.memory_space<vmem>>, %arg11: memref<1x16xf32, #tpu.memory_space<vmem>>, %arg12: memref<1x16xf32, #tpu.memory_space<vmem>>, %arg13: memref<144x16xbf16, #tpu.memory_space<vmem>>, %arg14: memref<1x16xf32, #tpu.memory_space<vmem>>, %arg15: memref<1x16xf32, #tpu.memory_space<vmem>>, %arg16: memref<16x32xbf16, #tpu.memory_space<vmem>>, %arg17: memref<1x32xf32, #tpu.memory_space<vmem>>, %arg18: memref<1x8x32xbf16, #tpu.memory_space<vmem>>, %arg19: memref<1x72x64xf32, #tpu.memory_space<vmem>>, %arg20: memref<64x144xf32, #tpu.memory_space<vmem>>, %arg21: memref<10x10x64xf32, #tpu.memory_space<vmem>>, %arg22: memref<64x576xf32, #tpu.memory_space<vmem>>, %arg23: memref<10x10x16xf32, #tpu.memory_space<vmem>>, %arg24: memref<64x144xf32, #tpu.memory_space<vmem>>) attributes {dimension_semantics = [#tpu.dimension_semantics<parallel>], iteration_bounds = array<i64: 2>, scalar_prefetch = 0 : i64, scratch_operands = 5 : i64, tpu.core_type = #tpu.core_type<tc>, window_params = [{transform_indices = @transform_0, window_bounds = array<i64: 1, 10, 10, 16>}, {pipeline_mode = #tpu.pipeline_mode<synchronous>, transform_indices = @transform_1, window_bounds = array<i64: 144, 64>}, {pipeline_mode = #tpu.pipeline_mode<synchronous>, transform_indices = @transform_2, window_bounds = array<i64: 1, 64>}, {pipeline_mode = #tpu.pipeline_mode<synchronous>, transform_indices = @transform_3, window_bounds = array<i64: 1, 64>}, {pipeline_mode = #tpu.pipeline_mode<synchronous>, transform_indices = @transform_4, window_bounds = array<i64: 576, 64>}, {pipeline_mode = #tpu.pipeline_mode<synchronous>, transform_indices = @transform_5, window_bounds = array<i64: 1, 64>}, {pipeline_mode = #tpu.pipeline_mode<synchronous>, transform_indices = @transform_6, window_bounds = array<i64: 1, 64>}, {pipeline_mode = #tpu.pipeline_mode<synchronous>, transform_indices = @transform_7, window_bounds = array<i64: 64, 64>}, {pipeline_mode = #tpu.pipeline_mode<synchronous>, transform_indices = @transform_8, window_bounds = array<i64: 64, 1>}, {pipeline_mode = #tpu.pipeline_mode<synchronous>, transform_indices = @transform_9, window_bounds = array<i64: 144, 16>}, {pipeline_mode = #tpu.pipeline_mode<synchronous>, transform_indices = @transform_10, window_bounds = array<i64: 1, 16>}, {pipeline_mode = #tpu.pipeline_mode<synchronous>, transform_indices = @transform_11, window_bounds = array<i64: 1, 16>}, {pipeline_mode = #tpu.pipeline_mode<synchronous>, transform_indices = @transform_12, window_bounds = array<i64: 144, 16>}, {pipeline_mode = #tpu.pipeline_mode<synchronous>, transform_indices = @transform_13, window_bounds = array<i64: 1, 16>}, {pipeline_mode = #tpu.pipeline_mode<synchronous>, transform_indices = @transform_14, window_bounds = array<i64: 1, 16>}, {pipeline_mode = #tpu.pipeline_mode<synchronous>, transform_indices = @transform_15, window_bounds = array<i64: 16, 32>}, {pipeline_mode = #tpu.pipeline_mode<synchronous>, transform_indices = @transform_16, window_bounds = array<i64: 1, 32>}, {transform_indices = @transform_17, window_bounds = array<i64: 1, 8, 32>}, {transform_indices = @transform_18, window_bounds = array<i64: 1, 72, 64>}]} {
    %c0 = arith.constant 0 : index
    %c0_0 = arith.constant 0 : index
    %c0_1 = arith.constant 0 : index
    %c0_2 = arith.constant 0 : index
    %0 = vector.load %arg1[%c0, %c0_0, %c0_1, %c0_2] : memref<1x10x10x16xf32, #tpu.memory_space<vmem>>, vector<1x1x8x16xf32>
    %1 = vector.shape_cast %0 : vector<1x1x8x16xf32> to vector<8x16xf32>
    %c0_3 = arith.constant 0 : index
    %c0_4 = arith.constant 0 : index
    %2 = vector.load %arg20[%c0_3, %c0_4] : memref<64x144xf32, #tpu.memory_space<vmem>>, vector<8x16xf32>
    tpu.vector_store %arg20[%c0_3, %c0_4], %1 {strides = array<i32>} : memref<64x144xf32, #tpu.memory_space<vmem>>, vector<8x16xf32>,
    %c0_5 = arith.constant 0 : index
    %c1 = arith.constant 1 : index
    %c0_6 = arith.constant 0 : index
    %c0_7 = arith.constant 0 : index
    %3 = vector.load %arg1[%c0_5, %c1, %c0_6, %c0_7] : memref<1x10x10x16xf32, #tpu.memory_space<vmem>>, vector<1x1x8x16xf32>
    %4 = vector.shape_cast %3 : vector<1x1x8x16xf32> to vector<8x16xf32>
    %c8 = arith.constant 8 : index
    %c0_8 = arith.constant 0 : index
    %5 = vector.load %arg20[%c8, %c0_8] : memref<64x144xf32, #tpu.memory_space<vmem>>, vector<8x16xf32>
    tpu.vector_store %arg20[%c8, %c0_8], %4 {strides = array<i32>} : memref<64x144xf32, #tpu.memory_space<vmem>>, vector<8x16xf32>,
    %c0_9 = arith.constant 0 : index
    %c2 = arith.constant 2 : index
    %c0_10 = arith.constant 0 : index
    %c0_11 = arith.constant 0 : index
    %6 = vector.load %arg1[%c0_9, %c2, %c0_10, %c0_11] : memref<1x10x10x16xf32, #tpu.memory_space<vmem>>, vector<1x1x8x16xf32>
    %7 = vector.shape_cast %6 : vector<1x1x8x16xf32> to vector<8x16xf32>
    %c16 = arith.constant 16 : index
    %c0_12 = arith.constant 0 : index
    %8 = vector.load %arg20[%c16, %c0_12] : memref<64x144xf32, #tpu.memory_space<vmem>>, vector<8x16xf32>
    tpu.vector_store %arg20[%c16, %c0_12], %7 {strides = array<i32>} : memref<64x144xf32, #tpu.memory_space<vmem>>, vector<8x16xf32>,
    %c0_13 = arith.constant 0 : index
    %c3 = arith.constant 3 : index
    %c0_14 = arith.constant 0 : index
    %c0_15 = arith.constant 0 : index
    %9 = vector.load %arg1[%c0_13, %c3, %c0_14, %c0_15] : memref<1x10x10x16xf32, #tpu.memory_space<vmem>>, vector<1x1x8x16xf32>
    %10 = vector.shape_cast %9 : vector<1x1x8x16xf32> to vector<8x16xf32>
    %c24 = arith.constant 24 : index
    %c0_16 = arith.constant 0 : index
    %11 = vector.load %arg20[%c24, %c0_16] : memref<64x144xf32, #tpu.memory_space<vmem>>, vector<8x16xf32>
    tpu.vector_store %arg20[%c24, %c0_16], %10 {strides = array<i32>} : memref<64x144xf32, #tpu.memory_space<vmem>>, vector<8x16xf32>,
    %c0_17 = arith.constant 0 : index
    %c4 = arith.constant 4 : index
    %c0_18 = arith.constant 0 : index
    %c0_19 = arith.constant 0 : index
    %12 = vector.load %arg1[%c0_17, %c4, %c0_18, %c0_19] : memref<1x10x10x16xf32, #tpu.memory_space<vmem>>, vector<1x1x8x16xf32>
    %13 = vector.shape_cast %12 : vector<1x1x8x16xf32> to vector<8x16xf32>
    %c32 = arith.constant 32 : index
    %c0_20 = arith.constant 0 : index
    %14 = vector.load %arg20[%c32, %c0_20] : memref<64x144xf32, #tpu.memory_space<vmem>>, vector<8x16xf32>
    tpu.vector_store %arg20[%c32, %c0_20], %13 {strides = array<i32>} : memref<64x144xf32, #tpu.memory_space<vmem>>, vector<8x16xf32>,
    %c0_21 = arith.constant 0 : index
    %c5 = arith.constant 5 : index
    %c0_22 = arith.constant 0 : index
    %c0_23 = arith.constant 0 : index
    %15 = vector.load %arg1[%c0_21, %c5, %c0_22, %c0_23] : memref<1x10x10x16xf32, #tpu.memory_space<vmem>>, vector<1x1x8x16xf32>
    %16 = vector.shape_cast %15 : vector<1x1x8x16xf32> to vector<8x16xf32>
    %c40 = arith.constant 40 : index
    %c0_24 = arith.constant 0 : index
    %17 = vector.load %arg20[%c40, %c0_24] : memref<64x144xf32, #tpu.memory_space<vmem>>, vector<8x16xf32>
    tpu.vector_store %arg20[%c40, %c0_24], %16 {strides = array<i32>} : memref<64x144xf32, #tpu.memory_space<vmem>>, vector<8x16xf32>,
    %c0_25 = arith.constant 0 : index
    %c6 = arith.constant 6 : index
    %c0_26 = arith.constant 0 : index
    %c0_27 = arith.constant 0 : index
    %18 = vector.load %arg1[%c0_25, %c6, %c0_26, %c0_27] : memref<1x10x10x16xf32, #tpu.memory_space<vmem>>, vector<1x1x8x16xf32>
    %19 = vector.shape_cast %18 : vector<1x1x8x16xf32> to vector<8x16xf32>
    %c48 = arith.constant 48 : index
    %c0_28 = arith.constant 0 : index
    %20 = vector.load %arg20[%c48, %c0_28] : memref<64x144xf32, #tpu.memory_space<vmem>>, vector<8x16xf32>
    tpu.vector_store %arg20[%c48, %c0_28], %19 {strides = array<i32>} : memref<64x144xf32, #tpu.memory_space<vmem>>, vector<8x16xf32>,
    %c0_29 = arith.constant 0 : index
    %c7 = arith.constant 7 : index
    %c0_30 = arith.constant 0 : index
    %c0_31 = arith.constant 0 : index
    %21 = vector.load %arg1[%c0_29, %c7, %c0_30, %c0_31] : memref<1x10x10x16xf32, #tpu.memory_space<vmem>>, vector<1x1x8x16xf32>
    %22 = vector.shape_cast %21 : vector<1x1x8x16xf32> to vector<8x16xf32>
    %c56 = arith.constant 56 : index
    %c0_32 = arith.constant 0 : index
    %23 = vector.load %arg20[%c56, %c0_32] : memref<64x144xf32, #tpu.memory_space<vmem>>, vector<8x16xf32>
    tpu.vector_store %arg20[%c56, %c0_32], %22 {strides = array<i32>} : memref<64x144xf32, #tpu.memory_space<vmem>>, vector<8x16xf32>,
    %c0_33 = arith.constant 0 : index
    %c0_34 = arith.constant 0 : index
    %c1_35 = arith.constant 1 : index
    %c0_36 = arith.constant 0 : index
    %24 = vector.load %arg1[%c0_33, %c0_34, %c1_35, %c0_36] : memref<1x10x10x16xf32, #tpu.memory_space<vmem>>, vector<1x1x8x16xf32>
    %25 = vector.shape_cast %24 : vector<1x1x8x16xf32> to vector<8x16xf32>
    %c0_37 = arith.constant 0 : index
    %c16_38 = arith.constant 16 : index
    %26 = vector.load %arg20[%c0_37, %c16_38] : memref<64x144xf32, #tpu.memory_space<vmem>>, vector<8x16xf32>
    tpu.vector_store %arg20[%c0_37, %c16_38], %25 {strides = array<i32>} : memref<64x144xf32, #tpu.memory_space<vmem>>, vector<8x16xf32>,
    %c0_39 = arith.constant 0 : index
    %c1_40 = arith.constant 1 : index
    %c1_41 = arith.constant 1 : index
    %c0_42 = arith.constant 0 : index
    %27 = vector.load %arg1[%c0_39, %c1_40, %c1_41, %c0_42] : memref<1x10x10x16xf32, #tpu.memory_space<vmem>>, vector<1x1x8x16xf32>
    %28 = vector.shape_cast %27 : vector<1x1x8x16xf32> to vector<8x16xf32>
    %c8_43 = arith.constant 8 : index
    %c16_44 = arith.constant 16 : index
    %29 = vector.load %arg20[%c8_43, %c16_44] : memref<64x144xf32, #tpu.memory_space<vmem>>, vector<8x16xf32>
    tpu.vector_store %arg20[%c8_43, %c16_44], %28 {strides = array<i32>} : memref<64x144xf32, #tpu.memory_space<vmem>>, vector<8x16xf32>,
    %c0_45 = arith.constant 0 : index
    %c2_46 = arith.constant 2 : index
    %c1_47 = arith.constant 1 : index
    %c0_48 = arith.constant 0 : index
    %30 = vector.load %arg1[%c0_45, %c2_46, %c1_47, %c0_48] : memref<1x10x10x16xf32, #tpu.memory_space<vmem>>, vector<1x1x8x16xf32>
    %31 = vector.shape_cast %30 : vector<1x1x8x16xf32> to vector<8x16xf32>
    %c16_49 = arith.constant 16 : index
    %c16_50 = arith.constant 16 : index
    %32 = vector.load %arg20[%c16_49, %c16_50] : memref<64x144xf32, #tpu.memory_space<vmem>>, vector<8x16xf32>
    tpu.vector_store %arg20[%c16_49, %c16_50], %31 {strides = array<i32>} : memref<64x144xf32, #tpu.memory_space<vmem>>, vector<8x16xf32>,
    %c0_51 = arith.constant 0 : index
    %c3_52 = arith.constant 3 : index
    %c1_53 = arith.constant 1 : index
    %c0_54 = arith.constant 0 : index
    %33 = vector.load %arg1[%c0_51, %c3_52, %c1_53, %c0_54] : memref<1x10x10x16xf32, #tpu.memory_space<vmem>>, vector<1x1x8x16xf32>
    %34 = vector.shape_cast %33 : vector<1x1x8x16xf32> to vector<8x16xf32>
    %c24_55 = arith.constant 24 : index
    %c16_56 = arith.constant 16 : index
    %35 = vector.load %arg20[%c24_55, %c16_56] : memref<64x144xf32, #tpu.memory_space<vmem>>, vector<8x16xf32>
    tpu.vector_store %arg20[%c24_55, %c16_56], %34 {strides = array<i32>} : memref<64x144xf32, #tpu.memory_space<vmem>>, vector<8x16xf32>,
    %c0_57 = arith.constant 0 : index
    %c4_58 = arith.constant 4 : index
    %c1_59 = arith.constant 1 : index
    %c0_60 = arith.constant 0 : index
    %36 = vector.load %arg1[%c0_57, %c4_58, %c1_59, %c0_60] : memref<1x10x10x16xf32, #tpu.memory_space<vmem>>, vector<1x1x8x16xf32>
    %37 = vector.shape_cast %36 : vector<1x1x8x16xf32> to vector<8x16xf32>
    %c32_61 = arith.constant 32 : index
    %c16_62 = arith.constant 16 : index
    %38 = vector.load %arg20[%c32_61, %c16_62] : memref<64x144xf32, #tpu.memory_space<vmem>>, vector<8x16xf32>
    tpu.vector_store %arg20[%c32_61, %c16_62], %37 {strides = array<i32>} : memref<64x144xf32, #tpu.memory_space<vmem>>, vector<8x16xf32>,
    %c0_63 = arith.constant 0 : index
    %c5_64 = arith.constant 5 : index
    %c1_65 = arith.constant 1 : index
    %c0_66 = arith.constant 0 : index
    %39 = vector.load %arg1[%c0_63, %c5_64, %c1_65, %c0_66] : memref<1x10x10x16xf32, #tpu.memory_space<vmem>>, vector<1x1x8x16xf32>
    %40 = vector.shape_cast %39 : vector<1x1x8x16xf32> to vector<8x16xf32>
    %c40_67 = arith.constant 40 : index
    %c16_68 = arith.constant 16 : index
    %41 = vector.load %arg20[%c40_67, %c16_68] : memref<64x144xf32, #tpu.memory_space<vmem>>, vector<8x16xf32>
    tpu.vector_store %arg20[%c40_67, %c16_68], %40 {strides = array<i32>} : memref<64x144xf32, #tpu.memory_space<vmem>>, vector<8x16xf32>,
    %c0_69 = arith.constant 0 : index
    %c6_70 = arith.constant 6 : index
    %c1_71 = arith.constant 1 : index
    %c0_72 = arith.constant 0 : index
    %42 = vector.load %arg1[%c0_69, %c6_70, %c1_71, %c0_72] : memref<1x10x10x16xf32, #tpu.memory_space<vmem>>, vector<1x1x8x16xf32>
    %43 = vector.shape_cast %42 : vector<1x1x8x16xf32> to vector<8x16xf32>
    %c48_73 = arith.constant 48 : index
    %c16_74 = arith.constant 16 : index
    %44 = vector.load %arg20[%c48_73, %c16_74] : memref<64x144xf32, #tpu.memory_space<vmem>>, vector<8x16xf32>
    tpu.vector_store %arg20[%c48_73, %c16_74], %43 {strides = array<i32>} : memref<64x144xf32, #tpu.memory_space<vmem>>, vector<8x16xf32>,
    %c0_75 = arith.constant 0 : index
    %c7_76 = arith.constant 7 : index
    %c1_77 = arith.constant 1 : index
    %c0_78 = arith.constant 0 : index
    %45 = vector.load %arg1[%c0_75, %c7_76, %c1_77, %c0_78] : memref<1x10x10x16xf32, #tpu.memory_space<vmem>>, vector<1x1x8x16xf32>
    %46 = vector.shape_cast %45 : vector<1x1x8x16xf32> to vector<8x16xf32>
    %c56_79 = arith.constant 56 : index
    %c16_80 = arith.constant 16 : index
    %47 = vector.load %arg20[%c56_79, %c16_80] : memref<64x144xf32, #tpu.memory_space<vmem>>, vector<8x16xf32>
    tpu.vector_store %arg20[%c56_79, %c16_80], %46 {strides = array<i32>} : memref<64x144xf32, #tpu.memory_space<vmem>>, vector<8x16xf32>,
    %c0_81 = arith.constant 0 : index
    %c0_82 = arith.constant 0 : index
    %c2_83 = arith.constant 2 : index
    %c0_84 = arith.constant 0 : index
    %48 = vector.load %arg1[%c0_81, %c0_82, %c2_83, %c0_84] : memref<1x10x10x16xf32, #tpu.memory_space<vmem>>, vector<1x1x8x16xf32>
    %49 = vector.shape_cast %48 : vector<1x1x8x16xf32> to vector<8x16xf32>
    %c0_85 = arith.constant 0 : index
    %c32_86 = arith.constant 32 : index
    %50 = vector.load %arg20[%c0_85, %c32_86] : memref<64x144xf32, #tpu.memory_space<vmem>>, vector<8x16xf32>
    tpu.vector_store %arg20[%c0_85, %c32_86], %49 {strides = array<i32>} : memref<64x144xf32, #tpu.memory_space<vmem>>, vector<8x16xf32>,
    %c0_87 = arith.constant 0 : index
    %c1_88 = arith.constant 1 : index
    %c2_89 = arith.constant 2 : index
    %c0_90 = arith.constant 0 : index
    %51 = vector.load %arg1[%c0_87, %c1_88, %c2_89, %c0_90] : memref<1x10x10x16xf32, #tpu.memory_space<vmem>>, vector<1x1x8x16xf32>
    %52 = vector.shape_cast %51 : vector<1x1x8x16xf32> to vector<8x16xf32>
    %c8_91 = arith.constant 8 : index
    %c32_92 = arith.constant 32 : index
    %53 = vector.load %arg20[%c8_91, %c32_92] : memref<64x144xf32, #tpu.memory_space<vmem>>, vector<8x16xf32>
    tpu.vector_store %arg20[%c8_91, %c32_92], %52 {strides = array<i32>} : memref<64x144xf32, #tpu.memory_space<vmem>>, vector<8x16xf32>,
    %c0_93 = arith.constant 0 : index
    %c2_94 = arith.constant 2 : index
    %c2_95 = arith.constant 2 : index
    %c0_96 = arith.constant 0 : index
    %54 = vector.load %arg1[%c0_93, %c2_94, %c2_95, %c0_96] : memref<1x10x10x16xf32, #tpu.memory_space<vmem>>, vector<1x1x8x16xf32>
    %55 = vector.shape_cast %54 : vector<1x1x8x16xf32> to vector<8x16xf32>
    %c16_97 = arith.constant 16 : index
    %c32_98 = arith.constant 32 : index
    %56 = vector.load %arg20[%c16_97, %c32_98] : memref<64x144xf32, #tpu.memory_space<vmem>>, vector<8x16xf32>
    tpu.vector_store %arg20[%c16_97, %c32_98], %55 {strides = array<i32>} : memref<64x144xf32, #tpu.memory_space<vmem>>, vector<8x16xf32>,
    %c0_99 = arith.constant 0 : index
    %c3_100 = arith.constant 3 : index
    %c2_101 = arith.constant 2 : index
    %c0_102 = arith.constant 0 : index
    %57 = vector.load %arg1[%c0_99, %c3_100, %c2_101, %c0_102] : memref<1x10x10x16xf32, #tpu.memory_space<vmem>>, vector<1x1x8x16xf32>
    %58 = vector.shape_cast %57 : vector<1x1x8x16xf32> to vector<8x16xf32>
    %c24_103 = arith.constant 24 : index
    %c32_104 = arith.constant 32 : index
    %59 = vector.load %arg20[%c24_103, %c32_104] : memref<64x144xf32, #tpu.memory_space<vmem>>, vector<8x16xf32>
    tpu.vector_store %arg20[%c24_103, %c32_104], %58 {strides = array<i32>} : memref<64x144xf32, #tpu.memory_space<vmem>>, vector<8x16xf32>,
    %c0_105 = arith.constant 0 : index
    %c4_106 = arith.constant 4 : index
    %c2_107 = arith.constant 2 : index
    %c0_108 = arith.constant 0 : index
    %60 = vector.load %arg1[%c0_105, %c4_106, %c2_107, %c0_108] : memref<1x10x10x16xf32, #tpu.memory_space<vmem>>, vector<1x1x8x16xf32>
    %61 = vector.shape_cast %60 : vector<1x1x8x16xf32> to vector<8x16xf32>
    %c32_109 = arith.constant 32 : index
    %c32_110 = arith.constant 32 : index
    %62 = vector.load %arg20[%c32_109, %c32_110] : memref<64x144xf32, #tpu.memory_space<vmem>>, vector<8x16xf32>
    tpu.vector_store %arg20[%c32_109, %c32_110], %61 {strides = array<i32>} : memref<64x144xf32, #tpu.memory_space<vmem>>, vector<8x16xf32>,
    %c0_111 = arith.constant 0 : index
    %c5_112 = arith.constant 5 : index
    %c2_113 = arith.constant 2 : index
    %c0_114 = arith.constant 0 : index
    %63 = vector.load %arg1[%c0_111, %c5_112, %c2_113, %c0_114] : memref<1x10x10x16xf32, #tpu.memory_space<vmem>>, vector<1x1x8x16xf32>
    %64 = vector.shape_cast %63 : vector<1x1x8x16xf32> to vector<8x16xf32>
    %c40_115 = arith.constant 40 : index
    %c32_116 = arith.constant 32 : index
    %65 = vector.load %arg20[%c40_115, %c32_116] : memref<64x144xf32, #tpu.memory_space<vmem>>, vector<8x16xf32>
    tpu.vector_store %arg20[%c40_115, %c32_116], %64 {strides = array<i32>} : memref<64x144xf32, #tpu.memory_space<vmem>>, vector<8x16xf32>,
    %c0_117 = arith.constant 0 : index
    %c6_118 = arith.constant 6 : index
    %c2_119 = arith.constant 2 : index
    %c0_120 = arith.constant 0 : index
    %66 = vector.load %arg1[%c0_117, %c6_118, %c2_119, %c0_120] : memref<1x10x10x16xf32, #tpu.memory_space<vmem>>, vector<1x1x8x16xf32>
    %67 = vector.shape_cast %66 : vector<1x1x8x16xf32> to vector<8x16xf32>
    %c48_121 = arith.constant 48 : index
    %c32_122 = arith.constant 32 : index
    %68 = vector.load %arg20[%c48_121, %c32_122] : memref<64x144xf32, #tpu.memory_space<vmem>>, vector<8x16xf32>
    tpu.vector_store %arg20[%c48_121, %c32_122], %67 {strides = array<i32>} : memref<64x144xf32, #tpu.memory_space<vmem>>, vector<8x16xf32>,
    %c0_123 = arith.constant 0 : index
    %c7_124 = arith.constant 7 : index
    %c2_125 = arith.constant 2 : index
    %c0_126 = arith.constant 0 : index
    %69 = vector.load %arg1[%c0_123, %c7_124, %c2_125, %c0_126] : memref<1x10x10x16xf32, #tpu.memory_space<vmem>>, vector<1x1x8x16xf32>
    %70 = vector.shape_cast %69 : vector<1x1x8x16xf32> to vector<8x16xf32>
    %c56_127 = arith.constant 56 : index
    %c32_128 = arith.constant 32 : index
    %71 = vector.load %arg20[%c56_127, %c32_128] : memref<64x144xf32, #tpu.memory_space<vmem>>, vector<8x16xf32>
    tpu.vector_store %arg20[%c56_127, %c32_128], %70 {strides = array<i32>} : memref<64x144xf32, #tpu.memory_space<vmem>>, vector<8x16xf32>,
    %c0_129 = arith.constant 0 : index
    %c1_130 = arith.constant 1 : index
    %c0_131 = arith.constant 0 : index
    %c0_132 = arith.constant 0 : index
    %72 = vector.load %arg1[%c0_129, %c1_130, %c0_131, %c0_132] : memref<1x10x10x16xf32, #tpu.memory_space<vmem>>, vector<1x1x8x16xf32>
    %73 = vector.shape_cast %72 : vector<1x1x8x16xf32> to vector<8x16xf32>
    %c0_133 = arith.constant 0 : index
    %c48_134 = arith.constant 48 : index
    %74 = vector.load %arg20[%c0_133, %c48_134] : memref<64x144xf32, #tpu.memory_space<vmem>>, vector<8x16xf32>
    tpu.vector_store %arg20[%c0_133, %c48_134], %73 {strides = array<i32>} : memref<64x144xf32, #tpu.memory_space<vmem>>, vector<8x16xf32>,
    %c0_135 = arith.constant 0 : index
    %c2_136 = arith.constant 2 : index
    %c0_137 = arith.constant 0 : index
    %c0_138 = arith.constant 0 : index
    %75 = vector.load %arg1[%c0_135, %c2_136, %c0_137, %c0_138] : memref<1x10x10x16xf32, #tpu.memory_space<vmem>>, vector<1x1x8x16xf32>
    %76 = vector.shape_cast %75 : vector<1x1x8x16xf32> to vector<8x16xf32>
    %c8_139 = arith.constant 8 : index
    %c48_140 = arith.constant 48 : index
    %77 = vector.load %arg20[%c8_139, %c48_140] : memref<64x144xf32, #tpu.memory_space<vmem>>, vector<8x16xf32>
    tpu.vector_store %arg20[%c8_139, %c48_140], %76 {strides = array<i32>} : memref<64x144xf32, #tpu.memory_space<vmem>>, vector<8x16xf32>,
    %c0_141 = arith.constant 0 : index
    %c3_142 = arith.constant 3 : index
    %c0_143 = arith.constant 0 : index
    %c0_144 = arith.constant 0 : index
    %78 = vector.load %arg1[%c0_141, %c3_142, %c0_143, %c0_144] : memref<1x10x10x16xf32, #tpu.memory_space<vmem>>, vector<1x1x8x16xf32>
    %79 = vector.shape_cast %78 : vector<1x1x8x16xf32> to vector<8x16xf32>
    %c16_145 = arith.constant 16 : index
    %c48_146 = arith.constant 48 : index
    %80 = vector.load %arg20[%c16_145, %c48_146] : memref<64x144xf32, #tpu.memory_space<vmem>>, vector<8x16xf32>
    tpu.vector_store %arg20[%c16_145, %c48_146], %79 {strides = array<i32>} : memref<64x144xf32, #tpu.memory_space<vmem>>, vector<8x16xf32>,
    %c0_147 = arith.constant 0 : index
    %c4_148 = arith.constant 4 : index
    %c0_149 = arith.constant 0 : index
    %c0_150 = arith.constant 0 : index
    %81 = vector.load %arg1[%c0_147, %c4_148, %c0_149, %c0_150] : memref<1x10x10x16xf32, #tpu.memory_space<vmem>>, vector<1x1x8x16xf32>
    %82 = vector.shape_cast %81 : vector<1x1x8x16xf32> to vector<8x16xf32>
    %c24_151 = arith.constant 24 : index
    %c48_152 = arith.constant 48 : index
    %83 = vector.load %arg20[%c24_151, %c48_152] : memref<64x144xf32, #tpu.memory_space<vmem>>, vector<8x16xf32>
    tpu.vector_store %arg20[%c24_151, %c48_152], %82 {strides = array<i32>} : memref<64x144xf32, #tpu.memory_space<vmem>>, vector<8x16xf32>,
    %c0_153 = arith.constant 0 : index
    %c5_154 = arith.constant 5 : index
    %c0_155 = arith.constant 0 : index
    %c0_156 = arith.constant 0 : index
    %84 = vector.load %arg1[%c0_153, %c5_154, %c0_155, %c0_156] : memref<1x10x10x16xf32, #tpu.memory_space<vmem>>, vector<1x1x8x16xf32>
    %85 = vector.shape_cast %84 : vector<1x1x8x16xf32> to vector<8x16xf32>
    %c32_157 = arith.constant 32 : index
    %c48_158 = arith.constant 48 : index
    %86 = vector.load %arg20[%c32_157, %c48_158] : memref<64x144xf32, #tpu.memory_space<vmem>>, vector<8x16xf32>
    tpu.vector_store %arg20[%c32_157, %c48_158], %85 {strides = array<i32>} : memref<64x144xf32, #tpu.memory_space<vmem>>, vector<8x16xf32>,
    %c0_159 = arith.constant 0 : index
    %c6_160 = arith.constant 6 : index
    %c0_161 = arith.constant 0 : index
    %c0_162 = arith.constant 0 : index
    %87 = vector.load %arg1[%c0_159, %c6_160, %c0_161, %c0_162] : memref<1x10x10x16xf32, #tpu.memory_space<vmem>>, vector<1x1x8x16xf32>
    %88 = vector.shape_cast %87 : vector<1x1x8x16xf32> to vector<8x16xf32>
    %c40_163 = arith.constant 40 : index
    %c48_164 = arith.constant 48 : index
    %89 = vector.load %arg20[%c40_163, %c48_164] : memref<64x144xf32, #tpu.memory_space<vmem>>, vector<8x16xf32>
    tpu.vector_store %arg20[%c40_163, %c48_164], %88 {strides = array<i32>} : memref<64x144xf32, #tpu.memory_space<vmem>>, vector<8x16xf32>,
    %c0_165 = arith.constant 0 : index
    %c7_166 = arith.constant 7 : index
    %c0_167 = arith.constant 0 : index
    %c0_168 = arith.constant 0 : index
    %90 = vector.load %arg1[%c0_165, %c7_166, %c0_167, %c0_168] : memref<1x10x10x16xf32, #tpu.memory_space<vmem>>, vector<1x1x8x16xf32>
    %91 = vector.shape_cast %90 : vector<1x1x8x16xf32> to vector<8x16xf32>
    %c48_169 = arith.constant 48 : index
    %c48_170 = arith.constant 48 : index
    %92 = vector.load %arg20[%c48_169, %c48_170] : memref<64x144xf32, #tpu.memory_space<vmem>>, vector<8x16xf32>
    tpu.vector_store %arg20[%c48_169, %c48_170], %91 {strides = array<i32>} : memref<64x144xf32, #tpu.memory_space<vmem>>, vector<8x16xf32>,
    %c0_171 = arith.constant 0 : index
    %c8_172 = arith.constant 8 : index
    %c0_173 = arith.constant 0 : index
    %c0_174 = arith.constant 0 : index
    %93 = vector.load %arg1[%c0_171, %c8_172, %c0_173, %c0_174] : memref<1x10x10x16xf32, #tpu.memory_space<vmem>>, vector<1x1x8x16xf32>
    %94 = vector.shape_cast %93 : vector<1x1x8x16xf32> to vector<8x16xf32>
    %c56_175 = arith.constant 56 : index
    %c48_176 = arith.constant 48 : index
    %95 = vector.load %arg20[%c56_175, %c48_176] : memref<64x144xf32, #tpu.memory_space<vmem>>, vector<8x16xf32>
    tpu.vector_store %arg20[%c56_175, %c48_176], %94 {strides = array<i32>} : memref<64x144xf32, #tpu.memory_space<vmem>>, vector<8x16xf32>,
    %c0_177 = arith.constant 0 : index
    %c1_178 = arith.constant 1 : index
    %c1_179 = arith.constant 1 : index
    %c0_180 = arith.constant 0 : index
    %96 = vector.load %arg1[%c0_177, %c1_178, %c1_179, %c0_180] : memref<1x10x10x16xf32, #tpu.memory_space<vmem>>, vector<1x1x8x16xf32>
    %97 = vector.shape_cast %96 : vector<1x1x8x16xf32> to vector<8x16xf32>
    %c0_181 = arith.constant 0 : index
    %c64 = arith.constant 64 : index
    %98 = vector.load %arg20[%c0_181, %c64] : memref<64x144xf32, #tpu.memory_space<vmem>>, vector<8x16xf32>
    tpu.vector_store %arg20[%c0_181, %c64], %97 {strides = array<i32>} : memref<64x144xf32, #tpu.memory_space<vmem>>, vector<8x16xf32>,
    %c0_182 = arith.constant 0 : index
    %c2_183 = arith.constant 2 : index
    %c1_184 = arith.constant 1 : index
    %c0_185 = arith.constant 0 : index
    %99 = vector.load %arg1[%c0_182, %c2_183, %c1_184, %c0_185] : memref<1x10x10x16xf32, #tpu.memory_space<vmem>>, vector<1x1x8x16xf32>
    %100 = vector.shape_cast %99 : vector<1x1x8x16xf32> to vector<8x16xf32>
    %c8_186 = arith.constant 8 : index
    %c64_187 = arith.constant 64 : index
    %101 = vector.load %arg20[%c8_186, %c64_187] : memref<64x144xf32, #tpu.memory_space<vmem>>, vector<8x16xf32>
    tpu.vector_store %arg20[%c8_186, %c64_187], %100 {strides = array<i32>} : memref<64x144xf32, #tpu.memory_space<vmem>>, vector<8x16xf32>,
    %c0_188 = arith.constant 0 : index
    %c3_189 = arith.constant 3 : index
    %c1_190 = arith.constant 1 : index
    %c0_191 = arith.constant 0 : index
    %102 = vector.load %arg1[%c0_188, %c3_189, %c1_190, %c0_191] : memref<1x10x10x16xf32, #tpu.memory_space<vmem>>, vector<1x1x8x16xf32>
    %103 = vector.shape_cast %102 : vector<1x1x8x16xf32> to vector<8x16xf32>
    %c16_192 = arith.constant 16 : index
    %c64_193 = arith.constant 64 : index
    %104 = vector.load %arg20[%c16_192, %c64_193] : memref<64x144xf32, #tpu.memory_space<vmem>>, vector<8x16xf32>
    tpu.vector_store %arg20[%c16_192, %c64_193], %103 {strides = array<i32>} : memref<64x144xf32, #tpu.memory_space<vmem>>, vector<8x16xf32>,
    %c0_194 = arith.constant 0 : index
    %c4_195 = arith.constant 4 : index
    %c1_196 = arith.constant 1 : index
    %c0_197 = arith.constant 0 : index
    %105 = vector.load %arg1[%c0_194, %c4_195, %c1_196, %c0_197] : memref<1x10x10x16xf32, #tpu.memory_space<vmem>>, vector<1x1x8x16xf32>
    %106 = vector.shape_cast %105 : vector<1x1x8x16xf32> to vector<8x16xf32>
    %c24_198 = arith.constant 24 : index
    %c64_199 = arith.constant 64 : index
    %107 = vector.load %arg20[%c24_198, %c64_199] : memref<64x144xf32, #tpu.memory_space<vmem>>, vector<8x16xf32>
    tpu.vector_store %arg20[%c24_198, %c64_199], %106 {strides = array<i32>} : memref<64x144xf32, #tpu.memory_space<vmem>>, vector<8x16xf32>,
    %c0_200 = arith.constant 0 : index
    %c5_201 = arith.constant 5 : index
    %c1_202 = arith.constant 1 : index
    %c0_203 = arith.constant 0 : index
    %108 = vector.load %arg1[%c0_200, %c5_201, %c1_202, %c0_203] : memref<1x10x10x16xf32, #tpu.memory_space<vmem>>, vector<1x1x8x16xf32>
    %109 = vector.shape_cast %108 : vector<1x1x8x16xf32> to vector<8x16xf32>
    %c32_204 = arith.constant 32 : index
    %c64_205 = arith.constant 64 : index
    %110 = vector.load %arg20[%c32_204, %c64_205] : memref<64x144xf32, #tpu.memory_space<vmem>>, vector<8x16xf32>
    tpu.vector_store %arg20[%c32_204, %c64_205], %109 {strides = array<i32>} : memref<64x144xf32, #tpu.memory_space<vmem>>, vector<8x16xf32>,
    %c0_206 = arith.constant 0 : index
    %c6_207 = arith.constant 6 : index
    %c1_208 = arith.constant 1 : index
    %c0_209 = arith.constant 0 : index
    %111 = vector.load %arg1[%c0_206, %c6_207, %c1_208, %c0_209] : memref<1x10x10x16xf32, #tpu.memory_space<vmem>>, vector<1x1x8x16xf32>
    %112 = vector.shape_cast %111 : vector<1x1x8x16xf32> to vector<8x16xf32>
    %c40_210 = arith.constant 40 : index
    %c64_211 = arith.constant 64 : index
    %113 = vector.load %arg20[%c40_210, %c64_211] : memref<64x144xf32, #tpu.memory_space<vmem>>, vector<8x16xf32>
    tpu.vector_store %arg20[%c40_210, %c64_211], %112 {strides = array<i32>} : memref<64x144xf32, #tpu.memory_space<vmem>>, vector<8x16xf32>,
    %c0_212 = arith.constant 0 : index
    %c7_213 = arith.constant 7 : index
    %c1_214 = arith.constant 1 : index
    %c0_215 = arith.constant 0 : index
    %114 = vector.load %arg1[%c0_212, %c7_213, %c1_214, %c0_215] : memref<1x10x10x16xf32, #tpu.memory_space<vmem>>, vector<1x1x8x16xf32>
    %115 = vector.shape_cast %114 : vector<1x1x8x16xf32> to vector<8x16xf32>
    %c48_216 = arith.constant 48 : index
    %c64_217 = arith.constant 64 : index
    %116 = vector.load %arg20[%c48_216, %c64_217] : memref<64x144xf32, #tpu.memory_space<vmem>>, vector<8x16xf32>
    tpu.vector_store %arg20[%c48_216, %c64_217], %115 {strides = array<i32>} : memref<64x144xf32, #tpu.memory_space<vmem>>, vector<8x16xf32>,
    %c0_218 = arith.constant 0 : index
    %c8_219 = arith.constant 8 : index
    %c1_220 = arith.constant 1 : index
    %c0_221 = arith.constant 0 : index
    %117 = vector.load %arg1[%c0_218, %c8_219, %c1_220, %c0_221] : memref<1x10x10x16xf32, #tpu.memory_space<vmem>>, vector<1x1x8x16xf32>
    %118 = vector.shape_cast %117 : vector<1x1x8x16xf32> to vector<8x16xf32>
    %c56_222 = arith.constant 56 : index
    %c64_223 = arith.constant 64 : index
    %119 = vector.load %arg20[%c56_222, %c64_223] : memref<64x144xf32, #tpu.memory_space<vmem>>, vector<8x16xf32>
    tpu.vector_store %arg20[%c56_222, %c64_223], %118 {strides = array<i32>} : memref<64x144xf32, #tpu.memory_space<vmem>>, vector<8x16xf32>,
    %c0_224 = arith.constant 0 : index
    %c1_225 = arith.constant 1 : index
    %c2_226 = arith.constant 2 : index
    %c0_227 = arith.constant 0 : index
    %120 = vector.load %arg1[%c0_224, %c1_225, %c2_226, %c0_227] : memref<1x10x10x16xf32, #tpu.memory_space<vmem>>, vector<1x1x8x16xf32>
    %121 = vector.shape_cast %120 : vector<1x1x8x16xf32> to vector<8x16xf32>
    %c0_228 = arith.constant 0 : index
    %c80 = arith.constant 80 : index
    %122 = vector.load %arg20[%c0_228, %c80] : memref<64x144xf32, #tpu.memory_space<vmem>>, vector<8x16xf32>
    tpu.vector_store %arg20[%c0_228, %c80], %121 {strides = array<i32>} : memref<64x144xf32, #tpu.memory_space<vmem>>, vector<8x16xf32>,
    %c0_229 = arith.constant 0 : index
    %c2_230 = arith.constant 2 : index
    %c2_231 = arith.constant 2 : index
    %c0_232 = arith.constant 0 : index
    %123 = vector.load %arg1[%c0_229, %c2_230, %c2_231, %c0_232] : memref<1x10x10x16xf32, #tpu.memory_space<vmem>>, vector<1x1x8x16xf32>
    %124 = vector.shape_cast %123 : vector<1x1x8x16xf32> to vector<8x16xf32>
    %c8_233 = arith.constant 8 : index
    %c80_234 = arith.constant 80 : index
    %125 = vector.load %arg20[%c8_233, %c80_234] : memref<64x144xf32, #tpu.memory_space<vmem>>, vector<8x16xf32>
    tpu.vector_store %arg20[%c8_233, %c80_234], %124 {strides = array<i32>} : memref<64x144xf32, #tpu.memory_space<vmem>>, vector<8x16xf32>,
    %c0_235 = arith.constant 0 : index
    %c3_236 = arith.constant 3 : index
    %c2_237 = arith.constant 2 : index
    %c0_238 = arith.constant 0 : index
    %126 = vector.load %arg1[%c0_235, %c3_236, %c2_237, %c0_238] : memref<1x10x10x16xf32, #tpu.memory_space<vmem>>, vector<1x1x8x16xf32>
    %127 = vector.shape_cast %126 : vector<1x1x8x16xf32> to vector<8x16xf32>
    %c16_239 = arith.constant 16 : index
    %c80_240 = arith.constant 80 : index
    %128 = vector.load %arg20[%c16_239, %c80_240] : memref<64x144xf32, #tpu.memory_space<vmem>>, vector<8x16xf32>
    tpu.vector_store %arg20[%c16_239, %c80_240], %127 {strides = array<i32>} : memref<64x144xf32, #tpu.memory_space<vmem>>, vector<8x16xf32>,
    %c0_241 = arith.constant 0 : index
    %c4_242 = arith.constant 4 : index
    %c2_243 = arith.constant 2 : index
    %c0_244 = arith.constant 0 : index
    %129 = vector.load %arg1[%c0_241, %c4_242, %c2_243, %c0_244] : memref<1x10x10x16xf32, #tpu.memory_space<vmem>>, vector<1x1x8x16xf32>
    %130 = vector.shape_cast %129 : vector<1x1x8x16xf32> to vector<8x16xf32>
    %c24_245 = arith.constant 24 : index
    %c80_246 = arith.constant 80 : index
    %131 = vector.load %arg20[%c24_245, %c80_246] : memref<64x144xf32, #tpu.memory_space<vmem>>, vector<8x16xf32>
    tpu.vector_store %arg20[%c24_245, %c80_246], %130 {strides = array<i32>} : memref<64x144xf32, #tpu.memory_space<vmem>>, vector<8x16xf32>,
    %c0_247 = arith.constant 0 : index
    %c5_248 = arith.constant 5 : index
    %c2_249 = arith.constant 2 : index
    %c0_250 = arith.constant 0 : index
    %132 = vector.load %arg1[%c0_247, %c5_248, %c2_249, %c0_250] : memref<1x10x10x16xf32, #tpu.memory_space<vmem>>, vector<1x1x8x16xf32>
    %133 = vector.shape_cast %132 : vector<1x1x8x16xf32> to vector<8x16xf32>
    %c32_251 = arith.constant 32 : index
    %c80_252 = arith.constant 80 : index
    %134 = vector.load %arg20[%c32_251, %c80_252] : memref<64x144xf32, #tpu.memory_space<vmem>>, vector<8x16xf32>
    tpu.vector_store %arg20[%c32_251, %c80_252], %133 {strides = array<i32>} : memref<64x144xf32, #tpu.memory_space<vmem>>, vector<8x16xf32>,
    %c0_253 = arith.constant 0 : index
    %c6_254 = arith.constant 6 : index
    %c2_255 = arith.constant 2 : index
    %c0_256 = arith.constant 0 : index
    %135 = vector.load %arg1[%c0_253, %c6_254, %c2_255, %c0_256] : memref<1x10x10x16xf32, #tpu.memory_space<vmem>>, vector<1x1x8x16xf32>
    %136 = vector.shape_cast %135 : vector<1x1x8x16xf32> to vector<8x16xf32>
    %c40_257 = arith.constant 40 : index
    %c80_258 = arith.constant 80 : index
    %137 = vector.load %arg20[%c40_257, %c80_258] : memref<64x144xf32, #tpu.memory_space<vmem>>, vector<8x16xf32>
    tpu.vector_store %arg20[%c40_257, %c80_258], %136 {strides = array<i32>} : memref<64x144xf32, #tpu.memory_space<vmem>>, vector<8x16xf32>,
    %c0_259 = arith.constant 0 : index
    %c7_260 = arith.constant 7 : index
    %c2_261 = arith.constant 2 : index
    %c0_262 = arith.constant 0 : index
    %138 = vector.load %arg1[%c0_259, %c7_260, %c2_261, %c0_262] : memref<1x10x10x16xf32, #tpu.memory_space<vmem>>, vector<1x1x8x16xf32>
    %139 = vector.shape_cast %138 : vector<1x1x8x16xf32> to vector<8x16xf32>
    %c48_263 = arith.constant 48 : index
    %c80_264 = arith.constant 80 : index
    %140 = vector.load %arg20[%c48_263, %c80_264] : memref<64x144xf32, #tpu.memory_space<vmem>>, vector<8x16xf32>
    tpu.vector_store %arg20[%c48_263, %c80_264], %139 {strides = array<i32>} : memref<64x144xf32, #tpu.memory_space<vmem>>, vector<8x16xf32>,
    %c0_265 = arith.constant 0 : index
    %c8_266 = arith.constant 8 : index
    %c2_267 = arith.constant 2 : index
    %c0_268 = arith.constant 0 : index
    %141 = vector.load %arg1[%c0_265, %c8_266, %c2_267, %c0_268] : memref<1x10x10x16xf32, #tpu.memory_space<vmem>>, vector<1x1x8x16xf32>
    %142 = vector.shape_cast %141 : vector<1x1x8x16xf32> to vector<8x16xf32>
    %c56_269 = arith.constant 56 : index
    %c80_270 = arith.constant 80 : index
    %143 = vector.load %arg20[%c56_269, %c80_270] : memref<64x144xf32, #tpu.memory_space<vmem>>, vector<8x16xf32>
    tpu.vector_store %arg20[%c56_269, %c80_270], %142 {strides = array<i32>} : memref<64x144xf32, #tpu.memory_space<vmem>>, vector<8x16xf32>,
    %c0_271 = arith.constant 0 : index
    %c2_272 = arith.constant 2 : index
    %c0_273 = arith.constant 0 : index
    %c0_274 = arith.constant 0 : index
    %144 = vector.load %arg1[%c0_271, %c2_272, %c0_273, %c0_274] : memref<1x10x10x16xf32, #tpu.memory_space<vmem>>, vector<1x1x8x16xf32>
    %145 = vector.shape_cast %144 : vector<1x1x8x16xf32> to vector<8x16xf32>
    %c0_275 = arith.constant 0 : index
    %c96 = arith.constant 96 : index
    %146 = vector.load %arg20[%c0_275, %c96] : memref<64x144xf32, #tpu.memory_space<vmem>>, vector<8x16xf32>
    tpu.vector_store %arg20[%c0_275, %c96], %145 {strides = array<i32>} : memref<64x144xf32, #tpu.memory_space<vmem>>, vector<8x16xf32>,
    %c0_276 = arith.constant 0 : index
    %c3_277 = arith.constant 3 : index
    %c0_278 = arith.constant 0 : index
    %c0_279 = arith.constant 0 : index
    %147 = vector.load %arg1[%c0_276, %c3_277, %c0_278, %c0_279] : memref<1x10x10x16xf32, #tpu.memory_space<vmem>>, vector<1x1x8x16xf32>
    %148 = vector.shape_cast %147 : vector<1x1x8x16xf32> to vector<8x16xf32>
    %c8_280 = arith.constant 8 : index
    %c96_281 = arith.constant 96 : index
    %149 = vector.load %arg20[%c8_280, %c96_281] : memref<64x144xf32, #tpu.memory_space<vmem>>, vector<8x16xf32>
    tpu.vector_store %arg20[%c8_280, %c96_281], %148 {strides = array<i32>} : memref<64x144xf32, #tpu.memory_space<vmem>>, vector<8x16xf32>,
    %c0_282 = arith.constant 0 : index
    %c4_283 = arith.constant 4 : index
    %c0_284 = arith.constant 0 : index
    %c0_285 = arith.constant 0 : index
    %150 = vector.load %arg1[%c0_282, %c4_283, %c0_284, %c0_285] : memref<1x10x10x16xf32, #tpu.memory_space<vmem>>, vector<1x1x8x16xf32>
    %151 = vector.shape_cast %150 : vector<1x1x8x16xf32> to vector<8x16xf32>
    %c16_286 = arith.constant 16 : index
    %c96_287 = arith.constant 96 : index
    %152 = vector.load %arg20[%c16_286, %c96_287] : memref<64x144xf32, #tpu.memory_space<vmem>>, vector<8x16xf32>
    tpu.vector_store %arg20[%c16_286, %c96_287], %151 {strides = array<i32>} : memref<64x144xf32, #tpu.memory_space<vmem>>, vector<8x16xf32>,
    %c0_288 = arith.constant 0 : index
    %c5_289 = arith.constant 5 : index
    %c0_290 = arith.constant 0 : index
    %c0_291 = arith.constant 0 : index
    %153 = vector.load %arg1[%c0_288, %c5_289, %c0_290, %c0_291] : memref<1x10x10x16xf32, #tpu.memory_space<vmem>>, vector<1x1x8x16xf32>
    %154 = vector.shape_cast %153 : vector<1x1x8x16xf32> to vector<8x16xf32>
    %c24_292 = arith.constant 24 : index
    %c96_293 = arith.constant 96 : index
    %155 = vector.load %arg20[%c24_292, %c96_293] : memref<64x144xf32, #tpu.memory_space<vmem>>, vector<8x16xf32>
    tpu.vector_store %arg20[%c24_292, %c96_293], %154 {strides = array<i32>} : memref<64x144xf32, #tpu.memory_space<vmem>>, vector<8x16xf32>,
    %c0_294 = arith.constant 0 : index
    %c6_295 = arith.constant 6 : index
    %c0_296 = arith.constant 0 : index
    %c0_297 = arith.constant 0 : index
    %156 = vector.load %arg1[%c0_294, %c6_295, %c0_296, %c0_297] : memref<1x10x10x16xf32, #tpu.memory_space<vmem>>, vector<1x1x8x16xf32>
    %157 = vector.shape_cast %156 : vector<1x1x8x16xf32> to vector<8x16xf32>
    %c32_298 = arith.constant 32 : index
    %c96_299 = arith.constant 96 : index
    %158 = vector.load %arg20[%c32_298, %c96_299] : memref<64x144xf32, #tpu.memory_space<vmem>>, vector<8x16xf32>
    tpu.vector_store %arg20[%c32_298, %c96_299], %157 {strides = array<i32>} : memref<64x144xf32, #tpu.memory_space<vmem>>, vector<8x16xf32>,
    %c0_300 = arith.constant 0 : index
    %c7_301 = arith.constant 7 : index
    %c0_302 = arith.constant 0 : index
    %c0_303 = arith.constant 0 : index
    %159 = vector.load %arg1[%c0_300, %c7_301, %c0_302, %c0_303] : memref<1x10x10x16xf32, #tpu.memory_space<vmem>>, vector<1x1x8x16xf32>
    %160 = vector.shape_cast %159 : vector<1x1x8x16xf32> to vector<8x16xf32>
    %c40_304 = arith.constant 40 : index
    %c96_305 = arith.constant 96 : index
    %161 = vector.load %arg20[%c40_304, %c96_305] : memref<64x144xf32, #tpu.memory_space<vmem>>, vector<8x16xf32>
    tpu.vector_store %arg20[%c40_304, %c96_305], %160 {strides = array<i32>} : memref<64x144xf32, #tpu.memory_space<vmem>>, vector<8x16xf32>,
    %c0_306 = arith.constant 0 : index
    %c8_307 = arith.constant 8 : index
    %c0_308 = arith.constant 0 : index
    %c0_309 = arith.constant 0 : index
    %162 = vector.load %arg1[%c0_306, %c8_307, %c0_308, %c0_309] : memref<1x10x10x16xf32, #tpu.memory_space<vmem>>, vector<1x1x8x16xf32>
    %163 = vector.shape_cast %162 : vector<1x1x8x16xf32> to vector<8x16xf32>
    %c48_310 = arith.constant 48 : index
    %c96_311 = arith.constant 96 : index
    %164 = vector.load %arg20[%c48_310, %c96_311] : memref<64x144xf32, #tpu.memory_space<vmem>>, vector<8x16xf32>
    tpu.vector_store %arg20[%c48_310, %c96_311], %163 {strides = array<i32>} : memref<64x144xf32, #tpu.memory_space<vmem>>, vector<8x16xf32>,
    %c0_312 = arith.constant 0 : index
    %c9 = arith.constant 9 : index
    %c0_313 = arith.constant 0 : index
    %c0_314 = arith.constant 0 : index
    %165 = vector.load %arg1[%c0_312, %c9, %c0_313, %c0_314] : memref<1x10x10x16xf32, #tpu.memory_space<vmem>>, vector<1x1x8x16xf32>
    %166 = vector.shape_cast %165 : vector<1x1x8x16xf32> to vector<8x16xf32>
    %c56_315 = arith.constant 56 : index
    %c96_316 = arith.constant 96 : index
    %167 = vector.load %arg20[%c56_315, %c96_316] : memref<64x144xf32, #tpu.memory_space<vmem>>, vector<8x16xf32>
    tpu.vector_store %arg20[%c56_315, %c96_316], %166 {strides = array<i32>} : memref<64x144xf32, #tpu.memory_space<vmem>>, vector<8x16xf32>,
    %c0_317 = arith.constant 0 : index
    %c2_318 = arith.constant 2 : index
    %c1_319 = arith.constant 1 : index
    %c0_320 = arith.constant 0 : index
    %168 = vector.load %arg1[%c0_317, %c2_318, %c1_319, %c0_320] : memref<1x10x10x16xf32, #tpu.memory_space<vmem>>, vector<1x1x8x16xf32>
    %169 = vector.shape_cast %168 : vector<1x1x8x16xf32> to vector<8x16xf32>
    %c0_321 = arith.constant 0 : index
    %c112 = arith.constant 112 : index
    %170 = vector.load %arg20[%c0_321, %c112] : memref<64x144xf32, #tpu.memory_space<vmem>>, vector<8x16xf32>
    tpu.vector_store %arg20[%c0_321, %c112], %169 {strides = array<i32>} : memref<64x144xf32, #tpu.memory_space<vmem>>, vector<8x16xf32>,
    %c0_322 = arith.constant 0 : index
    %c3_323 = arith.constant 3 : index
    %c1_324 = arith.constant 1 : index
    %c0_325 = arith.constant 0 : index
    %171 = vector.load %arg1[%c0_322, %c3_323, %c1_324, %c0_325] : memref<1x10x10x16xf32, #tpu.memory_space<vmem>>, vector<1x1x8x16xf32>
    %172 = vector.shape_cast %171 : vector<1x1x8x16xf32> to vector<8x16xf32>
    %c8_326 = arith.constant 8 : index
    %c112_327 = arith.constant 112 : index
    %173 = vector.load %arg20[%c8_326, %c112_327] : memref<64x144xf32, #tpu.memory_space<vmem>>, vector<8x16xf32>
    tpu.vector_store %arg20[%c8_326, %c112_327], %172 {strides = array<i32>} : memref<64x144xf32, #tpu.memory_space<vmem>>, vector<8x16xf32>,
    %c0_328 = arith.constant 0 : index
    %c4_329 = arith.constant 4 : index
    %c1_330 = arith.constant 1 : index
    %c0_331 = arith.constant 0 : index
    %174 = vector.load %arg1[%c0_328, %c4_329, %c1_330, %c0_331] : memref<1x10x10x16xf32, #tpu.memory_space<vmem>>, vector<1x1x8x16xf32>
    %175 = vector.shape_cast %174 : vector<1x1x8x16xf32> to vector<8x16xf32>
    %c16_332 = arith.constant 16 : index
    %c112_333 = arith.constant 112 : index
    %176 = vector.load %arg20[%c16_332, %c112_333] : memref<64x144xf32, #tpu.memory_space<vmem>>, vector<8x16xf32>
    tpu.vector_store %arg20[%c16_332, %c112_333], %175 {strides = array<i32>} : memref<64x144xf32, #tpu.memory_space<vmem>>, vector<8x16xf32>,
    %c0_334 = arith.constant 0 : index
    %c5_335 = arith.constant 5 : index
    %c1_336 = arith.constant 1 : index
    %c0_337 = arith.constant 0 : index
    %177 = vector.load %arg1[%c0_334, %c5_335, %c1_336, %c0_337] : memref<1x10x10x16xf32, #tpu.memory_space<vmem>>, vector<1x1x8x16xf32>
    %178 = vector.shape_cast %177 : vector<1x1x8x16xf32> to vector<8x16xf32>
    %c24_338 = arith.constant 24 : index
    %c112_339 = arith.constant 112 : index
    %179 = vector.load %arg20[%c24_338, %c112_339] : memref<64x144xf32, #tpu.memory_space<vmem>>, vector<8x16xf32>
    tpu.vector_store %arg20[%c24_338, %c112_339], %178 {strides = array<i32>} : memref<64x144xf32, #tpu.memory_space<vmem>>, vector<8x16xf32>,
    %c0_340 = arith.constant 0 : index
    %c6_341 = arith.constant 6 : index
    %c1_342 = arith.constant 1 : index
    %c0_343 = arith.constant 0 : index
    %180 = vector.load %arg1[%c0_340, %c6_341, %c1_342, %c0_343] : memref<1x10x10x16xf32, #tpu.memory_space<vmem>>, vector<1x1x8x16xf32>
    %181 = vector.shape_cast %180 : vector<1x1x8x16xf32> to vector<8x16xf32>
    %c32_344 = arith.constant 32 : index
    %c112_345 = arith.constant 112 : index
    %182 = vector.load %arg20[%c32_344, %c112_345] : memref<64x144xf32, #tpu.memory_space<vmem>>, vector<8x16xf32>
    tpu.vector_store %arg20[%c32_344, %c112_345], %181 {strides = array<i32>} : memref<64x144xf32, #tpu.memory_space<vmem>>, vector<8x16xf32>,
    %c0_346 = arith.constant 0 : index
    %c7_347 = arith.constant 7 : index
    %c1_348 = arith.constant 1 : index
    %c0_349 = arith.constant 0 : index
    %183 = vector.load %arg1[%c0_346, %c7_347, %c1_348, %c0_349] : memref<1x10x10x16xf32, #tpu.memory_space<vmem>>, vector<1x1x8x16xf32>
    %184 = vector.shape_cast %183 : vector<1x1x8x16xf32> to vector<8x16xf32>
    %c40_350 = arith.constant 40 : index
    %c112_351 = arith.constant 112 : index
    %185 = vector.load %arg20[%c40_350, %c112_351] : memref<64x144xf32, #tpu.memory_space<vmem>>, vector<8x16xf32>
    tpu.vector_store %arg20[%c40_350, %c112_351], %184 {strides = array<i32>} : memref<64x144xf32, #tpu.memory_space<vmem>>, vector<8x16xf32>,
    %c0_352 = arith.constant 0 : index
    %c8_353 = arith.constant 8 : index
    %c1_354 = arith.constant 1 : index
    %c0_355 = arith.constant 0 : index
    %186 = vector.load %arg1[%c0_352, %c8_353, %c1_354, %c0_355] : memref<1x10x10x16xf32, #tpu.memory_space<vmem>>, vector<1x1x8x16xf32>
    %187 = vector.shape_cast %186 : vector<1x1x8x16xf32> to vector<8x16xf32>
    %c48_356 = arith.constant 48 : index
    %c112_357 = arith.constant 112 : index
    %188 = vector.load %arg20[%c48_356, %c112_357] : memref<64x144xf32, #tpu.memory_space<vmem>>, vector<8x16xf32>
    tpu.vector_store %arg20[%c48_356, %c112_357], %187 {strides = array<i32>} : memref<64x144xf32, #tpu.memory_space<vmem>>, vector<8x16xf32>,
    %c0_358 = arith.constant 0 : index
    %c9_359 = arith.constant 9 : index
    %c1_360 = arith.constant 1 : index
    %c0_361 = arith.constant 0 : index
    %189 = vector.load %arg1[%c0_358, %c9_359, %c1_360, %c0_361] : memref<1x10x10x16xf32, #tpu.memory_space<vmem>>, vector<1x1x8x16xf32>
    %190 = vector.shape_cast %189 : vector<1x1x8x16xf32> to vector<8x16xf32>
    %c56_362 = arith.constant 56 : index
    %c112_363 = arith.constant 112 : index
    %191 = vector.load %arg20[%c56_362, %c112_363] : memref<64x144xf32, #tpu.memory_space<vmem>>, vector<8x16xf32>
    tpu.vector_store %arg20[%c56_362, %c112_363], %190 {strides = array<i32>} : memref<64x144xf32, #tpu.memory_space<vmem>>, vector<8x16xf32>,
    %c0_364 = arith.constant 0 : index
    %c2_365 = arith.constant 2 : index
    %c2_366 = arith.constant 2 : index
    %c0_367 = arith.constant 0 : index
    %192 = vector.load %arg1[%c0_364, %c2_365, %c2_366, %c0_367] : memref<1x10x10x16xf32, #tpu.memory_space<vmem>>, vector<1x1x8x16xf32>
    %193 = vector.shape_cast %192 : vector<1x1x8x16xf32> to vector<8x16xf32>
    %c0_368 = arith.constant 0 : index
    %c128 = arith.constant 128 : index
    %194 = vector.load %arg20[%c0_368, %c128] : memref<64x144xf32, #tpu.memory_space<vmem>>, vector<8x16xf32>
    tpu.vector_store %arg20[%c0_368, %c128], %193 {strides = array<i32>} : memref<64x144xf32, #tpu.memory_space<vmem>>, vector<8x16xf32>,
    %c0_369 = arith.constant 0 : index
    %c3_370 = arith.constant 3 : index
    %c2_371 = arith.constant 2 : index
    %c0_372 = arith.constant 0 : index
    %195 = vector.load %arg1[%c0_369, %c3_370, %c2_371, %c0_372] : memref<1x10x10x16xf32, #tpu.memory_space<vmem>>, vector<1x1x8x16xf32>
    %196 = vector.shape_cast %195 : vector<1x1x8x16xf32> to vector<8x16xf32>
    %c8_373 = arith.constant 8 : index
    %c128_374 = arith.constant 128 : index
    %197 = vector.load %arg20[%c8_373, %c128_374] : memref<64x144xf32, #tpu.memory_space<vmem>>, vector<8x16xf32>
    tpu.vector_store %arg20[%c8_373, %c128_374], %196 {strides = array<i32>} : memref<64x144xf32, #tpu.memory_space<vmem>>, vector<8x16xf32>,
    %c0_375 = arith.constant 0 : index
    %c4_376 = arith.constant 4 : index
    %c2_377 = arith.constant 2 : index
    %c0_378 = arith.constant 0 : index
    %198 = vector.load %arg1[%c0_375, %c4_376, %c2_377, %c0_378] : memref<1x10x10x16xf32, #tpu.memory_space<vmem>>, vector<1x1x8x16xf32>
    %199 = vector.shape_cast %198 : vector<1x1x8x16xf32> to vector<8x16xf32>
    %c16_379 = arith.constant 16 : index
    %c128_380 = arith.constant 128 : index
    %200 = vector.load %arg20[%c16_379, %c128_380] : memref<64x144xf32, #tpu.memory_space<vmem>>, vector<8x16xf32>
    tpu.vector_store %arg20[%c16_379, %c128_380], %199 {strides = array<i32>} : memref<64x144xf32, #tpu.memory_space<vmem>>, vector<8x16xf32>,
    %c0_381 = arith.constant 0 : index
    %c5_382 = arith.constant 5 : index
    %c2_383 = arith.constant 2 : index
    %c0_384 = arith.constant 0 : index
    %201 = vector.load %arg1[%c0_381, %c5_382, %c2_383, %c0_384] : memref<1x10x10x16xf32, #tpu.memory_space<vmem>>, vector<1x1x8x16xf32>
    %202 = vector.shape_cast %201 : vector<1x1x8x16xf32> to vector<8x16xf32>
    %c24_385 = arith.constant 24 : index
    %c128_386 = arith.constant 128 : index
    %203 = vector.load %arg20[%c24_385, %c128_386] : memref<64x144xf32, #tpu.memory_space<vmem>>, vector<8x16xf32>
    tpu.vector_store %arg20[%c24_385, %c128_386], %202 {strides = array<i32>} : memref<64x144xf32, #tpu.memory_space<vmem>>, vector<8x16xf32>,
    %c0_387 = arith.constant 0 : index
    %c6_388 = arith.constant 6 : index
    %c2_389 = arith.constant 2 : index
    %c0_390 = arith.constant 0 : index
    %204 = vector.load %arg1[%c0_387, %c6_388, %c2_389, %c0_390] : memref<1x10x10x16xf32, #tpu.memory_space<vmem>>, vector<1x1x8x16xf32>
    %205 = vector.shape_cast %204 : vector<1x1x8x16xf32> to vector<8x16xf32>
    %c32_391 = arith.constant 32 : index
    %c128_392 = arith.constant 128 : index
    %206 = vector.load %arg20[%c32_391, %c128_392] : memref<64x144xf32, #tpu.memory_space<vmem>>, vector<8x16xf32>
    tpu.vector_store %arg20[%c32_391, %c128_392], %205 {strides = array<i32>} : memref<64x144xf32, #tpu.memory_space<vmem>>, vector<8x16xf32>,
    %c0_393 = arith.constant 0 : index
    %c7_394 = arith.constant 7 : index
    %c2_395 = arith.constant 2 : index
    %c0_396 = arith.constant 0 : index
    %207 = vector.load %arg1[%c0_393, %c7_394, %c2_395, %c0_396] : memref<1x10x10x16xf32, #tpu.memory_space<vmem>>, vector<1x1x8x16xf32>
    %208 = vector.shape_cast %207 : vector<1x1x8x16xf32> to vector<8x16xf32>
    %c40_397 = arith.constant 40 : index
    %c128_398 = arith.constant 128 : index
    %209 = vector.load %arg20[%c40_397, %c128_398] : memref<64x144xf32, #tpu.memory_space<vmem>>, vector<8x16xf32>
    tpu.vector_store %arg20[%c40_397, %c128_398], %208 {strides = array<i32>} : memref<64x144xf32, #tpu.memory_space<vmem>>, vector<8x16xf32>,
    %c0_399 = arith.constant 0 : index
    %c8_400 = arith.constant 8 : index
    %c2_401 = arith.constant 2 : index
    %c0_402 = arith.constant 0 : index
    %210 = vector.load %arg1[%c0_399, %c8_400, %c2_401, %c0_402] : memref<1x10x10x16xf32, #tpu.memory_space<vmem>>, vector<1x1x8x16xf32>
    %211 = vector.shape_cast %210 : vector<1x1x8x16xf32> to vector<8x16xf32>
    %c48_403 = arith.constant 48 : index
    %c128_404 = arith.constant 128 : index
    %212 = vector.load %arg20[%c48_403, %c128_404] : memref<64x144xf32, #tpu.memory_space<vmem>>, vector<8x16xf32>
    tpu.vector_store %arg20[%c48_403, %c128_404], %211 {strides = array<i32>} : memref<64x144xf32, #tpu.memory_space<vmem>>, vector<8x16xf32>,
    %c0_405 = arith.constant 0 : index
    %c9_406 = arith.constant 9 : index
    %c2_407 = arith.constant 2 : index
    %c0_408 = arith.constant 0 : index
    %213 = vector.load %arg1[%c0_405, %c9_406, %c2_407, %c0_408] : memref<1x10x10x16xf32, #tpu.memory_space<vmem>>, vector<1x1x8x16xf32>
    %214 = vector.shape_cast %213 : vector<1x1x8x16xf32> to vector<8x16xf32>
    %c56_409 = arith.constant 56 : index
    %c128_410 = arith.constant 128 : index
    %215 = vector.load %arg20[%c56_409, %c128_410] : memref<64x144xf32, #tpu.memory_space<vmem>>, vector<8x16xf32>
    tpu.vector_store %arg20[%c56_409, %c128_410], %214 {strides = array<i32>} : memref<64x144xf32, #tpu.memory_space<vmem>>, vector<8x16xf32>,
    %c0_411 = arith.constant 0 : index
    %c0_412 = arith.constant 0 : index
    %216 = vector.load %arg20[%c0_411, %c0_412] : memref<64x144xf32, #tpu.memory_space<vmem>>, vector<64x144xf32>
    %217 = arith.truncf %216 : vector<64x144xf32> to vector<64x144xbf16>
    %c0_413 = arith.constant 0 : index
    %c0_414 = arith.constant 0 : index
    %218 = vector.load %arg2[%c0_413, %c0_414] : memref<144x64xbf16, #tpu.memory_space<vmem>>, vector<144x64xbf16>
    %cst = arith.constant dense<0.000000e+00> : vector<64x64xf32>
    %219 = tpu.matmul %217, %218, %cst {dimension_numbers = #tpu.dot_dimension_numbers<[1], [0], [0], [1], [0, 0, 1, 1], [], []>} : vector<64x144xbf16>, vector<144x64xbf16>, vector<64x64xf32> -> vector<64x64xf32>
    %c0_415 = arith.constant 0 : index
    %c0_416 = arith.constant 0 : index
    %220 = vector.load %arg3[%c0_415, %c0_416] : memref<1x64xf32, #tpu.memory_space<vmem>>, vector<1x64xf32>
    %221 = vector.broadcast %220 : vector<1x64xf32> to vector<64x64xf32>
    %222 = arith.mulf %219, %221 : vector<64x64xf32>
    %c0_417 = arith.constant 0 : index
    %c0_418 = arith.constant 0 : index
    %223 = vector.load %arg4[%c0_417, %c0_418] : memref<1x64xf32, #tpu.memory_space<vmem>>, vector<1x64xf32>
    %224 = vector.broadcast %223 : vector<1x64xf32> to vector<64x64xf32>
    %225 = arith.addf %222, %224 : vector<64x64xf32>
    %cst_419 = arith.constant 0.000000e+00 : f32
    %226 = vector.broadcast %cst_419 : f32 to vector<64x64xf32>
    %227 = arith.subf %226, %225 : vector<64x64xf32>
    %228 = math.exp %227 : vector<64x64xf32>
    %cst_420 = arith.constant 1.000000e+00 : f32
    %229 = vector.broadcast %cst_420 : f32 to vector<64x64xf32>
    %230 = arith.addf %229, %228 : vector<64x64xf32>
    %231 = tpu.reciprocal %230 {approx = true} : vector<64x64xf32> -> vector<64x64xf32>
    %232 = arith.mulf %225, %231 : vector<64x64xf32>
    %cst_421 = arith.constant 0.000000e+00 : f32
    %233 = vector.broadcast %cst_421 : f32 to vector<10x10x64xf32>
    %c0_422 = arith.constant 0 : index
    %c0_423 = arith.constant 0 : index
    %c0_424 = arith.constant 0 : index
    %234 = vector.load %arg21[%c0_422, %c0_423, %c0_424] : memref<10x10x64xf32, #tpu.memory_space<vmem>>, vector<10x10x64xf32>
    tpu.vector_store %arg21[%c0_422, %c0_423, %c0_424], %233 {strides = array<i32>} : memref<10x10x64xf32, #tpu.memory_space<vmem>>, vector<10x10x64xf32>,
    %235 = vector.extract_strided_slice %232 {offsets = [0, 0], sizes = [8, 64], strides = [1, 1]} : vector<64x64xf32> to vector<8x64xf32>
    %c1_425 = arith.constant 1 : index
    %c1_426 = arith.constant 1 : index
    %c0_427 = arith.constant 0 : index
    %236 = vector.load %arg21[%c1_425, %c1_426, %c0_427] : memref<10x10x64xf32, #tpu.memory_space<vmem>>, vector<1x8x64xf32>
    %237 = vector.shape_cast %236 : vector<1x8x64xf32> to vector<8x64xf32>
    %238 = vector.shape_cast %235 : vector<8x64xf32> to vector<1x8x64xf32>
    tpu.vector_store %arg21[%c1_425, %c1_426, %c0_427], %238 {strides = array<i32>} : memref<10x10x64xf32, #tpu.memory_space<vmem>>, vector<1x8x64xf32>,
    %239 = vector.extract_strided_slice %232 {offsets = [8, 0], sizes = [8, 64], strides = [1, 1]} : vector<64x64xf32> to vector<8x64xf32>
    %c2_428 = arith.constant 2 : index
    %c1_429 = arith.constant 1 : index
    %c0_430 = arith.constant 0 : index
    %240 = vector.load %arg21[%c2_428, %c1_429, %c0_430] : memref<10x10x64xf32, #tpu.memory_space<vmem>>, vector<1x8x64xf32>
    %241 = vector.shape_cast %240 : vector<1x8x64xf32> to vector<8x64xf32>
    %242 = vector.shape_cast %239 : vector<8x64xf32> to vector<1x8x64xf32>
    tpu.vector_store %arg21[%c2_428, %c1_429, %c0_430], %242 {strides = array<i32>} : memref<10x10x64xf32, #tpu.memory_space<vmem>>, vector<1x8x64xf32>,
    %243 = vector.extract_strided_slice %232 {offsets = [16, 0], sizes = [8, 64], strides = [1, 1]} : vector<64x64xf32> to vector<8x64xf32>
    %c3_431 = arith.constant 3 : index
    %c1_432 = arith.constant 1 : index
    %c0_433 = arith.constant 0 : index
    %244 = vector.load %arg21[%c3_431, %c1_432, %c0_433] : memref<10x10x64xf32, #tpu.memory_space<vmem>>, vector<1x8x64xf32>
    %245 = vector.shape_cast %244 : vector<1x8x64xf32> to vector<8x64xf32>
    %246 = vector.shape_cast %243 : vector<8x64xf32> to vector<1x8x64xf32>
    tpu.vector_store %arg21[%c3_431, %c1_432, %c0_433], %246 {strides = array<i32>} : memref<10x10x64xf32, #tpu.memory_space<vmem>>, vector<1x8x64xf32>,
    %247 = vector.extract_strided_slice %232 {offsets = [24, 0], sizes = [8, 64], strides = [1, 1]} : vector<64x64xf32> to vector<8x64xf32>
    %c4_434 = arith.constant 4 : index
    %c1_435 = arith.constant 1 : index
    %c0_436 = arith.constant 0 : index
    %248 = vector.load %arg21[%c4_434, %c1_435, %c0_436] : memref<10x10x64xf32, #tpu.memory_space<vmem>>, vector<1x8x64xf32>
    %249 = vector.shape_cast %248 : vector<1x8x64xf32> to vector<8x64xf32>
    %250 = vector.shape_cast %247 : vector<8x64xf32> to vector<1x8x64xf32>
    tpu.vector_store %arg21[%c4_434, %c1_435, %c0_436], %250 {strides = array<i32>} : memref<10x10x64xf32, #tpu.memory_space<vmem>>, vector<1x8x64xf32>,
    %251 = vector.extract_strided_slice %232 {offsets = [32, 0], sizes = [8, 64], strides = [1, 1]} : vector<64x64xf32> to vector<8x64xf32>
    %c5_437 = arith.constant 5 : index
    %c1_438 = arith.constant 1 : index
    %c0_439 = arith.constant 0 : index
    %252 = vector.load %arg21[%c5_437, %c1_438, %c0_439] : memref<10x10x64xf32, #tpu.memory_space<vmem>>, vector<1x8x64xf32>
    %253 = vector.shape_cast %252 : vector<1x8x64xf32> to vector<8x64xf32>
    %254 = vector.shape_cast %251 : vector<8x64xf32> to vector<1x8x64xf32>
    tpu.vector_store %arg21[%c5_437, %c1_438, %c0_439], %254 {strides = array<i32>} : memref<10x10x64xf32, #tpu.memory_space<vmem>>, vector<1x8x64xf32>,
    %255 = vector.extract_strided_slice %232 {offsets = [40, 0], sizes = [8, 64], strides = [1, 1]} : vector<64x64xf32> to vector<8x64xf32>
    %c6_440 = arith.constant 6 : index
    %c1_441 = arith.constant 1 : index
    %c0_442 = arith.constant 0 : index
    %256 = vector.load %arg21[%c6_440, %c1_441, %c0_442] : memref<10x10x64xf32, #tpu.memory_space<vmem>>, vector<1x8x64xf32>
    %257 = vector.shape_cast %256 : vector<1x8x64xf32> to vector<8x64xf32>
    %258 = vector.shape_cast %255 : vector<8x64xf32> to vector<1x8x64xf32>
    tpu.vector_store %arg21[%c6_440, %c1_441, %c0_442], %258 {strides = array<i32>} : memref<10x10x64xf32, #tpu.memory_space<vmem>>, vector<1x8x64xf32>,
    %259 = vector.extract_strided_slice %232 {offsets = [48, 0], sizes = [8, 64], strides = [1, 1]} : vector<64x64xf32> to vector<8x64xf32>
    %c7_443 = arith.constant 7 : index
    %c1_444 = arith.constant 1 : index
    %c0_445 = arith.constant 0 : index
    %260 = vector.load %arg21[%c7_443, %c1_444, %c0_445] : memref<10x10x64xf32, #tpu.memory_space<vmem>>, vector<1x8x64xf32>
    %261 = vector.shape_cast %260 : vector<1x8x64xf32> to vector<8x64xf32>
    %262 = vector.shape_cast %259 : vector<8x64xf32> to vector<1x8x64xf32>
    tpu.vector_store %arg21[%c7_443, %c1_444, %c0_445], %262 {strides = array<i32>} : memref<10x10x64xf32, #tpu.memory_space<vmem>>, vector<1x8x64xf32>,
    %263 = vector.extract_strided_slice %232 {offsets = [56, 0], sizes = [8, 64], strides = [1, 1]} : vector<64x64xf32> to vector<8x64xf32>
    %c8_446 = arith.constant 8 : index
    %c1_447 = arith.constant 1 : index
    %c0_448 = arith.constant 0 : index
    %264 = vector.load %arg21[%c8_446, %c1_447, %c0_448] : memref<10x10x64xf32, #tpu.memory_space<vmem>>, vector<1x8x64xf32>
    %265 = vector.shape_cast %264 : vector<1x8x64xf32> to vector<8x64xf32>
    %266 = vector.shape_cast %263 : vector<8x64xf32> to vector<1x8x64xf32>
    tpu.vector_store %arg21[%c8_446, %c1_447, %c0_448], %266 {strides = array<i32>} : memref<10x10x64xf32, #tpu.memory_space<vmem>>, vector<1x8x64xf32>,
    %c0_449 = arith.constant 0 : index
    %c0_450 = arith.constant 0 : index
    %c0_451 = arith.constant 0 : index
    %267 = vector.load %arg21[%c0_449, %c0_450, %c0_451] : memref<10x10x64xf32, #tpu.memory_space<vmem>>, vector<1x8x64xf32>
    %268 = vector.shape_cast %267 : vector<1x8x64xf32> to vector<8x64xf32>
    %c0_452 = arith.constant 0 : index
    %c0_453 = arith.constant 0 : index
    %269 = vector.load %arg22[%c0_452, %c0_453] : memref<64x576xf32, #tpu.memory_space<vmem>>, vector<8x64xf32>
    tpu.vector_store %arg22[%c0_452, %c0_453], %268 {strides = array<i32>} : memref<64x576xf32, #tpu.memory_space<vmem>>, vector<8x64xf32>,
    %c1_454 = arith.constant 1 : index
    %c0_455 = arith.constant 0 : index
    %c0_456 = arith.constant 0 : index
    %270 = vector.load %arg21[%c1_454, %c0_455, %c0_456] : memref<10x10x64xf32, #tpu.memory_space<vmem>>, vector<1x8x64xf32>
    %271 = vector.shape_cast %270 : vector<1x8x64xf32> to vector<8x64xf32>
    %c8_457 = arith.constant 8 : index
    %c0_458 = arith.constant 0 : index
    %272 = vector.load %arg22[%c8_457, %c0_458] : memref<64x576xf32, #tpu.memory_space<vmem>>, vector<8x64xf32>
    tpu.vector_store %arg22[%c8_457, %c0_458], %271 {strides = array<i32>} : memref<64x576xf32, #tpu.memory_space<vmem>>, vector<8x64xf32>,
    %c2_459 = arith.constant 2 : index
    %c0_460 = arith.constant 0 : index
    %c0_461 = arith.constant 0 : index
    %273 = vector.load %arg21[%c2_459, %c0_460, %c0_461] : memref<10x10x64xf32, #tpu.memory_space<vmem>>, vector<1x8x64xf32>
    %274 = vector.shape_cast %273 : vector<1x8x64xf32> to vector<8x64xf32>
    %c16_462 = arith.constant 16 : index
    %c0_463 = arith.constant 0 : index
    %275 = vector.load %arg22[%c16_462, %c0_463] : memref<64x576xf32, #tpu.memory_space<vmem>>, vector<8x64xf32>
    tpu.vector_store %arg22[%c16_462, %c0_463], %274 {strides = array<i32>} : memref<64x576xf32, #tpu.memory_space<vmem>>, vector<8x64xf32>,
    %c3_464 = arith.constant 3 : index
    %c0_465 = arith.constant 0 : index
    %c0_466 = arith.constant 0 : index
    %276 = vector.load %arg21[%c3_464, %c0_465, %c0_466] : memref<10x10x64xf32, #tpu.memory_space<vmem>>, vector<1x8x64xf32>
    %277 = vector.shape_cast %276 : vector<1x8x64xf32> to vector<8x64xf32>
    %c24_467 = arith.constant 24 : index
    %c0_468 = arith.constant 0 : index
    %278 = vector.load %arg22[%c24_467, %c0_468] : memref<64x576xf32, #tpu.memory_space<vmem>>, vector<8x64xf32>
    tpu.vector_store %arg22[%c24_467, %c0_468], %277 {strides = array<i32>} : memref<64x576xf32, #tpu.memory_space<vmem>>, vector<8x64xf32>,
    %c4_469 = arith.constant 4 : index
    %c0_470 = arith.constant 0 : index
    %c0_471 = arith.constant 0 : index
    %279 = vector.load %arg21[%c4_469, %c0_470, %c0_471] : memref<10x10x64xf32, #tpu.memory_space<vmem>>, vector<1x8x64xf32>
    %280 = vector.shape_cast %279 : vector<1x8x64xf32> to vector<8x64xf32>
    %c32_472 = arith.constant 32 : index
    %c0_473 = arith.constant 0 : index
    %281 = vector.load %arg22[%c32_472, %c0_473] : memref<64x576xf32, #tpu.memory_space<vmem>>, vector<8x64xf32>
    tpu.vector_store %arg22[%c32_472, %c0_473], %280 {strides = array<i32>} : memref<64x576xf32, #tpu.memory_space<vmem>>, vector<8x64xf32>,
    %c5_474 = arith.constant 5 : index
    %c0_475 = arith.constant 0 : index
    %c0_476 = arith.constant 0 : index
    %282 = vector.load %arg21[%c5_474, %c0_475, %c0_476] : memref<10x10x64xf32, #tpu.memory_space<vmem>>, vector<1x8x64xf32>
    %283 = vector.shape_cast %282 : vector<1x8x64xf32> to vector<8x64xf32>
    %c40_477 = arith.constant 40 : index
    %c0_478 = arith.constant 0 : index
    %284 = vector.load %arg22[%c40_477, %c0_478] : memref<64x576xf32, #tpu.memory_space<vmem>>, vector<8x64xf32>
    tpu.vector_store %arg22[%c40_477, %c0_478], %283 {strides = array<i32>} : memref<64x576xf32, #tpu.memory_space<vmem>>, vector<8x64xf32>,
    %c6_479 = arith.constant 6 : index
    %c0_480 = arith.constant 0 : index
    %c0_481 = arith.constant 0 : index
    %285 = vector.load %arg21[%c6_479, %c0_480, %c0_481] : memref<10x10x64xf32, #tpu.memory_space<vmem>>, vector<1x8x64xf32>
    %286 = vector.shape_cast %285 : vector<1x8x64xf32> to vector<8x64xf32>
    %c48_482 = arith.constant 48 : index
    %c0_483 = arith.constant 0 : index
    %287 = vector.load %arg22[%c48_482, %c0_483] : memref<64x576xf32, #tpu.memory_space<vmem>>, vector<8x64xf32>
    tpu.vector_store %arg22[%c48_482, %c0_483], %286 {strides = array<i32>} : memref<64x576xf32, #tpu.memory_space<vmem>>, vector<8x64xf32>,
    %c7_484 = arith.constant 7 : index
    %c0_485 = arith.constant 0 : index
    %c0_486 = arith.constant 0 : index
    %288 = vector.load %arg21[%c7_484, %c0_485, %c0_486] : memref<10x10x64xf32, #tpu.memory_space<vmem>>, vector<1x8x64xf32>
    %289 = vector.shape_cast %288 : vector<1x8x64xf32> to vector<8x64xf32>
    %c56_487 = arith.constant 56 : index
    %c0_488 = arith.constant 0 : index
    %290 = vector.load %arg22[%c56_487, %c0_488] : memref<64x576xf32, #tpu.memory_space<vmem>>, vector<8x64xf32>
    tpu.vector_store %arg22[%c56_487, %c0_488], %289 {strides = array<i32>} : memref<64x576xf32, #tpu.memory_space<vmem>>, vector<8x64xf32>,
    %c0_489 = arith.constant 0 : index
    %c1_490 = arith.constant 1 : index
    %c0_491 = arith.constant 0 : index
    %291 = vector.load %arg21[%c0_489, %c1_490, %c0_491] : memref<10x10x64xf32, #tpu.memory_space<vmem>>, vector<1x8x64xf32>
    %292 = vector.shape_cast %291 : vector<1x8x64xf32> to vector<8x64xf32>
    %c0_492 = arith.constant 0 : index
    %c64_493 = arith.constant 64 : index
    %293 = vector.load %arg22[%c0_492, %c64_493] : memref<64x576xf32, #tpu.memory_space<vmem>>, vector<8x64xf32>
    tpu.vector_store %arg22[%c0_492, %c64_493], %292 {strides = array<i32>} : memref<64x576xf32, #tpu.memory_space<vmem>>, vector<8x64xf32>,
    %c1_494 = arith.constant 1 : index
    %c1_495 = arith.constant 1 : index
    %c0_496 = arith.constant 0 : index
    %294 = vector.load %arg21[%c1_494, %c1_495, %c0_496] : memref<10x10x64xf32, #tpu.memory_space<vmem>>, vector<1x8x64xf32>
    %295 = vector.shape_cast %294 : vector<1x8x64xf32> to vector<8x64xf32>
    %c8_497 = arith.constant 8 : index
    %c64_498 = arith.constant 64 : index
    %296 = vector.load %arg22[%c8_497, %c64_498] : memref<64x576xf32, #tpu.memory_space<vmem>>, vector<8x64xf32>
    tpu.vector_store %arg22[%c8_497, %c64_498], %295 {strides = array<i32>} : memref<64x576xf32, #tpu.memory_space<vmem>>, vector<8x64xf32>,
    %c2_499 = arith.constant 2 : index
    %c1_500 = arith.constant 1 : index
    %c0_501 = arith.constant 0 : index
    %297 = vector.load %arg21[%c2_499, %c1_500, %c0_501] : memref<10x10x64xf32, #tpu.memory_space<vmem>>, vector<1x8x64xf32>
    %298 = vector.shape_cast %297 : vector<1x8x64xf32> to vector<8x64xf32>
    %c16_502 = arith.constant 16 : index
    %c64_503 = arith.constant 64 : index
    %299 = vector.load %arg22[%c16_502, %c64_503] : memref<64x576xf32, #tpu.memory_space<vmem>>, vector<8x64xf32>
    tpu.vector_store %arg22[%c16_502, %c64_503], %298 {strides = array<i32>} : memref<64x576xf32, #tpu.memory_space<vmem>>, vector<8x64xf32>,
    %c3_504 = arith.constant 3 : index
    %c1_505 = arith.constant 1 : index
    %c0_506 = arith.constant 0 : index
    %300 = vector.load %arg21[%c3_504, %c1_505, %c0_506] : memref<10x10x64xf32, #tpu.memory_space<vmem>>, vector<1x8x64xf32>
    %301 = vector.shape_cast %300 : vector<1x8x64xf32> to vector<8x64xf32>
    %c24_507 = arith.constant 24 : index
    %c64_508 = arith.constant 64 : index
    %302 = vector.load %arg22[%c24_507, %c64_508] : memref<64x576xf32, #tpu.memory_space<vmem>>, vector<8x64xf32>
    tpu.vector_store %arg22[%c24_507, %c64_508], %301 {strides = array<i32>} : memref<64x576xf32, #tpu.memory_space<vmem>>, vector<8x64xf32>,
    %c4_509 = arith.constant 4 : index
    %c1_510 = arith.constant 1 : index
    %c0_511 = arith.constant 0 : index
    %303 = vector.load %arg21[%c4_509, %c1_510, %c0_511] : memref<10x10x64xf32, #tpu.memory_space<vmem>>, vector<1x8x64xf32>
    %304 = vector.shape_cast %303 : vector<1x8x64xf32> to vector<8x64xf32>
    %c32_512 = arith.constant 32 : index
    %c64_513 = arith.constant 64 : index
    %305 = vector.load %arg22[%c32_512, %c64_513] : memref<64x576xf32, #tpu.memory_space<vmem>>, vector<8x64xf32>
    tpu.vector_store %arg22[%c32_512, %c64_513], %304 {strides = array<i32>} : memref<64x576xf32, #tpu.memory_space<vmem>>, vector<8x64xf32>,
    %c5_514 = arith.constant 5 : index
    %c1_515 = arith.constant 1 : index
    %c0_516 = arith.constant 0 : index
    %306 = vector.load %arg21[%c5_514, %c1_515, %c0_516] : memref<10x10x64xf32, #tpu.memory_space<vmem>>, vector<1x8x64xf32>
    %307 = vector.shape_cast %306 : vector<1x8x64xf32> to vector<8x64xf32>
    %c40_517 = arith.constant 40 : index
    %c64_518 = arith.constant 64 : index
    %308 = vector.load %arg22[%c40_517, %c64_518] : memref<64x576xf32, #tpu.memory_space<vmem>>, vector<8x64xf32>
    tpu.vector_store %arg22[%c40_517, %c64_518], %307 {strides = array<i32>} : memref<64x576xf32, #tpu.memory_space<vmem>>, vector<8x64xf32>,
    %c6_519 = arith.constant 6 : index
    %c1_520 = arith.constant 1 : index
    %c0_521 = arith.constant 0 : index
    %309 = vector.load %arg21[%c6_519, %c1_520, %c0_521] : memref<10x10x64xf32, #tpu.memory_space<vmem>>, vector<1x8x64xf32>
    %310 = vector.shape_cast %309 : vector<1x8x64xf32> to vector<8x64xf32>
    %c48_522 = arith.constant 48 : index
    %c64_523 = arith.constant 64 : index
    %311 = vector.load %arg22[%c48_522, %c64_523] : memref<64x576xf32, #tpu.memory_space<vmem>>, vector<8x64xf32>
    tpu.vector_store %arg22[%c48_522, %c64_523], %310 {strides = array<i32>} : memref<64x576xf32, #tpu.memory_space<vmem>>, vector<8x64xf32>,
    %c7_524 = arith.constant 7 : index
    %c1_525 = arith.constant 1 : index
    %c0_526 = arith.constant 0 : index
    %312 = vector.load %arg21[%c7_524, %c1_525, %c0_526] : memref<10x10x64xf32, #tpu.memory_space<vmem>>, vector<1x8x64xf32>
    %313 = vector.shape_cast %312 : vector<1x8x64xf32> to vector<8x64xf32>
    %c56_527 = arith.constant 56 : index
    %c64_528 = arith.constant 64 : index
    %314 = vector.load %arg22[%c56_527, %c64_528] : memref<64x576xf32, #tpu.memory_space<vmem>>, vector<8x64xf32>
    tpu.vector_store %arg22[%c56_527, %c64_528], %313 {strides = array<i32>} : memref<64x576xf32, #tpu.memory_space<vmem>>, vector<8x64xf32>,
    %c0_529 = arith.constant 0 : index
    %c2_530 = arith.constant 2 : index
    %c0_531 = arith.constant 0 : index
    %315 = vector.load %arg21[%c0_529, %c2_530, %c0_531] : memref<10x10x64xf32, #tpu.memory_space<vmem>>, vector<1x8x64xf32>
    %316 = vector.shape_cast %315 : vector<1x8x64xf32> to vector<8x64xf32>
    %c0_532 = arith.constant 0 : index
    %c128_533 = arith.constant 128 : index
    %317 = vector.load %arg22[%c0_532, %c128_533] : memref<64x576xf32, #tpu.memory_space<vmem>>, vector<8x64xf32>
    tpu.vector_store %arg22[%c0_532, %c128_533], %316 {strides = array<i32>} : memref<64x576xf32, #tpu.memory_space<vmem>>, vector<8x64xf32>,
    %c1_534 = arith.constant 1 : index
    %c2_535 = arith.constant 2 : index
    %c0_536 = arith.constant 0 : index
    %318 = vector.load %arg21[%c1_534, %c2_535, %c0_536] : memref<10x10x64xf32, #tpu.memory_space<vmem>>, vector<1x8x64xf32>
    %319 = vector.shape_cast %318 : vector<1x8x64xf32> to vector<8x64xf32>
    %c8_537 = arith.constant 8 : index
    %c128_538 = arith.constant 128 : index
    %320 = vector.load %arg22[%c8_537, %c128_538] : memref<64x576xf32, #tpu.memory_space<vmem>>, vector<8x64xf32>
    tpu.vector_store %arg22[%c8_537, %c128_538], %319 {strides = array<i32>} : memref<64x576xf32, #tpu.memory_space<vmem>>, vector<8x64xf32>,
    %c2_539 = arith.constant 2 : index
    %c2_540 = arith.constant 2 : index
    %c0_541 = arith.constant 0 : index
    %321 = vector.load %arg21[%c2_539, %c2_540, %c0_541] : memref<10x10x64xf32, #tpu.memory_space<vmem>>, vector<1x8x64xf32>
    %322 = vector.shape_cast %321 : vector<1x8x64xf32> to vector<8x64xf32>
    %c16_542 = arith.constant 16 : index
    %c128_543 = arith.constant 128 : index
    %323 = vector.load %arg22[%c16_542, %c128_543] : memref<64x576xf32, #tpu.memory_space<vmem>>, vector<8x64xf32>
    tpu.vector_store %arg22[%c16_542, %c128_543], %322 {strides = array<i32>} : memref<64x576xf32, #tpu.memory_space<vmem>>, vector<8x64xf32>,
    %c3_544 = arith.constant 3 : index
    %c2_545 = arith.constant 2 : index
    %c0_546 = arith.constant 0 : index
    %324 = vector.load %arg21[%c3_544, %c2_545, %c0_546] : memref<10x10x64xf32, #tpu.memory_space<vmem>>, vector<1x8x64xf32>
    %325 = vector.shape_cast %324 : vector<1x8x64xf32> to vector<8x64xf32>
    %c24_547 = arith.constant 24 : index
    %c128_548 = arith.constant 128 : index
    %326 = vector.load %arg22[%c24_547, %c128_548] : memref<64x576xf32, #tpu.memory_space<vmem>>, vector<8x64xf32>
    tpu.vector_store %arg22[%c24_547, %c128_548], %325 {strides = array<i32>} : memref<64x576xf32, #tpu.memory_space<vmem>>, vector<8x64xf32>,
    %c4_549 = arith.constant 4 : index
    %c2_550 = arith.constant 2 : index
    %c0_551 = arith.constant 0 : index
    %327 = vector.load %arg21[%c4_549, %c2_550, %c0_551] : memref<10x10x64xf32, #tpu.memory_space<vmem>>, vector<1x8x64xf32>
    %328 = vector.shape_cast %327 : vector<1x8x64xf32> to vector<8x64xf32>
    %c32_552 = arith.constant 32 : index
    %c128_553 = arith.constant 128 : index
    %329 = vector.load %arg22[%c32_552, %c128_553] : memref<64x576xf32, #tpu.memory_space<vmem>>, vector<8x64xf32>
    tpu.vector_store %arg22[%c32_552, %c128_553], %328 {strides = array<i32>} : memref<64x576xf32, #tpu.memory_space<vmem>>, vector<8x64xf32>,
    %c5_554 = arith.constant 5 : index
    %c2_555 = arith.constant 2 : index
    %c0_556 = arith.constant 0 : index
    %330 = vector.load %arg21[%c5_554, %c2_555, %c0_556] : memref<10x10x64xf32, #tpu.memory_space<vmem>>, vector<1x8x64xf32>
    %331 = vector.shape_cast %330 : vector<1x8x64xf32> to vector<8x64xf32>
    %c40_557 = arith.constant 40 : index
    %c128_558 = arith.constant 128 : index
    %332 = vector.load %arg22[%c40_557, %c128_558] : memref<64x576xf32, #tpu.memory_space<vmem>>, vector<8x64xf32>
    tpu.vector_store %arg22[%c40_557, %c128_558], %331 {strides = array<i32>} : memref<64x576xf32, #tpu.memory_space<vmem>>, vector<8x64xf32>,
    %c6_559 = arith.constant 6 : index
    %c2_560 = arith.constant 2 : index
    %c0_561 = arith.constant 0 : index
    %333 = vector.load %arg21[%c6_559, %c2_560, %c0_561] : memref<10x10x64xf32, #tpu.memory_space<vmem>>, vector<1x8x64xf32>
    %334 = vector.shape_cast %333 : vector<1x8x64xf32> to vector<8x64xf32>
    %c48_562 = arith.constant 48 : index
    %c128_563 = arith.constant 128 : index
    %335 = vector.load %arg22[%c48_562, %c128_563] : memref<64x576xf32, #tpu.memory_space<vmem>>, vector<8x64xf32>
    tpu.vector_store %arg22[%c48_562, %c128_563], %334 {strides = array<i32>} : memref<64x576xf32, #tpu.memory_space<vmem>>, vector<8x64xf32>,
    %c7_564 = arith.constant 7 : index
    %c2_565 = arith.constant 2 : index
    %c0_566 = arith.constant 0 : index
    %336 = vector.load %arg21[%c7_564, %c2_565, %c0_566] : memref<10x10x64xf32, #tpu.memory_space<vmem>>, vector<1x8x64xf32>
    %337 = vector.shape_cast %336 : vector<1x8x64xf32> to vector<8x64xf32>
    %c56_567 = arith.constant 56 : index
    %c128_568 = arith.constant 128 : index
    %338 = vector.load %arg22[%c56_567, %c128_568] : memref<64x576xf32, #tpu.memory_space<vmem>>, vector<8x64xf32>
    tpu.vector_store %arg22[%c56_567, %c128_568], %337 {strides = array<i32>} : memref<64x576xf32, #tpu.memory_space<vmem>>, vector<8x64xf32>,
    %c1_569 = arith.constant 1 : index
    %c0_570 = arith.constant 0 : index
    %c0_571 = arith.constant 0 : index
    %339 = vector.load %arg21[%c1_569, %c0_570, %c0_571] : memref<10x10x64xf32, #tpu.memory_space<vmem>>, vector<1x8x64xf32>
    %340 = vector.shape_cast %339 : vector<1x8x64xf32> to vector<8x64xf32>
    %c0_572 = arith.constant 0 : index
    %c192 = arith.constant 192 : index
    %341 = vector.load %arg22[%c0_572, %c192] : memref<64x576xf32, #tpu.memory_space<vmem>>, vector<8x64xf32>
    tpu.vector_store %arg22[%c0_572, %c192], %340 {strides = array<i32>} : memref<64x576xf32, #tpu.memory_space<vmem>>, vector<8x64xf32>,
    %c2_573 = arith.constant 2 : index
    %c0_574 = arith.constant 0 : index
    %c0_575 = arith.constant 0 : index
    %342 = vector.load %arg21[%c2_573, %c0_574, %c0_575] : memref<10x10x64xf32, #tpu.memory_space<vmem>>, vector<1x8x64xf32>
    %343 = vector.shape_cast %342 : vector<1x8x64xf32> to vector<8x64xf32>
    %c8_576 = arith.constant 8 : index
    %c192_577 = arith.constant 192 : index
    %344 = vector.load %arg22[%c8_576, %c192_577] : memref<64x576xf32, #tpu.memory_space<vmem>>, vector<8x64xf32>
    tpu.vector_store %arg22[%c8_576, %c192_577], %343 {strides = array<i32>} : memref<64x576xf32, #tpu.memory_space<vmem>>, vector<8x64xf32>,
    %c3_578 = arith.constant 3 : index
    %c0_579 = arith.constant 0 : index
    %c0_580 = arith.constant 0 : index
    %345 = vector.load %arg21[%c3_578, %c0_579, %c0_580] : memref<10x10x64xf32, #tpu.memory_space<vmem>>, vector<1x8x64xf32>
    %346 = vector.shape_cast %345 : vector<1x8x64xf32> to vector<8x64xf32>
    %c16_581 = arith.constant 16 : index
    %c192_582 = arith.constant 192 : index
    %347 = vector.load %arg22[%c16_581, %c192_582] : memref<64x576xf32, #tpu.memory_space<vmem>>, vector<8x64xf32>
    tpu.vector_store %arg22[%c16_581, %c192_582], %346 {strides = array<i32>} : memref<64x576xf32, #tpu.memory_space<vmem>>, vector<8x64xf32>,
    %c4_583 = arith.constant 4 : index
    %c0_584 = arith.constant 0 : index
    %c0_585 = arith.constant 0 : index
    %348 = vector.load %arg21[%c4_583, %c0_584, %c0_585] : memref<10x10x64xf32, #tpu.memory_space<vmem>>, vector<1x8x64xf32>
    %349 = vector.shape_cast %348 : vector<1x8x64xf32> to vector<8x64xf32>
    %c24_586 = arith.constant 24 : index
    %c192_587 = arith.constant 192 : index
    %350 = vector.load %arg22[%c24_586, %c192_587] : memref<64x576xf32, #tpu.memory_space<vmem>>, vector<8x64xf32>
    tpu.vector_store %arg22[%c24_586, %c192_587], %349 {strides = array<i32>} : memref<64x576xf32, #tpu.memory_space<vmem>>, vector<8x64xf32>,
    %c5_588 = arith.constant 5 : index
    %c0_589 = arith.constant 0 : index
    %c0_590 = arith.constant 0 : index
    %351 = vector.load %arg21[%c5_588, %c0_589, %c0_590] : memref<10x10x64xf32, #tpu.memory_space<vmem>>, vector<1x8x64xf32>
    %352 = vector.shape_cast %351 : vector<1x8x64xf32> to vector<8x64xf32>
    %c32_591 = arith.constant 32 : index
    %c192_592 = arith.constant 192 : index
    %353 = vector.load %arg22[%c32_591, %c192_592] : memref<64x576xf32, #tpu.memory_space<vmem>>, vector<8x64xf32>
    tpu.vector_store %arg22[%c32_591, %c192_592], %352 {strides = array<i32>} : memref<64x576xf32, #tpu.memory_space<vmem>>, vector<8x64xf32>,
    %c6_593 = arith.constant 6 : index
    %c0_594 = arith.constant 0 : index
    %c0_595 = arith.constant 0 : index
    %354 = vector.load %arg21[%c6_593, %c0_594, %c0_595] : memref<10x10x64xf32, #tpu.memory_space<vmem>>, vector<1x8x64xf32>
    %355 = vector.shape_cast %354 : vector<1x8x64xf32> to vector<8x64xf32>
    %c40_596 = arith.constant 40 : index
    %c192_597 = arith.constant 192 : index
    %356 = vector.load %arg22[%c40_596, %c192_597] : memref<64x576xf32, #tpu.memory_space<vmem>>, vector<8x64xf32>
    tpu.vector_store %arg22[%c40_596, %c192_597], %355 {strides = array<i32>} : memref<64x576xf32, #tpu.memory_space<vmem>>, vector<8x64xf32>,
    %c7_598 = arith.constant 7 : index
    %c0_599 = arith.constant 0 : index
    %c0_600 = arith.constant 0 : index
    %357 = vector.load %arg21[%c7_598, %c0_599, %c0_600] : memref<10x10x64xf32, #tpu.memory_space<vmem>>, vector<1x8x64xf32>
    %358 = vector.shape_cast %357 : vector<1x8x64xf32> to vector<8x64xf32>
    %c48_601 = arith.constant 48 : index
    %c192_602 = arith.constant 192 : index
    %359 = vector.load %arg22[%c48_601, %c192_602] : memref<64x576xf32, #tpu.memory_space<vmem>>, vector<8x64xf32>
    tpu.vector_store %arg22[%c48_601, %c192_602], %358 {strides = array<i32>} : memref<64x576xf32, #tpu.memory_space<vmem>>, vector<8x64xf32>,
    %c8_603 = arith.constant 8 : index
    %c0_604 = arith.constant 0 : index
    %c0_605 = arith.constant 0 : index
    %360 = vector.load %arg21[%c8_603, %c0_604, %c0_605] : memref<10x10x64xf32, #tpu.memory_space<vmem>>, vector<1x8x64xf32>
    %361 = vector.shape_cast %360 : vector<1x8x64xf32> to vector<8x64xf32>
    %c56_606 = arith.constant 56 : index
    %c192_607 = arith.constant 192 : index
    %362 = vector.load %arg22[%c56_606, %c192_607] : memref<64x576xf32, #tpu.memory_space<vmem>>, vector<8x64xf32>
    tpu.vector_store %arg22[%c56_606, %c192_607], %361 {strides = array<i32>} : memref<64x576xf32, #tpu.memory_space<vmem>>, vector<8x64xf32>,
    %c1_608 = arith.constant 1 : index
    %c1_609 = arith.constant 1 : index
    %c0_610 = arith.constant 0 : index
    %363 = vector.load %arg21[%c1_608, %c1_609, %c0_610] : memref<10x10x64xf32, #tpu.memory_space<vmem>>, vector<1x8x64xf32>
    %364 = vector.shape_cast %363 : vector<1x8x64xf32> to vector<8x64xf32>
    %c0_611 = arith.constant 0 : index
    %c256 = arith.constant 256 : index
    %365 = vector.load %arg22[%c0_611, %c256] : memref<64x576xf32, #tpu.memory_space<vmem>>, vector<8x64xf32>
    tpu.vector_store %arg22[%c0_611, %c256], %364 {strides = array<i32>} : memref<64x576xf32, #tpu.memory_space<vmem>>, vector<8x64xf32>,
    %c2_612 = arith.constant 2 : index
    %c1_613 = arith.constant 1 : index
    %c0_614 = arith.constant 0 : index
    %366 = vector.load %arg21[%c2_612, %c1_613, %c0_614] : memref<10x10x64xf32, #tpu.memory_space<vmem>>, vector<1x8x64xf32>
    %367 = vector.shape_cast %366 : vector<1x8x64xf32> to vector<8x64xf32>
    %c8_615 = arith.constant 8 : index
    %c256_616 = arith.constant 256 : index
    %368 = vector.load %arg22[%c8_615, %c256_616] : memref<64x576xf32, #tpu.memory_space<vmem>>, vector<8x64xf32>
    tpu.vector_store %arg22[%c8_615, %c256_616], %367 {strides = array<i32>} : memref<64x576xf32, #tpu.memory_space<vmem>>, vector<8x64xf32>,
    %c3_617 = arith.constant 3 : index
    %c1_618 = arith.constant 1 : index
    %c0_619 = arith.constant 0 : index
    %369 = vector.load %arg21[%c3_617, %c1_618, %c0_619] : memref<10x10x64xf32, #tpu.memory_space<vmem>>, vector<1x8x64xf32>
    %370 = vector.shape_cast %369 : vector<1x8x64xf32> to vector<8x64xf32>
    %c16_620 = arith.constant 16 : index
    %c256_621 = arith.constant 256 : index
    %371 = vector.load %arg22[%c16_620, %c256_621] : memref<64x576xf32, #tpu.memory_space<vmem>>, vector<8x64xf32>
    tpu.vector_store %arg22[%c16_620, %c256_621], %370 {strides = array<i32>} : memref<64x576xf32, #tpu.memory_space<vmem>>, vector<8x64xf32>,
    %c4_622 = arith.constant 4 : index
    %c1_623 = arith.constant 1 : index
    %c0_624 = arith.constant 0 : index
    %372 = vector.load %arg21[%c4_622, %c1_623, %c0_624] : memref<10x10x64xf32, #tpu.memory_space<vmem>>, vector<1x8x64xf32>
    %373 = vector.shape_cast %372 : vector<1x8x64xf32> to vector<8x64xf32>
    %c24_625 = arith.constant 24 : index
    %c256_626 = arith.constant 256 : index
    %374 = vector.load %arg22[%c24_625, %c256_626] : memref<64x576xf32, #tpu.memory_space<vmem>>, vector<8x64xf32>
    tpu.vector_store %arg22[%c24_625, %c256_626], %373 {strides = array<i32>} : memref<64x576xf32, #tpu.memory_space<vmem>>, vector<8x64xf32>,
    %c5_627 = arith.constant 5 : index
    %c1_628 = arith.constant 1 : index
    %c0_629 = arith.constant 0 : index
    %375 = vector.load %arg21[%c5_627, %c1_628, %c0_629] : memref<10x10x64xf32, #tpu.memory_space<vmem>>, vector<1x8x64xf32>
    %376 = vector.shape_cast %375 : vector<1x8x64xf32> to vector<8x64xf32>
    %c32_630 = arith.constant 32 : index
    %c256_631 = arith.constant 256 : index
    %377 = vector.load %arg22[%c32_630, %c256_631] : memref<64x576xf32, #tpu.memory_space<vmem>>, vector<8x64xf32>
    tpu.vector_store %arg22[%c32_630, %c256_631], %376 {strides = array<i32>} : memref<64x576xf32, #tpu.memory_space<vmem>>, vector<8x64xf32>,
    %c6_632 = arith.constant 6 : index
    %c1_633 = arith.constant 1 : index
    %c0_634 = arith.constant 0 : index
    %378 = vector.load %arg21[%c6_632, %c1_633, %c0_634] : memref<10x10x64xf32, #tpu.memory_space<vmem>>, vector<1x8x64xf32>
    %379 = vector.shape_cast %378 : vector<1x8x64xf32> to vector<8x64xf32>
    %c40_635 = arith.constant 40 : index
    %c256_636 = arith.constant 256 : index
    %380 = vector.load %arg22[%c40_635, %c256_636] : memref<64x576xf32, #tpu.memory_space<vmem>>, vector<8x64xf32>
    tpu.vector_store %arg22[%c40_635, %c256_636], %379 {strides = array<i32>} : memref<64x576xf32, #tpu.memory_space<vmem>>, vector<8x64xf32>,
    %c7_637 = arith.constant 7 : index
    %c1_638 = arith.constant 1 : index
    %c0_639 = arith.constant 0 : index
    %381 = vector.load %arg21[%c7_637, %c1_638, %c0_639] : memref<10x10x64xf32, #tpu.memory_space<vmem>>, vector<1x8x64xf32>
    %382 = vector.shape_cast %381 : vector<1x8x64xf32> to vector<8x64xf32>
    %c48_640 = arith.constant 48 : index
    %c256_641 = arith.constant 256 : index
    %383 = vector.load %arg22[%c48_640, %c256_641] : memref<64x576xf32, #tpu.memory_space<vmem>>, vector<8x64xf32>
    tpu.vector_store %arg22[%c48_640, %c256_641], %382 {strides = array<i32>} : memref<64x576xf32, #tpu.memory_space<vmem>>, vector<8x64xf32>,
    %c8_642 = arith.constant 8 : index
    %c1_643 = arith.constant 1 : index
    %c0_644 = arith.constant 0 : index
    %384 = vector.load %arg21[%c8_642, %c1_643, %c0_644] : memref<10x10x64xf32, #tpu.memory_space<vmem>>, vector<1x8x64xf32>
    %385 = vector.shape_cast %384 : vector<1x8x64xf32> to vector<8x64xf32>
    %c56_645 = arith.constant 56 : index
    %c256_646 = arith.constant 256 : index
    %386 = vector.load %arg22[%c56_645, %c256_646] : memref<64x576xf32, #tpu.memory_space<vmem>>, vector<8x64xf32>
    tpu.vector_store %arg22[%c56_645, %c256_646], %385 {strides = array<i32>} : memref<64x576xf32, #tpu.memory_space<vmem>>, vector<8x64xf32>,
    %c1_647 = arith.constant 1 : index
    %c2_648 = arith.constant 2 : index
    %c0_649 = arith.constant 0 : index
    %387 = vector.load %arg21[%c1_647, %c2_648, %c0_649] : memref<10x10x64xf32, #tpu.memory_space<vmem>>, vector<1x8x64xf32>
    %388 = vector.shape_cast %387 : vector<1x8x64xf32> to vector<8x64xf32>
    %c0_650 = arith.constant 0 : index
    %c320 = arith.constant 320 : index
    %389 = vector.load %arg22[%c0_650, %c320] : memref<64x576xf32, #tpu.memory_space<vmem>>, vector<8x64xf32>
    tpu.vector_store %arg22[%c0_650, %c320], %388 {strides = array<i32>} : memref<64x576xf32, #tpu.memory_space<vmem>>, vector<8x64xf32>,
    %c2_651 = arith.constant 2 : index
    %c2_652 = arith.constant 2 : index
    %c0_653 = arith.constant 0 : index
    %390 = vector.load %arg21[%c2_651, %c2_652, %c0_653] : memref<10x10x64xf32, #tpu.memory_space<vmem>>, vector<1x8x64xf32>
    %391 = vector.shape_cast %390 : vector<1x8x64xf32> to vector<8x64xf32>
    %c8_654 = arith.constant 8 : index
    %c320_655 = arith.constant 320 : index
    %392 = vector.load %arg22[%c8_654, %c320_655] : memref<64x576xf32, #tpu.memory_space<vmem>>, vector<8x64xf32>
    tpu.vector_store %arg22[%c8_654, %c320_655], %391 {strides = array<i32>} : memref<64x576xf32, #tpu.memory_space<vmem>>, vector<8x64xf32>,
    %c3_656 = arith.constant 3 : index
    %c2_657 = arith.constant 2 : index
    %c0_658 = arith.constant 0 : index
    %393 = vector.load %arg21[%c3_656, %c2_657, %c0_658] : memref<10x10x64xf32, #tpu.memory_space<vmem>>, vector<1x8x64xf32>
    %394 = vector.shape_cast %393 : vector<1x8x64xf32> to vector<8x64xf32>
    %c16_659 = arith.constant 16 : index
    %c320_660 = arith.constant 320 : index
    %395 = vector.load %arg22[%c16_659, %c320_660] : memref<64x576xf32, #tpu.memory_space<vmem>>, vector<8x64xf32>
    tpu.vector_store %arg22[%c16_659, %c320_660], %394 {strides = array<i32>} : memref<64x576xf32, #tpu.memory_space<vmem>>, vector<8x64xf32>,
    %c4_661 = arith.constant 4 : index
    %c2_662 = arith.constant 2 : index
    %c0_663 = arith.constant 0 : index
    %396 = vector.load %arg21[%c4_661, %c2_662, %c0_663] : memref<10x10x64xf32, #tpu.memory_space<vmem>>, vector<1x8x64xf32>
    %397 = vector.shape_cast %396 : vector<1x8x64xf32> to vector<8x64xf32>
    %c24_664 = arith.constant 24 : index
    %c320_665 = arith.constant 320 : index
    %398 = vector.load %arg22[%c24_664, %c320_665] : memref<64x576xf32, #tpu.memory_space<vmem>>, vector<8x64xf32>
    tpu.vector_store %arg22[%c24_664, %c320_665], %397 {strides = array<i32>} : memref<64x576xf32, #tpu.memory_space<vmem>>, vector<8x64xf32>,
    %c5_666 = arith.constant 5 : index
    %c2_667 = arith.constant 2 : index
    %c0_668 = arith.constant 0 : index
    %399 = vector.load %arg21[%c5_666, %c2_667, %c0_668] : memref<10x10x64xf32, #tpu.memory_space<vmem>>, vector<1x8x64xf32>
    %400 = vector.shape_cast %399 : vector<1x8x64xf32> to vector<8x64xf32>
    %c32_669 = arith.constant 32 : index
    %c320_670 = arith.constant 320 : index
    %401 = vector.load %arg22[%c32_669, %c320_670] : memref<64x576xf32, #tpu.memory_space<vmem>>, vector<8x64xf32>
    tpu.vector_store %arg22[%c32_669, %c320_670], %400 {strides = array<i32>} : memref<64x576xf32, #tpu.memory_space<vmem>>, vector<8x64xf32>,
    %c6_671 = arith.constant 6 : index
    %c2_672 = arith.constant 2 : index
    %c0_673 = arith.constant 0 : index
    %402 = vector.load %arg21[%c6_671, %c2_672, %c0_673] : memref<10x10x64xf32, #tpu.memory_space<vmem>>, vector<1x8x64xf32>
    %403 = vector.shape_cast %402 : vector<1x8x64xf32> to vector<8x64xf32>
    %c40_674 = arith.constant 40 : index
    %c320_675 = arith.constant 320 : index
    %404 = vector.load %arg22[%c40_674, %c320_675] : memref<64x576xf32, #tpu.memory_space<vmem>>, vector<8x64xf32>
    tpu.vector_store %arg22[%c40_674, %c320_675], %403 {strides = array<i32>} : memref<64x576xf32, #tpu.memory_space<vmem>>, vector<8x64xf32>,
    %c7_676 = arith.constant 7 : index
    %c2_677 = arith.constant 2 : index
    %c0_678 = arith.constant 0 : index
    %405 = vector.load %arg21[%c7_676, %c2_677, %c0_678] : memref<10x10x64xf32, #tpu.memory_space<vmem>>, vector<1x8x64xf32>
    %406 = vector.shape_cast %405 : vector<1x8x64xf32> to vector<8x64xf32>
    %c48_679 = arith.constant 48 : index
    %c320_680 = arith.constant 320 : index
    %407 = vector.load %arg22[%c48_679, %c320_680] : memref<64x576xf32, #tpu.memory_space<vmem>>, vector<8x64xf32>
    tpu.vector_store %arg22[%c48_679, %c320_680], %406 {strides = array<i32>} : memref<64x576xf32, #tpu.memory_space<vmem>>, vector<8x64xf32>,
    %c8_681 = arith.constant 8 : index
    %c2_682 = arith.constant 2 : index
    %c0_683 = arith.constant 0 : index
    %408 = vector.load %arg21[%c8_681, %c2_682, %c0_683] : memref<10x10x64xf32, #tpu.memory_space<vmem>>, vector<1x8x64xf32>
    %409 = vector.shape_cast %408 : vector<1x8x64xf32> to vector<8x64xf32>
    %c56_684 = arith.constant 56 : index
    %c320_685 = arith.constant 320 : index
    %410 = vector.load %arg22[%c56_684, %c320_685] : memref<64x576xf32, #tpu.memory_space<vmem>>, vector<8x64xf32>
    tpu.vector_store %arg22[%c56_684, %c320_685], %409 {strides = array<i32>} : memref<64x576xf32, #tpu.memory_space<vmem>>, vector<8x64xf32>,
    %c2_686 = arith.constant 2 : index
    %c0_687 = arith.constant 0 : index
    %c0_688 = arith.constant 0 : index
    %411 = vector.load %arg21[%c2_686, %c0_687, %c0_688] : memref<10x10x64xf32, #tpu.memory_space<vmem>>, vector<1x8x64xf32>
    %412 = vector.shape_cast %411 : vector<1x8x64xf32> to vector<8x64xf32>
    %c0_689 = arith.constant 0 : index
    %c384 = arith.constant 384 : index
    %413 = vector.load %arg22[%c0_689, %c384] : memref<64x576xf32, #tpu.memory_space<vmem>>, vector<8x64xf32>
    tpu.vector_store %arg22[%c0_689, %c384], %412 {strides = array<i32>} : memref<64x576xf32, #tpu.memory_space<vmem>>, vector<8x64xf32>,
    %c3_690 = arith.constant 3 : index
    %c0_691 = arith.constant 0 : index
    %c0_692 = arith.constant 0 : index
    %414 = vector.load %arg21[%c3_690, %c0_691, %c0_692] : memref<10x10x64xf32, #tpu.memory_space<vmem>>, vector<1x8x64xf32>
    %415 = vector.shape_cast %414 : vector<1x8x64xf32> to vector<8x64xf32>
    %c8_693 = arith.constant 8 : index
    %c384_694 = arith.constant 384 : index
    %416 = vector.load %arg22[%c8_693, %c384_694] : memref<64x576xf32, #tpu.memory_space<vmem>>, vector<8x64xf32>
    tpu.vector_store %arg22[%c8_693, %c384_694], %415 {strides = array<i32>} : memref<64x576xf32, #tpu.memory_space<vmem>>, vector<8x64xf32>,
    %c4_695 = arith.constant 4 : index
    %c0_696 = arith.constant 0 : index
    %c0_697 = arith.constant 0 : index
    %417 = vector.load %arg21[%c4_695, %c0_696, %c0_697] : memref<10x10x64xf32, #tpu.memory_space<vmem>>, vector<1x8x64xf32>
    %418 = vector.shape_cast %417 : vector<1x8x64xf32> to vector<8x64xf32>
    %c16_698 = arith.constant 16 : index
    %c384_699 = arith.constant 384 : index
    %419 = vector.load %arg22[%c16_698, %c384_699] : memref<64x576xf32, #tpu.memory_space<vmem>>, vector<8x64xf32>
    tpu.vector_store %arg22[%c16_698, %c384_699], %418 {strides = array<i32>} : memref<64x576xf32, #tpu.memory_space<vmem>>, vector<8x64xf32>,
    %c5_700 = arith.constant 5 : index
    %c0_701 = arith.constant 0 : index
    %c0_702 = arith.constant 0 : index
    %420 = vector.load %arg21[%c5_700, %c0_701, %c0_702] : memref<10x10x64xf32, #tpu.memory_space<vmem>>, vector<1x8x64xf32>
    %421 = vector.shape_cast %420 : vector<1x8x64xf32> to vector<8x64xf32>
    %c24_703 = arith.constant 24 : index
    %c384_704 = arith.constant 384 : index
    %422 = vector.load %arg22[%c24_703, %c384_704] : memref<64x576xf32, #tpu.memory_space<vmem>>, vector<8x64xf32>
    tpu.vector_store %arg22[%c24_703, %c384_704], %421 {strides = array<i32>} : memref<64x576xf32, #tpu.memory_space<vmem>>, vector<8x64xf32>,
    %c6_705 = arith.constant 6 : index
    %c0_706 = arith.constant 0 : index
    %c0_707 = arith.constant 0 : index
    %423 = vector.load %arg21[%c6_705, %c0_706, %c0_707] : memref<10x10x64xf32, #tpu.memory_space<vmem>>, vector<1x8x64xf32>
    %424 = vector.shape_cast %423 : vector<1x8x64xf32> to vector<8x64xf32>
    %c32_708 = arith.constant 32 : index
    %c384_709 = arith.constant 384 : index
    %425 = vector.load %arg22[%c32_708, %c384_709] : memref<64x576xf32, #tpu.memory_space<vmem>>, vector<8x64xf32>
    tpu.vector_store %arg22[%c32_708, %c384_709], %424 {strides = array<i32>} : memref<64x576xf32, #tpu.memory_space<vmem>>, vector<8x64xf32>,
    %c7_710 = arith.constant 7 : index
    %c0_711 = arith.constant 0 : index
    %c0_712 = arith.constant 0 : index
    %426 = vector.load %arg21[%c7_710, %c0_711, %c0_712] : memref<10x10x64xf32, #tpu.memory_space<vmem>>, vector<1x8x64xf32>
    %427 = vector.shape_cast %426 : vector<1x8x64xf32> to vector<8x64xf32>
    %c40_713 = arith.constant 40 : index
    %c384_714 = arith.constant 384 : index
    %428 = vector.load %arg22[%c40_713, %c384_714] : memref<64x576xf32, #tpu.memory_space<vmem>>, vector<8x64xf32>
    tpu.vector_store %arg22[%c40_713, %c384_714], %427 {strides = array<i32>} : memref<64x576xf32, #tpu.memory_space<vmem>>, vector<8x64xf32>,
    %c8_715 = arith.constant 8 : index
    %c0_716 = arith.constant 0 : index
    %c0_717 = arith.constant 0 : index
    %429 = vector.load %arg21[%c8_715, %c0_716, %c0_717] : memref<10x10x64xf32, #tpu.memory_space<vmem>>, vector<1x8x64xf32>
    %430 = vector.shape_cast %429 : vector<1x8x64xf32> to vector<8x64xf32>
    %c48_718 = arith.constant 48 : index
    %c384_719 = arith.constant 384 : index
    %431 = vector.load %arg22[%c48_718, %c384_719] : memref<64x576xf32, #tpu.memory_space<vmem>>, vector<8x64xf32>
    tpu.vector_store %arg22[%c48_718, %c384_719], %430 {strides = array<i32>} : memref<64x576xf32, #tpu.memory_space<vmem>>, vector<8x64xf32>,
    %c9_720 = arith.constant 9 : index
    %c0_721 = arith.constant 0 : index
    %c0_722 = arith.constant 0 : index
    %432 = vector.load %arg21[%c9_720, %c0_721, %c0_722] : memref<10x10x64xf32, #tpu.memory_space<vmem>>, vector<1x8x64xf32>
    %433 = vector.shape_cast %432 : vector<1x8x64xf32> to vector<8x64xf32>
    %c56_723 = arith.constant 56 : index
    %c384_724 = arith.constant 384 : index
    %434 = vector.load %arg22[%c56_723, %c384_724] : memref<64x576xf32, #tpu.memory_space<vmem>>, vector<8x64xf32>
    tpu.vector_store %arg22[%c56_723, %c384_724], %433 {strides = array<i32>} : memref<64x576xf32, #tpu.memory_space<vmem>>, vector<8x64xf32>,
    %c2_725 = arith.constant 2 : index
    %c1_726 = arith.constant 1 : index
    %c0_727 = arith.constant 0 : index
    %435 = vector.load %arg21[%c2_725, %c1_726, %c0_727] : memref<10x10x64xf32, #tpu.memory_space<vmem>>, vector<1x8x64xf32>
    %436 = vector.shape_cast %435 : vector<1x8x64xf32> to vector<8x64xf32>
    %c0_728 = arith.constant 0 : index
    %c448 = arith.constant 448 : index
    %437 = vector.load %arg22[%c0_728, %c448] : memref<64x576xf32, #tpu.memory_space<vmem>>, vector<8x64xf32>
    tpu.vector_store %arg22[%c0_728, %c448], %436 {strides = array<i32>} : memref<64x576xf32, #tpu.memory_space<vmem>>, vector<8x64xf32>,
    %c3_729 = arith.constant 3 : index
    %c1_730 = arith.constant 1 : index
    %c0_731 = arith.constant 0 : index
    %438 = vector.load %arg21[%c3_729, %c1_730, %c0_731] : memref<10x10x64xf32, #tpu.memory_space<vmem>>, vector<1x8x64xf32>
    %439 = vector.shape_cast %438 : vector<1x8x64xf32> to vector<8x64xf32>
    %c8_732 = arith.constant 8 : index
    %c448_733 = arith.constant 448 : index
    %440 = vector.load %arg22[%c8_732, %c448_733] : memref<64x576xf32, #tpu.memory_space<vmem>>, vector<8x64xf32>
    tpu.vector_store %arg22[%c8_732, %c448_733], %439 {strides = array<i32>} : memref<64x576xf32, #tpu.memory_space<vmem>>, vector<8x64xf32>,
    %c4_734 = arith.constant 4 : index
    %c1_735 = arith.constant 1 : index
    %c0_736 = arith.constant 0 : index
    %441 = vector.load %arg21[%c4_734, %c1_735, %c0_736] : memref<10x10x64xf32, #tpu.memory_space<vmem>>, vector<1x8x64xf32>
    %442 = vector.shape_cast %441 : vector<1x8x64xf32> to vector<8x64xf32>
    %c16_737 = arith.constant 16 : index
    %c448_738 = arith.constant 448 : index
    %443 = vector.load %arg22[%c16_737, %c448_738] : memref<64x576xf32, #tpu.memory_space<vmem>>, vector<8x64xf32>
    tpu.vector_store %arg22[%c16_737, %c448_738], %442 {strides = array<i32>} : memref<64x576xf32, #tpu.memory_space<vmem>>, vector<8x64xf32>,
    %c5_739 = arith.constant 5 : index
    %c1_740 = arith.constant 1 : index
    %c0_741 = arith.constant 0 : index
    %444 = vector.load %arg21[%c5_739, %c1_740, %c0_741] : memref<10x10x64xf32, #tpu.memory_space<vmem>>, vector<1x8x64xf32>
    %445 = vector.shape_cast %444 : vector<1x8x64xf32> to vector<8x64xf32>
    %c24_742 = arith.constant 24 : index
    %c448_743 = arith.constant 448 : index
    %446 = vector.load %arg22[%c24_742, %c448_743] : memref<64x576xf32, #tpu.memory_space<vmem>>, vector<8x64xf32>
    tpu.vector_store %arg22[%c24_742, %c448_743], %445 {strides = array<i32>} : memref<64x576xf32, #tpu.memory_space<vmem>>, vector<8x64xf32>,
    %c6_744 = arith.constant 6 : index
    %c1_745 = arith.constant 1 : index
    %c0_746 = arith.constant 0 : index
    %447 = vector.load %arg21[%c6_744, %c1_745, %c0_746] : memref<10x10x64xf32, #tpu.memory_space<vmem>>, vector<1x8x64xf32>
    %448 = vector.shape_cast %447 : vector<1x8x64xf32> to vector<8x64xf32>
    %c32_747 = arith.constant 32 : index
    %c448_748 = arith.constant 448 : index
    %449 = vector.load %arg22[%c32_747, %c448_748] : memref<64x576xf32, #tpu.memory_space<vmem>>, vector<8x64xf32>
    tpu.vector_store %arg22[%c32_747, %c448_748], %448 {strides = array<i32>} : memref<64x576xf32, #tpu.memory_space<vmem>>, vector<8x64xf32>,
    %c7_749 = arith.constant 7 : index
    %c1_750 = arith.constant 1 : index
    %c0_751 = arith.constant 0 : index
    %450 = vector.load %arg21[%c7_749, %c1_750, %c0_751] : memref<10x10x64xf32, #tpu.memory_space<vmem>>, vector<1x8x64xf32>
    %451 = vector.shape_cast %450 : vector<1x8x64xf32> to vector<8x64xf32>
    %c40_752 = arith.constant 40 : index
    %c448_753 = arith.constant 448 : index
    %452 = vector.load %arg22[%c40_752, %c448_753] : memref<64x576xf32, #tpu.memory_space<vmem>>, vector<8x64xf32>
    tpu.vector_store %arg22[%c40_752, %c448_753], %451 {strides = array<i32>} : memref<64x576xf32, #tpu.memory_space<vmem>>, vector<8x64xf32>,
    %c8_754 = arith.constant 8 : index
    %c1_755 = arith.constant 1 : index
    %c0_756 = arith.constant 0 : index
    %453 = vector.load %arg21[%c8_754, %c1_755, %c0_756] : memref<10x10x64xf32, #tpu.memory_space<vmem>>, vector<1x8x64xf32>
    %454 = vector.shape_cast %453 : vector<1x8x64xf32> to vector<8x64xf32>
    %c48_757 = arith.constant 48 : index
    %c448_758 = arith.constant 448 : index
    %455 = vector.load %arg22[%c48_757, %c448_758] : memref<64x576xf32, #tpu.memory_space<vmem>>, vector<8x64xf32>
    tpu.vector_store %arg22[%c48_757, %c448_758], %454 {strides = array<i32>} : memref<64x576xf32, #tpu.memory_space<vmem>>, vector<8x64xf32>,
    %c9_759 = arith.constant 9 : index
    %c1_760 = arith.constant 1 : index
    %c0_761 = arith.constant 0 : index
    %456 = vector.load %arg21[%c9_759, %c1_760, %c0_761] : memref<10x10x64xf32, #tpu.memory_space<vmem>>, vector<1x8x64xf32>
    %457 = vector.shape_cast %456 : vector<1x8x64xf32> to vector<8x64xf32>
    %c56_762 = arith.constant 56 : index
    %c448_763 = arith.constant 448 : index
    %458 = vector.load %arg22[%c56_762, %c448_763] : memref<64x576xf32, #tpu.memory_space<vmem>>, vector<8x64xf32>
    tpu.vector_store %arg22[%c56_762, %c448_763], %457 {strides = array<i32>} : memref<64x576xf32, #tpu.memory_space<vmem>>, vector<8x64xf32>,
    %c2_764 = arith.constant 2 : index
    %c2_765 = arith.constant 2 : index
    %c0_766 = arith.constant 0 : index
    %459 = vector.load %arg21[%c2_764, %c2_765, %c0_766] : memref<10x10x64xf32, #tpu.memory_space<vmem>>, vector<1x8x64xf32>
    %460 = vector.shape_cast %459 : vector<1x8x64xf32> to vector<8x64xf32>
    %c0_767 = arith.constant 0 : index
    %c512 = arith.constant 512 : index
    %461 = vector.load %arg22[%c0_767, %c512] : memref<64x576xf32, #tpu.memory_space<vmem>>, vector<8x64xf32>
    tpu.vector_store %arg22[%c0_767, %c512], %460 {strides = array<i32>} : memref<64x576xf32, #tpu.memory_space<vmem>>, vector<8x64xf32>,
    %c3_768 = arith.constant 3 : index
    %c2_769 = arith.constant 2 : index
    %c0_770 = arith.constant 0 : index
    %462 = vector.load %arg21[%c3_768, %c2_769, %c0_770] : memref<10x10x64xf32, #tpu.memory_space<vmem>>, vector<1x8x64xf32>
    %463 = vector.shape_cast %462 : vector<1x8x64xf32> to vector<8x64xf32>
    %c8_771 = arith.constant 8 : index
    %c512_772 = arith.constant 512 : index
    %464 = vector.load %arg22[%c8_771, %c512_772] : memref<64x576xf32, #tpu.memory_space<vmem>>, vector<8x64xf32>
    tpu.vector_store %arg22[%c8_771, %c512_772], %463 {strides = array<i32>} : memref<64x576xf32, #tpu.memory_space<vmem>>, vector<8x64xf32>,
    %c4_773 = arith.constant 4 : index
    %c2_774 = arith.constant 2 : index
    %c0_775 = arith.constant 0 : index
    %465 = vector.load %arg21[%c4_773, %c2_774, %c0_775] : memref<10x10x64xf32, #tpu.memory_space<vmem>>, vector<1x8x64xf32>
    %466 = vector.shape_cast %465 : vector<1x8x64xf32> to vector<8x64xf32>
    %c16_776 = arith.constant 16 : index
    %c512_777 = arith.constant 512 : index
    %467 = vector.load %arg22[%c16_776, %c512_777] : memref<64x576xf32, #tpu.memory_space<vmem>>, vector<8x64xf32>
    tpu.vector_store %arg22[%c16_776, %c512_777], %466 {strides = array<i32>} : memref<64x576xf32, #tpu.memory_space<vmem>>, vector<8x64xf32>,
    %c5_778 = arith.constant 5 : index
    %c2_779 = arith.constant 2 : index
    %c0_780 = arith.constant 0 : index
    %468 = vector.load %arg21[%c5_778, %c2_779, %c0_780] : memref<10x10x64xf32, #tpu.memory_space<vmem>>, vector<1x8x64xf32>
    %469 = vector.shape_cast %468 : vector<1x8x64xf32> to vector<8x64xf32>
    %c24_781 = arith.constant 24 : index
    %c512_782 = arith.constant 512 : index
    %470 = vector.load %arg22[%c24_781, %c512_782] : memref<64x576xf32, #tpu.memory_space<vmem>>, vector<8x64xf32>
    tpu.vector_store %arg22[%c24_781, %c512_782], %469 {strides = array<i32>} : memref<64x576xf32, #tpu.memory_space<vmem>>, vector<8x64xf32>,
    %c6_783 = arith.constant 6 : index
    %c2_784 = arith.constant 2 : index
    %c0_785 = arith.constant 0 : index
    %471 = vector.load %arg21[%c6_783, %c2_784, %c0_785] : memref<10x10x64xf32, #tpu.memory_space<vmem>>, vector<1x8x64xf32>
    %472 = vector.shape_cast %471 : vector<1x8x64xf32> to vector<8x64xf32>
    %c32_786 = arith.constant 32 : index
    %c512_787 = arith.constant 512 : index
    %473 = vector.load %arg22[%c32_786, %c512_787] : memref<64x576xf32, #tpu.memory_space<vmem>>, vector<8x64xf32>
    tpu.vector_store %arg22[%c32_786, %c512_787], %472 {strides = array<i32>} : memref<64x576xf32, #tpu.memory_space<vmem>>, vector<8x64xf32>,
    %c7_788 = arith.constant 7 : index
    %c2_789 = arith.constant 2 : index
    %c0_790 = arith.constant 0 : index
    %474 = vector.load %arg21[%c7_788, %c2_789, %c0_790] : memref<10x10x64xf32, #tpu.memory_space<vmem>>, vector<1x8x64xf32>
    %475 = vector.shape_cast %474 : vector<1x8x64xf32> to vector<8x64xf32>
    %c40_791 = arith.constant 40 : index
    %c512_792 = arith.constant 512 : index
    %476 = vector.load %arg22[%c40_791, %c512_792] : memref<64x576xf32, #tpu.memory_space<vmem>>, vector<8x64xf32>
    tpu.vector_store %arg22[%c40_791, %c512_792], %475 {strides = array<i32>} : memref<64x576xf32, #tpu.memory_space<vmem>>, vector<8x64xf32>,
    %c8_793 = arith.constant 8 : index
    %c2_794 = arith.constant 2 : index
    %c0_795 = arith.constant 0 : index
    %477 = vector.load %arg21[%c8_793, %c2_794, %c0_795] : memref<10x10x64xf32, #tpu.memory_space<vmem>>, vector<1x8x64xf32>
    %478 = vector.shape_cast %477 : vector<1x8x64xf32> to vector<8x64xf32>
    %c48_796 = arith.constant 48 : index
    %c512_797 = arith.constant 512 : index
    %479 = vector.load %arg22[%c48_796, %c512_797] : memref<64x576xf32, #tpu.memory_space<vmem>>, vector<8x64xf32>
    tpu.vector_store %arg22[%c48_796, %c512_797], %478 {strides = array<i32>} : memref<64x576xf32, #tpu.memory_space<vmem>>, vector<8x64xf32>,
    %c9_798 = arith.constant 9 : index
    %c2_799 = arith.constant 2 : index
    %c0_800 = arith.constant 0 : index
    %480 = vector.load %arg21[%c9_798, %c2_799, %c0_800] : memref<10x10x64xf32, #tpu.memory_space<vmem>>, vector<1x8x64xf32>
    %481 = vector.shape_cast %480 : vector<1x8x64xf32> to vector<8x64xf32>
    %c56_801 = arith.constant 56 : index
    %c512_802 = arith.constant 512 : index
    %482 = vector.load %arg22[%c56_801, %c512_802] : memref<64x576xf32, #tpu.memory_space<vmem>>, vector<8x64xf32>
    tpu.vector_store %arg22[%c56_801, %c512_802], %481 {strides = array<i32>} : memref<64x576xf32, #tpu.memory_space<vmem>>, vector<8x64xf32>,
    %c0_803 = arith.constant 0 : index
    %c0_804 = arith.constant 0 : index
    %483 = vector.load %arg22[%c0_803, %c0_804] : memref<64x576xf32, #tpu.memory_space<vmem>>, vector<64x576xf32>
    %484 = arith.truncf %483 : vector<64x576xf32> to vector<64x576xbf16>
    %c0_805 = arith.constant 0 : index
    %c0_806 = arith.constant 0 : index
    %485 = vector.load %arg5[%c0_805, %c0_806] : memref<576x64xbf16, #tpu.memory_space<vmem>>, vector<576x64xbf16>
    %cst_807 = arith.constant dense<0.000000e+00> : vector<64x64xf32>
    %486 = tpu.matmul %484, %485, %cst_807 {dimension_numbers = #tpu.dot_dimension_numbers<[1], [0], [0], [1], [0, 0, 1, 1], [], []>} : vector<64x576xbf16>, vector<576x64xbf16>, vector<64x64xf32> -> vector<64x64xf32>
    %c0_808 = arith.constant 0 : index
    %c0_809 = arith.constant 0 : index
    %487 = vector.load %arg6[%c0_808, %c0_809] : memref<1x64xf32, #tpu.memory_space<vmem>>, vector<1x64xf32>
    %488 = vector.broadcast %487 : vector<1x64xf32> to vector<64x64xf32>
    %489 = arith.mulf %486, %488 : vector<64x64xf32>
    %c0_810 = arith.constant 0 : index
    %c0_811 = arith.constant 0 : index
    %490 = vector.load %arg7[%c0_810, %c0_811] : memref<1x64xf32, #tpu.memory_space<vmem>>, vector<1x64xf32>
    %491 = vector.broadcast %490 : vector<1x64xf32> to vector<64x64xf32>
    %492 = arith.addf %489, %491 : vector<64x64xf32>
    %cst_812 = arith.constant 0.000000e+00 : f32
    %493 = vector.broadcast %cst_812 : f32 to vector<64x64xf32>
    %494 = arith.subf %493, %492 : vector<64x64xf32>
    %495 = math.exp %494 : vector<64x64xf32>
    %cst_813 = arith.constant 1.000000e+00 : f32
    %496 = vector.broadcast %cst_813 : f32 to vector<64x64xf32>
    %497 = arith.addf %496, %495 : vector<64x64xf32>
    %498 = tpu.reciprocal %497 {approx = true} : vector<64x64xf32> -> vector<64x64xf32>
    %499 = arith.mulf %492, %498 : vector<64x64xf32>
    %c0_814 = arith.constant 0 : index
    %c0_815 = arith.constant 0 : index
    %500 = vector.load %arg8[%c0_814, %c0_815] : memref<64x64xbf16, #tpu.memory_space<vmem>>, vector<64x64xbf16>
    %501 = arith.truncf %499 : vector<64x64xf32> to vector<64x64xbf16>
    %cst_816 = arith.constant dense<0.000000e+00> : vector<64x64xf32>
    %502 = tpu.matmul %500, %501, %cst_816 {dimension_numbers = #tpu.dot_dimension_numbers<[1], [1], [0], [0], [0, 0, 1, 0], [], []>} : vector<64x64xbf16>, vector<64x64xbf16>, vector<64x64xf32> -> vector<64x64xf32>
    %c0_817 = arith.constant 0 : index
    %c0_818 = arith.constant 0 : index
    %503 = vector.load %arg9[%c0_817, %c0_818] : memref<64x1xf32, #tpu.memory_space<vmem>>, vector<64x1xf32>
    %504 = vector.broadcast %503 : vector<64x1xf32> to vector<64x64xf32>
    %505 = arith.addf %502, %504 : vector<64x64xf32>
    %c0_819 = arith.constant 0 : index
    %c0_820 = arith.constant 0 : index
    %c0_821 = arith.constant 0 : index
    %506 = vector.load %arg19[%c0_819, %c0_820, %c0_821] : memref<1x72x64xf32, #tpu.memory_space<vmem>>, vector<1x64x64xf32>
    %507 = vector.shape_cast %506 : vector<1x64x64xf32> to vector<64x64xf32>
    %508 = vector.shape_cast %505 : vector<64x64xf32> to vector<1x64x64xf32>
    tpu.vector_store %arg19[%c0_819, %c0_820, %c0_821], %508 {strides = array<i32>} : memref<1x72x64xf32, #tpu.memory_space<vmem>>, vector<1x64x64xf32>,
    %c0_822 = arith.constant 0 : index
    %c0_823 = arith.constant 0 : index
    %509 = vector.load %arg20[%c0_822, %c0_823] : memref<64x144xf32, #tpu.memory_space<vmem>>, vector<64x144xf32>
    %510 = arith.truncf %509 : vector<64x144xf32> to vector<64x144xbf16>
    %c0_824 = arith.constant 0 : index
    %c0_825 = arith.constant 0 : index
    %511 = vector.load %arg10[%c0_824, %c0_825] : memref<144x16xbf16, #tpu.memory_space<vmem>>, vector<144x16xbf16>
    %cst_826 = arith.constant dense<0.000000e+00> : vector<64x16xf32>
    %512 = tpu.matmul %510, %511, %cst_826 {dimension_numbers = #tpu.dot_dimension_numbers<[1], [0], [0], [1], [0, 0, 1, 1], [], []>} : vector<64x144xbf16>, vector<144x16xbf16>, vector<64x16xf32> -> vector<64x16xf32>
    %c0_827 = arith.constant 0 : index
    %c0_828 = arith.constant 0 : index
    %513 = vector.load %arg11[%c0_827, %c0_828] : memref<1x16xf32, #tpu.memory_space<vmem>>, vector<1x16xf32>
    %514 = vector.broadcast %513 : vector<1x16xf32> to vector<64x16xf32>
    %515 = arith.mulf %512, %514 : vector<64x16xf32>
    %c0_829 = arith.constant 0 : index
    %c0_830 = arith.constant 0 : index
    %516 = vector.load %arg12[%c0_829, %c0_830] : memref<1x16xf32, #tpu.memory_space<vmem>>, vector<1x16xf32>
    %517 = vector.broadcast %516 : vector<1x16xf32> to vector<64x16xf32>
    %518 = arith.addf %515, %517 : vector<64x16xf32>
    %cst_831 = arith.constant 0.000000e+00 : f32
    %519 = vector.broadcast %cst_831 : f32 to vector<64x16xf32>
    %520 = arith.subf %519, %518 : vector<64x16xf32>
    %521 = math.exp %520 : vector<64x16xf32>
    %cst_832 = arith.constant 1.000000e+00 : f32
    %522 = vector.broadcast %cst_832 : f32 to vector<64x16xf32>
    %523 = arith.addf %522, %521 : vector<64x16xf32>
    %524 = tpu.reciprocal %523 {approx = true} : vector<64x16xf32> -> vector<64x16xf32>
    %525 = arith.mulf %518, %524 : vector<64x16xf32>
    %cst_833 = arith.constant 0.000000e+00 : f32
    %526 = vector.broadcast %cst_833 : f32 to vector<10x10x16xf32>
    %c0_834 = arith.constant 0 : index
    %c0_835 = arith.constant 0 : index
    %c0_836 = arith.constant 0 : index
    %527 = vector.load %arg23[%c0_834, %c0_835, %c0_836] : memref<10x10x16xf32, #tpu.memory_space<vmem>>, vector<10x10x16xf32>
    tpu.vector_store %arg23[%c0_834, %c0_835, %c0_836], %526 {strides = array<i32>} : memref<10x10x16xf32, #tpu.memory_space<vmem>>, vector<10x10x16xf32>,
    %528 = vector.extract_strided_slice %525 {offsets = [0, 0], sizes = [8, 16], strides = [1, 1]} : vector<64x16xf32> to vector<8x16xf32>
    %c1_837 = arith.constant 1 : index
    %c1_838 = arith.constant 1 : index
    %c0_839 = arith.constant 0 : index
    %529 = vector.load %arg23[%c1_837, %c1_838, %c0_839] : memref<10x10x16xf32, #tpu.memory_space<vmem>>, vector<1x8x16xf32>
    %530 = vector.shape_cast %529 : vector<1x8x16xf32> to vector<8x16xf32>
    %531 = vector.shape_cast %528 : vector<8x16xf32> to vector<1x8x16xf32>
    tpu.vector_store %arg23[%c1_837, %c1_838, %c0_839], %531 {strides = array<i32>} : memref<10x10x16xf32, #tpu.memory_space<vmem>>, vector<1x8x16xf32>,
    %532 = vector.extract_strided_slice %525 {offsets = [8, 0], sizes = [8, 16], strides = [1, 1]} : vector<64x16xf32> to vector<8x16xf32>
    %c2_840 = arith.constant 2 : index
    %c1_841 = arith.constant 1 : index
    %c0_842 = arith.constant 0 : index
    %533 = vector.load %arg23[%c2_840, %c1_841, %c0_842] : memref<10x10x16xf32, #tpu.memory_space<vmem>>, vector<1x8x16xf32>
    %534 = vector.shape_cast %533 : vector<1x8x16xf32> to vector<8x16xf32>
    %535 = vector.shape_cast %532 : vector<8x16xf32> to vector<1x8x16xf32>
    tpu.vector_store %arg23[%c2_840, %c1_841, %c0_842], %535 {strides = array<i32>} : memref<10x10x16xf32, #tpu.memory_space<vmem>>, vector<1x8x16xf32>,
    %536 = vector.extract_strided_slice %525 {offsets = [16, 0], sizes = [8, 16], strides = [1, 1]} : vector<64x16xf32> to vector<8x16xf32>
    %c3_843 = arith.constant 3 : index
    %c1_844 = arith.constant 1 : index
    %c0_845 = arith.constant 0 : index
    %537 = vector.load %arg23[%c3_843, %c1_844, %c0_845] : memref<10x10x16xf32, #tpu.memory_space<vmem>>, vector<1x8x16xf32>
    %538 = vector.shape_cast %537 : vector<1x8x16xf32> to vector<8x16xf32>
    %539 = vector.shape_cast %536 : vector<8x16xf32> to vector<1x8x16xf32>
    tpu.vector_store %arg23[%c3_843, %c1_844, %c0_845], %539 {strides = array<i32>} : memref<10x10x16xf32, #tpu.memory_space<vmem>>, vector<1x8x16xf32>,
    %540 = vector.extract_strided_slice %525 {offsets = [24, 0], sizes = [8, 16], strides = [1, 1]} : vector<64x16xf32> to vector<8x16xf32>
    %c4_846 = arith.constant 4 : index
    %c1_847 = arith.constant 1 : index
    %c0_848 = arith.constant 0 : index
    %541 = vector.load %arg23[%c4_846, %c1_847, %c0_848] : memref<10x10x16xf32, #tpu.memory_space<vmem>>, vector<1x8x16xf32>
    %542 = vector.shape_cast %541 : vector<1x8x16xf32> to vector<8x16xf32>
    %543 = vector.shape_cast %540 : vector<8x16xf32> to vector<1x8x16xf32>
    tpu.vector_store %arg23[%c4_846, %c1_847, %c0_848], %543 {strides = array<i32>} : memref<10x10x16xf32, #tpu.memory_space<vmem>>, vector<1x8x16xf32>,
    %544 = vector.extract_strided_slice %525 {offsets = [32, 0], sizes = [8, 16], strides = [1, 1]} : vector<64x16xf32> to vector<8x16xf32>
    %c5_849 = arith.constant 5 : index
    %c1_850 = arith.constant 1 : index
    %c0_851 = arith.constant 0 : index
    %545 = vector.load %arg23[%c5_849, %c1_850, %c0_851] : memref<10x10x16xf32, #tpu.memory_space<vmem>>, vector<1x8x16xf32>
    %546 = vector.shape_cast %545 : vector<1x8x16xf32> to vector<8x16xf32>
    %547 = vector.shape_cast %544 : vector<8x16xf32> to vector<1x8x16xf32>
    tpu.vector_store %arg23[%c5_849, %c1_850, %c0_851], %547 {strides = array<i32>} : memref<10x10x16xf32, #tpu.memory_space<vmem>>, vector<1x8x16xf32>,
    %548 = vector.extract_strided_slice %525 {offsets = [40, 0], sizes = [8, 16], strides = [1, 1]} : vector<64x16xf32> to vector<8x16xf32>
    %c6_852 = arith.constant 6 : index
    %c1_853 = arith.constant 1 : index
    %c0_854 = arith.constant 0 : index
    %549 = vector.load %arg23[%c6_852, %c1_853, %c0_854] : memref<10x10x16xf32, #tpu.memory_space<vmem>>, vector<1x8x16xf32>
    %550 = vector.shape_cast %549 : vector<1x8x16xf32> to vector<8x16xf32>
    %551 = vector.shape_cast %548 : vector<8x16xf32> to vector<1x8x16xf32>
    tpu.vector_store %arg23[%c6_852, %c1_853, %c0_854], %551 {strides = array<i32>} : memref<10x10x16xf32, #tpu.memory_space<vmem>>, vector<1x8x16xf32>,
    %552 = vector.extract_strided_slice %525 {offsets = [48, 0], sizes = [8, 16], strides = [1, 1]} : vector<64x16xf32> to vector<8x16xf32>
    %c7_855 = arith.constant 7 : index
    %c1_856 = arith.constant 1 : index
    %c0_857 = arith.constant 0 : index
    %553 = vector.load %arg23[%c7_855, %c1_856, %c0_857] : memref<10x10x16xf32, #tpu.memory_space<vmem>>, vector<1x8x16xf32>
    %554 = vector.shape_cast %553 : vector<1x8x16xf32> to vector<8x16xf32>
    %555 = vector.shape_cast %552 : vector<8x16xf32> to vector<1x8x16xf32>
    tpu.vector_store %arg23[%c7_855, %c1_856, %c0_857], %555 {strides = array<i32>} : memref<10x10x16xf32, #tpu.memory_space<vmem>>, vector<1x8x16xf32>,
    %556 = vector.extract_strided_slice %525 {offsets = [56, 0], sizes = [8, 16], strides = [1, 1]} : vector<64x16xf32> to vector<8x16xf32>
    %c8_858 = arith.constant 8 : index
    %c1_859 = arith.constant 1 : index
    %c0_860 = arith.constant 0 : index
    %557 = vector.load %arg23[%c8_858, %c1_859, %c0_860] : memref<10x10x16xf32, #tpu.memory_space<vmem>>, vector<1x8x16xf32>
    %558 = vector.shape_cast %557 : vector<1x8x16xf32> to vector<8x16xf32>
    %559 = vector.shape_cast %556 : vector<8x16xf32> to vector<1x8x16xf32>
    tpu.vector_store %arg23[%c8_858, %c1_859, %c0_860], %559 {strides = array<i32>} : memref<10x10x16xf32, #tpu.memory_space<vmem>>, vector<1x8x16xf32>,
    %c0_861 = arith.constant 0 : index
    %c0_862 = arith.constant 0 : index
    %c0_863 = arith.constant 0 : index
    %560 = vector.load %arg23[%c0_861, %c0_862, %c0_863] : memref<10x10x16xf32, #tpu.memory_space<vmem>>, vector<1x8x16xf32>
    %561 = vector.shape_cast %560 : vector<1x8x16xf32> to vector<8x16xf32>
    %c0_864 = arith.constant 0 : index
    %c0_865 = arith.constant 0 : index
    %562 = vector.load %arg24[%c0_864, %c0_865] : memref<64x144xf32, #tpu.memory_space<vmem>>, vector<8x16xf32>
    tpu.vector_store %arg24[%c0_864, %c0_865], %561 {strides = array<i32>} : memref<64x144xf32, #tpu.memory_space<vmem>>, vector<8x16xf32>,
    %c1_866 = arith.constant 1 : index
    %c0_867 = arith.constant 0 : index
    %c0_868 = arith.constant 0 : index
    %563 = vector.load %arg23[%c1_866, %c0_867, %c0_868] : memref<10x10x16xf32, #tpu.memory_space<vmem>>, vector<1x8x16xf32>
    %564 = vector.shape_cast %563 : vector<1x8x16xf32> to vector<8x16xf32>
    %c8_869 = arith.constant 8 : index
    %c0_870 = arith.constant 0 : index
    %565 = vector.load %arg24[%c8_869, %c0_870] : memref<64x144xf32, #tpu.memory_space<vmem>>, vector<8x16xf32>
    tpu.vector_store %arg24[%c8_869, %c0_870], %564 {strides = array<i32>} : memref<64x144xf32, #tpu.memory_space<vmem>>, vector<8x16xf32>,
    %c2_871 = arith.constant 2 : index
    %c0_872 = arith.constant 0 : index
    %c0_873 = arith.constant 0 : index
    %566 = vector.load %arg23[%c2_871, %c0_872, %c0_873] : memref<10x10x16xf32, #tpu.memory_space<vmem>>, vector<1x8x16xf32>
    %567 = vector.shape_cast %566 : vector<1x8x16xf32> to vector<8x16xf32>
    %c16_874 = arith.constant 16 : index
    %c0_875 = arith.constant 0 : index
    %568 = vector.load %arg24[%c16_874, %c0_875] : memref<64x144xf32, #tpu.memory_space<vmem>>, vector<8x16xf32>
    tpu.vector_store %arg24[%c16_874, %c0_875], %567 {strides = array<i32>} : memref<64x144xf32, #tpu.memory_space<vmem>>, vector<8x16xf32>,
    %c3_876 = arith.constant 3 : index
    %c0_877 = arith.constant 0 : index
    %c0_878 = arith.constant 0 : index
    %569 = vector.load %arg23[%c3_876, %c0_877, %c0_878] : memref<10x10x16xf32, #tpu.memory_space<vmem>>, vector<1x8x16xf32>
    %570 = vector.shape_cast %569 : vector<1x8x16xf32> to vector<8x16xf32>
    %c24_879 = arith.constant 24 : index
    %c0_880 = arith.constant 0 : index
    %571 = vector.load %arg24[%c24_879, %c0_880] : memref<64x144xf32, #tpu.memory_space<vmem>>, vector<8x16xf32>
    tpu.vector_store %arg24[%c24_879, %c0_880], %570 {strides = array<i32>} : memref<64x144xf32, #tpu.memory_space<vmem>>, vector<8x16xf32>,
    %c4_881 = arith.constant 4 : index
    %c0_882 = arith.constant 0 : index
    %c0_883 = arith.constant 0 : index
    %572 = vector.load %arg23[%c4_881, %c0_882, %c0_883] : memref<10x10x16xf32, #tpu.memory_space<vmem>>, vector<1x8x16xf32>
    %573 = vector.shape_cast %572 : vector<1x8x16xf32> to vector<8x16xf32>
    %c32_884 = arith.constant 32 : index
    %c0_885 = arith.constant 0 : index
    %574 = vector.load %arg24[%c32_884, %c0_885] : memref<64x144xf32, #tpu.memory_space<vmem>>, vector<8x16xf32>
    tpu.vector_store %arg24[%c32_884, %c0_885], %573 {strides = array<i32>} : memref<64x144xf32, #tpu.memory_space<vmem>>, vector<8x16xf32>,
    %c5_886 = arith.constant 5 : index
    %c0_887 = arith.constant 0 : index
    %c0_888 = arith.constant 0 : index
    %575 = vector.load %arg23[%c5_886, %c0_887, %c0_888] : memref<10x10x16xf32, #tpu.memory_space<vmem>>, vector<1x8x16xf32>
    %576 = vector.shape_cast %575 : vector<1x8x16xf32> to vector<8x16xf32>
    %c40_889 = arith.constant 40 : index
    %c0_890 = arith.constant 0 : index
    %577 = vector.load %arg24[%c40_889, %c0_890] : memref<64x144xf32, #tpu.memory_space<vmem>>, vector<8x16xf32>
    tpu.vector_store %arg24[%c40_889, %c0_890], %576 {strides = array<i32>} : memref<64x144xf32, #tpu.memory_space<vmem>>, vector<8x16xf32>,
    %c6_891 = arith.constant 6 : index
    %c0_892 = arith.constant 0 : index
    %c0_893 = arith.constant 0 : index
    %578 = vector.load %arg23[%c6_891, %c0_892, %c0_893] : memref<10x10x16xf32, #tpu.memory_space<vmem>>, vector<1x8x16xf32>
    %579 = vector.shape_cast %578 : vector<1x8x16xf32> to vector<8x16xf32>
    %c48_894 = arith.constant 48 : index
    %c0_895 = arith.constant 0 : index
    %580 = vector.load %arg24[%c48_894, %c0_895] : memref<64x144xf32, #tpu.memory_space<vmem>>, vector<8x16xf32>
    tpu.vector_store %arg24[%c48_894, %c0_895], %579 {strides = array<i32>} : memref<64x144xf32, #tpu.memory_space<vmem>>, vector<8x16xf32>,
    %c7_896 = arith.constant 7 : index
    %c0_897 = arith.constant 0 : index
    %c0_898 = arith.constant 0 : index
    %581 = vector.load %arg23[%c7_896, %c0_897, %c0_898] : memref<10x10x16xf32, #tpu.memory_space<vmem>>, vector<1x8x16xf32>
    %582 = vector.shape_cast %581 : vector<1x8x16xf32> to vector<8x16xf32>
    %c56_899 = arith.constant 56 : index
    %c0_900 = arith.constant 0 : index
    %583 = vector.load %arg24[%c56_899, %c0_900] : memref<64x144xf32, #tpu.memory_space<vmem>>, vector<8x16xf32>
    tpu.vector_store %arg24[%c56_899, %c0_900], %582 {strides = array<i32>} : memref<64x144xf32, #tpu.memory_space<vmem>>, vector<8x16xf32>,
    %c0_901 = arith.constant 0 : index
    %c1_902 = arith.constant 1 : index
    %c0_903 = arith.constant 0 : index
    %584 = vector.load %arg23[%c0_901, %c1_902, %c0_903] : memref<10x10x16xf32, #tpu.memory_space<vmem>>, vector<1x8x16xf32>
    %585 = vector.shape_cast %584 : vector<1x8x16xf32> to vector<8x16xf32>
    %c0_904 = arith.constant 0 : index
    %c16_905 = arith.constant 16 : index
    %586 = vector.load %arg24[%c0_904, %c16_905] : memref<64x144xf32, #tpu.memory_space<vmem>>, vector<8x16xf32>
    tpu.vector_store %arg24[%c0_904, %c16_905], %585 {strides = array<i32>} : memref<64x144xf32, #tpu.memory_space<vmem>>, vector<8x16xf32>,
    %c1_906 = arith.constant 1 : index
    %c1_907 = arith.constant 1 : index
    %c0_908 = arith.constant 0 : index
    %587 = vector.load %arg23[%c1_906, %c1_907, %c0_908] : memref<10x10x16xf32, #tpu.memory_space<vmem>>, vector<1x8x16xf32>
    %588 = vector.shape_cast %587 : vector<1x8x16xf32> to vector<8x16xf32>
    %c8_909 = arith.constant 8 : index
    %c16_910 = arith.constant 16 : index
    %589 = vector.load %arg24[%c8_909, %c16_910] : memref<64x144xf32, #tpu.memory_space<vmem>>, vector<8x16xf32>
    tpu.vector_store %arg24[%c8_909, %c16_910], %588 {strides = array<i32>} : memref<64x144xf32, #tpu.memory_space<vmem>>, vector<8x16xf32>,
    %c2_911 = arith.constant 2 : index
    %c1_912 = arith.constant 1 : index
    %c0_913 = arith.constant 0 : index
    %590 = vector.load %arg23[%c2_911, %c1_912, %c0_913] : memref<10x10x16xf32, #tpu.memory_space<vmem>>, vector<1x8x16xf32>
    %591 = vector.shape_cast %590 : vector<1x8x16xf32> to vector<8x16xf32>
    %c16_914 = arith.constant 16 : index
    %c16_915 = arith.constant 16 : index
    %592 = vector.load %arg24[%c16_914, %c16_915] : memref<64x144xf32, #tpu.memory_space<vmem>>, vector<8x16xf32>
    tpu.vector_store %arg24[%c16_914, %c16_915], %591 {strides = array<i32>} : memref<64x144xf32, #tpu.memory_space<vmem>>, vector<8x16xf32>,
    %c3_916 = arith.constant 3 : index
    %c1_917 = arith.constant 1 : index
    %c0_918 = arith.constant 0 : index
    %593 = vector.load %arg23[%c3_916, %c1_917, %c0_918] : memref<10x10x16xf32, #tpu.memory_space<vmem>>, vector<1x8x16xf32>
    %594 = vector.shape_cast %593 : vector<1x8x16xf32> to vector<8x16xf32>
    %c24_919 = arith.constant 24 : index
    %c16_920 = arith.constant 16 : index
    %595 = vector.load %arg24[%c24_919, %c16_920] : memref<64x144xf32, #tpu.memory_space<vmem>>, vector<8x16xf32>
    tpu.vector_store %arg24[%c24_919, %c16_920], %594 {strides = array<i32>} : memref<64x144xf32, #tpu.memory_space<vmem>>, vector<8x16xf32>,
    %c4_921 = arith.constant 4 : index
    %c1_922 = arith.constant 1 : index
    %c0_923 = arith.constant 0 : index
    %596 = vector.load %arg23[%c4_921, %c1_922, %c0_923] : memref<10x10x16xf32, #tpu.memory_space<vmem>>, vector<1x8x16xf32>
    %597 = vector.shape_cast %596 : vector<1x8x16xf32> to vector<8x16xf32>
    %c32_924 = arith.constant 32 : index
    %c16_925 = arith.constant 16 : index
    %598 = vector.load %arg24[%c32_924, %c16_925] : memref<64x144xf32, #tpu.memory_space<vmem>>, vector<8x16xf32>
    tpu.vector_store %arg24[%c32_924, %c16_925], %597 {strides = array<i32>} : memref<64x144xf32, #tpu.memory_space<vmem>>, vector<8x16xf32>,
    %c5_926 = arith.constant 5 : index
    %c1_927 = arith.constant 1 : index
    %c0_928 = arith.constant 0 : index
    %599 = vector.load %arg23[%c5_926, %c1_927, %c0_928] : memref<10x10x16xf32, #tpu.memory_space<vmem>>, vector<1x8x16xf32>
    %600 = vector.shape_cast %599 : vector<1x8x16xf32> to vector<8x16xf32>
    %c40_929 = arith.constant 40 : index
    %c16_930 = arith.constant 16 : index
    %601 = vector.load %arg24[%c40_929, %c16_930] : memref<64x144xf32, #tpu.memory_space<vmem>>, vector<8x16xf32>
    tpu.vector_store %arg24[%c40_929, %c16_930], %600 {strides = array<i32>} : memref<64x144xf32, #tpu.memory_space<vmem>>, vector<8x16xf32>,
    %c6_931 = arith.constant 6 : index
    %c1_932 = arith.constant 1 : index
    %c0_933 = arith.constant 0 : index
    %602 = vector.load %arg23[%c6_931, %c1_932, %c0_933] : memref<10x10x16xf32, #tpu.memory_space<vmem>>, vector<1x8x16xf32>
    %603 = vector.shape_cast %602 : vector<1x8x16xf32> to vector<8x16xf32>
    %c48_934 = arith.constant 48 : index
    %c16_935 = arith.constant 16 : index
    %604 = vector.load %arg24[%c48_934, %c16_935] : memref<64x144xf32, #tpu.memory_space<vmem>>, vector<8x16xf32>
    tpu.vector_store %arg24[%c48_934, %c16_935], %603 {strides = array<i32>} : memref<64x144xf32, #tpu.memory_space<vmem>>, vector<8x16xf32>,
    %c7_936 = arith.constant 7 : index
    %c1_937 = arith.constant 1 : index
    %c0_938 = arith.constant 0 : index
    %605 = vector.load %arg23[%c7_936, %c1_937, %c0_938] : memref<10x10x16xf32, #tpu.memory_space<vmem>>, vector<1x8x16xf32>
    %606 = vector.shape_cast %605 : vector<1x8x16xf32> to vector<8x16xf32>
    %c56_939 = arith.constant 56 : index
    %c16_940 = arith.constant 16 : index
    %607 = vector.load %arg24[%c56_939, %c16_940] : memref<64x144xf32, #tpu.memory_space<vmem>>, vector<8x16xf32>
    tpu.vector_store %arg24[%c56_939, %c16_940], %606 {strides = array<i32>} : memref<64x144xf32, #tpu.memory_space<vmem>>, vector<8x16xf32>,
    %c0_941 = arith.constant 0 : index
    %c2_942 = arith.constant 2 : index
    %c0_943 = arith.constant 0 : index
    %608 = vector.load %arg23[%c0_941, %c2_942, %c0_943] : memref<10x10x16xf32, #tpu.memory_space<vmem>>, vector<1x8x16xf32>
    %609 = vector.shape_cast %608 : vector<1x8x16xf32> to vector<8x16xf32>
    %c0_944 = arith.constant 0 : index
    %c32_945 = arith.constant 32 : index
    %610 = vector.load %arg24[%c0_944, %c32_945] : memref<64x144xf32, #tpu.memory_space<vmem>>, vector<8x16xf32>
    tpu.vector_store %arg24[%c0_944, %c32_945], %609 {strides = array<i32>} : memref<64x144xf32, #tpu.memory_space<vmem>>, vector<8x16xf32>,
    %c1_946 = arith.constant 1 : index
    %c2_947 = arith.constant 2 : index
    %c0_948 = arith.constant 0 : index
    %611 = vector.load %arg23[%c1_946, %c2_947, %c0_948] : memref<10x10x16xf32, #tpu.memory_space<vmem>>, vector<1x8x16xf32>
    %612 = vector.shape_cast %611 : vector<1x8x16xf32> to vector<8x16xf32>
    %c8_949 = arith.constant 8 : index
    %c32_950 = arith.constant 32 : index
    %613 = vector.load %arg24[%c8_949, %c32_950] : memref<64x144xf32, #tpu.memory_space<vmem>>, vector<8x16xf32>
    tpu.vector_store %arg24[%c8_949, %c32_950], %612 {strides = array<i32>} : memref<64x144xf32, #tpu.memory_space<vmem>>, vector<8x16xf32>,
    %c2_951 = arith.constant 2 : index
    %c2_952 = arith.constant 2 : index
    %c0_953 = arith.constant 0 : index
    %614 = vector.load %arg23[%c2_951, %c2_952, %c0_953] : memref<10x10x16xf32, #tpu.memory_space<vmem>>, vector<1x8x16xf32>
    %615 = vector.shape_cast %614 : vector<1x8x16xf32> to vector<8x16xf32>
    %c16_954 = arith.constant 16 : index
    %c32_955 = arith.constant 32 : index
    %616 = vector.load %arg24[%c16_954, %c32_955] : memref<64x144xf32, #tpu.memory_space<vmem>>, vector<8x16xf32>
    tpu.vector_store %arg24[%c16_954, %c32_955], %615 {strides = array<i32>} : memref<64x144xf32, #tpu.memory_space<vmem>>, vector<8x16xf32>,
    %c3_956 = arith.constant 3 : index
    %c2_957 = arith.constant 2 : index
    %c0_958 = arith.constant 0 : index
    %617 = vector.load %arg23[%c3_956, %c2_957, %c0_958] : memref<10x10x16xf32, #tpu.memory_space<vmem>>, vector<1x8x16xf32>
    %618 = vector.shape_cast %617 : vector<1x8x16xf32> to vector<8x16xf32>
    %c24_959 = arith.constant 24 : index
    %c32_960 = arith.constant 32 : index
    %619 = vector.load %arg24[%c24_959, %c32_960] : memref<64x144xf32, #tpu.memory_space<vmem>>, vector<8x16xf32>
    tpu.vector_store %arg24[%c24_959, %c32_960], %618 {strides = array<i32>} : memref<64x144xf32, #tpu.memory_space<vmem>>, vector<8x16xf32>,
    %c4_961 = arith.constant 4 : index
    %c2_962 = arith.constant 2 : index
    %c0_963 = arith.constant 0 : index
    %620 = vector.load %arg23[%c4_961, %c2_962, %c0_963] : memref<10x10x16xf32, #tpu.memory_space<vmem>>, vector<1x8x16xf32>
    %621 = vector.shape_cast %620 : vector<1x8x16xf32> to vector<8x16xf32>
    %c32_964 = arith.constant 32 : index
    %c32_965 = arith.constant 32 : index
    %622 = vector.load %arg24[%c32_964, %c32_965] : memref<64x144xf32, #tpu.memory_space<vmem>>, vector<8x16xf32>
    tpu.vector_store %arg24[%c32_964, %c32_965], %621 {strides = array<i32>} : memref<64x144xf32, #tpu.memory_space<vmem>>, vector<8x16xf32>,
    %c5_966 = arith.constant 5 : index
    %c2_967 = arith.constant 2 : index
    %c0_968 = arith.constant 0 : index
    %623 = vector.load %arg23[%c5_966, %c2_967, %c0_968] : memref<10x10x16xf32, #tpu.memory_space<vmem>>, vector<1x8x16xf32>
    %624 = vector.shape_cast %623 : vector<1x8x16xf32> to vector<8x16xf32>
    %c40_969 = arith.constant 40 : index
    %c32_970 = arith.constant 32 : index
    %625 = vector.load %arg24[%c40_969, %c32_970] : memref<64x144xf32, #tpu.memory_space<vmem>>, vector<8x16xf32>
    tpu.vector_store %arg24[%c40_969, %c32_970], %624 {strides = array<i32>} : memref<64x144xf32, #tpu.memory_space<vmem>>, vector<8x16xf32>,
    %c6_971 = arith.constant 6 : index
    %c2_972 = arith.constant 2 : index
    %c0_973 = arith.constant 0 : index
    %626 = vector.load %arg23[%c6_971, %c2_972, %c0_973] : memref<10x10x16xf32, #tpu.memory_space<vmem>>, vector<1x8x16xf32>
    %627 = vector.shape_cast %626 : vector<1x8x16xf32> to vector<8x16xf32>
    %c48_974 = arith.constant 48 : index
    %c32_975 = arith.constant 32 : index
    %628 = vector.load %arg24[%c48_974, %c32_975] : memref<64x144xf32, #tpu.memory_space<vmem>>, vector<8x16xf32>
    tpu.vector_store %arg24[%c48_974, %c32_975], %627 {strides = array<i32>} : memref<64x144xf32, #tpu.memory_space<vmem>>, vector<8x16xf32>,
    %c7_976 = arith.constant 7 : index
    %c2_977 = arith.constant 2 : index
    %c0_978 = arith.constant 0 : index
    %629 = vector.load %arg23[%c7_976, %c2_977, %c0_978] : memref<10x10x16xf32, #tpu.memory_space<vmem>>, vector<1x8x16xf32>
    %630 = vector.shape_cast %629 : vector<1x8x16xf32> to vector<8x16xf32>
    %c56_979 = arith.constant 56 : index
    %c32_980 = arith.constant 32 : index
    %631 = vector.load %arg24[%c56_979, %c32_980] : memref<64x144xf32, #tpu.memory_space<vmem>>, vector<8x16xf32>
    tpu.vector_store %arg24[%c56_979, %c32_980], %630 {strides = array<i32>} : memref<64x144xf32, #tpu.memory_space<vmem>>, vector<8x16xf32>,
    %c1_981 = arith.constant 1 : index
    %c0_982 = arith.constant 0 : index
    %c0_983 = arith.constant 0 : index
    %632 = vector.load %arg23[%c1_981, %c0_982, %c0_983] : memref<10x10x16xf32, #tpu.memory_space<vmem>>, vector<1x8x16xf32>
    %633 = vector.shape_cast %632 : vector<1x8x16xf32> to vector<8x16xf32>
    %c0_984 = arith.constant 0 : index
    %c48_985 = arith.constant 48 : index
    %634 = vector.load %arg24[%c0_984, %c48_985] : memref<64x144xf32, #tpu.memory_space<vmem>>, vector<8x16xf32>
    tpu.vector_store %arg24[%c0_984, %c48_985], %633 {strides = array<i32>} : memref<64x144xf32, #tpu.memory_space<vmem>>, vector<8x16xf32>,
    %c2_986 = arith.constant 2 : index
    %c0_987 = arith.constant 0 : index
    %c0_988 = arith.constant 0 : index
    %635 = vector.load %arg23[%c2_986, %c0_987, %c0_988] : memref<10x10x16xf32, #tpu.memory_space<vmem>>, vector<1x8x16xf32>
    %636 = vector.shape_cast %635 : vector<1x8x16xf32> to vector<8x16xf32>
    %c8_989 = arith.constant 8 : index
    %c48_990 = arith.constant 48 : index
    %637 = vector.load %arg24[%c8_989, %c48_990] : memref<64x144xf32, #tpu.memory_space<vmem>>, vector<8x16xf32>
    tpu.vector_store %arg24[%c8_989, %c48_990], %636 {strides = array<i32>} : memref<64x144xf32, #tpu.memory_space<vmem>>, vector<8x16xf32>,
    %c3_991 = arith.constant 3 : index
    %c0_992 = arith.constant 0 : index
    %c0_993 = arith.constant 0 : index
    %638 = vector.load %arg23[%c3_991, %c0_992, %c0_993] : memref<10x10x16xf32, #tpu.memory_space<vmem>>, vector<1x8x16xf32>
    %639 = vector.shape_cast %638 : vector<1x8x16xf32> to vector<8x16xf32>
    %c16_994 = arith.constant 16 : index
    %c48_995 = arith.constant 48 : index
    %640 = vector.load %arg24[%c16_994, %c48_995] : memref<64x144xf32, #tpu.memory_space<vmem>>, vector<8x16xf32>
    tpu.vector_store %arg24[%c16_994, %c48_995], %639 {strides = array<i32>} : memref<64x144xf32, #tpu.memory_space<vmem>>, vector<8x16xf32>,
    %c4_996 = arith.constant 4 : index
    %c0_997 = arith.constant 0 : index
    %c0_998 = arith.constant 0 : index
    %641 = vector.load %arg23[%c4_996, %c0_997, %c0_998] : memref<10x10x16xf32, #tpu.memory_space<vmem>>, vector<1x8x16xf32>
    %642 = vector.shape_cast %641 : vector<1x8x16xf32> to vector<8x16xf32>
    %c24_999 = arith.constant 24 : index
    %c48_1000 = arith.constant 48 : index
    %643 = vector.load %arg24[%c24_999, %c48_1000] : memref<64x144xf32, #tpu.memory_space<vmem>>, vector<8x16xf32>
    tpu.vector_store %arg24[%c24_999, %c48_1000], %642 {strides = array<i32>} : memref<64x144xf32, #tpu.memory_space<vmem>>, vector<8x16xf32>,
    %c5_1001 = arith.constant 5 : index
    %c0_1002 = arith.constant 0 : index
    %c0_1003 = arith.constant 0 : index
    %644 = vector.load %arg23[%c5_1001, %c0_1002, %c0_1003] : memref<10x10x16xf32, #tpu.memory_space<vmem>>, vector<1x8x16xf32>
    %645 = vector.shape_cast %644 : vector<1x8x16xf32> to vector<8x16xf32>
    %c32_1004 = arith.constant 32 : index
    %c48_1005 = arith.constant 48 : index
    %646 = vector.load %arg24[%c32_1004, %c48_1005] : memref<64x144xf32, #tpu.memory_space<vmem>>, vector<8x16xf32>
    tpu.vector_store %arg24[%c32_1004, %c48_1005], %645 {strides = array<i32>} : memref<64x144xf32, #tpu.memory_space<vmem>>, vector<8x16xf32>,
    %c6_1006 = arith.constant 6 : index
    %c0_1007 = arith.constant 0 : index
    %c0_1008 = arith.constant 0 : index
    %647 = vector.load %arg23[%c6_1006, %c0_1007, %c0_1008] : memref<10x10x16xf32, #tpu.memory_space<vmem>>, vector<1x8x16xf32>
    %648 = vector.shape_cast %647 : vector<1x8x16xf32> to vector<8x16xf32>
    %c40_1009 = arith.constant 40 : index
    %c48_1010 = arith.constant 48 : index
    %649 = vector.load %arg24[%c40_1009, %c48_1010] : memref<64x144xf32, #tpu.memory_space<vmem>>, vector<8x16xf32>
    tpu.vector_store %arg24[%c40_1009, %c48_1010], %648 {strides = array<i32>} : memref<64x144xf32, #tpu.memory_space<vmem>>, vector<8x16xf32>,
    %c7_1011 = arith.constant 7 : index
    %c0_1012 = arith.constant 0 : index
    %c0_1013 = arith.constant 0 : index
    %650 = vector.load %arg23[%c7_1011, %c0_1012, %c0_1013] : memref<10x10x16xf32, #tpu.memory_space<vmem>>, vector<1x8x16xf32>
    %651 = vector.shape_cast %650 : vector<1x8x16xf32> to vector<8x16xf32>
    %c48_1014 = arith.constant 48 : index
    %c48_1015 = arith.constant 48 : index
    %652 = vector.load %arg24[%c48_1014, %c48_1015] : memref<64x144xf32, #tpu.memory_space<vmem>>, vector<8x16xf32>
    tpu.vector_store %arg24[%c48_1014, %c48_1015], %651 {strides = array<i32>} : memref<64x144xf32, #tpu.memory_space<vmem>>, vector<8x16xf32>,
    %c8_1016 = arith.constant 8 : index
    %c0_1017 = arith.constant 0 : index
    %c0_1018 = arith.constant 0 : index
    %653 = vector.load %arg23[%c8_1016, %c0_1017, %c0_1018] : memref<10x10x16xf32, #tpu.memory_space<vmem>>, vector<1x8x16xf32>
    %654 = vector.shape_cast %653 : vector<1x8x16xf32> to vector<8x16xf32>
    %c56_1019 = arith.constant 56 : index
    %c48_1020 = arith.constant 48 : index
    %655 = vector.load %arg24[%c56_1019, %c48_1020] : memref<64x144xf32, #tpu.memory_space<vmem>>, vector<8x16xf32>
    tpu.vector_store %arg24[%c56_1019, %c48_1020], %654 {strides = array<i32>} : memref<64x144xf32, #tpu.memory_space<vmem>>, vector<8x16xf32>,
    %c1_1021 = arith.constant 1 : index
    %c1_1022 = arith.constant 1 : index
    %c0_1023 = arith.constant 0 : index
    %656 = vector.load %arg23[%c1_1021, %c1_1022, %c0_1023] : memref<10x10x16xf32, #tpu.memory_space<vmem>>, vector<1x8x16xf32>
    %657 = vector.shape_cast %656 : vector<1x8x16xf32> to vector<8x16xf32>
    %c0_1024 = arith.constant 0 : index
    %c64_1025 = arith.constant 64 : index
    %658 = vector.load %arg24[%c0_1024, %c64_1025] : memref<64x144xf32, #tpu.memory_space<vmem>>, vector<8x16xf32>
    tpu.vector_store %arg24[%c0_1024, %c64_1025], %657 {strides = array<i32>} : memref<64x144xf32, #tpu.memory_space<vmem>>, vector<8x16xf32>,
    %c2_1026 = arith.constant 2 : index
    %c1_1027 = arith.constant 1 : index
    %c0_1028 = arith.constant 0 : index
    %659 = vector.load %arg23[%c2_1026, %c1_1027, %c0_1028] : memref<10x10x16xf32, #tpu.memory_space<vmem>>, vector<1x8x16xf32>
    %660 = vector.shape_cast %659 : vector<1x8x16xf32> to vector<8x16xf32>
    %c8_1029 = arith.constant 8 : index
    %c64_1030 = arith.constant 64 : index
    %661 = vector.load %arg24[%c8_1029, %c64_1030] : memref<64x144xf32, #tpu.memory_space<vmem>>, vector<8x16xf32>
    tpu.vector_store %arg24[%c8_1029, %c64_1030], %660 {strides = array<i32>} : memref<64x144xf32, #tpu.memory_space<vmem>>, vector<8x16xf32>,
    %c3_1031 = arith.constant 3 : index
    %c1_1032 = arith.constant 1 : index
    %c0_1033 = arith.constant 0 : index
    %662 = vector.load %arg23[%c3_1031, %c1_1032, %c0_1033] : memref<10x10x16xf32, #tpu.memory_space<vmem>>, vector<1x8x16xf32>
    %663 = vector.shape_cast %662 : vector<1x8x16xf32> to vector<8x16xf32>
    %c16_1034 = arith.constant 16 : index
    %c64_1035 = arith.constant 64 : index
    %664 = vector.load %arg24[%c16_1034, %c64_1035] : memref<64x144xf32, #tpu.memory_space<vmem>>, vector<8x16xf32>
    tpu.vector_store %arg24[%c16_1034, %c64_1035], %663 {strides = array<i32>} : memref<64x144xf32, #tpu.memory_space<vmem>>, vector<8x16xf32>,
    %c4_1036 = arith.constant 4 : index
    %c1_1037 = arith.constant 1 : index
    %c0_1038 = arith.constant 0 : index
    %665 = vector.load %arg23[%c4_1036, %c1_1037, %c0_1038] : memref<10x10x16xf32, #tpu.memory_space<vmem>>, vector<1x8x16xf32>
    %666 = vector.shape_cast %665 : vector<1x8x16xf32> to vector<8x16xf32>
    %c24_1039 = arith.constant 24 : index
    %c64_1040 = arith.constant 64 : index
    %667 = vector.load %arg24[%c24_1039, %c64_1040] : memref<64x144xf32, #tpu.memory_space<vmem>>, vector<8x16xf32>
    tpu.vector_store %arg24[%c24_1039, %c64_1040], %666 {strides = array<i32>} : memref<64x144xf32, #tpu.memory_space<vmem>>, vector<8x16xf32>,
    %c5_1041 = arith.constant 5 : index
    %c1_1042 = arith.constant 1 : index
    %c0_1043 = arith.constant 0 : index
    %668 = vector.load %arg23[%c5_1041, %c1_1042, %c0_1043] : memref<10x10x16xf32, #tpu.memory_space<vmem>>, vector<1x8x16xf32>
    %669 = vector.shape_cast %668 : vector<1x8x16xf32> to vector<8x16xf32>
    %c32_1044 = arith.constant 32 : index
    %c64_1045 = arith.constant 64 : index
    %670 = vector.load %arg24[%c32_1044, %c64_1045] : memref<64x144xf32, #tpu.memory_space<vmem>>, vector<8x16xf32>
    tpu.vector_store %arg24[%c32_1044, %c64_1045], %669 {strides = array<i32>} : memref<64x144xf32, #tpu.memory_space<vmem>>, vector<8x16xf32>,
    %c6_1046 = arith.constant 6 : index
    %c1_1047 = arith.constant 1 : index
    %c0_1048 = arith.constant 0 : index
    %671 = vector.load %arg23[%c6_1046, %c1_1047, %c0_1048] : memref<10x10x16xf32, #tpu.memory_space<vmem>>, vector<1x8x16xf32>
    %672 = vector.shape_cast %671 : vector<1x8x16xf32> to vector<8x16xf32>
    %c40_1049 = arith.constant 40 : index
    %c64_1050 = arith.constant 64 : index
    %673 = vector.load %arg24[%c40_1049, %c64_1050] : memref<64x144xf32, #tpu.memory_space<vmem>>, vector<8x16xf32>
    tpu.vector_store %arg24[%c40_1049, %c64_1050], %672 {strides = array<i32>} : memref<64x144xf32, #tpu.memory_space<vmem>>, vector<8x16xf32>,
    %c7_1051 = arith.constant 7 : index
    %c1_1052 = arith.constant 1 : index
    %c0_1053 = arith.constant 0 : index
    %674 = vector.load %arg23[%c7_1051, %c1_1052, %c0_1053] : memref<10x10x16xf32, #tpu.memory_space<vmem>>, vector<1x8x16xf32>
    %675 = vector.shape_cast %674 : vector<1x8x16xf32> to vector<8x16xf32>
    %c48_1054 = arith.constant 48 : index
    %c64_1055 = arith.constant 64 : index
    %676 = vector.load %arg24[%c48_1054, %c64_1055] : memref<64x144xf32, #tpu.memory_space<vmem>>, vector<8x16xf32>
    tpu.vector_store %arg24[%c48_1054, %c64_1055], %675 {strides = array<i32>} : memref<64x144xf32, #tpu.memory_space<vmem>>, vector<8x16xf32>,
    %c8_1056 = arith.constant 8 : index
    %c1_1057 = arith.constant 1 : index
    %c0_1058 = arith.constant 0 : index
    %677 = vector.load %arg23[%c8_1056, %c1_1057, %c0_1058] : memref<10x10x16xf32, #tpu.memory_space<vmem>>, vector<1x8x16xf32>
    %678 = vector.shape_cast %677 : vector<1x8x16xf32> to vector<8x16xf32>
    %c56_1059 = arith.constant 56 : index
    %c64_1060 = arith.constant 64 : index
    %679 = vector.load %arg24[%c56_1059, %c64_1060] : memref<64x144xf32, #tpu.memory_space<vmem>>, vector<8x16xf32>
    tpu.vector_store %arg24[%c56_1059, %c64_1060], %678 {strides = array<i32>} : memref<64x144xf32, #tpu.memory_space<vmem>>, vector<8x16xf32>,
    %c1_1061 = arith.constant 1 : index
    %c2_1062 = arith.constant 2 : index
    %c0_1063 = arith.constant 0 : index
    %680 = vector.load %arg23[%c1_1061, %c2_1062, %c0_1063] : memref<10x10x16xf32, #tpu.memory_space<vmem>>, vector<1x8x16xf32>
    %681 = vector.shape_cast %680 : vector<1x8x16xf32> to vector<8x16xf32>
    %c0_1064 = arith.constant 0 : index
    %c80_1065 = arith.constant 80 : index
    %682 = vector.load %arg24[%c0_1064, %c80_1065] : memref<64x144xf32, #tpu.memory_space<vmem>>, vector<8x16xf32>
    tpu.vector_store %arg24[%c0_1064, %c80_1065], %681 {strides = array<i32>} : memref<64x144xf32, #tpu.memory_space<vmem>>, vector<8x16xf32>,
    %c2_1066 = arith.constant 2 : index
    %c2_1067 = arith.constant 2 : index
    %c0_1068 = arith.constant 0 : index
    %683 = vector.load %arg23[%c2_1066, %c2_1067, %c0_1068] : memref<10x10x16xf32, #tpu.memory_space<vmem>>, vector<1x8x16xf32>
    %684 = vector.shape_cast %683 : vector<1x8x16xf32> to vector<8x16xf32>
    %c8_1069 = arith.constant 8 : index
    %c80_1070 = arith.constant 80 : index
    %685 = vector.load %arg24[%c8_1069, %c80_1070] : memref<64x144xf32, #tpu.memory_space<vmem>>, vector<8x16xf32>
    tpu.vector_store %arg24[%c8_1069, %c80_1070], %684 {strides = array<i32>} : memref<64x144xf32, #tpu.memory_space<vmem>>, vector<8x16xf32>,
    %c3_1071 = arith.constant 3 : index
    %c2_1072 = arith.constant 2 : index
    %c0_1073 = arith.constant 0 : index
    %686 = vector.load %arg23[%c3_1071, %c2_1072, %c0_1073] : memref<10x10x16xf32, #tpu.memory_space<vmem>>, vector<1x8x16xf32>
    %687 = vector.shape_cast %686 : vector<1x8x16xf32> to vector<8x16xf32>
    %c16_1074 = arith.constant 16 : index
    %c80_1075 = arith.constant 80 : index
    %688 = vector.load %arg24[%c16_1074, %c80_1075] : memref<64x144xf32, #tpu.memory_space<vmem>>, vector<8x16xf32>
    tpu.vector_store %arg24[%c16_1074, %c80_1075], %687 {strides = array<i32>} : memref<64x144xf32, #tpu.memory_space<vmem>>, vector<8x16xf32>,
    %c4_1076 = arith.constant 4 : index
    %c2_1077 = arith.constant 2 : index
    %c0_1078 = arith.constant 0 : index
    %689 = vector.load %arg23[%c4_1076, %c2_1077, %c0_1078] : memref<10x10x16xf32, #tpu.memory_space<vmem>>, vector<1x8x16xf32>
    %690 = vector.shape_cast %689 : vector<1x8x16xf32> to vector<8x16xf32>
    %c24_1079 = arith.constant 24 : index
    %c80_1080 = arith.constant 80 : index
    %691 = vector.load %arg24[%c24_1079, %c80_1080] : memref<64x144xf32, #tpu.memory_space<vmem>>, vector<8x16xf32>
    tpu.vector_store %arg24[%c24_1079, %c80_1080], %690 {strides = array<i32>} : memref<64x144xf32, #tpu.memory_space<vmem>>, vector<8x16xf32>,
    %c5_1081 = arith.constant 5 : index
    %c2_1082 = arith.constant 2 : index
    %c0_1083 = arith.constant 0 : index
    %692 = vector.load %arg23[%c5_1081, %c2_1082, %c0_1083] : memref<10x10x16xf32, #tpu.memory_space<vmem>>, vector<1x8x16xf32>
    %693 = vector.shape_cast %692 : vector<1x8x16xf32> to vector<8x16xf32>
    %c32_1084 = arith.constant 32 : index
    %c80_1085 = arith.constant 80 : index
    %694 = vector.load %arg24[%c32_1084, %c80_1085] : memref<64x144xf32, #tpu.memory_space<vmem>>, vector<8x16xf32>
    tpu.vector_store %arg24[%c32_1084, %c80_1085], %693 {strides = array<i32>} : memref<64x144xf32, #tpu.memory_space<vmem>>, vector<8x16xf32>,
    %c6_1086 = arith.constant 6 : index
    %c2_1087 = arith.constant 2 : index
    %c0_1088 = arith.constant 0 : index
    %695 = vector.load %arg23[%c6_1086, %c2_1087, %c0_1088] : memref<10x10x16xf32, #tpu.memory_space<vmem>>, vector<1x8x16xf32>
    %696 = vector.shape_cast %695 : vector<1x8x16xf32> to vector<8x16xf32>
    %c40_1089 = arith.constant 40 : index
    %c80_1090 = arith.constant 80 : index
    %697 = vector.load %arg24[%c40_1089, %c80_1090] : memref<64x144xf32, #tpu.memory_space<vmem>>, vector<8x16xf32>
    tpu.vector_store %arg24[%c40_1089, %c80_1090], %696 {strides = array<i32>} : memref<64x144xf32, #tpu.memory_space<vmem>>, vector<8x16xf32>,
    %c7_1091 = arith.constant 7 : index
    %c2_1092 = arith.constant 2 : index
    %c0_1093 = arith.constant 0 : index
    %698 = vector.load %arg23[%c7_1091, %c2_1092, %c0_1093] : memref<10x10x16xf32, #tpu.memory_space<vmem>>, vector<1x8x16xf32>
    %699 = vector.shape_cast %698 : vector<1x8x16xf32> to vector<8x16xf32>
    %c48_1094 = arith.constant 48 : index
    %c80_1095 = arith.constant 80 : index
    %700 = vector.load %arg24[%c48_1094, %c80_1095] : memref<64x144xf32, #tpu.memory_space<vmem>>, vector<8x16xf32>
    tpu.vector_store %arg24[%c48_1094, %c80_1095], %699 {strides = array<i32>} : memref<64x144xf32, #tpu.memory_space<vmem>>, vector<8x16xf32>,
    %c8_1096 = arith.constant 8 : index
    %c2_1097 = arith.constant 2 : index
    %c0_1098 = arith.constant 0 : index
    %701 = vector.load %arg23[%c8_1096, %c2_1097, %c0_1098] : memref<10x10x16xf32, #tpu.memory_space<vmem>>, vector<1x8x16xf32>
    %702 = vector.shape_cast %701 : vector<1x8x16xf32> to vector<8x16xf32>
    %c56_1099 = arith.constant 56 : index
    %c80_1100 = arith.constant 80 : index
    %703 = vector.load %arg24[%c56_1099, %c80_1100] : memref<64x144xf32, #tpu.memory_space<vmem>>, vector<8x16xf32>
    tpu.vector_store %arg24[%c56_1099, %c80_1100], %702 {strides = array<i32>} : memref<64x144xf32, #tpu.memory_space<vmem>>, vector<8x16xf32>,
    %c2_1101 = arith.constant 2 : index
    %c0_1102 = arith.constant 0 : index
    %c0_1103 = arith.constant 0 : index
    %704 = vector.load %arg23[%c2_1101, %c0_1102, %c0_1103] : memref<10x10x16xf32, #tpu.memory_space<vmem>>, vector<1x8x16xf32>
    %705 = vector.shape_cast %704 : vector<1x8x16xf32> to vector<8x16xf32>
    %c0_1104 = arith.constant 0 : index
    %c96_1105 = arith.constant 96 : index
    %706 = vector.load %arg24[%c0_1104, %c96_1105] : memref<64x144xf32, #tpu.memory_space<vmem>>, vector<8x16xf32>
    tpu.vector_store %arg24[%c0_1104, %c96_1105], %705 {strides = array<i32>} : memref<64x144xf32, #tpu.memory_space<vmem>>, vector<8x16xf32>,
    %c3_1106 = arith.constant 3 : index
    %c0_1107 = arith.constant 0 : index
    %c0_1108 = arith.constant 0 : index
    %707 = vector.load %arg23[%c3_1106, %c0_1107, %c0_1108] : memref<10x10x16xf32, #tpu.memory_space<vmem>>, vector<1x8x16xf32>
    %708 = vector.shape_cast %707 : vector<1x8x16xf32> to vector<8x16xf32>
    %c8_1109 = arith.constant 8 : index
    %c96_1110 = arith.constant 96 : index
    %709 = vector.load %arg24[%c8_1109, %c96_1110] : memref<64x144xf32, #tpu.memory_space<vmem>>, vector<8x16xf32>
    tpu.vector_store %arg24[%c8_1109, %c96_1110], %708 {strides = array<i32>} : memref<64x144xf32, #tpu.memory_space<vmem>>, vector<8x16xf32>,
    %c4_1111 = arith.constant 4 : index
    %c0_1112 = arith.constant 0 : index
    %c0_1113 = arith.constant 0 : index
    %710 = vector.load %arg23[%c4_1111, %c0_1112, %c0_1113] : memref<10x10x16xf32, #tpu.memory_space<vmem>>, vector<1x8x16xf32>
    %711 = vector.shape_cast %710 : vector<1x8x16xf32> to vector<8x16xf32>
    %c16_1114 = arith.constant 16 : index
    %c96_1115 = arith.constant 96 : index
    %712 = vector.load %arg24[%c16_1114, %c96_1115] : memref<64x144xf32, #tpu.memory_space<vmem>>, vector<8x16xf32>
    tpu.vector_store %arg24[%c16_1114, %c96_1115], %711 {strides = array<i32>} : memref<64x144xf32, #tpu.memory_space<vmem>>, vector<8x16xf32>,
    %c5_1116 = arith.constant 5 : index
    %c0_1117 = arith.constant 0 : index
    %c0_1118 = arith.constant 0 : index
    %713 = vector.load %arg23[%c5_1116, %c0_1117, %c0_1118] : memref<10x10x16xf32, #tpu.memory_space<vmem>>, vector<1x8x16xf32>
    %714 = vector.shape_cast %713 : vector<1x8x16xf32> to vector<8x16xf32>
    %c24_1119 = arith.constant 24 : index
    %c96_1120 = arith.constant 96 : index
    %715 = vector.load %arg24[%c24_1119, %c96_1120] : memref<64x144xf32, #tpu.memory_space<vmem>>, vector<8x16xf32>
    tpu.vector_store %arg24[%c24_1119, %c96_1120], %714 {strides = array<i32>} : memref<64x144xf32, #tpu.memory_space<vmem>>, vector<8x16xf32>,
    %c6_1121 = arith.constant 6 : index
    %c0_1122 = arith.constant 0 : index
    %c0_1123 = arith.constant 0 : index
    %716 = vector.load %arg23[%c6_1121, %c0_1122, %c0_1123] : memref<10x10x16xf32, #tpu.memory_space<vmem>>, vector<1x8x16xf32>
    %717 = vector.shape_cast %716 : vector<1x8x16xf32> to vector<8x16xf32>
    %c32_1124 = arith.constant 32 : index
    %c96_1125 = arith.constant 96 : index
    %718 = vector.load %arg24[%c32_1124, %c96_1125] : memref<64x144xf32, #tpu.memory_space<vmem>>, vector<8x16xf32>
    tpu.vector_store %arg24[%c32_1124, %c96_1125], %717 {strides = array<i32>} : memref<64x144xf32, #tpu.memory_space<vmem>>, vector<8x16xf32>,
    %c7_1126 = arith.constant 7 : index
    %c0_1127 = arith.constant 0 : index
    %c0_1128 = arith.constant 0 : index
    %719 = vector.load %arg23[%c7_1126, %c0_1127, %c0_1128] : memref<10x10x16xf32, #tpu.memory_space<vmem>>, vector<1x8x16xf32>
    %720 = vector.shape_cast %719 : vector<1x8x16xf32> to vector<8x16xf32>
    %c40_1129 = arith.constant 40 : index
    %c96_1130 = arith.constant 96 : index
    %721 = vector.load %arg24[%c40_1129, %c96_1130] : memref<64x144xf32, #tpu.memory_space<vmem>>, vector<8x16xf32>
    tpu.vector_store %arg24[%c40_1129, %c96_1130], %720 {strides = array<i32>} : memref<64x144xf32, #tpu.memory_space<vmem>>, vector<8x16xf32>,
    %c8_1131 = arith.constant 8 : index
    %c0_1132 = arith.constant 0 : index
    %c0_1133 = arith.constant 0 : index
    %722 = vector.load %arg23[%c8_1131, %c0_1132, %c0_1133] : memref<10x10x16xf32, #tpu.memory_space<vmem>>, vector<1x8x16xf32>
    %723 = vector.shape_cast %722 : vector<1x8x16xf32> to vector<8x16xf32>
    %c48_1134 = arith.constant 48 : index
    %c96_1135 = arith.constant 96 : index
    %724 = vector.load %arg24[%c48_1134, %c96_1135] : memref<64x144xf32, #tpu.memory_space<vmem>>, vector<8x16xf32>
    tpu.vector_store %arg24[%c48_1134, %c96_1135], %723 {strides = array<i32>} : memref<64x144xf32, #tpu.memory_space<vmem>>, vector<8x16xf32>,
    %c9_1136 = arith.constant 9 : index
    %c0_1137 = arith.constant 0 : index
    %c0_1138 = arith.constant 0 : index
    %725 = vector.load %arg23[%c9_1136, %c0_1137, %c0_1138] : memref<10x10x16xf32, #tpu.memory_space<vmem>>, vector<1x8x16xf32>
    %726 = vector.shape_cast %725 : vector<1x8x16xf32> to vector<8x16xf32>
    %c56_1139 = arith.constant 56 : index
    %c96_1140 = arith.constant 96 : index
    %727 = vector.load %arg24[%c56_1139, %c96_1140] : memref<64x144xf32, #tpu.memory_space<vmem>>, vector<8x16xf32>
    tpu.vector_store %arg24[%c56_1139, %c96_1140], %726 {strides = array<i32>} : memref<64x144xf32, #tpu.memory_space<vmem>>, vector<8x16xf32>,
    %c2_1141 = arith.constant 2 : index
    %c1_1142 = arith.constant 1 : index
    %c0_1143 = arith.constant 0 : index
    %728 = vector.load %arg23[%c2_1141, %c1_1142, %c0_1143] : memref<10x10x16xf32, #tpu.memory_space<vmem>>, vector<1x8x16xf32>
    %729 = vector.shape_cast %728 : vector<1x8x16xf32> to vector<8x16xf32>
    %c0_1144 = arith.constant 0 : index
    %c112_1145 = arith.constant 112 : index
    %730 = vector.load %arg24[%c0_1144, %c112_1145] : memref<64x144xf32, #tpu.memory_space<vmem>>, vector<8x16xf32>
    tpu.vector_store %arg24[%c0_1144, %c112_1145], %729 {strides = array<i32>} : memref<64x144xf32, #tpu.memory_space<vmem>>, vector<8x16xf32>,
    %c3_1146 = arith.constant 3 : index
    %c1_1147 = arith.constant 1 : index
    %c0_1148 = arith.constant 0 : index
    %731 = vector.load %arg23[%c3_1146, %c1_1147, %c0_1148] : memref<10x10x16xf32, #tpu.memory_space<vmem>>, vector<1x8x16xf32>
    %732 = vector.shape_cast %731 : vector<1x8x16xf32> to vector<8x16xf32>
    %c8_1149 = arith.constant 8 : index
    %c112_1150 = arith.constant 112 : index
    %733 = vector.load %arg24[%c8_1149, %c112_1150] : memref<64x144xf32, #tpu.memory_space<vmem>>, vector<8x16xf32>
    tpu.vector_store %arg24[%c8_1149, %c112_1150], %732 {strides = array<i32>} : memref<64x144xf32, #tpu.memory_space<vmem>>, vector<8x16xf32>,
    %c4_1151 = arith.constant 4 : index
    %c1_1152 = arith.constant 1 : index
    %c0_1153 = arith.constant 0 : index
    %734 = vector.load %arg23[%c4_1151, %c1_1152, %c0_1153] : memref<10x10x16xf32, #tpu.memory_space<vmem>>, vector<1x8x16xf32>
    %735 = vector.shape_cast %734 : vector<1x8x16xf32> to vector<8x16xf32>
    %c16_1154 = arith.constant 16 : index
    %c112_1155 = arith.constant 112 : index
    %736 = vector.load %arg24[%c16_1154, %c112_1155] : memref<64x144xf32, #tpu.memory_space<vmem>>, vector<8x16xf32>
    tpu.vector_store %arg24[%c16_1154, %c112_1155], %735 {strides = array<i32>} : memref<64x144xf32, #tpu.memory_space<vmem>>, vector<8x16xf32>,
    %c5_1156 = arith.constant 5 : index
    %c1_1157 = arith.constant 1 : index
    %c0_1158 = arith.constant 0 : index
    %737 = vector.load %arg23[%c5_1156, %c1_1157, %c0_1158] : memref<10x10x16xf32, #tpu.memory_space<vmem>>, vector<1x8x16xf32>
    %738 = vector.shape_cast %737 : vector<1x8x16xf32> to vector<8x16xf32>
    %c24_1159 = arith.constant 24 : index
    %c112_1160 = arith.constant 112 : index
    %739 = vector.load %arg24[%c24_1159, %c112_1160] : memref<64x144xf32, #tpu.memory_space<vmem>>, vector<8x16xf32>
    tpu.vector_store %arg24[%c24_1159, %c112_1160], %738 {strides = array<i32>} : memref<64x144xf32, #tpu.memory_space<vmem>>, vector<8x16xf32>,
    %c6_1161 = arith.constant 6 : index
    %c1_1162 = arith.constant 1 : index
    %c0_1163 = arith.constant 0 : index
    %740 = vector.load %arg23[%c6_1161, %c1_1162, %c0_1163] : memref<10x10x16xf32, #tpu.memory_space<vmem>>, vector<1x8x16xf32>
    %741 = vector.shape_cast %740 : vector<1x8x16xf32> to vector<8x16xf32>
    %c32_1164 = arith.constant 32 : index
    %c112_1165 = arith.constant 112 : index
    %742 = vector.load %arg24[%c32_1164, %c112_1165] : memref<64x144xf32, #tpu.memory_space<vmem>>, vector<8x16xf32>
    tpu.vector_store %arg24[%c32_1164, %c112_1165], %741 {strides = array<i32>} : memref<64x144xf32, #tpu.memory_space<vmem>>, vector<8x16xf32>,
    %c7_1166 = arith.constant 7 : index
    %c1_1167 = arith.constant 1 : index
    %c0_1168 = arith.constant 0 : index
    %743 = vector.load %arg23[%c7_1166, %c1_1167, %c0_1168] : memref<10x10x16xf32, #tpu.memory_space<vmem>>, vector<1x8x16xf32>
    %744 = vector.shape_cast %743 : vector<1x8x16xf32> to vector<8x16xf32>
    %c40_1169 = arith.constant 40 : index
    %c112_1170 = arith.constant 112 : index
    %745 = vector.load %arg24[%c40_1169, %c112_1170] : memref<64x144xf32, #tpu.memory_space<vmem>>, vector<8x16xf32>
    tpu.vector_store %arg24[%c40_1169, %c112_1170], %744 {strides = array<i32>} : memref<64x144xf32, #tpu.memory_space<vmem>>, vector<8x16xf32>,
    %c8_1171 = arith.constant 8 : index
    %c1_1172 = arith.constant 1 : index
    %c0_1173 = arith.constant 0 : index
    %746 = vector.load %arg23[%c8_1171, %c1_1172, %c0_1173] : memref<10x10x16xf32, #tpu.memory_space<vmem>>, vector<1x8x16xf32>
    %747 = vector.shape_cast %746 : vector<1x8x16xf32> to vector<8x16xf32>
    %c48_1174 = arith.constant 48 : index
    %c112_1175 = arith.constant 112 : index
    %748 = vector.load %arg24[%c48_1174, %c112_1175] : memref<64x144xf32, #tpu.memory_space<vmem>>, vector<8x16xf32>
    tpu.vector_store %arg24[%c48_1174, %c112_1175], %747 {strides = array<i32>} : memref<64x144xf32, #tpu.memory_space<vmem>>, vector<8x16xf32>,
    %c9_1176 = arith.constant 9 : index
    %c1_1177 = arith.constant 1 : index
    %c0_1178 = arith.constant 0 : index
    %749 = vector.load %arg23[%c9_1176, %c1_1177, %c0_1178] : memref<10x10x16xf32, #tpu.memory_space<vmem>>, vector<1x8x16xf32>
    %750 = vector.shape_cast %749 : vector<1x8x16xf32> to vector<8x16xf32>
    %c56_1179 = arith.constant 56 : index
    %c112_1180 = arith.constant 112 : index
    %751 = vector.load %arg24[%c56_1179, %c112_1180] : memref<64x144xf32, #tpu.memory_space<vmem>>, vector<8x16xf32>
    tpu.vector_store %arg24[%c56_1179, %c112_1180], %750 {strides = array<i32>} : memref<64x144xf32, #tpu.memory_space<vmem>>, vector<8x16xf32>,
    %c2_1181 = arith.constant 2 : index
    %c2_1182 = arith.constant 2 : index
    %c0_1183 = arith.constant 0 : index
    %752 = vector.load %arg23[%c2_1181, %c2_1182, %c0_1183] : memref<10x10x16xf32, #tpu.memory_space<vmem>>, vector<1x8x16xf32>
    %753 = vector.shape_cast %752 : vector<1x8x16xf32> to vector<8x16xf32>
    %c0_1184 = arith.constant 0 : index
    %c128_1185 = arith.constant 128 : index
    %754 = vector.load %arg24[%c0_1184, %c128_1185] : memref<64x144xf32, #tpu.memory_space<vmem>>, vector<8x16xf32>
    tpu.vector_store %arg24[%c0_1184, %c128_1185], %753 {strides = array<i32>} : memref<64x144xf32, #tpu.memory_space<vmem>>, vector<8x16xf32>,
    %c3_1186 = arith.constant 3 : index
    %c2_1187 = arith.constant 2 : index
    %c0_1188 = arith.constant 0 : index
    %755 = vector.load %arg23[%c3_1186, %c2_1187, %c0_1188] : memref<10x10x16xf32, #tpu.memory_space<vmem>>, vector<1x8x16xf32>
    %756 = vector.shape_cast %755 : vector<1x8x16xf32> to vector<8x16xf32>
    %c8_1189 = arith.constant 8 : index
    %c128_1190 = arith.constant 128 : index
    %757 = vector.load %arg24[%c8_1189, %c128_1190] : memref<64x144xf32, #tpu.memory_space<vmem>>, vector<8x16xf32>
    tpu.vector_store %arg24[%c8_1189, %c128_1190], %756 {strides = array<i32>} : memref<64x144xf32, #tpu.memory_space<vmem>>, vector<8x16xf32>,
    %c4_1191 = arith.constant 4 : index
    %c2_1192 = arith.constant 2 : index
    %c0_1193 = arith.constant 0 : index
    %758 = vector.load %arg23[%c4_1191, %c2_1192, %c0_1193] : memref<10x10x16xf32, #tpu.memory_space<vmem>>, vector<1x8x16xf32>
    %759 = vector.shape_cast %758 : vector<1x8x16xf32> to vector<8x16xf32>
    %c16_1194 = arith.constant 16 : index
    %c128_1195 = arith.constant 128 : index
    %760 = vector.load %arg24[%c16_1194, %c128_1195] : memref<64x144xf32, #tpu.memory_space<vmem>>, vector<8x16xf32>
    tpu.vector_store %arg24[%c16_1194, %c128_1195], %759 {strides = array<i32>} : memref<64x144xf32, #tpu.memory_space<vmem>>, vector<8x16xf32>,
    %c5_1196 = arith.constant 5 : index
    %c2_1197 = arith.constant 2 : index
    %c0_1198 = arith.constant 0 : index
    %761 = vector.load %arg23[%c5_1196, %c2_1197, %c0_1198] : memref<10x10x16xf32, #tpu.memory_space<vmem>>, vector<1x8x16xf32>
    %762 = vector.shape_cast %761 : vector<1x8x16xf32> to vector<8x16xf32>
    %c24_1199 = arith.constant 24 : index
    %c128_1200 = arith.constant 128 : index
    %763 = vector.load %arg24[%c24_1199, %c128_1200] : memref<64x144xf32, #tpu.memory_space<vmem>>, vector<8x16xf32>
    tpu.vector_store %arg24[%c24_1199, %c128_1200], %762 {strides = array<i32>} : memref<64x144xf32, #tpu.memory_space<vmem>>, vector<8x16xf32>,
    %c6_1201 = arith.constant 6 : index
    %c2_1202 = arith.constant 2 : index
    %c0_1203 = arith.constant 0 : index
    %764 = vector.load %arg23[%c6_1201, %c2_1202, %c0_1203] : memref<10x10x16xf32, #tpu.memory_space<vmem>>, vector<1x8x16xf32>
    %765 = vector.shape_cast %764 : vector<1x8x16xf32> to vector<8x16xf32>
    %c32_1204 = arith.constant 32 : index
    %c128_1205 = arith.constant 128 : index
    %766 = vector.load %arg24[%c32_1204, %c128_1205] : memref<64x144xf32, #tpu.memory_space<vmem>>, vector<8x16xf32>
    tpu.vector_store %arg24[%c32_1204, %c128_1205], %765 {strides = array<i32>} : memref<64x144xf32, #tpu.memory_space<vmem>>, vector<8x16xf32>,
    %c7_1206 = arith.constant 7 : index
    %c2_1207 = arith.constant 2 : index
    %c0_1208 = arith.constant 0 : index
    %767 = vector.load %arg23[%c7_1206, %c2_1207, %c0_1208] : memref<10x10x16xf32, #tpu.memory_space<vmem>>, vector<1x8x16xf32>
    %768 = vector.shape_cast %767 : vector<1x8x16xf32> to vector<8x16xf32>
    %c40_1209 = arith.constant 40 : index
    %c128_1210 = arith.constant 128 : index
    %769 = vector.load %arg24[%c40_1209, %c128_1210] : memref<64x144xf32, #tpu.memory_space<vmem>>, vector<8x16xf32>
    tpu.vector_store %arg24[%c40_1209, %c128_1210], %768 {strides = array<i32>} : memref<64x144xf32, #tpu.memory_space<vmem>>, vector<8x16xf32>,
    %c8_1211 = arith.constant 8 : index
    %c2_1212 = arith.constant 2 : index
    %c0_1213 = arith.constant 0 : index
    %770 = vector.load %arg23[%c8_1211, %c2_1212, %c0_1213] : memref<10x10x16xf32, #tpu.memory_space<vmem>>, vector<1x8x16xf32>
    %771 = vector.shape_cast %770 : vector<1x8x16xf32> to vector<8x16xf32>
    %c48_1214 = arith.constant 48 : index
    %c128_1215 = arith.constant 128 : index
    %772 = vector.load %arg24[%c48_1214, %c128_1215] : memref<64x144xf32, #tpu.memory_space<vmem>>, vector<8x16xf32>
    tpu.vector_store %arg24[%c48_1214, %c128_1215], %771 {strides = array<i32>} : memref<64x144xf32, #tpu.memory_space<vmem>>, vector<8x16xf32>,
    %c9_1216 = arith.constant 9 : index
    %c2_1217 = arith.constant 2 : index
    %c0_1218 = arith.constant 0 : index
    %773 = vector.load %arg23[%c9_1216, %c2_1217, %c0_1218] : memref<10x10x16xf32, #tpu.memory_space<vmem>>, vector<1x8x16xf32>
    %774 = vector.shape_cast %773 : vector<1x8x16xf32> to vector<8x16xf32>
    %c56_1219 = arith.constant 56 : index
    %c128_1220 = arith.constant 128 : index
    %775 = vector.load %arg24[%c56_1219, %c128_1220] : memref<64x144xf32, #tpu.memory_space<vmem>>, vector<8x16xf32>
    tpu.vector_store %arg24[%c56_1219, %c128_1220], %774 {strides = array<i32>} : memref<64x144xf32, #tpu.memory_space<vmem>>, vector<8x16xf32>,
    %c0_1221 = arith.constant 0 : index
    %c0_1222 = arith.constant 0 : index
    %776 = vector.load %arg24[%c0_1221, %c0_1222] : memref<64x144xf32, #tpu.memory_space<vmem>>, vector<64x144xf32>
    %777 = arith.truncf %776 : vector<64x144xf32> to vector<64x144xbf16>
    %c0_1223 = arith.constant 0 : index
    %c0_1224 = arith.constant 0 : index
    %778 = vector.load %arg13[%c0_1223, %c0_1224] : memref<144x16xbf16, #tpu.memory_space<vmem>>, vector<144x16xbf16>
    %cst_1225 = arith.constant dense<0.000000e+00> : vector<64x16xf32>
    %779 = tpu.matmul %777, %778, %cst_1225 {dimension_numbers = #tpu.dot_dimension_numbers<[1], [0], [0], [1], [0, 0, 1, 1], [], []>} : vector<64x144xbf16>, vector<144x16xbf16>, vector<64x16xf32> -> vector<64x16xf32>
    %c0_1226 = arith.constant 0 : index
    %c0_1227 = arith.constant 0 : index
    %780 = vector.load %arg14[%c0_1226, %c0_1227] : memref<1x16xf32, #tpu.memory_space<vmem>>, vector<1x16xf32>
    %781 = vector.broadcast %780 : vector<1x16xf32> to vector<64x16xf32>
    %782 = arith.mulf %779, %781 : vector<64x16xf32>
    %c0_1228 = arith.constant 0 : index
    %c0_1229 = arith.constant 0 : index
    %783 = vector.load %arg15[%c0_1228, %c0_1229] : memref<1x16xf32, #tpu.memory_space<vmem>>, vector<1x16xf32>
    %784 = vector.broadcast %783 : vector<1x16xf32> to vector<64x16xf32>
    %785 = arith.addf %782, %784 : vector<64x16xf32>
    %cst_1230 = arith.constant 0.000000e+00 : f32
    %786 = vector.broadcast %cst_1230 : f32 to vector<64x16xf32>
    %787 = arith.subf %786, %785 : vector<64x16xf32>
    %788 = math.exp %787 : vector<64x16xf32>
    %cst_1231 = arith.constant 1.000000e+00 : f32
    %789 = vector.broadcast %cst_1231 : f32 to vector<64x16xf32>
    %790 = arith.addf %789, %788 : vector<64x16xf32>
    %791 = tpu.reciprocal %790 {approx = true} : vector<64x16xf32> -> vector<64x16xf32>
    %792 = arith.mulf %785, %791 : vector<64x16xf32>
    %793 = arith.truncf %792 : vector<64x16xf32> to vector<64x16xbf16>
    %c0_1232 = arith.constant 0 : index
    %c0_1233 = arith.constant 0 : index
    %794 = vector.load %arg16[%c0_1232, %c0_1233] : memref<16x32xbf16, #tpu.memory_space<vmem>>, vector<16x32xbf16>
    %cst_1234 = arith.constant dense<0.000000e+00> : vector<64x32xf32>
    %795 = tpu.matmul %793, %794, %cst_1234 {dimension_numbers = #tpu.dot_dimension_numbers<[1], [0], [0], [1], [0, 0, 1, 1], [], []>} : vector<64x16xbf16>, vector<16x32xbf16>, vector<64x32xf32> -> vector<64x32xf32>
    %c0_1235 = arith.constant 0 : index
    %c0_1236 = arith.constant 0 : index
    %796 = vector.load %arg17[%c0_1235, %c0_1236] : memref<1x32xf32, #tpu.memory_space<vmem>>, vector<1x32xf32>
    %797 = vector.broadcast %796 : vector<1x32xf32> to vector<64x32xf32>
    %798 = arith.addf %795, %797 : vector<64x32xf32>
    %799 = arith.mulf %798, %798 : vector<64x32xf32>
    %cst_1237 = arith.constant dense<0.000000e+00> : vector<64xf32>
    %800 = vector.multi_reduction <add>, %799, %cst_1237 [1] : vector<64x32xf32> to vector<64xf32>
    %801 = vector.shape_cast %800 : vector<64xf32> to vector<64x1xf32>
    %cst_1238 = arith.constant 1.000000e-24 : f32
    %802 = vector.broadcast %cst_1238 : f32 to vector<64x1xf32>
    %803 = arith.maximumf %801, %802 : vector<64x1xf32>
    %804 = math.rsqrt %803 : vector<64x1xf32>
    %805 = vector.broadcast %804 : vector<64x1xf32> to vector<64x32xf32>
    %806 = arith.mulf %798, %805 : vector<64x32xf32>
    %807 = arith.truncf %806 : vector<64x32xf32> to vector<64x32xbf16>
    %c0_1239 = arith.constant 0 : index
    %c0_1240 = arith.constant 0 : index
    %c0_1241 = arith.constant 0 : index
    %808 = vector.load %arg18[%c0_1239, %c0_1240, %c0_1241] : memref<1x8x32xbf16, #tpu.memory_space<vmem>>, vector<1x8x32xbf16>
    %809 = vector.shape_cast %808 : vector<1x8x32xbf16> to vector<8x32xbf16>
    %cst_1242 = arith.constant dense<0.000000e+00> : vector<8x64xf32>
    %810 = tpu.matmul %809, %807, %cst_1242 {dimension_numbers = #tpu.dot_dimension_numbers<[1], [1], [0], [0], [0, 0, 1, 0], [], []>} : vector<8x32xbf16>, vector<64x32xbf16>, vector<8x64xf32> -> vector<8x64xf32>
    %cst_1243 = arith.constant 14.2857141 : f32
    %811 = vector.broadcast %cst_1243 : f32 to vector<8x64xf32>
    %812 = arith.mulf %810, %811 : vector<8x64xf32>
    %cst_1244 = arith.constant -1.000000e+01 : f32
    %813 = vector.broadcast %cst_1244 : f32 to vector<8x64xf32>
    %814 = arith.addf %812, %813 : vector<8x64xf32>
    %c0_1245 = arith.constant 0 : index
    %c64_1246 = arith.constant 64 : index
    %c0_1247 = arith.constant 0 : index
    %815 = vector.load %arg19[%c0_1245, %c64_1246, %c0_1247] : memref<1x72x64xf32, #tpu.memory_space<vmem>>, vector<1x8x64xf32>
    %816 = vector.shape_cast %815 : vector<1x8x64xf32> to vector<8x64xf32>
    %817 = vector.shape_cast %814 : vector<8x64xf32> to vector<1x8x64xf32>
    tpu.vector_store %arg19[%c0_1245, %c64_1246, %c0_1247], %817 {strides = array<i32>} : memref<1x72x64xf32, #tpu.memory_space<vmem>>, vector<1x8x64xf32>,
    return
  }
  func.func @transform_0(%arg0: i32) -> (i32, i32, i32, i32) {
    %c0_i32 = arith.constant 0 : i32
    %c0_i32_0 = arith.constant 0 : i32
    %c0_i32_1 = arith.constant 0 : i32
    %c0_i32_2 = arith.constant 0 : i32
    return %arg0, %c0_i32, %c0_i32_0, %c0_i32_1 : i32, i32, i32, i32
  }
  func.func @transform_1(%arg0: i32) -> (i32, i32) {
    %c0_i32 = arith.constant 0 : i32
    %c0_i32_0 = arith.constant 0 : i32
    %c0_i32_1 = arith.constant 0 : i32
    return %c0_i32, %c0_i32_0 : i32, i32
  }
  func.func @transform_2(%arg0: i32) -> (i32, i32) {
    %c0_i32 = arith.constant 0 : i32
    %c0_i32_0 = arith.constant 0 : i32
    %c0_i32_1 = arith.constant 0 : i32
    return %c0_i32, %c0_i32_0 : i32, i32
  }
  func.func @transform_3(%arg0: i32) -> (i32, i32) {
    %c0_i32 = arith.constant 0 : i32
    %c0_i32_0 = arith.constant 0 : i32
    %c0_i32_1 = arith.constant 0 : i32
    return %c0_i32, %c0_i32_0 : i32, i32
  }
  func.func @transform_4(%arg0: i32) -> (i32, i32) {
    %c0_i32 = arith.constant 0 : i32
    %c0_i32_0 = arith.constant 0 : i32
    %c0_i32_1 = arith.constant 0 : i32
    return %c0_i32, %c0_i32_0 : i32, i32
  }
  func.func @transform_5(%arg0: i32) -> (i32, i32) {
    %c0_i32 = arith.constant 0 : i32
    %c0_i32_0 = arith.constant 0 : i32
    %c0_i32_1 = arith.constant 0 : i32
    return %c0_i32, %c0_i32_0 : i32, i32
  }
  func.func @transform_6(%arg0: i32) -> (i32, i32) {
    %c0_i32 = arith.constant 0 : i32
    %c0_i32_0 = arith.constant 0 : i32
    %c0_i32_1 = arith.constant 0 : i32
    return %c0_i32, %c0_i32_0 : i32, i32
  }
  func.func @transform_7(%arg0: i32) -> (i32, i32) {
    %c0_i32 = arith.constant 0 : i32
    %c0_i32_0 = arith.constant 0 : i32
    %c0_i32_1 = arith.constant 0 : i32
    return %c0_i32, %c0_i32_0 : i32, i32
  }
  func.func @transform_8(%arg0: i32) -> (i32, i32) {
    %c0_i32 = arith.constant 0 : i32
    %c0_i32_0 = arith.constant 0 : i32
    %c0_i32_1 = arith.constant 0 : i32
    return %c0_i32, %c0_i32_0 : i32, i32
  }
  func.func @transform_9(%arg0: i32) -> (i32, i32) {
    %c0_i32 = arith.constant 0 : i32
    %c0_i32_0 = arith.constant 0 : i32
    %c0_i32_1 = arith.constant 0 : i32
    return %c0_i32, %c0_i32_0 : i32, i32
  }
  func.func @transform_10(%arg0: i32) -> (i32, i32) {
    %c0_i32 = arith.constant 0 : i32
    %c0_i32_0 = arith.constant 0 : i32
    %c0_i32_1 = arith.constant 0 : i32
    return %c0_i32, %c0_i32_0 : i32, i32
  }
  func.func @transform_11(%arg0: i32) -> (i32, i32) {
    %c0_i32 = arith.constant 0 : i32
    %c0_i32_0 = arith.constant 0 : i32
    %c0_i32_1 = arith.constant 0 : i32
    return %c0_i32, %c0_i32_0 : i32, i32
  }
  func.func @transform_12(%arg0: i32) -> (i32, i32) {
    %c0_i32 = arith.constant 0 : i32
    %c0_i32_0 = arith.constant 0 : i32
    %c0_i32_1 = arith.constant 0 : i32
    return %c0_i32, %c0_i32_0 : i32, i32
  }
  func.func @transform_13(%arg0: i32) -> (i32, i32) {
    %c0_i32 = arith.constant 0 : i32
    %c0_i32_0 = arith.constant 0 : i32
    %c0_i32_1 = arith.constant 0 : i32
    return %c0_i32, %c0_i32_0 : i32, i32
  }
  func.func @transform_14(%arg0: i32) -> (i32, i32) {
    %c0_i32 = arith.constant 0 : i32
    %c0_i32_0 = arith.constant 0 : i32
    %c0_i32_1 = arith.constant 0 : i32
    return %c0_i32, %c0_i32_0 : i32, i32
  }
  func.func @transform_15(%arg0: i32) -> (i32, i32) {
    %c0_i32 = arith.constant 0 : i32
    %c0_i32_0 = arith.constant 0 : i32
    %c0_i32_1 = arith.constant 0 : i32
    return %c0_i32, %c0_i32_0 : i32, i32
  }
  func.func @transform_16(%arg0: i32) -> (i32, i32) {
    %c0_i32 = arith.constant 0 : i32
    %c0_i32_0 = arith.constant 0 : i32
    %c0_i32_1 = arith.constant 0 : i32
    return %c0_i32, %c0_i32_0 : i32, i32
  }
  func.func @transform_17(%arg0: i32) -> (i32, i32, i32) {
    %c0_i32 = arith.constant 0 : i32
    %c0_i32_0 = arith.constant 0 : i32
    %c0_i32_1 = arith.constant 0 : i32
    return %arg0, %c0_i32, %c0_i32_0 : i32, i32, i32
  }
  func.func @transform_18(%arg0: i32) -> (i32, i32, i32) {
    %c0_i32 = arith.constant 0 : i32
    %c0_i32_0 = arith.constant 0 : i32
    %c0_i32_1 = arith.constant 0 : i32
    return %arg0, %c0_i32, %c0_i32_0 : i32, i32, i32
  }
}

</mosaic_0001>

<bundles_post_ra>
// kernel: tpu_custom_call.1
= control target key start
LH: loop header
LB: loop body
LE: loop exit
PB: predicated region body
PF: predicated region fallthrough
CT: control target
= control target key end

     0   :  { %s4235_s27 = smov 0   ;;  %s5536_s0 = inlined_call_operand.vmem [shape: f32[2,10,10,16], index: 0, kind: input, shape index: {}]   ;;  %s5537_s1 = inlined_call_operand.vmem [shape: bf16[144,64], index: 1, kind: input, shape index: {}]   ;;  %s5538_s2 = inlined_call_operand.vmem [shape: f32[1,64], index: 2, kind: input, shape index: {}]   ;;  %s5539_s3 = inlined_call_operand.vmem [shape: f32[1,64], index: 3, kind: input, shape index: {}]   ;;  %s5540_s4 = inlined_call_operand.vmem [shape: bf16[576,64], index: 4, kind: input, shape index: {}]   ;;  %s5541_s5 = inlined_call_operand.vmem [shape: f32[1,64], index: 5, kind: input, shape index: {}]   ;;  %s5542_s6 = inlined_call_operand.vmem [shape: f32[1,64], index: 6, kind: input, shape index: {}]   ;;  %s5543_s7 = inlined_call_operand.vmem [shape: bf16[64,64], index: 7, kind: input, shape index: {}]   ;;  %s5544_s8 = inlined_call_operand.vmem [shape: f32[64,1], index: 8, kind: input, shape index: {}]   ;;  %s5545_s9 = inlined_call_operand.vmem [shape: bf16[144,16], index: 9, kind: input, shape index: {}]   ;;  %s5546_s10 = inlined_call_operand.vmem [shape: f32[1,16], index: 10, kind: input, shape index: {}]   ;;  %s5547_s11 = inlined_call_operand.vmem [shape: f32[1,16], index: 11, kind: input, shape index: {}]   ;;  %s5548_s12 = inlined_call_operand.vmem [shape: bf16[144,16], index: 12, kind: input, shape index: {}]   ;;  %s5549_s13 = inlined_call_operand.vmem [shape: f32[1,16], index: 13, kind: input, shape index: {}]   ;;  %s5550_s14 = inlined_call_operand.vmem [shape: f32[1,16], index: 14, kind: input, shape index: {}]   ;;  %s5551_s15 = inlined_call_operand.vmem [shape: bf16[16,32], index: 15, kind: input, shape index: {}]   ;;  %s5552_s16 = inlined_call_operand.vmem [shape: f32[1,32], index: 16, kind: input, shape index: {}]   ;;  %s5553_s17 = inlined_call_operand.vmem [shape: bf16[2,8,32], index: 17, kind: input, shape index: {}]   ;;  %s5554_s18 = inlined_call_operand.vmem [shape: f32[2,72,64], index: 18, kind: output, shape index: {}]  }
   0x1   :  { %5564 = sst [smem:[#allocation7_spill]] %s5536_s0 }
   0x2   :  { %5565 = sst [smem:[#allocation8_spill]] %s5537_s1 }
   0x3   :  { %5566 = sst [smem:[#allocation9_spill]] %s5538_s2 }
   0x4 LB: > { %s3543_s28 = sadd.s32 4294967295, %s4128_s27   ;;  %p3547_p0 = scmp.ge.s32.totalorder %s4128_s27, 1  ;;  %s4128_s27 = sphi %s4235_s27, %s28_s27  }
   0x5   : > { %p521_p1 = scmp.lt.s32.totalorder %s4128_s27, 3 }
   0x7   : > { %p522_p2 = pnand %p3547_p0, %p521_p1 }
   0x8   : > { %p579_p3 = scmp.lt.s32.totalorder (!%p522_p2), %s3543_s28, 1  ;;  %s5567_s0 = sld [smem:[#allocation8_spill]] (!%p522_p2) }
   0x9   : > { %525 = sbr.rel (%p522_p2) target bundleno = 1830 (0x726), region = 92  ;;  %s5568_s24 = sld [smem:[#allocation7_spill]] (!%p522_p2) }
   0xa   : > { %s4131_s26 = smov (!%p522_p2), 32   ;;  %s4132_s29 = smov (!%p522_p2), 16  }
   0xb   : > { %s5560_s1 = smov (!%p522_p2), 48   ;;  %s4134_s23 = smov (!%p522_p2), 64  }
   0xc   : > { %s5558_s19 = smov (!%p522_p2), 80   ;;  %s5562_s22 = smov (!%p522_p2), 96  }
   0xd   : > { %s5556_s30 = smov (!%p522_p2), 112   ;;  %s5569_s21 = sld [smem:[#allocation9_spill]] (!%p522_p2) }
   0xe   : > { %v3910_v0 = vld [vmem:[%s5567_s0 + $0x38] sm:$0xff]   ;;  %v4130_v1 = vmov 0   ;;  %s5575_s28 = smov (!%p579_p3, %s3543_s28), 1  ;;  %v3911_v2 = vld [vmem:[%s5567_s0 + $0x30] sm:$0xff]   ;;  %v3912_v3 = vld [vmem:[%s5567_s0 + $0x28] sm:$0xff]   ;;  %vm595_vm0 = vcmask 130048  }
   0xf   : > { %1087 = vmatprep.subr.bf16.mxu0 %v4130_v1  ;;  %3908 = vset.pattern.permute.xlu1 %v4130_v1  ;;  %s3888_s20 = smul.u32 160, %s5575_s28  ;;  %v3913_v13 = vld [vmem:[%s5567_s0 + $0x20] sm:$0xff]   ;;  %v3914_v25 = vld [vmem:[%s5567_s0 + $0x18] sm:$0xff]   ;;  %v3915_v26 = vld [vmem:[%s5567_s0 + $0x10] sm:$0xff]   ;;  %vm623_vm1 = vcmask 261248   ;;  %vm672_vm2 = vcmask 392448  }
  0x10   : > { %1088 = vmatpush1.bf16.msra.mxu0 %v3910_v0  ;;  %3909 = vset.pattern.permute.xlu0 %v4130_v1  ;;  %v3916_v27 = vld [vmem:[%s5567_s0 + $0x8] sm:$0xff]   ;;  %v3917_v28 = vld [vmem:[%s5567_s0] sm:$0xff]   ;;  %vm721_vm3 = vcmask 523648   ;;  %vm771_vm4 = vcmask 654848   ;;  %vm820_vm5 = vcmask 786048   ;;  %vm869_vm6 = vcmask 917248  }
  0x11   : > { %1089 = vmatprep.subr.bf16.mxu0 %v4130_v1  ;;  %s4262_s25 = scalar_lea.vmem %s5568_s24, %s3888_s20  ;;  %v3918_v33 = vld [vmem:[%s5567_s0 + $0x40] sm:$0xff]   ;;  %vm919_vm7 = vcmask 1048448   ;;  %vm1230_vm8 = vcmask 523264   ;;  %vm1232_vm9 = vcmask 517120   ;;  %vm1289_vm10 = vcmask 1048064   ;;  %s5571_s20 = smov 48  }
  0x12   : > { %v667_v4 = vld [vmem:[%s4262_s25 + $0x2] sm:$0xff]  ;;  %v3565_v6 = vld [vmem:[%s4262_s25 + $0x12] sm:$0xff]  ;;  %vm2604_vm11 = vcmask 123904   ;;  %s5573_s2 = smov 112   ;;  %vm3364_vm12 = vcmask 261120   ;;  %vm4139_vm13 = vmmov 0  }
  0x13   : > { %v618_v5 = vld [vmem:[%s4262_s25 + $0x1] sm:$0xff]  ;;  %669 = vrot.lane.b32.xlu1 %v667_v4, %s4131_s26  ;;  %v3558_v8 = vld [vmem:[%s4262_s25 + $0x11] sm:$0xff] }
  0x14   : > { %1090 = vmatpush1.bf16.msra.mxu0 %v3911_v2  ;;  %620 = vrot.lane.b32.xlu0 %v618_v5, %s4132_s29  ;;  %v4271_v7 = vld [vmem:[%s4262_s25 + $0x20] sm:$0xff]  ;;  %v3572_v9 = vld [vmem:[%s4262_s25 + $0x10] sm:$0xff] }
  0x15   : > { %1091 = vmatprep.subr.bf16.mxu0 %v4130_v1  ;;  %v4276_v10 = vld [vmem:[%s4262_s25 + $0x22] sm:$0xff]  ;;  %602 = vst.msk [vmem:[#allocation2 + $0x20] sm:$0xff] %vm595_vm0, %v4271_v7  ;;  %v4281_v11 = vld [vmem:[%s4262_s25 + $0x30] sm:$0xff]  ;;  %599 = vst.msk [vmem:[#allocation2 + $0x10] sm:$0xff] %vm595_vm0, %v3572_v9 }
  0x16   : > { %v4284_v12 = vld [vmem:[%s4262_s25 + $0x32] sm:$0xff]  ;;  %964 = vst.msk [vmem:[#allocation2 + $0x8] sm:$0xff] %vm595_vm0, %v4276_v10  ;;  %v4293_v14 = vld [vmem:[%s4262_s25 + $0x40] sm:$0xff]  ;;  %605 = vst.msk [vmem:[#allocation2 + $0x30] sm:$0xff] %vm595_vm0, %v4281_v11 }
  0x17   : > { %v4296_v15 = vld [vmem:[%s4262_s25 + $0x42] sm:$0xff]  ;;  %966 = vst.msk [vmem:[#allocation2 + $0x18] sm:$0xff] %vm595_vm0, %v4284_v12  ;;  %676 = vrot.lane.b32.xlu1 %v3565_v6, %s4131_s26  ;;  %v4306_v16 = vld [vmem:[%s4262_s25 + $0x50] sm:$0xff]  ;;  %608 = vst.msk [vmem:[#allocation2 + $0x40] sm:$0xff] %vm595_vm0, %v4293_v14 }
  0x18   : > { %1092 = vmatpush1.bf16.msra.mxu0 %v3912_v3  ;;  %627 = vrot.lane.b32.xlu0 %v3558_v8, %s4132_s29  ;;  %968 = vst.msk [vmem:[#allocation2 + $0x28] sm:$0xff] %vm595_vm0, %v4296_v15  ;;  %v4313_v17 = vld [vmem:[%s4262_s25 + $0x52] sm:$0xff]  ;;  %v4316_v18 = vld [vmem:[%s4262_s25 + $0x60] sm:$0xff]  ;;  %611 = vst.msk [vmem:[#allocation2 + $0x50] sm:$0xff] %vm595_vm0, %v4306_v16 }
  0x19   : > { %1093 = vmatprep.subr.bf16.mxu0 %v4130_v1  ;;  %v4321_v19 = vld [vmem:[%s4262_s25 + $0x62] sm:$0xff]  ;;  %v4324_v20 = vld [vmem:[%s4262_s25 + $0x70] sm:$0xff]  ;;  %970 = vst.msk [vmem:[#allocation2 + $0x38] sm:$0xff] %vm595_vm0, %v4313_v17  ;;  %614 = vst.msk [vmem:[#allocation2 + $0x60] sm:$0xff] %vm595_vm0, %v4316_v18 }
  0x1a   : > { %v4331_v21 = vld [vmem:[%s4262_s25 + $0x72] sm:$0xff]  ;;  %617 = vst.msk [vmem:[#allocation2 + $0x70] sm:$0xff] %vm595_vm0, %v4324_v20  ;;  %972 = vst.msk [vmem:[#allocation2 + $0x48] sm:$0xff] %vm595_vm0, %v4321_v19  ;;  %v4342_v22 = vld [vmem:[%s4262_s25 + $0x82] sm:$0xff] }
  0x1b   : > { %725 = vrot.lane.b32.xlu1 %v4271_v7, %s5560_s1  ;;  %974 = vst.msk [vmem:[#allocation2 + $0x58] sm:$0xff] %vm595_vm0, %v4331_v21  ;;  %v3581_v23 = vld [vmem:[%s4262_s25 + $0x21] sm:$0xff]  ;;  %976 = vst.msk [vmem:[#allocation2 + $0x68] sm:$0xff] %vm595_vm0, %v4342_v22  ;;  %v3605_v32 = vld [vmem:[%s4262_s25 + $0x31] sm:$0xff] }
  0x1c   : > { %1094 = vmatpush1.bf16.msra.mxu0 %v3913_v13  ;;  %718 = vrot.lane.b32.xlu0 %v3572_v9, %s5560_s1  ;;  %v594_v24 = vld [vmem:[%s4262_s25] sm:$0xff]  ;;  %v3607_v35 = vld [vmem:[%s4262_s25 + $0x51] sm:$0xff] }
  0x1d   : > { %1095 = vmatprep.subr.bf16.mxu0 %v4130_v1  ;;  %596 = vst.msk [vmem:[#allocation2] sm:$0xff] %vm595_vm0, %v594_v24  ;;  %v980_v29 = vld [vmem:[#allocation2 + $0x8] sm:$0xff]  ;;  %v3609_v37 = vld [vmem:[%s4262_s25 + $0x71] sm:$0xff]  ;;  %v3579_v38 = vld [vmem:[%s4262_s25 + $0x80] sm:$0xff] }
  0x1e   : > { %v982_v30 = vld [vmem:[#allocation2 + $0x18] sm:$0xff]  ;;  %v3583_v34 = vld [vmem:[%s4262_s25 + $0x41] sm:$0xff]  ;;  %v3603_v41 = vld [vmem:[%s4262_s25 + $0x90] sm:$0xff] }
  0x1f   : > { %775 = vrot.lane.b32.xlu1 %v3581_v23, %s4134_s23  ;;  %v4370_v31 = vpack.c.bf16 %v982_v30, %v980_v29  ;;  %v3585_v36 = vld [vmem:[%s4262_s25 + $0x61] sm:$0xff]  ;;  %v3619_v40 = vld [vmem:[%s4262_s25 + $0x92] sm:$0xff] }
  0x20   : > { %1096 = vmatpush1.bf16.msra.mxu0 %v3914_v25  ;;  %768 = vrot.lane.b32.xlu0 %v3558_v8, %s4134_s23  ;;  %v3587_v39 = vld [vmem:[%s4262_s25 + $0x81] sm:$0xff]  ;;  %978 = vst.msk [vmem:[#allocation2 + $0x78] sm:$0xff] %vm595_vm0, %v3619_v40  ;;  %v3611_v42 = vld [vmem:[%s4262_s25 + $0x91] sm:$0xff] }
  0x21   : > { %1097 = vmatprep.subr.bf16.mxu0 %v4130_v1  ;;  %3629 = vmatprep.mubr.msk.bf16.mxu0 %vm595_vm0, %v4370_v31  ;;  %v984_v59 = vld [vmem:[#allocation2 + $0x28] sm:$0xff]  ;;  %v986_v60 = vld [vmem:[#allocation2 + $0x38] sm:$0xff] }
  0x22   : > { %v4475_v2 = vpack.c.bf16 %v986_v60, %v984_v59  ;;  %v3919_v59 = vld [vmem:[%s5540_s4 + $0x118] sm:$0xff]   ;;  %v3920_v60 = vld [vmem:[%s5540_s4 + $0x110] sm:$0xff]  }
  0x23   : > { %824 = vrot.lane.b32.xlu1 %v4276_v10, %s5558_s19 }
  0x24   : > { %1098 = vmatpush1.bf16.msra.mxu0 %v3915_v26  ;;  %817 = vrot.lane.b32.xlu0 %v3565_v6, %s5558_s19 }
  0x25   : > { %1099 = vmatprep.subr.bf16.mxu0 %v4130_v1 }
  0x27   : > { %873 = vrot.lane.b32.xlu1 %v4281_v11, %s5562_s22 }
  0x28   : > { %1100 = vmatpush1.bf16.msra.mxu0 %v3916_v27  ;;  %866 = vrot.lane.b32.xlu0 %v4271_v7, %s5562_s22 }
  0x29   : > { %1101 = vmatprep.subr.bf16.mxu0 %v4130_v1 }
  0x2b   : > { %923 = vrot.lane.b32.xlu1 %v3605_v32, %s5556_s30 }
  0x2c   : > { %1102 = vmatpush1.bf16.msra.mxu0 %v3917_v28  ;;  %916 = vrot.lane.b32.xlu0 %v3581_v23, %s5556_s30 }
  0x2d   : > { %1117 = vmatprep.subr.bf16.mxu0 %v4130_v1 }
  0x2f   : > { %639 = vrot.lane.b32.xlu1 %v3605_v32, %s4132_s29 }
  0x30   : > { %1118 = vmatpush2.bf16.msra.mxu0 %v3918_v33  ;;  %633 = vrot.lane.b32.xlu0 %v3581_v23, %s4132_s29 }
  0x31   : > { %3830 = vmatprep.subr.bf16.mxu0 %v3919_v59 }
  0x33   : > { %688 = vrot.lane.b32.xlu1 %v4284_v12, %s4131_s26 }
  0x34   : > { %682 = vrot.lane.b32.xlu0 %v4276_v10, %s4131_s26 }
  0x37   : > { %737 = vrot.lane.b32.xlu1 %v4293_v14, %s5560_s1 }
  0x38   : > { %731 = vrot.lane.b32.xlu0 %v4281_v11, %s5560_s1 }
  0x3b   : > { %787 = vrot.lane.b32.xlu1 %v3583_v34, %s4134_s23 }
  0x3c   : > { %781 = vrot.lane.b32.xlu0 %v3605_v32, %s4134_s23 }
  0x3f   : > { %836 = vrot.lane.b32.xlu1 %v4296_v15, %s5558_s19 }
  0x40   : > { %830 = vrot.lane.b32.xlu0 %v4284_v12, %s5558_s19 }
  0x43   : > { %885 = vrot.lane.b32.xlu1 %v4306_v16, %s5562_s22 }
  0x44   : > { %879 = vrot.lane.b32.xlu0 %v4293_v14, %s5562_s22 }
  0x47   : > { %935 = vrot.lane.b32.xlu1 %v3607_v35, %s5556_s30 }
  0x48   : > { %929 = vrot.lane.b32.xlu0 %v3583_v34, %s5556_s30 }
  0x4b   : > { %651 = vrot.lane.b32.xlu1 %v3607_v35, %s4132_s29 }
  0x4c   : > { %645 = vrot.lane.b32.xlu0 %v3583_v34, %s4132_s29 }
  0x4f   : > { %700 = vrot.lane.b32.xlu1 %v4313_v17, %s4131_s26 }
  0x50   : > { %694 = vrot.lane.b32.xlu0 %v4296_v15, %s4131_s26 }
  0x53   : > { %749 = vrot.lane.b32.xlu1 %v4316_v18, %s5560_s1 }
  0x54   : > { %743 = vrot.lane.b32.xlu0 %v4306_v16, %s5560_s1  ;;  %v988_v16 = vld [vmem:[#allocation2 + $0x48] sm:$0xff] }
  0x57   : > { %799 = vrot.lane.b32.xlu1 %v3585_v36, %s4134_s23 }
  0x58   : > { %793 = vrot.lane.b32.xlu0 %v3607_v35, %s4134_s23 }
  0x5b   : > { %848 = vrot.lane.b32.xlu1 %v4321_v19, %s5558_s19 }
  0x5c   : > { %842 = vrot.lane.b32.xlu0 %v4313_v17, %s5558_s19  ;;  %v990_v17 = vld [vmem:[#allocation2 + $0x58] sm:$0xff] }
  0x5f   : > { %897 = vrot.lane.b32.xlu1 %v4324_v20, %s5562_s22 }
  0x60   : > { %891 = vrot.lane.b32.xlu0 %v4316_v18, %s5562_s22 }
  0x63   : > { %947 = vrot.lane.b32.xlu1 %v3609_v37, %s5556_s30 }
  0x64   : > { %941 = vrot.lane.b32.xlu0 %v3585_v36, %s5556_s30 }
  0x67   : > { %663 = vrot.lane.b32.xlu1 %v3609_v37, %s4132_s29 }
  0x68   : > { %657 = vrot.lane.b32.xlu0 %v3585_v36, %s4132_s29 }
  0x6b   : > { %712 = vrot.lane.b32.xlu1 %v4331_v21, %s4131_s26 }
  0x6c   : > { %706 = vrot.lane.b32.xlu0 %v4321_v19, %s4131_s26 }
  0x6f   : > { %762 = vrot.lane.b32.xlu1 %v3579_v38, %s5560_s1 }
  0x70   : > { %755 = vrot.lane.b32.xlu0 %v4324_v20, %s5560_s1 }
  0x73   : > { %811 = vrot.lane.b32.xlu1 %v3587_v39, %s4134_s23 }
  0x74   : > { %805 = vrot.lane.b32.xlu0 %v3609_v37, %s4134_s23  ;;  %v992_v37 = vld [vmem:[#allocation2 + $0x68] sm:$0xff] }
  0x77   : > { %860 = vrot.lane.b32.xlu1 %v4342_v22, %s5558_s19  ;;  %v4496_v22 = vpack.c.bf16 %v990_v17, %v988_v16  ;;  %v3931_v17 = vld [vmem:[%s5540_s4 + $0x78] sm:$0xff]  }
  0x78   : > { %854 = vrot.lane.b32.xlu0 %v4331_v21, %s5558_s19  ;;  %3724 = vmatprep.subr.bf16.mxu1 %v3931_v17  ;;  %s5570_s19 = smov 96  }
  0x7b   : > { %910 = vrot.lane.b32.xlu1 %v3603_v41, %s5562_s22 }
  0x7c   : > { %903 = vrot.lane.b32.xlu0 %v3579_v38, %s5562_s22  ;;  %v994_v38 = vld [vmem:[#allocation2 + $0x78] sm:$0xff] }
  0x7f   : > { %959 = vrot.lane.b32.xlu1 %v3611_v42, %s5556_s30 }
  0x80   : > { %953 = vrot.lane.b32.xlu0 %v3587_v39, %s5556_s30 }
  0x85   : > { %v670_v43 = vpop.permute.xlu1 %669 }
  0x86   : > { %v621_v44 = vpop.permute.xlu0 %620 }
  0x87   : > { %624 = vst.msk [vmem:[#allocation2] sm:$0xff] %vm623_vm1, %v621_v44 }
  0x88   : > { %673 = vst.msk [vmem:[#allocation2] sm:$0xff] %vm672_vm2, %v670_v43  ;;  %v4517_v43 = vpack.c.bf16 %v994_v38, %v992_v37  ;;  %v3939_v38 = vld [vmem:[%s5540_s4 + $0x20] sm:$0xff]  }
  0x89   : > { %v677_v45 = vpop.permute.xlu1 %676 }
  0x8a   : > { %v628_v46 = vpop.permute.xlu0 %627 }
  0x8b   : > { %630 = vst.msk [vmem:[#allocation2 + $0x10] sm:$0xff] %vm623_vm1, %v628_v46 }
  0x8c   : > { %679 = vst.msk [vmem:[#allocation2 + $0x10] sm:$0xff] %vm672_vm2, %v677_v45 }
  0x8d   : > { %v726_v47 = vpop.permute.xlu1 %725 }
  0x8e   : > { %v719_v48 = vpop.permute.xlu0 %718  ;;  %728 = vst.msk [vmem:[#allocation2 + $0x10] sm:$0xff] %vm721_vm3, %v726_v47 }
  0x8f   : > { %722 = vst.msk [vmem:[#allocation2] sm:$0xff] %vm721_vm3, %v719_v48 }
  0x91   : > { %v776_v49 = vpop.permute.xlu1 %775 }
  0x92   : > { %v769_v50 = vpop.permute.xlu0 %768  ;;  %778 = vst.msk [vmem:[#allocation2 + $0x10] sm:$0xff] %vm771_vm4, %v776_v49 }
  0x93   : > { %772 = vst.msk [vmem:[#allocation2] sm:$0xff] %vm771_vm4, %v769_v50 }
  0x95   : > { %v825_v51 = vpop.permute.xlu1 %824 }
  0x96   : > { %v818_v52 = vpop.permute.xlu0 %817  ;;  %827 = vst.msk [vmem:[#allocation2 + $0x10] sm:$0xff] %vm820_vm5, %v825_v51 }
  0x97   : > { %821 = vst.msk [vmem:[#allocation2] sm:$0xff] %vm820_vm5, %v818_v52 }
  0x99   : > { %v874_v53 = vpop.permute.xlu1 %873 }
  0x9a   : > { %v867_v54 = vpop.permute.xlu0 %866  ;;  %876 = vst.msk [vmem:[#allocation2 + $0x10] sm:$0xff] %vm869_vm6, %v874_v53 }
  0x9b   : > { %870 = vst.msk [vmem:[#allocation2] sm:$0xff] %vm869_vm6, %v867_v54 }
  0x9d   : > { %v924_v55 = vpop.permute.xlu1 %923 }
  0x9e   : > { %v917_v56 = vpop.permute.xlu0 %916  ;;  %926 = vst.msk [vmem:[#allocation2 + $0x10] sm:$0xff] %vm919_vm7, %v924_v55 }
  0x9f   : > { %920 = vst.msk [vmem:[#allocation2] sm:$0xff] %vm919_vm7, %v917_v56 }
  0xa1   : > { %v640_v57 = vpop.permute.xlu1 %639 }
  0xa2   : > { %v634_v58 = vpop.permute.xlu0 %633  ;;  %642 = vst.msk [vmem:[#allocation2 + $0x30] sm:$0xff] %vm623_vm1, %v640_v57 }
  0xa3   : > { %636 = vst.msk [vmem:[#allocation2 + $0x20] sm:$0xff] %vm623_vm1, %v634_v58  ;;  %v4138_v58 = vmov 0.0  }
  0xa4   : > { %1234 = vst.msk [vmem:[#allocation3 + $0x10] sm:$0xff] %vm1230_vm8, %v4138_v58  ;;  %1231 = vst.msk [vmem:[#allocation3] sm:$0xff] %vm1230_vm8, %v4138_v58 }
  0xa5   : > { %v689_v61 = vpop.permute.xlu1 %688  ;;  %v981_v0 = vld [vmem:[#allocation2 + $0x10] sm:$0xff]  ;;  %1235 = vst.msk [vmem:[#allocation3 + $0x18] sm:$0x3] %vm1232_vm9, %v4138_v58  ;;  %1251 = vst.msk [vmem:[#allocation3 + $0x98] sm:$0x3] %vm1232_vm9, %v4138_v58 }
  0xa6   : > { %v683_v62 = vpop.permute.xlu0 %682  ;;  %v979_v63 = vld [vmem:[#allocation2] sm:$0xff]  ;;  %691 = vst.msk [vmem:[#allocation2 + $0x30] sm:$0xff] %vm672_vm2, %v689_v61  ;;  %v3921_v61 = vld [vmem:[%s5540_s4 + $0x108] sm:$0xff]  }
  0xa7   : > { %685 = vst.msk [vmem:[#allocation2 + $0x20] sm:$0xff] %vm672_vm2, %v683_v62  ;;  %v4479_v3 = vpack.c.bf16 %v981_v0, %v979_v63  ;;  %v3922_v62 = vld [vmem:[%s5540_s4 + $0x100] sm:$0xff]  }
  0xa8   : > { %1233 = vst.msk [vmem:[#allocation3 + $0x8] sm:$0x3] %vm1232_vm9, %v4138_v58  ;;  %1237 = vst.msk [vmem:[#allocation3 + $0x28] sm:$0x3] %vm1232_vm9, %v4138_v58  ;;  %v4615_v63 = vld [vmem:[%s5569_s21] ss:$0 sm:$0xff] }
  0xa9   : > { %1120 = vmatmul.mubr.bf16.vlgmr.msra.gmra.mxu0 %v4479_v3  ;;  %v738_v4 = vpop.permute.xlu1 %737  ;;  %1236 = vst.msk [vmem:[#allocation3 + $0x20] sm:$0xff] %vm1230_vm8, %v4138_v58  ;;  %1238 = vst.msk [vmem:[#allocation3 + $0x30] sm:$0xff] %vm1230_vm8, %v4138_v58  ;;  %s5572_s21 = smov 80  }
  0xaa   : > { %v732_v5 = vpop.permute.xlu0 %731  ;;  %3630 = vmatprep.mubr.msk.bf16.mxu0 %vm595_vm0, %v4475_v2  ;;  %740 = vst.msk [vmem:[#allocation2 + $0x30] sm:$0xff] %vm721_vm3, %v738_v4  ;;  %3831 = vmatpush3.bf16.msra.mxu0 %v3919_v59  ;;  %v4620_v4 = vld [vmem:[%s5539_s3] ss:$0 sm:$0xff]  ;;  %v3945_v59 = vld [vmem:[%s5540_s4 + $0x8] sm:$0xff]  }
  0xab   : > { %734 = vst.msk [vmem:[#allocation2 + $0x20] sm:$0xff] %vm721_vm3, %v732_v5  ;;  %3832 = vmatprep.subr.bf16.mxu0 %v3920_v60 }
  0xac   : > { %1239 = vst.msk [vmem:[#allocation3 + $0x38] sm:$0x3] %vm1232_vm9, %v4138_v58  ;;  %1241 = vst.msk [vmem:[#allocation3 + $0x48] sm:$0x3] %vm1232_vm9, %v4138_v58 }
  0xad   : > { %v788_v6 = vpop.permute.xlu1 %787  ;;  %1240 = vst.msk [vmem:[#allocation3 + $0x40] sm:$0xff] %vm1230_vm8, %v4138_v58  ;;  %1242 = vst.msk [vmem:[#allocation3 + $0x50] sm:$0xff] %vm1230_vm8, %v4138_v58 }
  0xae   : > { %v782_v7 = vpop.permute.xlu0 %781  ;;  %790 = vst.msk [vmem:[#allocation2 + $0x30] sm:$0xff] %vm771_vm4, %v788_v6  ;;  %3833 = vmatpush3.bf16.msra.mxu0 %v3920_v60  ;;  %v3946_v60 = vld [vmem:[%s5540_s4 + $0x40] sm:$0xff]  }
  0xaf   : > { %784 = vst.msk [vmem:[#allocation2 + $0x20] sm:$0xff] %vm771_vm4, %v782_v7  ;;  %3834 = vmatprep.subr.bf16.mxu0 %v3921_v61 }
  0xb0   : > { %1243 = vst.msk [vmem:[#allocation3 + $0x58] sm:$0x3] %vm1232_vm9, %v4138_v58  ;;  %1245 = vst.msk [vmem:[#allocation3 + $0x68] sm:$0x3] %vm1232_vm9, %v4138_v58 }
  0xb1   : > { %v837_v8 = vpop.permute.xlu1 %836  ;;  %1244 = vst.msk [vmem:[#allocation3 + $0x60] sm:$0xff] %vm1230_vm8, %v4138_v58  ;;  %1246 = vst.msk [vmem:[#allocation3 + $0x70] sm:$0xff] %vm1230_vm8, %v4138_v58 }
  0xb2   : > { %v831_v9 = vpop.permute.xlu0 %830  ;;  %839 = vst.msk [vmem:[#allocation2 + $0x30] sm:$0xff] %vm820_vm5, %v837_v8  ;;  %3835 = vmatpush3.bf16.msra.mxu0 %v3921_v61 }
  0xb3   : > { %833 = vst.msk [vmem:[#allocation2 + $0x20] sm:$0xff] %vm820_vm5, %v831_v9  ;;  %3836 = vmatprep.subr.bf16.mxu0 %v3922_v62 }
  0xb4   : > { %1247 = vst.msk [vmem:[#allocation3 + $0x78] sm:$0x3] %vm1232_vm9, %v4138_v58  ;;  %1249 = vst.msk [vmem:[#allocation3 + $0x88] sm:$0x3] %vm1232_vm9, %v4138_v58 }
  0xb5   : > { %v886_v10 = vpop.permute.xlu1 %885  ;;  %1248 = vst.msk [vmem:[#allocation3 + $0x80] sm:$0xff] %vm1230_vm8, %v4138_v58  ;;  %1250 = vst.msk [vmem:[#allocation3 + $0x90] sm:$0xff] %vm1230_vm8, %v4138_v58 }
  0xb6   : > { %v880_v11 = vpop.permute.xlu0 %879  ;;  %888 = vst.msk [vmem:[#allocation2 + $0x30] sm:$0xff] %vm869_vm6, %v886_v10  ;;  %3837 = vmatpush3.bf16.msra.mxu0 %v3922_v62 }
  0xb7   : > { %882 = vst.msk [vmem:[#allocation2 + $0x20] sm:$0xff] %vm869_vm6, %v880_v11  ;;  %2460 = vmatprep.subr.bf16.mxu0 %v4130_v1 }
  0xb8   : > { %2603 = vst.msk [vmem:[#allocation5] sm:$0xff] %vm595_vm0, %v4138_v58  ;;  %2606 = vst.msk [vmem:[#allocation5 + $0x10] sm:$0xff] %vm595_vm0, %v4138_v58 }
  0xb9   : > { %v936_v12 = vpop.permute.xlu1 %935  ;;  %2608 = vst.msk [vmem:[#allocation5 + $0x20] sm:$0xff] %vm595_vm0, %v4138_v58  ;;  %2610 = vst.msk [vmem:[#allocation5 + $0x30] sm:$0xff] %vm595_vm0, %v4138_v58 }
  0xba   : > { %v930_v13 = vpop.permute.xlu0 %929  ;;  %938 = vst.msk [vmem:[#allocation2 + $0x30] sm:$0xff] %vm919_vm7, %v936_v12 }
  0xbb   : > { %932 = vst.msk [vmem:[#allocation2 + $0x20] sm:$0xff] %vm919_vm7, %v930_v13 }
  0xbc   : > { %2612 = vst.msk [vmem:[#allocation5 + $0x40] sm:$0xff] %vm595_vm0, %v4138_v58  ;;  %2614 = vst.msk [vmem:[#allocation5 + $0x50] sm:$0xff] %vm595_vm0, %v4138_v58 }
  0xbd   : > { %v652_v14 = vpop.permute.xlu1 %651  ;;  %2616 = vst.msk [vmem:[#allocation5 + $0x60] sm:$0xff] %vm595_vm0, %v4138_v58  ;;  %2618 = vst.msk [vmem:[#allocation5 + $0x70] sm:$0xff] %vm595_vm0, %v4138_v58 }
  0xbe   : > { %v646_v15 = vpop.permute.xlu0 %645  ;;  %654 = vst.msk [vmem:[#allocation2 + $0x50] sm:$0xff] %vm623_vm1, %v652_v14  ;;  %v1540_v14 = vld [vmem:[#allocation3 + $0x92] sm:$0xff] }
  0xbf   : > { %648 = vst.msk [vmem:[#allocation2 + $0x40] sm:$0xff] %vm623_vm1, %v646_v15 }
  0xc0   : > { %2620 = vst.msk [vmem:[#allocation5 + $0x80] sm:$0xff] %vm595_vm0, %v4138_v58  ;;  %2622 = vst.msk [vmem:[#allocation5 + $0x90] sm:$0xff] %vm595_vm0, %v4138_v58 }
  0xc1   : > { %v701_v18 = vpop.permute.xlu1 %700  ;;  %v985_v21 = vld [vmem:[#allocation2 + $0x30] sm:$0xff]  ;;  %1541 = vst.msk [vmem:[#allocation4 + $0x138] sm:$0xff] %vm1230_vm8, %v1540_v14 }
  0xc2   : > { %v695_v19 = vpop.permute.xlu0 %694  ;;  %v983_v20 = vld [vmem:[#allocation2 + $0x20] sm:$0xff]  ;;  %703 = vst.msk [vmem:[#allocation2 + $0x50] sm:$0xff] %vm672_vm2, %v701_v18  ;;  %v3932_v18 = vld [vmem:[%s5540_s4 + $0x38] sm:$0xff]  }
  0xc3   : > { %697 = vst.msk [vmem:[#allocation2 + $0x40] sm:$0xff] %vm672_vm2, %v695_v19  ;;  %v4500_v23 = vpack.c.bf16 %v985_v21, %v983_v20  ;;  %3725 = vmatpush3.bf16.msra.mxu1 %v3932_v18  ;;  %v3934_v21 = vld [vmem:[%s5540_s4 + $0x70] sm:$0xff]  }
  0xc4   : > { %3726 = vmatprep.subr.bf16.mxu1 %v3934_v21  ;;  %2607 = vst.msk [vmem:[#allocation5 + $0x18] sm:$0x3] %vm2604_vm11, %v4138_v58  ;;  %2605 = vst.msk [vmem:[#allocation5 + $0x8] sm:$0x3] %vm2604_vm11, %v4138_v58 }
  0xc5   : > { %1128 = vmatmul.mubr.bf16.gmra.mxu0 %v4500_v23  ;;  %v750_v24 = vpop.permute.xlu1 %749  ;;  %2609 = vst.msk [vmem:[#allocation5 + $0x28] sm:$0x3] %vm2604_vm11, %v4138_v58  ;;  %2611 = vst.msk [vmem:[#allocation5 + $0x38] sm:$0x3] %vm2604_vm11, %v4138_v58 }
  0xc6   : > { %v744_v25 = vpop.permute.xlu0 %743  ;;  %3631 = vmatprep.mubr.msk.bf16.mxu0 %vm595_vm0, %v4496_v22  ;;  %752 = vst.msk [vmem:[#allocation2 + $0x50] sm:$0xff] %vm721_vm3, %v750_v24  ;;  %v3935_v24 = vld [vmem:[%s5540_s4 + $0x30] sm:$0xff]  }
  0xc7   : > { %746 = vst.msk [vmem:[#allocation2 + $0x40] sm:$0xff] %vm721_vm3, %v744_v25  ;;  %3727 = vmatpush3.bf16.msra.mxu1 %v3935_v24 }
  0xc8   : > { %2613 = vst.msk [vmem:[#allocation5 + $0x48] sm:$0x3] %vm2604_vm11, %v4138_v58  ;;  %2615 = vst.msk [vmem:[#allocation5 + $0x58] sm:$0x3] %vm2604_vm11, %v4138_v58 }
  0xc9   : > { %v800_v26 = vpop.permute.xlu1 %799  ;;  %2617 = vst.msk [vmem:[#allocation5 + $0x68] sm:$0x3] %vm2604_vm11, %v4138_v58  ;;  %2619 = vst.msk [vmem:[#allocation5 + $0x78] sm:$0x3] %vm2604_vm11, %v4138_v58 }
  0xca   : > { %v794_v27 = vpop.permute.xlu0 %793  ;;  %802 = vst.msk [vmem:[#allocation2 + $0x50] sm:$0xff] %vm771_vm4, %v800_v26 }
  0xcb   : > { %796 = vst.msk [vmem:[#allocation2 + $0x40] sm:$0xff] %vm771_vm4, %v794_v27 }
  0xcc   : > { %2621 = vst.msk [vmem:[#allocation5 + $0x88] sm:$0x3] %vm2604_vm11, %v4138_v58  ;;  %2623 = vst.msk [vmem:[#allocation5 + $0x98] sm:$0x3] %vm2604_vm11, %v4138_v58 }
  0xcd   : > { %v849_v28 = vpop.permute.xlu1 %848 }
  0xce   : > { %v843_v29 = vpop.permute.xlu0 %842  ;;  %851 = vst.msk [vmem:[#allocation2 + $0x50] sm:$0xff] %vm820_vm5, %v849_v28  ;;  %v3936_v28 = vld [vmem:[%s5540_s4 + $0x68] sm:$0xff]  }
  0xcf   : > { %845 = vst.msk [vmem:[#allocation2 + $0x40] sm:$0xff] %vm820_vm5, %v843_v29  ;;  %3728 = vmatprep.subr.bf16.mxu1 %v3936_v28 }
  0xd1   : > { %v898_v30 = vpop.permute.xlu1 %897 }
  0xd2   : > { %v892_v32 = vpop.permute.xlu0 %891  ;;  %900 = vst.msk [vmem:[#allocation2 + $0x50] sm:$0xff] %vm869_vm6, %v898_v30  ;;  %v3937_v30 = vld [vmem:[%s5540_s4 + $0x28] sm:$0xff]  }
  0xd3   : > { %894 = vst.msk [vmem:[#allocation2 + $0x40] sm:$0xff] %vm869_vm6, %v892_v32  ;;  %3729 = vmatpush3.bf16.msra.mxu1 %v3937_v30 }
  0xd5   : > { %v948_v33 = vpop.permute.xlu1 %947 }
  0xd6   : > { %v942_v34 = vpop.permute.xlu0 %941  ;;  %950 = vst.msk [vmem:[#allocation2 + $0x50] sm:$0xff] %vm919_vm7, %v948_v33 }
  0xd7   : > { %944 = vst.msk [vmem:[#allocation2 + $0x40] sm:$0xff] %vm919_vm7, %v942_v34 }
  0xd9   : > { %v664_v35 = vpop.permute.xlu1 %663 }
  0xda   : > { %v658_v36 = vpop.permute.xlu0 %657  ;;  %666 = vst.msk [vmem:[#allocation2 + $0x70] sm:$0xff] %vm623_vm1, %v664_v35  ;;  %v3938_v35 = vld [vmem:[%s5540_s4 + $0x60] sm:$0xff]  }
  0xdb   : > { %660 = vst.msk [vmem:[#allocation2 + $0x60] sm:$0xff] %vm623_vm1, %v658_v36  ;;  %3730 = vmatprep.subr.bf16.mxu1 %v3938_v35 }
  0xdc   : > { %3731 = vmatpush3.bf16.msra.mxu1 %v3939_v38 }
  0xdd   : > { %v713_v39 = vpop.permute.xlu1 %712  ;;  %v989_v42 = vld [vmem:[#allocation2 + $0x50] sm:$0xff] }
  0xde   : > { %v707_v40 = vpop.permute.xlu0 %706  ;;  %v987_v41 = vld [vmem:[#allocation2 + $0x40] sm:$0xff]  ;;  %715 = vst.msk [vmem:[#allocation2 + $0x70] sm:$0xff] %vm672_vm2, %v713_v39 }
  0xdf   : > { %709 = vst.msk [vmem:[#allocation2 + $0x60] sm:$0xff] %vm672_vm2, %v707_v40  ;;  %v4521_v44 = vpack.c.bf16 %v989_v42, %v987_v41  ;;  %v1333_v39 = vld [vmem:[#allocation3 + $0x2] sm:$0xff] }
  0xe0   : > { %1334 = vst.msk [vmem:[#allocation4 + $0x8] sm:$0xff] %vm1230_vm8, %v1333_v39 }
  0xe1   : > { %1136 = vmatmul.mubr.bf16.gmra.mxu0 %v4521_v44  ;;  %v763_v45 = vpop.permute.xlu1 %762 }
  0xe2   : > { %v756_v46 = vpop.permute.xlu0 %755  ;;  %3632 = vmatprep.mubr.msk.bf16.mxu0 %vm595_vm0, %v4517_v43  ;;  %765 = vst.msk [vmem:[#allocation2 + $0x70] sm:$0xff] %vm721_vm3, %v763_v45  ;;  %v3940_v45 = vld [vmem:[%s5540_s4 + $0x58] sm:$0xff]  }
  0xe3   : > { %758 = vst.msk [vmem:[#allocation2 + $0x60] sm:$0xff] %vm721_vm3, %v756_v46  ;;  %3732 = vmatprep.subr.bf16.mxu1 %v3940_v45 }
  0xe5   : > { %v812_v47 = vpop.permute.xlu1 %811 }
  0xe6   : > { %v806_v48 = vpop.permute.xlu0 %805  ;;  %814 = vst.msk [vmem:[#allocation2 + $0x70] sm:$0xff] %vm771_vm4, %v812_v47  ;;  %v3941_v47 = vld [vmem:[%s5540_s4 + $0x18] sm:$0xff]  }
  0xe7   : > { %808 = vst.msk [vmem:[#allocation2 + $0x60] sm:$0xff] %vm771_vm4, %v806_v48  ;;  %3733 = vmatpush3.bf16.msra.mxu1 %v3941_v47 }
  0xe9   : > { %v861_v49 = vpop.permute.xlu1 %860 }
  0xea   : > { %v855_v50 = vpop.permute.xlu0 %854  ;;  %863 = vst.msk [vmem:[#allocation2 + $0x70] sm:$0xff] %vm820_vm5, %v861_v49 }
  0xeb   : > { %857 = vst.msk [vmem:[#allocation2 + $0x60] sm:$0xff] %vm820_vm5, %v855_v50 }
  0xed   : > { %v911_v51 = vpop.permute.xlu1 %910 }
  0xee   : > { %v904_v52 = vpop.permute.xlu0 %903  ;;  %913 = vst.msk [vmem:[#allocation2 + $0x70] sm:$0xff] %vm869_vm6, %v911_v51  ;;  %v3942_v51 = vld [vmem:[%s5540_s4 + $0x50] sm:$0xff]  }
  0xef   : > { %906 = vst.msk [vmem:[#allocation2 + $0x60] sm:$0xff] %vm869_vm6, %v904_v52  ;;  %v3943_v52 = vld [vmem:[%s5540_s4 + $0x10] sm:$0xff]   ;;  %3734 = vmatprep.subr.bf16.mxu1 %v3942_v51 }
  0xf0   : > { %3735 = vmatpush3.bf16.msra.mxu1 %v3943_v52 }
  0xf1   : > { %v960_v53 = vpop.permute.xlu1 %959 }
  0xf2   : > { %v954_v54 = vpop.permute.xlu0 %953  ;;  %962 = vst.msk [vmem:[#allocation2 + $0x70] sm:$0xff] %vm919_vm7, %v960_v53  ;;  %v1268_v53 = vld [vmem:[#allocation3] sm:$0xff] }
  0xf3   : > { %956 = vst.msk [vmem:[#allocation2 + $0x60] sm:$0xff] %vm919_vm7, %v954_v54 }
  0xf4   : > { %1269 = vst.msk [vmem:[#allocation4] sm:$0xff] %vm1230_vm8, %v1268_v53 }
  0xf9   : > { %v993_v56 = vld [vmem:[#allocation2 + $0x70] sm:$0xff] }
  0xfa   : > { %v991_v55 = vld [vmem:[#allocation2 + $0x60] sm:$0xff] }
  0xfb   : > { %v4536_v57 = vpack.c.bf16 %v993_v56, %v991_v55  ;;  %v3944_v56 = vld [vmem:[%s5540_s4 + $0x48] sm:$0xff]  }
  0xfc   : > { %3736 = vmatprep.subr.bf16.mxu1 %v3944_v56 }
  0xfd   : > { %1144 = vmatmul.mubr.bf16.gmra.mxu0 %v4536_v57  ;;  %3737 = vmatpush3.bf16.msra.mxu1 %v3945_v59 }
  0xfe   : > { %3738 = vmatprep.subr.bf16.mxu1 %v3946_v60 }
 0x169   : > { %v1121_v0 = vpop.f32.mrf.mxu0 }
 0x16a   : > { %v1159_v5 = vmul.f32 %v4615_v63, %v1121_v0 }
 0x16b   : > { %v1123_v6 = vpop.f32.mrf.mxu0 }
 0x16c   : > { %v1174_v7 = vadd.f32 %v4620_v4, %v1159_v5  ;;  %v3947_v5 = vld [vmem:[%s5540_s4] sm:$0xff]  }
 0x16d   : > { %v1124_v8 = vpop.f32.mrf.mxu0  ;;  %3739 = vmatpush3.bf16.msra.mxu1 %v3947_v5 }
 0x16e   : > { %v1182_v9 = vsub.f32 0.0, %v1174_v7  ;;  %v1160_v10 = vmul.f32 %v4615_v63, %v1124_v8 }
 0x16f   : > { %v1126_v11 = vpop.f32.mrf.mxu0 }
 0x170   : > { %v1190_v12 = vmul.f32 1.442695, %v1182_v9  ;;  %v1175_v13 = vadd.f32 %v4620_v4, %v1160_v10 }
 0x172   : > { %3978 = vpow2.f32 %v1190_v12  ;;  %v1183_v15 = vsub.f32 0.0, %v1175_v13 }
 0x174   : > { %v1192_v16 = vmul.f32 1.442695, %v1183_v15 }
 0x176   : > { %3980 = vpow2.f32 %v1192_v16 }
 0x17f   : > { %v3979_v19 = vpop.eup %3978 }
 0x180   : > { %v1206_v20 = vadd.f32 1.0, %v3979_v19 }
 0x182   : > { %3982 = vrcp.f32 %v1206_v20 }
 0x183   : > { %v3981_v25 = vpop.eup %3980 }
 0x184   : > { %v1207_v26 = vadd.f32 1.0, %v3981_v25 }
 0x185   : > { %v1129_v27 = vpop.f32.mrf.mxu0 }
 0x186   : > { %3984 = vrcp.f32 %v1207_v26  ;;  %v1161_v29 = vmul.f32 %v4615_v63, %v1129_v27 }
 0x187   : > { %v1131_v32 = vpop.f32.mrf.mxu0 }
 0x188   : > { %v4647_v33 = vadd.f32 %v4620_v4, %v1161_v29 }
 0x189   : > { %v1132_v34 = vpop.f32.mrf.mxu0 }
 0x18a   : > { %v1184_v36 = vsub.f32 0.0, %v4647_v33  ;;  %v1162_v37 = vmul.f32 %v4615_v63, %v1132_v34 }
 0x18b   : > { %v1134_v40 = vpop.f32.mrf.mxu0 }
 0x18c   : > { %v1194_v41 = vmul.f32 1.442695, %v1184_v36  ;;  %v4659_v42 = vadd.f32 %v4620_v4, %v1162_v37 }
 0x18e   : > { %3986 = vpow2.f32 %v1194_v41  ;;  %v1185_v46 = vsub.f32 0.0, %v4659_v42 }
 0x18f   : > { %v3983_v48 = vpop.eup %3982 }
 0x190   : > { %v1222_v49 = vmul.f32 %v3983_v48, %v1174_v7  ;;  %v1196_v50 = vmul.f32 1.442695, %v1185_v46  ;;  %v1284_v7 = vld [vmem:[#allocation3 + $0x1] sm:$0xff] }
 0x192   : > { %1253 = vst.msk [vmem:[#allocation3 + $0x11] sm:$0xff] %vm1230_vm8, %v1222_v49  ;;  %3988 = vpow2.f32 %v1196_v50 }
 0x193   : > { %v3985_v54 = vpop.eup %3984 }
 0x194   : > { %v1223_v55 = vmul.f32 %v3985_v54, %v1175_v13 }
 0x196   : > { %1255 = vst.msk [vmem:[#allocation3 + $0x21] sm:$0xff] %vm1230_vm8, %v1223_v55 }
 0x199   : > { %v1349_v61 = vld [vmem:[#allocation3 + $0x10] sm:$0xff] }
 0x19a   : > { %v1291_v62 = vld [vmem:[#allocation3 + $0x11] sm:$0xff]  ;;  %1351 = vrot.lane.b32.xlu0 %v1349_v61, %s4134_s23  ;;  %1271 = vst.msk [vmem:[#allocation4 + $0x28] sm:$0xff] %vm1230_vm8, %v1349_v61 }
 0x19b   : > { %v4686_v0 = vld [vmem:[#allocation3 + $0x12] sm:$0xff]  ;;  %1398 = vst.msk [vmem:[#allocation4 + $0x10] sm:$0xff] %vm1230_vm8, %v1291_v62  ;;  %v3987_v6 = vpop.eup %3986 }
 0x19c   : > { %1336 = vst.msk [vmem:[#allocation4 + $0x30] sm:$0xff] %vm1230_vm8, %v4686_v0  ;;  %v1208_v8 = vadd.f32 1.0, %v3987_v6 }
 0x19d   : > { %v1355_v9 = vld [vmem:[#allocation3 + $0x20] sm:$0xff] }
 0x19e   : > { %v4696_v10 = vld [vmem:[#allocation3 + $0x21] sm:$0xff]  ;;  %3990 = vrcp.f32 %v1208_v8  ;;  %1357 = vrot.lane.b32.xlu1 %v1355_v9, %s4134_s23  ;;  %1286 = vrot.lane.b32.xlu0 %v1284_v7, %s4134_s23  ;;  %1273 = vst.msk [vmem:[#allocation4 + $0x50] sm:$0xff] %vm1230_vm8, %v1355_v9  ;;  %1462 = vst.msk [vmem:[#allocation4 + $0x18] sm:$0xff] %vm1230_vm8, %v1355_v9 }
 0x19f   : > { %v4698_v11 = vld [vmem:[#allocation3 + $0x22] sm:$0xff]  ;;  %1400 = vst.msk [vmem:[#allocation4 + $0x38] sm:$0xff] %vm1230_vm8, %v4696_v10  ;;  %v3989_v12 = vpop.eup %3988 }
 0x1a0   : > { %1527 = vst.msk [vmem:[#allocation4 + $0x20] sm:$0xff] %vm1230_vm8, %v4698_v11  ;;  %1338 = vst.msk [vmem:[#allocation4 + $0x58] sm:$0xff] %vm1230_vm8, %v4698_v11  ;;  %v1209_v13 = vadd.f32 1.0, %v3989_v12 }
 0x1a1   : > { %v1137_v14 = vpop.f32.mrf.mxu0 }
 0x1a2   : > { %3992 = vrcp.f32 %v1209_v13  ;;  %v1163_v15 = vmul.f32 %v4615_v63, %v1137_v14  ;;  %1293 = vrot.lane.b32.xlu1 %v1291_v62, %s4134_s23 }
 0x1a3   : > { %v1139_v16 = vpop.f32.mrf.mxu0 }
 0x1a4   : > { %v1178_v17 = vadd.f32 %v4620_v4, %v1163_v15 }
 0x1a5   : > { %v1140_v18 = vpop.f32.mrf.mxu0 }
 0x1a6   : > { %v1186_v19 = vsub.f32 0.0, %v1178_v17  ;;  %v1164_v20 = vmul.f32 %v4615_v63, %v1140_v18 }
 0x1a7   : > { %v1142_v21 = vpop.f32.mrf.mxu0  ;;  %v1546_v46 = vld [vmem:[#allocation4 + $0x20] sm:$0xff] }
 0x1a8   : > { %v1198_v24 = vmul.f32 1.442695, %v1186_v19  ;;  %v1179_v25 = vadd.f32 %v4620_v4, %v1164_v20  ;;  %v3923_v21 = vld [vmem:[%s5545_s9 + $0x38] sm:$0xff]  }
 0x1aa   : > { %3994 = vpow2.f32 %v1198_v24  ;;  %v1187_v26 = vsub.f32 0.0, %v1179_v25 }
 0x1ab   : > { %v3991_v27 = vpop.eup %3990 }
 0x1ac   : > { %v1224_v28 = vmul.f32 %v3991_v27, %v4647_v33  ;;  %v1200_v29 = vmul.f32 1.442695, %v1187_v26  ;;  %v3925_v26 = vld [vmem:[%s5545_s9 + $0x28] sm:$0xff]  }
 0x1ae   : > { %1257 = vst.msk [vmem:[#allocation3 + $0x31] sm:$0xff] %vm1230_vm8, %v1224_v28  ;;  %3996 = vpow2.f32 %v1200_v29  ;;  %v3926_v29 = vld [vmem:[%s5545_s9 + $0x20] sm:$0xff]  }
 0x1af   : > { %v3993_v30 = vpop.eup %3992 }
 0x1b0   : > { %v1225_v32 = vmul.f32 %v3993_v30, %v4659_v42 }
 0x1b2   : > { %1259 = vst.msk [vmem:[#allocation3 + $0x41] sm:$0xff] %vm1230_vm8, %v1225_v32 }
 0x1b5   : > { %v1361_v34 = vld [vmem:[#allocation3 + $0x30] sm:$0xff] }
 0x1b6   : > { %v4719_v35 = vld [vmem:[#allocation3 + $0x31] sm:$0xff]  ;;  %1363 = vrot.lane.b32.xlu0 %v1361_v34, %s4134_s23  ;;  %1275 = vst.msk [vmem:[#allocation4 + $0x78] sm:$0xff] %vm1230_vm8, %v1361_v34  ;;  %1464 = vst.msk [vmem:[#allocation4 + $0x40] sm:$0xff] %vm1230_vm8, %v1361_v34 }
 0x1b7   : > { %v4721_v36 = vld [vmem:[#allocation3 + $0x32] sm:$0xff]  ;;  %1402 = vst.msk [vmem:[#allocation4 + $0x60] sm:$0xff] %vm1230_vm8, %v4719_v35  ;;  %v3995_v33 = vpop.eup %3994 }
 0x1b8   : > { %1529 = vst.msk [vmem:[#allocation4 + $0x48] sm:$0xff] %vm1230_vm8, %v4721_v36  ;;  %1340 = vst.msk [vmem:[#allocation4 + $0x80] sm:$0xff] %vm1230_vm8, %v4721_v36  ;;  %v1210_v37 = vadd.f32 1.0, %v3995_v33  ;;  %v3927_v34 = vld [vmem:[%s5545_s9 + $0x18] sm:$0xff]   ;;  %v3928_v33 = vld [vmem:[%s5545_s9 + $0x10] sm:$0xff]  }
 0x1b9   : > { %v4732_v38 = vld [vmem:[#allocation3 + $0x42] sm:$0xff] }
 0x1ba   : > { %v1367_v39 = vld [vmem:[#allocation3 + $0x40] sm:$0xff]  ;;  %1531 = vst.msk [vmem:[#allocation4 + $0x70] sm:$0xff] %vm1230_vm8, %v4732_v38  ;;  %3998 = vrcp.f32 %v1210_v37  ;;  %1299 = vrot.lane.b32.xlu0 %v4696_v10, %s4134_s23  ;;  %1342 = vst.msk [vmem:[#allocation4 + $0xa8] sm:$0xff] %vm1230_vm8, %v4732_v38 }
 0x1bb   : > { %v4734_v40 = vld [vmem:[#allocation3 + $0x41] sm:$0xff]  ;;  %1369 = vrot.lane.b32.xlu1 %v1367_v39, %s4134_s23  ;;  %1277 = vst.msk [vmem:[#allocation4 + $0xa0] sm:$0xff] %vm1230_vm8, %v1367_v39  ;;  %1466 = vst.msk [vmem:[#allocation4 + $0x68] sm:$0xff] %vm1230_vm8, %v1367_v39  ;;  %v3997_v41 = vpop.eup %3996 }
 0x1bc   : > { %1404 = vst.msk [vmem:[#allocation4 + $0x88] sm:$0xff] %vm1230_vm8, %v4734_v40  ;;  %v1211_v42 = vadd.f32 1.0, %v3997_v41 }
 0x1bd   : > { %v1145_v45 = vpop.f32.mrf.mxu0 }
 0x1be   : > { %4000 = vrcp.f32 %v1211_v42  ;;  %v1165_v48 = vmul.f32 %v4615_v63, %v1145_v45  ;;  %v3929_v42 = vld [vmem:[%s5545_s9 + $0x8] sm:$0xff]  }
 0x1bf   : > { %v1551_v47 = vld [vmem:[#allocation4 + $0x48] sm:$0xff]  ;;  %1305 = vrot.lane.b32.xlu1 %v4719_v35, %s4134_s23  ;;  %v1147_v50 = vpop.f32.mrf.mxu0 }
 0x1c0   : > { %v1586_v49 = vpack.c.bf16 %v1551_v47, %v1546_v46  ;;  %v1180_v51 = vadd.f32 %v4620_v4, %v1165_v48  ;;  %v3930_v50 = vld [vmem:[%s5545_s9] sm:$0xff]  }
 0x1c1   : > { %v1148_v52 = vpop.f32.mrf.mxu0  ;;  %v1556_v19 = vld [vmem:[#allocation4 + $0x70] sm:$0xff] }
 0x1c2   : > { %3838 = vmatprep.mubr.msk.bf16.mxu0 %vm1230_vm8, %v1586_v49  ;;  %v1188_v53 = vsub.f32 0.0, %v1180_v51  ;;  %v1166_v54 = vmul.f32 %v4615_v63, %v1148_v52  ;;  %v1581_v52 = vld [vmem:[#allocation4 + $0x138] sm:$0xff] }
 0x1c3   : > { %v1150_v55 = vpop.f32.mrf.mxu0 }
 0x1c4   : > { %v1202_v56 = vmul.f32 1.442695, %v1188_v53  ;;  %v1181_v59 = vadd.f32 %v4620_v4, %v1166_v54  ;;  %v3933_v54 = vld [vmem:[%s5545_s9 + $0x40] sm:$0xff]   ;;  %v3949_v55 = vld [vmem:[%s5540_s4 + $0xb8] sm:$0xff]  }
 0x1c6   : > { %4002 = vpow2.f32 %v1202_v56  ;;  %v1189_v60 = vsub.f32 0.0, %v1181_v59  ;;  %v3950_v56 = vld [vmem:[%s5540_s4 + $0xf0] sm:$0xff]  }
 0x1c7   : > { %v3999_v61 = vpop.eup %3998 }
 0x1c8   : > { %v1226_v62 = vmul.f32 %v3999_v61, %v1178_v17  ;;  %v1204_v5 = vmul.f32 1.442695, %v1189_v60  ;;  %v3948_v17 = vld [vmem:[%s5540_s4 + $0xf8] sm:$0xff]   ;;  %v3954_v60 = vld [vmem:[%s5540_s4 + $0xe0] sm:$0xff]  }
 0x1c9   : > { %3764 = vmatprep.subr.bf16.mxu1 %v3948_v17  ;;  %v3962_v17 = vld [vmem:[%s5540_s4 + $0xc0] sm:$0xff]  }
 0x1ca   : > { %1261 = vst.msk [vmem:[#allocation3 + $0x51] sm:$0xff] %vm1230_vm8, %v1226_v62  ;;  %4004 = vpow2.f32 %v1204_v5  ;;  %v3955_v62 = vld [vmem:[%s5540_s4 + $0xa0] sm:$0xff]   ;;  %v3956_v5 = vld [vmem:[%s5540_s4 + $0xd8] sm:$0xff]  }
 0x1cb   : > { %v4001_v6 = vpop.eup %4000 }
 0x1cc   : > { %v1227_v7 = vmul.f32 %v4001_v6, %v1179_v25  ;;  %v3924_v25 = vld [vmem:[%s5545_s9 + $0x30] sm:$0xff]  }
 0x1ce   : > { %1263 = vst.msk [vmem:[#allocation3 + $0x61] sm:$0xff] %vm1230_vm8, %v1227_v7 }
 0x1d1   : > { %v4756_v8 = vld [vmem:[#allocation3 + $0x52] sm:$0xff] }
 0x1d2   : > { %v1373_v9 = vld [vmem:[#allocation3 + $0x50] sm:$0xff]  ;;  %1533 = vst.msk [vmem:[#allocation4 + $0x98] sm:$0xff] %vm1230_vm8, %v4756_v8  ;;  %1344 = vst.msk [vmem:[#allocation4 + $0xd0] sm:$0xff] %vm1230_vm8, %v4756_v8 }
 0x1d3   : > { %v4758_v63 = vld [vmem:[#allocation3 + $0x51] sm:$0xff]  ;;  %1375 = vrot.lane.b32.xlu0 %v1373_v9, %s4134_s23  ;;  %1279 = vst.msk [vmem:[#allocation4 + $0xc8] sm:$0xff] %vm1230_vm8, %v1373_v9  ;;  %1468 = vst.msk [vmem:[#allocation4 + $0x90] sm:$0xff] %vm1230_vm8, %v1373_v9  ;;  %v4003_v4 = vpop.eup %4002 }
 0x1d4   : > { %1406 = vst.msk [vmem:[#allocation4 + $0xb0] sm:$0xff] %vm1230_vm8, %v4758_v63  ;;  %v1212_v12 = vadd.f32 1.0, %v4003_v4  ;;  %v3958_v9 = vld [vmem:[%s5540_s4 + $0xd0] sm:$0xff]  }
 0x1d5   : > { %v1379_v13 = vld [vmem:[#allocation3 + $0x60] sm:$0xff]  ;;  %v3959_v4 = vld [vmem:[%s5540_s4 + $0x90] sm:$0xff]  }
 0x1d6   : > { %v4769_v14 = vld [vmem:[#allocation3 + $0x61] sm:$0xff]  ;;  %4006 = vrcp.f32 %v1212_v12  ;;  %1381 = vrot.lane.b32.xlu1 %v1379_v13, %s4134_s23  ;;  %1281 = vst.msk [vmem:[#allocation4 + $0xf0] sm:$0xff] %vm1230_vm8, %v1379_v13  ;;  %1470 = vst.msk [vmem:[#allocation4 + $0xb8] sm:$0xff] %vm1230_vm8, %v1379_v13 }
 0x1d7   : > { %v4771_v15 = vld [vmem:[#allocation3 + $0x62] sm:$0xff]  ;;  %1311 = vrot.lane.b32.xlu0 %v4734_v40, %s4134_s23  ;;  %1408 = vst.msk [vmem:[#allocation4 + $0xd8] sm:$0xff] %vm1230_vm8, %v4769_v14  ;;  %v4005_v16 = vpop.eup %4004 }
 0x1d8   : > { %1535 = vst.msk [vmem:[#allocation4 + $0xc0] sm:$0xff] %vm1230_vm8, %v4771_v15  ;;  %1346 = vst.msk [vmem:[#allocation4 + $0xf8] sm:$0xff] %vm1230_vm8, %v4771_v15  ;;  %v1213_v18 = vadd.f32 1.0, %v4005_v16  ;;  %v3960_v12 = vld [vmem:[%s5540_s4 + $0xc8] sm:$0xff]  }
 0x1d9   : > { %v1561_v20 = vld [vmem:[#allocation4 + $0x98] sm:$0xff] }
 0x1da   : > { %4008 = vrcp.f32 %v1213_v18  ;;  %1317 = vrot.lane.b32.xlu1 %v4758_v63, %s4134_s23  ;;  %v1591_v24 = vpack.c.bf16 %v1561_v20, %v1556_v19  ;;  %v3963_v20 = vld [vmem:[%s5540_s4 + $0x80] sm:$0xff]  }
 0x1dc   : > { %3839 = vmatmul.mubr.msk.bf16.vlgmr.msra.gmra.mxu0 %vm1230_vm8, %v1591_v24 }
 0x1dd   : > { %2461 = vmatpush1.bf16.msra.mxu0 %v3923_v21 }
 0x1de   : > { %2462 = vmatprep.subr.bf16.mxu0 %v4130_v1 }
 0x1df   : > { %v1566_v48 = vld [vmem:[#allocation4 + $0xc0] sm:$0xff] }
 0x1e1   : > { %2463 = vmatpush1.bf16.msra.mxu0 %v3924_v25 }
 0x1e2   : > { %2464 = vmatprep.subr.bf16.mxu0 %v4130_v1 }
 0x1e3   : > { %v4007_v27 = vpop.eup %4006 }
 0x1e4   : > { %v1228_v28 = vmul.f32 %v4007_v27, %v1180_v51 }
 0x1e5   : > { %2465 = vmatpush1.bf16.msra.mxu0 %v3925_v26 }
 0x1e6   : > { %1265 = vst.msk [vmem:[#allocation3 + $0x71] sm:$0xff] %vm1230_vm8, %v1228_v28  ;;  %2466 = vmatprep.subr.bf16.mxu0 %v4130_v1 }
 0x1e7   : > { %v4009_v30 = vpop.eup %4008 }
 0x1e8   : > { %v1229_v32 = vmul.f32 %v4009_v30, %v1181_v59  ;;  %v3953_v59 = vld [vmem:[%s5540_s4 + $0xa8] sm:$0xff]  }
 0x1e9   : > { %2467 = vmatpush1.bf16.msra.mxu0 %v3926_v29 }
 0x1ea   : > { %1267 = vst.msk [vmem:[#allocation3 + $0x81] sm:$0xff] %vm1230_vm8, %v1229_v32  ;;  %2468 = vmatprep.subr.bf16.mxu0 %v4130_v1 }
 0x1ed   : > { %v1385_v37 = vld [vmem:[#allocation3 + $0x70] sm:$0xff]  ;;  %2469 = vmatpush1.bf16.msra.mxu0 %v3927_v34 }
 0x1ee   : > { %v1327_v39 = vld [vmem:[#allocation3 + $0x71] sm:$0xff]  ;;  %1387 = vrot.lane.b32.xlu0 %v1385_v37, %s4134_s23  ;;  %2470 = vmatprep.subr.bf16.mxu0 %v4130_v1  ;;  %1283 = vst.msk [vmem:[#allocation4 + $0x118] sm:$0xff] %vm1230_vm8, %v1385_v37  ;;  %1472 = vst.msk [vmem:[#allocation4 + $0xe0] sm:$0xff] %vm1230_vm8, %v1385_v37 }
 0x1ef   : > { %v4814_v41 = vld [vmem:[#allocation3 + $0x72] sm:$0xff]  ;;  %1410 = vst.msk [vmem:[#allocation4 + $0x100] sm:$0xff] %vm1230_vm8, %v1327_v39 }
 0x1f0   : > { %1537 = vst.msk [vmem:[#allocation4 + $0xe8] sm:$0xff] %vm1230_vm8, %v4814_v41  ;;  %1348 = vst.msk [vmem:[#allocation4 + $0x120] sm:$0xff] %vm1230_vm8, %v4814_v41 }
 0x1f1   : > { %v1391_v45 = vld [vmem:[#allocation3 + $0x80] sm:$0xff]  ;;  %2471 = vmatpush1.bf16.msra.mxu0 %v3928_v33 }
 0x1f2   : > { %v1538_v46 = vld [vmem:[#allocation3 + $0x82] sm:$0xff]  ;;  %1323 = vrot.lane.b32.xlu0 %v4769_v14, %s4134_s23  ;;  %1393 = vrot.lane.b32.xlu1 %v1391_v45, %s4134_s23  ;;  %1474 = vst.msk [vmem:[#allocation4 + $0x108] sm:$0xff] %vm1230_vm8, %v1391_v45 }
 0x1f3   : > { %v1514_v47 = vld [vmem:[#allocation3 + $0x81] sm:$0xff]  ;;  %1539 = vst.msk [vmem:[#allocation4 + $0x110] sm:$0xff] %vm1230_vm8, %v1538_v46  ;;  %2472 = vmatprep.subr.bf16.mxu0 %v4130_v1 }
 0x1f4   : > { %1412 = vst.msk [vmem:[#allocation4 + $0x128] sm:$0xff] %vm1230_vm8, %v1514_v47 }
 0x1f5   : > { %2473 = vmatpush1.bf16.msra.mxu0 %v3929_v42 }
 0x1f6   : > { %1480 = vrot.lane.b32.xlu0 %v4696_v10, %s4134_s23  ;;  %1329 = vrot.lane.b32.xlu1 %v1327_v39, %s4134_s23 }
 0x1f7   : > { %v1571_v49 = vld [vmem:[#allocation4 + $0xe8] sm:$0xff]  ;;  %2474 = vmatprep.subr.bf16.mxu0 %v4130_v1 }
 0x1f8   : > { %v1596_v51 = vpack.c.bf16 %v1571_v49, %v1566_v48 }
 0x1f9   : > { %2475 = vmatpush1.bf16.msra.mxu0 %v3930_v50 }
 0x1fa   : > { %3842 = vmatprep.mubr.msk.bf16.mxu0 %vm1230_vm8, %v1596_v51  ;;  %v1576_v53 = vld [vmem:[#allocation4 + $0x110] sm:$0xff]  ;;  %1415 = vrot.lane.b32.xlu0 %v4686_v0, %s4134_s23  ;;  %v2656_v51 = vld [vmem:[#allocation5 + $0x1] sm:$0xff] }
 0x1fb   : > { %1486 = vrot.lane.b32.xlu1 %v4719_v35, %s4134_s23  ;;  %v1601_v10 = vpack.c.bf16 %v1581_v52, %v1576_v53  ;;  %2490 = vmatprep.subr.bf16.mxu0 %v4130_v1  ;;  %v1476_v0 = vld [vmem:[#allocation3 + $0x90] sm:$0xff] }
 0x1fc   : > { %1477 = vst.msk [vmem:[#allocation4 + $0x130] sm:$0xff] %vm1230_vm8, %v1476_v0 }
 0x1fd   : > { %3843 = vmatmul.mubr.msk.bf16.gmra.mxu0 %vm1230_vm8, %v1601_v10 }
 0x1fe   : > { %2491 = vmatpush2.bf16.msra.mxu0 %v3933_v54  ;;  %3694 = vmatprep.mubr.msk.bf16.mxu0 %vm595_vm0, %v4370_v31 }
 0x1ff   : > { %1492 = vrot.lane.b32.xlu0 %v4734_v40, %s4134_s23  ;;  %1421 = vrot.lane.b32.xlu1 %v4698_v11, %s4134_s23 }
 0x203   : > { %1427 = vrot.lane.b32.xlu0 %v4721_v36, %s4134_s23  ;;  %1498 = vrot.lane.b32.xlu1 %v4758_v63, %s4134_s23 }
 0x205   : > { %2493 = vmatmul.mubr.bf16.vlgmr.msra.gmra.mxu0 %v4479_v3 }
 0x206   : > { %3695 = vmatprep.mubr.msk.bf16.mxu0 %vm595_vm0, %v4475_v2  ;;  %v1520_v2 = vld [vmem:[#allocation3 + $0x91] sm:$0xff] }
 0x207   : > { %1504 = vrot.lane.b32.xlu0 %v4769_v14, %s4134_s23  ;;  %1433 = vrot.lane.b32.xlu1 %v4732_v38, %s4134_s23 }
 0x20b   : > { %1439 = vrot.lane.b32.xlu0 %v4756_v8, %s4134_s23  ;;  %1510 = vrot.lane.b32.xlu1 %v1327_v39, %s4134_s23  ;;  %v3957_v8 = vld [vmem:[%s5540_s4 + $0x98] sm:$0xff]  }
 0x20c   : > { %v1352_v31 = vpop.permute.xlu0 %1351 }
 0x20d   : > { %2501 = vmatmul.mubr.bf16.gmra.mxu0 %v4500_v23  ;;  %1354 = vst.msk [vmem:[#allocation4 + $0x8] sm:$0xff] %vm1289_vm10, %v1352_v31  ;;  %v2704_v31 = vld [vmem:[#allocation5 + $0x2] sm:$0xff] }
 0x20e   : > { %3696 = vmatprep.mubr.msk.bf16.mxu0 %vm595_vm0, %v4496_v22 }
 0x20f   : > { %1516 = vrot.lane.b32.xlu0 %v1514_v47, %s4134_s23  ;;  %1445 = vrot.lane.b32.xlu1 %v4771_v15, %s4134_s23  ;;  %v3961_v15 = vld [vmem:[%s5540_s4 + $0x88] sm:$0xff]  }
 0x210   : > { %v1358_v3 = vpop.permute.xlu1 %1357  ;;  %v1287_v11 = vpop.permute.xlu0 %1286 }
 0x211   : > { %1360 = vst.msk [vmem:[#allocation4 + $0x30] sm:$0xff] %vm1289_vm10, %v1358_v3  ;;  %1290 = vst.msk [vmem:[#allocation4] sm:$0xff] %vm1289_vm10, %v1287_v11 }
 0x213   : > { %1451 = vrot.lane.b32.xlu0 %v4814_v41, %s4134_s23  ;;  %1522 = vrot.lane.b32.xlu1 %v1520_v2, %s4134_s23  ;;  %v2939_v2 = vld [vmem:[#allocation5 + $0x90] sm:$0xff] }
 0x214   : > { %v1294_v23 = vpop.permute.xlu1 %1293  ;;  %v1543_v22 = vld [vmem:[#allocation4 + $0x8] sm:$0xff] }
 0x215   : > { %2509 = vmatmul.mubr.bf16.gmra.mxu0 %v4521_v44  ;;  %1296 = vst.msk [vmem:[#allocation4 + $0x28] sm:$0xff] %vm1289_vm10, %v1294_v23 }
 0x216   : > { %3697 = vmatprep.mubr.msk.bf16.mxu0 %vm595_vm0, %v4517_v43  ;;  %v3951_v43 = vld [vmem:[%s5540_s4 + $0xb0] sm:$0xff]  }
 0x217   : > { %1457 = vrot.lane.b32.xlu1 %v1538_v46, %s4134_s23  ;;  %2658 = vrot.lane.b32.xlu0 %v2656_v51, %s4132_s29 }
 0x218   : > { %v1548_v35 = vld [vmem:[#allocation4 + $0x30] sm:$0xff]  ;;  %v1542_v38 = vld [vmem:[#allocation4] sm:$0xff] }
 0x219   : > { %v1583_v36 = vpack.c.bf16 %v1548_v35, %v1543_v22 }
 0x21b   : > { %1934 = vmatprep.mubr.bf16.mxu1 %v1583_v36  ;;  %2706 = vrot.lane.b32.xlu0 %v2704_v31, %s4131_s26 }
 0x21c   : > { %v1547_v40 = vld [vmem:[#allocation4 + $0x28] sm:$0xff]  ;;  %2941 = vrot.lane.b32.xlu1 %v2939_v2, %s5570_s19 }
 0x21d   : > { %2517 = vmatmul.mubr.bf16.gmra.mxu0 %v4536_v57  ;;  %v1582_v44 = vpack.c.bf16 %v1547_v40, %v1542_v38  ;;  %v3952_v57 = vld [vmem:[%s5540_s4 + $0xe8] sm:$0xff]  }
 0x21f   : > { %1935 = vmatmul.mubr.bf16.vlgmr.msra.gmra.mxu1 %v1582_v44 }
 0x220   : > { %3765 = vmatpush3.bf16.msra.mxu1 %v3949_v55 }
 0x221   : > { %3766 = vmatprep.subr.bf16.mxu1 %v3950_v56 }
 0x224   : > { %3767 = vmatpush3.bf16.msra.mxu1 %v3951_v43 }
 0x225   : > { %3768 = vmatprep.subr.bf16.mxu1 %v3952_v57 }
 0x228   : > { %v1364_v61 = vpop.permute.xlu0 %1363  ;;  %3769 = vmatpush3.bf16.msra.mxu1 %v3953_v59 }
 0x229   : > { %1366 = vst.msk [vmem:[#allocation4 + $0x58] sm:$0xff] %vm1289_vm10, %v1364_v61  ;;  %3770 = vmatprep.subr.bf16.mxu1 %v3954_v60 }
 0x22c   : > { %v1300_v6 = vpop.permute.xlu0 %1299  ;;  %3771 = vmatpush3.bf16.msra.mxu1 %v3955_v62 }
 0x22d   : > { %v1370_v7 = vpop.permute.xlu1 %1369  ;;  %1302 = vst.msk [vmem:[#allocation4 + $0x50] sm:$0xff] %vm1289_vm10, %v1300_v6  ;;  %3772 = vmatprep.subr.bf16.mxu1 %v3956_v5 }
 0x22e   : > { %1372 = vst.msk [vmem:[#allocation4 + $0x80] sm:$0xff] %vm1289_vm10, %v1370_v7 }
 0x230   : > { %3773 = vmatpush3.bf16.msra.mxu1 %v3957_v8  ;;  %v1553_v13 = vld [vmem:[#allocation4 + $0x58] sm:$0xff] }
 0x231   : > { %v1306_v63 = vpop.permute.xlu1 %1305  ;;  %3774 = vmatprep.subr.bf16.mxu1 %v3958_v9 }
 0x232   : > { %1308 = vst.msk [vmem:[#allocation4 + $0x78] sm:$0xff] %vm1289_vm10, %v1306_v63 }
 0x234   : > { %3775 = vmatpush3.bf16.msra.mxu1 %v3959_v4  ;;  %v1552_v18 = vld [vmem:[#allocation4 + $0x50] sm:$0xff] }
 0x235   : > { %v1558_v14 = vld [vmem:[#allocation4 + $0x80] sm:$0xff]  ;;  %3776 = vmatprep.subr.bf16.mxu1 %v3960_v12 }
 0x236   : > { %v1588_v16 = vpack.c.bf16 %v1558_v14, %v1553_v13 }
 0x238   : > { %1942 = vmatprep.mubr.bf16.mxu1 %v1588_v16  ;;  %3777 = vmatpush3.bf16.msra.mxu1 %v3961_v15 }
 0x239   : > { %v1557_v19 = vld [vmem:[#allocation4 + $0x78] sm:$0xff]  ;;  %3778 = vmatprep.subr.bf16.mxu1 %v3962_v17 }
 0x23a   : > { %v1587_v21 = vpack.c.bf16 %v1557_v19, %v1552_v18 }
 0x23c   : > { %1943 = vmatmul.mubr.bf16.gmra.mxu1 %v1587_v21 }
 0x23d   : > { %3779 = vmatpush3.bf16.msra.mxu1 %v3963_v20 }
 0x245   : > { %v1376_v24 = vpop.permute.xlu0 %1375 }
 0x246   : > { %1378 = vst.msk [vmem:[#allocation4 + $0xa8] sm:$0xff] %vm1289_vm10, %v1376_v24 }
 0x248   : > { %v1382_v26 = vpop.permute.xlu1 %1381 }
 0x249   : > { %v1312_v25 = vpop.permute.xlu0 %1311  ;;  %1384 = vst.msk [vmem:[#allocation4 + $0xd0] sm:$0xff] %vm1289_vm10, %v1382_v26 }
 0x24a   : > { %1314 = vst.msk [vmem:[#allocation4 + $0xa0] sm:$0xff] %vm1289_vm10, %v1312_v25  ;;  %v3007_v25 = vld [vmem:[#allocation5 + $0x92] sm:$0xff] }
 0x24b   : > { %3008 = vst.msk [vmem:[#allocation6 + $0x78] sm:$0xff] %vm595_vm0, %v3007_v25 }
 0x24c   : > { %v1318_v27 = vpop.permute.xlu1 %1317 }
 0x24d   : > { %1320 = vst.msk [vmem:[#allocation4 + $0xc8] sm:$0xff] %vm1289_vm10, %v1318_v27  ;;  %v1563_v28 = vld [vmem:[#allocation4 + $0xa8] sm:$0xff] }
 0x250   : > { %v1568_v29 = vld [vmem:[#allocation4 + $0xd0] sm:$0xff] }
 0x251   : > { %v1593_v30 = vpack.c.bf16 %v1568_v29, %v1563_v28  ;;  %v1562_v32 = vld [vmem:[#allocation4 + $0xa0] sm:$0xff] }
 0x253   : > { %1950 = vmatprep.mubr.bf16.mxu1 %v1593_v30 }
 0x254   : > { %v1567_v34 = vld [vmem:[#allocation4 + $0xc8] sm:$0xff] }
 0x255   : > { %v1592_v33 = vpack.c.bf16 %v1567_v34, %v1562_v32 }
 0x257   : > { %1951 = vmatmul.mubr.bf16.gmra.mxu1 %v1592_v33 }
 0x260   : > { %v1388_v37 = vpop.permute.xlu0 %1387 }
 0x261   : > { %1390 = vst.msk [vmem:[#allocation4 + $0xf8] sm:$0xff] %vm1289_vm10, %v1388_v37  ;;  %v3698_v37 = vld [vmem:[%s5546_s10] ss:$0 sm:$0xff] }
 0x264   : > { %v1324_v39 = vpop.permute.xlu0 %1323  ;;  %v1394_v41 = vpop.permute.xlu1 %1393 }
 0x265   : > { %1326 = vst.msk [vmem:[#allocation4 + $0xf0] sm:$0xff] %vm1289_vm10, %v1324_v39  ;;  %1396 = vst.msk [vmem:[#allocation4 + $0x120] sm:$0xff] %vm1289_vm10, %v1394_v41  ;;  %v5000_v41 = vld [vmem:[%s5547_s11] ss:$0 sm:$0xff] }
 0x268   : > { %v1481_v42 = vpop.permute.xlu0 %1480  ;;  %v1330_v45 = vpop.permute.xlu1 %1329  ;;  %v1573_v48 = vld [vmem:[#allocation4 + $0xf8] sm:$0xff] }
 0x269   : > { %1483 = vst.msk [vmem:[#allocation4 + $0x18] sm:$0xff] %vm1289_vm10, %v1481_v42  ;;  %1332 = vst.msk [vmem:[#allocation4 + $0x118] sm:$0xff] %vm1289_vm10, %v1330_v45 }
 0x26c   : > { %v1416_v46 = vpop.permute.xlu0 %1415  ;;  %v1578_v49 = vld [vmem:[#allocation4 + $0x120] sm:$0xff]  ;;  %v1572_v54 = vld [vmem:[#allocation4 + $0xf0] sm:$0xff] }
 0x26d   : > { %v1487_v47 = vpop.permute.xlu1 %1486  ;;  %1418 = vst.msk [vmem:[#allocation4 + $0x10] sm:$0xff] %vm1289_vm10, %v1416_v46  ;;  %v1598_v50 = vpack.c.bf16 %v1578_v49, %v1573_v48 }
 0x26e   : > { %1489 = vst.msk [vmem:[#allocation4 + $0x40] sm:$0xff] %vm1289_vm10, %v1487_v47 }
 0x26f   : > { %1958 = vmatprep.mubr.bf16.mxu1 %v1598_v50 }
 0x270   : > { %v1577_v10 = vld [vmem:[#allocation4 + $0x118] sm:$0xff] }
 0x271   : > { %v1493_v52 = vpop.permute.xlu0 %1492  ;;  %v1422_v53 = vpop.permute.xlu1 %1421  ;;  %v1597_v0 = vpack.c.bf16 %v1577_v10, %v1572_v54  ;;  %v1545_v23 = vld [vmem:[#allocation4 + $0x18] sm:$0xff] }
 0x272   : > { %1495 = vst.msk [vmem:[#allocation4 + $0x68] sm:$0xff] %vm1289_vm10, %v1493_v52  ;;  %1424 = vst.msk [vmem:[#allocation4 + $0x38] sm:$0xff] %vm1289_vm10, %v1422_v53 }
 0x273   : > { %1959 = vmatmul.mubr.bf16.gmra.mxu1 %v1597_v0 }
 0x274   : > { %v1544_v40 = vld [vmem:[#allocation4 + $0x10] sm:$0xff] }
 0x275   : > { %v1428_v3 = vpop.permute.xlu0 %1427  ;;  %v1499_v11 = vpop.permute.xlu1 %1498  ;;  %v1550_v22 = vld [vmem:[#allocation4 + $0x40] sm:$0xff] }
 0x276   : > { %1430 = vst.msk [vmem:[#allocation4 + $0x60] sm:$0xff] %vm1289_vm10, %v1428_v3  ;;  %1501 = vst.msk [vmem:[#allocation4 + $0x90] sm:$0xff] %vm1289_vm10, %v1499_v11  ;;  %v1585_v35 = vpack.c.bf16 %v1550_v22, %v1545_v23 }
 0x278   : > { %1999 = vmatprep.mubr.bf16.mxu1 %v1585_v35 }
 0x279   : > { %v1505_v36 = vpop.permute.xlu0 %1504  ;;  %v1434_v38 = vpop.permute.xlu1 %1433  ;;  %v1549_v55 = vld [vmem:[#allocation4 + $0x38] sm:$0xff]  ;;  %v1555_v57 = vld [vmem:[#allocation4 + $0x68] sm:$0xff] }
 0x27a   : > { %1507 = vst.msk [vmem:[#allocation4 + $0xb8] sm:$0xff] %vm1289_vm10, %v1505_v36  ;;  %1436 = vst.msk [vmem:[#allocation4 + $0x88] sm:$0xff] %vm1289_vm10, %v1434_v38  ;;  %v1584_v44 = vpack.c.bf16 %v1549_v55, %v1544_v40 }
 0x27c   : > { %2000 = vmatmul.mubr.bf16.vlgmr.msra.gmra.mxu1 %v1584_v44 }
 0x27d   : > { %v1440_v56 = vpop.permute.xlu0 %1439  ;;  %v1511_v43 = vpop.permute.xlu1 %1510  ;;  %v1560_v59 = vld [vmem:[#allocation4 + $0x90] sm:$0xff]  ;;  %v1554_v5 = vld [vmem:[#allocation4 + $0x60] sm:$0xff] }
 0x27e   : > { %1442 = vst.msk [vmem:[#allocation4 + $0xb0] sm:$0xff] %vm1289_vm10, %v1440_v56  ;;  %1513 = vst.msk [vmem:[#allocation4 + $0xe0] sm:$0xff] %vm1289_vm10, %v1511_v43  ;;  %v1590_v60 = vpack.c.bf16 %v1560_v59, %v1555_v57 }
 0x280   : > { %2007 = vmatprep.mubr.bf16.mxu1 %v1590_v60 }
 0x281   : > { %v1517_v61 = vpop.permute.xlu0 %1516  ;;  %v1446_v62 = vpop.permute.xlu1 %1445  ;;  %v1559_v6 = vld [vmem:[#allocation4 + $0x88] sm:$0xff]  ;;  %v1565_v63 = vld [vmem:[#allocation4 + $0xb8] sm:$0xff] }
 0x282   : > { %1519 = vst.msk [vmem:[#allocation4 + $0x108] sm:$0xff] %vm1289_vm10, %v1517_v61  ;;  %1448 = vst.msk [vmem:[#allocation4 + $0xd8] sm:$0xff] %vm1289_vm10, %v1446_v62  ;;  %v1589_v7 = vpack.c.bf16 %v1559_v6, %v1554_v5 }
 0x284   : > { %2008 = vmatmul.mubr.bf16.gmra.mxu1 %v1589_v7 }
 0x285   : > { %v1452_v8 = vpop.permute.xlu0 %1451  ;;  %v1523_v9 = vpop.permute.xlu1 %1522  ;;  %v1570_v4 = vld [vmem:[#allocation4 + $0xe0] sm:$0xff]  ;;  %v1564_v14 = vld [vmem:[#allocation4 + $0xb0] sm:$0xff] }
 0x286   : > { %1454 = vst.msk [vmem:[#allocation4 + $0x100] sm:$0xff] %vm1289_vm10, %v1452_v8  ;;  %1525 = vst.msk [vmem:[#allocation4 + $0x130] sm:$0xff] %vm1289_vm10, %v1523_v9  ;;  %v1595_v12 = vpack.c.bf16 %v1570_v4, %v1565_v63 }
 0x288   : > { %2015 = vmatprep.mubr.bf16.mxu1 %v1595_v12 }
 0x289   : > { %v1458_v13 = vpop.permute.xlu1 %1457  ;;  %v1569_v15 = vld [vmem:[#allocation4 + $0xd8] sm:$0xff]  ;;  %v1575_v17 = vld [vmem:[#allocation4 + $0x108] sm:$0xff] }
 0x28a   : > { %1460 = vst.msk [vmem:[#allocation4 + $0x128] sm:$0xff] %vm1289_vm10, %v1458_v13  ;;  %v1594_v16 = vpack.c.bf16 %v1569_v15, %v1564_v14 }
 0x28c   : > { %2016 = vmatmul.mubr.bf16.gmra.mxu1 %v1594_v16 }
 0x28d   : > { %v1580_v18 = vld [vmem:[#allocation4 + $0x130] sm:$0xff]  ;;  %v1574_v20 = vld [vmem:[#allocation4 + $0x100] sm:$0xff] }
 0x28e   : > { %v1600_v19 = vpack.c.bf16 %v1580_v18, %v1575_v17 }
 0x290   : > { %2023 = vmatprep.mubr.bf16.mxu1 %v1600_v19 }
 0x291   : > { %v1579_v21 = vld [vmem:[#allocation4 + $0x128] sm:$0xff] }
 0x292   : > { %v1599_v24 = vpack.c.bf16 %v1579_v21, %v1574_v20  ;;  %v2659_v21 = vpop.permute.xlu0 %2658 }
 0x294   : > { %2024 = vmatmul.mubr.bf16.gmra.mxu1 %v1599_v24 }
 0x29c   : > { %v4978_v26 = vpop.f32.mrf.mxu0 }
 0x29e   : > { %v4980_v27 = vpop.f32.mrf.mxu0 }
 0x2a0   : > { %v4982_v28 = vpop.f32.mrf.mxu0 }
 0x2a2   : > { %v4984_v29 = vpop.f32.mrf.mxu0 }
 0x2bd   : > { %v4986_v30 = vpop.f32.mrf.mxu0 }
 0x2bf   : > { %v4988_v32 = vpop.f32.mrf.mxu0 }
 0x2c1   : > { %v4990_v34 = vpop.f32.mrf.mxu0 }
 0x2c3   : > { %v4992_v33 = vpop.f32.mrf.mxu0 }
 0x2c5   : > { %v2494_v39 = vpop.f32.mrf.mxu0 }
 0x2c6   : > { %v2532_v42 = vmul.f32 %v3698_v37, %v2494_v39 }
 0x2c7   : > { %v2496_v45 = vpop.f32.mrf.mxu0 }
 0x2c8   : > { %v5003_v46 = vadd.f32 %v5000_v41, %v2532_v42 }
 0x2c9   : > { %v2497_v47 = vpop.f32.mrf.mxu0 }
 0x2ca   : > { %v2555_v48 = vsub.f32 0.0, %v5003_v46  ;;  %v2533_v49 = vmul.f32 %v3698_v37, %v2497_v47 }
 0x2cb   : > { %v2499_v50 = vpop.f32.mrf.mxu0 }
 0x2cc   : > { %v2563_v51 = vmul.f32 1.442695, %v2555_v48  ;;  %v5007_v52 = vadd.f32 %v5000_v41, %v2533_v49 }
 0x2cd   : > { %v2502_v53 = vpop.f32.mrf.mxu0 }
 0x2ce   : > { %4010 = vpow2.f32 %v2563_v51  ;;  %v2556_v54 = vsub.f32 0.0, %v5007_v52  ;;  %v2534_v10 = vmul.f32 %v3698_v37, %v2502_v53  ;;  %v2640_v51 = vld [vmem:[#allocation5] sm:$0xff] }
 0x2cf   : > { %v2504_v0 = vpop.f32.mrf.mxu0  ;;  %2641 = vst.msk [vmem:[#allocation6] sm:$0xff] %vm595_vm0, %v2640_v51 }
 0x2d0   : > { %v2565_v31 = vmul.f32 1.442695, %v2556_v54  ;;  %v5011_v2 = vadd.f32 %v5000_v41, %v2534_v10  ;;  %2661 = vst.msk [vmem:[#allocation6] sm:$0xff] %vm623_vm1, %v2659_v21  ;;  %v2707_v0 = vpop.permute.xlu0 %2706 }
 0x2d1   : > { %v2505_v3 = vpop.f32.mrf.mxu0  ;;  %2709 = vst.msk [vmem:[#allocation6] sm:$0xff] %vm672_vm2, %v2707_v0 }
 0x2d2   : > { %4012 = vpow2.f32 %v2565_v31  ;;  %v2557_v11 = vsub.f32 0.0, %v5011_v2  ;;  %v2535_v23 = vmul.f32 %v3698_v37, %v2505_v3 }
 0x2d3   : > { %v2507_v22 = vpop.f32.mrf.mxu0 }
 0x2d4   : > { %v2567_v35 = vmul.f32 1.442695, %v2557_v11  ;;  %v5015_v36 = vadd.f32 %v5000_v41, %v2535_v23 }
 0x2d5   : > { %v2510_v38 = vpop.f32.mrf.mxu0 }
 0x2d6   : > { %4014 = vpow2.f32 %v2567_v35  ;;  %v2558_v40 = vsub.f32 0.0, %v5015_v36  ;;  %v2536_v55 = vmul.f32 %v3698_v37, %v2510_v38 }
 0x2d7   : > { %v2512_v44 = vpop.f32.mrf.mxu0 }
 0x2d8   : > { %v2569_v56 = vmul.f32 1.442695, %v2558_v40  ;;  %v5019_v43 = vadd.f32 %v5000_v41, %v2536_v55 }
 0x2d9   : > { %v2513_v57 = vpop.f32.mrf.mxu0 }
 0x2da   : > { %4016 = vpow2.f32 %v2569_v56  ;;  %v2559_v59 = vsub.f32 0.0, %v5019_v43  ;;  %v2537_v60 = vmul.f32 %v3698_v37, %v2513_v57 }
 0x2db   : > { %v4011_v61 = vpop.eup %4010  ;;  %v2515_v62 = vpop.f32.mrf.mxu0 }
 0x2dc   : > { %v2579_v5 = vadd.f32 1.0, %v4011_v61  ;;  %v2571_v6 = vmul.f32 1.442695, %v2559_v59  ;;  %v5023_v7 = vadd.f32 %v5000_v41, %v2537_v60 }
 0x2dd   : > { %v2518_v8 = vpop.f32.mrf.mxu0 }
 0x2de   : > { %4018 = vrcp.f32 %v2579_v5  ;;  %v2560_v9 = vsub.f32 0.0, %v5023_v7  ;;  %v2538_v63 = vmul.f32 %v3698_v37, %v2518_v8 }
 0x2df   : > { %v4013_v4 = vpop.eup %4012  ;;  %4020 = vpow2.f32 %v2571_v6  ;;  %v2520_v12 = vpop.f32.mrf.mxu0 }
 0x2e0   : > { %v2580_v13 = vadd.f32 1.0, %v4013_v4  ;;  %v2573_v14 = vmul.f32 1.442695, %v2560_v9  ;;  %v5027_v15 = vadd.f32 %v5000_v41, %v2538_v63  ;;  %v3740_v16 = vpop.f32.mrf.mxu1 }
 0x2e1   : > { %v2521_v17 = vpop.f32.mrf.mxu0 }
 0x2e2   : > { %4022 = vrcp.f32 %v2580_v13  ;;  %v2561_v18 = vsub.f32 0.0, %v5027_v15  ;;  %v2539_v19 = vmul.f32 %v3698_v37, %v2521_v17  ;;  %v3741_v20 = vpop.f32.mrf.mxu1 }
 0x2e3   : > { %v4015_v24 = vpop.eup %4014  ;;  %4024 = vpow2.f32 %v2573_v14  ;;  %v5030_v25 = vadd.f32 %v3741_v20, %v3740_v16  ;;  %v2523_v39 = vpop.f32.mrf.mxu0 }
 0x2e4   : > { %v2581_v42 = vadd.f32 1.0, %v4015_v24  ;;  %v2575_v45 = vmul.f32 1.442695, %v2561_v18  ;;  %v5033_v47 = vadd.f32 %v5000_v41, %v2539_v19  ;;  %v3743_v48 = vpop.f32.mrf.mxu1 }
 0x2e6   : > { %4026 = vrcp.f32 %v2581_v42  ;;  %v2562_v49 = vsub.f32 0.0, %v5033_v47  ;;  %v3744_v50 = vpop.f32.mrf.mxu1 }
 0x2e7   : > { %v4017_v53 = vpop.eup %4016  ;;  %4028 = vpow2.f32 %v2575_v45  ;;  %v5036_v37 = vadd.f32 %v3744_v50, %v3743_v48 }
 0x2e8   : > { %v2582_v54 = vadd.f32 1.0, %v4017_v53  ;;  %v2577_v10 = vmul.f32 1.442695, %v2562_v49 }
 0x2ea   : > { %4030 = vrcp.f32 %v2582_v54  ;;  %v3964_v54 = vld [vmem:[%s5543_s7] sm:$0xff]  }
 0x2eb   : > { %v4019_v41 = vpop.eup %4018  ;;  %4032 = vpow2.f32 %v2577_v10  ;;  %3854 = vmatprep.mubr.msk.bf16.mxu1 %vm1230_vm8, %v3964_v54 }
 0x2ec   : > { %v4021_v31 = vpop.eup %4020  ;;  %v2595_v3 = vmul.f32 %v4019_v41, %v5003_v46 }
 0x2ed   : > { %v2583_v11 = vadd.f32 1.0, %v4021_v31 }
 0x2ee   : > { %2625 = vst.msk [vmem:[#allocation5 + $0x11] sm:$0xff] %vm595_vm0, %v2595_v3 }
 0x2ef   : > { %v4023_v23 = vpop.eup %4022  ;;  %4034 = vrcp.f32 %v2583_v11 }
 0x2f0   : > { %v4025_v22 = vpop.eup %4024  ;;  %v2596_v35 = vmul.f32 %v4023_v23, %v5007_v52 }
 0x2f1   : > { %v2584_v38 = vadd.f32 1.0, %v4025_v22 }
 0x2f2   : > { %2627 = vst.msk [vmem:[#allocation5 + $0x21] sm:$0xff] %vm595_vm0, %v2596_v35 }
 0x2f3   : > { %v4027_v40 = vpop.eup %4026  ;;  %4036 = vrcp.f32 %v2584_v38 }
 0x2f4   : > { %v4029_v55 = vpop.eup %4028  ;;  %v2597_v44 = vmul.f32 %v4027_v40, %v5011_v2 }
 0x2f5   : > { %v2585_v56 = vadd.f32 1.0, %v4029_v55  ;;  %v2752_v57 = vld [vmem:[#allocation5 + $0x10] sm:$0xff] }
 0x2f6   : > { %v2662_v59 = vld [vmem:[#allocation5 + $0x11] sm:$0xff]  ;;  %2629 = vst.msk [vmem:[#allocation5 + $0x31] sm:$0xff] %vm595_vm0, %v2597_v44  ;;  %2754 = vrot.lane.b32.xlu0 %v2752_v57, %s5571_s20  ;;  %2643 = vst.msk [vmem:[#allocation6 + $0x10] sm:$0xff] %vm595_vm0, %v2752_v57 }
 0x2f7   : > { %2664 = vrot.lane.b32.xlu1 %v2662_v59, %s4132_s29  ;;  %v4031_v46 = vpop.eup %4030  ;;  %4038 = vrcp.f32 %v2585_v56  ;;  %v2710_v62 = vld [vmem:[#allocation5 + $0x12] sm:$0xff]  ;;  %v5148_v56 = vld [vmem:[%s5541_s5] ss:$0 sm:$0xff] }
 0x2f8   : > { %v4033_v52 = vpop.eup %4032  ;;  %v2598_v60 = vmul.f32 %v4031_v46, %v5015_v36 }
 0x2f9   : > { %v2586_v61 = vadd.f32 1.0, %v4033_v52  ;;  %v2758_v5 = vld [vmem:[#allocation5 + $0x20] sm:$0xff] }
 0x2fa   : > { %v2854_v2 = vld [vmem:[#allocation5 + $0x22] sm:$0xff]  ;;  %2631 = vst.msk [vmem:[#allocation5 + $0x41] sm:$0xff] %vm595_vm0, %v2598_v60  ;;  %2802 = vrot.lane.b32.xlu0 %v2662_v59, %s4134_s23  ;;  %2645 = vst.msk [vmem:[#allocation6 + $0x20] sm:$0xff] %vm595_vm0, %v2758_v5  ;;  %v5157_v52 = vld [vmem:[%s5542_s6] ss:$0 sm:$0xff] }
 0x2fb   : > { %2712 = vrot.lane.b32.xlu1 %v2710_v62, %s4131_s26  ;;  %2994 = vst.msk [vmem:[#allocation6 + $0x8] sm:$0xff] %vm595_vm0, %v2854_v2  ;;  %4040 = vrcp.f32 %v2586_v61  ;;  %v2806_v12 = vld [vmem:[#allocation5 + $0x21] sm:$0xff] }
 0x2fc   : > { %v4035_v6 = vpop.eup %4034  ;;  %v5101_v45 = vpop.f32.mrf.mxu1 }
 0x2fd   : > { %v2599_v8 = vmul.f32 %v4035_v6, %v5019_v43  ;;  %v2902_v9 = vld [vmem:[#allocation5 + $0x30] sm:$0xff] }
 0x2fe   : > { %v2722_v36 = vld [vmem:[#allocation5 + $0x32] sm:$0xff]  ;;  %2850 = vrot.lane.b32.xlu0 %v2710_v62, %s5572_s21  ;;  %2647 = vst.msk [vmem:[#allocation6 + $0x30] sm:$0xff] %vm595_vm0, %v2902_v9 }
 0x2ff   : > { %2760 = vrot.lane.b32.xlu1 %v2758_v5, %s5571_s20  ;;  %2996 = vst.msk [vmem:[#allocation6 + $0x18] sm:$0xff] %vm595_vm0, %v2722_v36  ;;  %2633 = vst.msk [vmem:[#allocation5 + $0x51] sm:$0xff] %vm595_vm0, %v2599_v8  ;;  %v2951_v21 = vld [vmem:[#allocation5 + $0x31] sm:$0xff] }
 0x300   : > { %v4037_v63 = vpop.eup %4036 }
 0x301   : > { %v2600_v4 = vmul.f32 %v4037_v63, %v5023_v7  ;;  %v2770_v13 = vld [vmem:[#allocation5 + $0x40] sm:$0xff] }
 0x302   : > { %v2866_v14 = vld [vmem:[#allocation5 + $0x42] sm:$0xff]  ;;  %2898 = vrot.lane.b32.xlu0 %v2758_v5, %s5570_s19  ;;  %2649 = vst.msk [vmem:[#allocation6 + $0x40] sm:$0xff] %vm595_vm0, %v2770_v13 }
 0x303   : > { %2808 = vrot.lane.b32.xlu1 %v2806_v12, %s4134_s23  ;;  %2998 = vst.msk [vmem:[#allocation6 + $0x28] sm:$0xff] %vm595_vm0, %v2866_v14  ;;  %2635 = vst.msk [vmem:[#allocation5 + $0x61] sm:$0xff] %vm595_vm0, %v2600_v4  ;;  %v2818_v48 = vld [vmem:[#allocation5 + $0x41] sm:$0xff] }
 0x304   : > { %v4039_v43 = vpop.eup %4038 }
 0x305   : > { %v2601_v16 = vmul.f32 %v4039_v43, %v5027_v15 }
 0x306   : > { %2947 = vrot.lane.b32.xlu0 %v2806_v12, %s5573_s2  ;;  %v2914_v7 = vld [vmem:[#allocation5 + $0x50] sm:$0xff] }
 0x307   : > { %2856 = vrot.lane.b32.xlu1 %v2854_v2, %s5572_s21  ;;  %v2734_v17 = vld [vmem:[#allocation5 + $0x52] sm:$0xff]  ;;  %2637 = vst.msk [vmem:[#allocation5 + $0x71] sm:$0xff] %vm595_vm0, %v2601_v16  ;;  %2651 = vst.msk [vmem:[#allocation6 + $0x50] sm:$0xff] %vm595_vm0, %v2914_v7 }
 0x308   : > { %3000 = vst.msk [vmem:[#allocation6 + $0x38] sm:$0xff] %vm595_vm0, %v2734_v17  ;;  %v4041_v18 = vpop.eup %4040  ;;  %v2963_v53 = vld [vmem:[#allocation5 + $0x51] sm:$0xff] }
 0x309   : > { %v2602_v19 = vmul.f32 %v4041_v18, %v5033_v47  ;;  %v5105_v47 = vpop.f32.mrf.mxu1 }
 0x30a   : > { %2670 = vrot.lane.b32.xlu0 %v2806_v12, %s4132_s29  ;;  %v2782_v15 = vld [vmem:[#allocation5 + $0x60] sm:$0xff] }
 0x30b   : > { %2904 = vrot.lane.b32.xlu1 %v2902_v9, %s5570_s19  ;;  %v5077_v20 = vld [vmem:[#allocation5 + $0x62] sm:$0xff]  ;;  %2639 = vst.msk [vmem:[#allocation5 + $0x81] sm:$0xff] %vm595_vm0, %v2602_v19  ;;  %2653 = vst.msk [vmem:[#allocation6 + $0x60] sm:$0xff] %vm595_vm0, %v2782_v15  ;;  %v5109_v49 = vpop.f32.mrf.mxu1 }
 0x30c   : > { %3002 = vst.msk [vmem:[#allocation6 + $0x48] sm:$0xff] %vm595_vm0, %v5077_v20  ;;  %v2830_v23 = vld [vmem:[#allocation5 + $0x61] sm:$0xff] }
 0x30d   : > { %v5113_v50 = vpop.f32.mrf.mxu1 }
 0x30e   : > { %2718 = vrot.lane.b32.xlu0 %v2854_v2, %s4131_s26  ;;  %v5085_v24 = vld [vmem:[#allocation5 + $0x70] sm:$0xff]  ;;  %v3751_v19 = vadd.f32 %v5113_v50, %v5109_v49 }
 0x30f   : > { %2953 = vrot.lane.b32.xlu1 %v2951_v21, %s5573_s2  ;;  %v5087_v39 = vld [vmem:[#allocation5 + $0x72] sm:$0xff]  ;;  %2655 = vst.msk [vmem:[#allocation6 + $0x70] sm:$0xff] %vm595_vm0, %v5085_v24 }
 0x310   : > { %3004 = vst.msk [vmem:[#allocation6 + $0x58] sm:$0xff] %vm595_vm0, %v5087_v39  ;;  %v2975_v62 = vld [vmem:[#allocation5 + $0x71] sm:$0xff] }
 0x312   : > { %2766 = vrot.lane.b32.xlu0 %v2902_v9, %s5571_s20  ;;  %v5095_v42 = vld [vmem:[#allocation5 + $0x82] sm:$0xff] }
 0x313   : > { %2676 = vrot.lane.b32.xlu1 %v2951_v21, %s4132_s29  ;;  %3006 = vst.msk [vmem:[#allocation6 + $0x68] sm:$0xff] %vm595_vm0, %v5095_v42  ;;  %v2794_v18 = vld [vmem:[#allocation5 + $0x80] sm:$0xff] }
 0x314   : > { %v2842_v50 = vld [vmem:[#allocation5 + $0x81] sm:$0xff] }
 0x316   : > { %2814 = vrot.lane.b32.xlu0 %v2951_v21, %s4134_s23 }
 0x317   : > { %2724 = vrot.lane.b32.xlu1 %v2722_v36, %s4131_s26  ;;  %v3752_v51 = vpop.f32.mrf.mxu1 }
 0x319   : > { %v3753_v10 = vpop.f32.mrf.mxu1 }
 0x31a   : > { %2862 = vrot.lane.b32.xlu0 %v2722_v36, %s5572_s21 }
 0x31b   : > { %2772 = vrot.lane.b32.xlu1 %v2770_v13, %s5571_s20  ;;  %v5123_v0 = vpop.f32.mrf.mxu1 }
 0x31d   : > { %v3756_v41 = vpop.f32.mrf.mxu1 }
 0x31e   : > { %2910 = vrot.lane.b32.xlu0 %v2770_v13, %s5570_s19  ;;  %v3754_v13 = vadd.f32 %v3753_v10, %v3752_v51  ;;  %v3757_v21 = vadd.f32 %v3756_v41, %v5123_v0  ;;  %v3748_v51 = vadd.f32 %v5105_v47, %v5101_v45 }
 0x31f   : > { %2820 = vrot.lane.b32.xlu1 %v2818_v48, %s4134_s23 }
 0x322   : > { %2959 = vrot.lane.b32.xlu0 %v2818_v48, %s5573_s2 }
 0x323   : > { %2868 = vrot.lane.b32.xlu1 %v2866_v14, %s5572_s21 }
 0x326   : > { %2682 = vrot.lane.b32.xlu0 %v2818_v48, %s4132_s29 }
 0x327   : > { %2916 = vrot.lane.b32.xlu1 %v2914_v7, %s5570_s19 }
 0x32a   : > { %2730 = vrot.lane.b32.xlu0 %v2866_v14, %s4131_s26 }
 0x32b   : > { %2965 = vrot.lane.b32.xlu1 %v2963_v53, %s5573_s2 }
 0x32e   : > { %2778 = vrot.lane.b32.xlu0 %v2914_v7, %s5571_s20 }
 0x32f   : > { %2688 = vrot.lane.b32.xlu1 %v2963_v53, %s4132_s29 }
 0x332   : > { %2826 = vrot.lane.b32.xlu0 %v2963_v53, %s4134_s23 }
 0x333   : > { %2736 = vrot.lane.b32.xlu1 %v2734_v17, %s4131_s26  ;;  %v5129_v31 = vpop.f32.mrf.mxu1 }
 0x335   : > { %v5131_v3 = vpop.f32.mrf.mxu1 }
 0x336   : > { %2874 = vrot.lane.b32.xlu0 %v2734_v17, %s5572_s21 }
 0x337   : > { %2784 = vrot.lane.b32.xlu1 %v2782_v15, %s5571_s20  ;;  %v5135_v11 = vpop.f32.mrf.mxu1 }
 0x339   : > { %v5137_v22 = vpop.f32.mrf.mxu1 }
 0x33a   : > { %2922 = vrot.lane.b32.xlu0 %v2782_v15, %s5570_s19 }
 0x33b   : > { %2832 = vrot.lane.b32.xlu1 %v2830_v23, %s4134_s23 }
 0x33c   : > { %v3780_v35 = vpop.f32.mrf.mxu1 }
 0x33e   : > { %v3781_v38 = vpop.f32.mrf.mxu1  ;;  %2971 = vrot.lane.b32.xlu0 %v2830_v23, %s5573_s2 }
 0x33f   : > { %2880 = vrot.lane.b32.xlu1 %v5077_v20, %s5572_s21  ;;  %v3782_v40 = vadd.f32 %v3781_v38, %v3780_v35 }
 0x340   : > { %v3783_v55 = vpop.f32.mrf.mxu1 }
 0x341   : > { %v2002_v44 = vadd.f32 %v3782_v40, %v5030_v25 }
 0x342   : > { %v3784_v57 = vpop.f32.mrf.mxu1  ;;  %2694 = vrot.lane.b32.xlu0 %v2830_v23, %s4132_s29 }
 0x343   : > { %2928 = vrot.lane.b32.xlu1 %v5085_v24, %s5570_s19  ;;  %v2067_v59 = vadd.f32 %v4980_v27, %v2002_v44  ;;  %v3785_v46 = vadd.f32 %v3784_v57, %v3783_v55 }
 0x344   : > { %v3786_v25 = vpop.f32.mrf.mxu1 }
 0x345   : > { %v2104_v60 = vmul.f32 %v5148_v56, %v2067_v59  ;;  %v2005_v61 = vadd.f32 %v3785_v46, %v5036_v37  ;;  %v3763_v59 = vadd.f32 %v5137_v22, %v5135_v11 }
 0x346   : > { %v3787_v5 = vpop.f32.mrf.mxu1  ;;  %2742 = vrot.lane.b32.xlu0 %v5077_v20, %s4131_s26 }
 0x347   : > { %2977 = vrot.lane.b32.xlu1 %v2975_v62, %s5573_s2  ;;  %v5165_v27 = vadd.f32 %v5157_v52, %v2104_v60  ;;  %v2070_v2 = vadd.f32 %v4984_v29, %v2005_v61  ;;  %v3788_v15 = vadd.f32 %v3787_v5, %v3786_v25 }
 0x348   : > { %v3789_v6 = vpop.f32.mrf.mxu1 }
 0x349   : > { %v2127_v8 = vsub.f32 0.0, %v5165_v27  ;;  %v2105_v9 = vmul.f32 %v5148_v56, %v2070_v2  ;;  %v2010_v23 = vadd.f32 %v3788_v15, %v3748_v51 }
 0x34a   : > { %v3790_v36 = vpop.f32.mrf.mxu1  ;;  %2790 = vrot.lane.b32.xlu0 %v5085_v24, %s5571_s20 }
 0x34b   : > { %2700 = vrot.lane.b32.xlu1 %v2975_v62, %s4132_s29  ;;  %v2135_v37 = vmul.f32 1.442695, %v2127_v8  ;;  %v5174_v63 = vadd.f32 %v5157_v52, %v2105_v9  ;;  %v3791_v16 = vadd.f32 %v3790_v36, %v3789_v6  ;;  %v2075_v44 = vadd.f32 %v4978_v26, %v2010_v23 }
 0x34c   : > { %v3792_v4 = vpop.f32.mrf.mxu1 }
 0x34d   : > { %4042 = vpow2.f32 %v2135_v37  ;;  %v2128_v12 = vsub.f32 0.0, %v5174_v63  ;;  %v2013_v53 = vadd.f32 %v3791_v16, %v3751_v19 }
 0x34e   : > { %v3793_v29 = vpop.f32.mrf.mxu1  ;;  %2838 = vrot.lane.b32.xlu0 %v2975_v62, %s4134_s23  ;;  %v2106_v62 = vmul.f32 %v5148_v56, %v2075_v44 }
 0x34f   : > { %2748 = vrot.lane.b32.xlu1 %v5087_v39, %s4131_s26  ;;  %v2137_v14 = vmul.f32 1.442695, %v2128_v12  ;;  %v3794_v43 = vadd.f32 %v3793_v29, %v3792_v4  ;;  %v2078_v45 = vadd.f32 %v4982_v28, %v2013_v53  ;;  %v5228_v4 = vpop.permute.xlu1 %2941  ;;  %s3889_s26 = smul.u32 72, %s5575_s28 }
 0x350   : > { %v3795_v7 = vpop.f32.mrf.mxu1  ;;  %v5225_v36 = vadd.f32 %v5157_v52, %v2106_v62 }
 0x351   : > { %4044 = vpow2.f32 %v2137_v14  ;;  %v2018_v17 = vadd.f32 %v3794_v43, %v3754_v13  ;;  %v2107_v46 = vmul.f32 %v5148_v56, %v2078_v45 }
 0x352   : > { %v3796_v20 = vpop.f32.mrf.mxu1  ;;  %2886 = vrot.lane.b32.xlu0 %v5087_v39, %s5572_s21  ;;  %v3760_v39 = vadd.f32 %v5131_v3, %v5129_v31  ;;  %v2987_v3 = vld [vmem:[#allocation5 + $0x91] sm:$0xff] }
 0x353   : > { %2796 = vrot.lane.b32.xlu1 %v2794_v18, %s5571_s20  ;;  %v2083_v24 = vadd.f32 %v4988_v32, %v2018_v17  ;;  %v3797_v48 = vadd.f32 %v3796_v20, %v3795_v7  ;;  %v5220_v22 = vadd.f32 %v5157_v52, %v2107_v46  ;;  %s3549_s20 = sshll.u32 %s5575_s28, 2 }
 0x354   : > { %v3798_v54 = vpop.f32.mrf.mxu1  ;;  %s587_s22 = scalar_lea.vmem %s5553_s17, %s3549_s20 }
 0x355   : > { %v2108_v10 = vmul.f32 %v5148_v56, %v2083_v24  ;;  %v2021_v49 = vadd.f32 %v3797_v48, %v3757_v21  ;;  %v2130_v29 = vsub.f32 0.0, %v5220_v22 }
 0x356   : > { %v3799_v35 = vpop.f32.mrf.mxu1  ;;  %2934 = vrot.lane.b32.xlu0 %v2794_v18, %s5570_s19  ;;  %s5485_s19 = scalar_lea.vmem %s5554_s18, %s3889_s26 }
 0x357   : > { %2844 = vrot.lane.b32.xlu1 %v2842_v50, %s4134_s23  ;;  %v2086_v32 = vadd.f32 %v4992_v33, %v2021_v49  ;;  %v3800_v0 = vadd.f32 %v3799_v35, %v3798_v54  ;;  %v5197_v41 = vadd.f32 %v5157_v52, %v2108_v10  ;;  %v2141_v43 = vmul.f32 1.442695, %v2130_v29 }
 0x358   : > { %v3801_v47 = vpop.f32.mrf.mxu1 }
 0x359   : > { %v2109_v38 = vmul.f32 %v5148_v56, %v2086_v32  ;;  %v2026_v40 = vadd.f32 %v3800_v0, %v3760_v39  ;;  %v2131_v26 = vsub.f32 0.0, %v5197_v41 }
 0x35a   : > { %v4043_v55 = vpop.eup %4042  ;;  %v3802_v57 = vpop.f32.mrf.mxu1  ;;  %2983 = vrot.lane.b32.xlu0 %v2842_v50, %s5573_s2 }
 0x35b   : > { %2892 = vrot.lane.b32.xlu1 %v5095_v42, %s5572_s21  ;;  %v2151_v33 = vadd.f32 1.0, %v4043_v55  ;;  %v5205_v31 = vadd.f32 %v5157_v52, %v2109_v38  ;;  %v2091_v28 = vadd.f32 %v4986_v30, %v2026_v40  ;;  %v3803_v25 = vadd.f32 %v3802_v57, %v3801_v47 }
 0x35c   : > { %v2143_v8 = vmul.f32 1.442695, %v2131_v26 }
 0x35d   : > { %v2132_v60 = vsub.f32 0.0, %v5205_v31  ;;  %v2110_v61 = vmul.f32 %v5148_v56, %v2091_v28  ;;  %v2029_v5 = vadd.f32 %v3803_v25, %v3763_v59  ;;  %4046 = vrcp.f32 %v2151_v33 }
 0x35e   : > { %v4045_v42 = vpop.eup %4044 }
 0x35f   : > { %2989 = vrot.lane.b32.xlu1 %v2987_v3, %s5573_s2  ;;  %v2152_v30 = vadd.f32 1.0, %v4045_v42  ;;  %v2145_v2 = vmul.f32 1.442695, %v2132_v60  ;;  %v5217_v11 = vadd.f32 %v5157_v52, %v2110_v61  ;;  %v2094_v6 = vadd.f32 %v4990_v34, %v2029_v5 }
 0x360   : > { %v2129_v34 = vsub.f32 0.0, %v5225_v36 }
 0x361   : > { %4048 = vrcp.f32 %v2152_v30  ;;  %v2133_v9 = vsub.f32 0.0, %v5217_v11  ;;  %v2111_v37 = vmul.f32 %v5148_v56, %v2094_v6 }
 0x362   : > { %4050 = vpow2.f32 %v2145_v2  ;;  %v2139_v56 = vmul.f32 1.442695, %v2129_v34 }
 0x363   : > { %v2147_v12 = vmul.f32 1.442695, %v2133_v9  ;;  %v5232_v13 = vadd.f32 %v5157_v52, %v2111_v37  ;;  %4052 = vpow2.f32 %v2143_v8 }
 0x365   : > { %4054 = vpow2.f32 %v2147_v12  ;;  %v2134_v14 = vsub.f32 0.0, %v5232_v13 }
 0x367   : > { %v2149_v16 = vmul.f32 1.442695, %v2134_v14 }
 0x368   : > { %v2755_v7 = vpop.permute.xlu0 %2754 }
 0x369   : > { %v2665_v17 = vpop.permute.xlu1 %2664  ;;  %2757 = vst.msk [vmem:[#allocation6] sm:$0xff] %vm721_vm3, %v2755_v7  ;;  %4056 = vpow2.f32 %v2149_v16 }
 0x36a   : > { %2667 = vst.msk [vmem:[#allocation6 + $0x10] sm:$0xff] %vm623_vm1, %v2665_v17  ;;  %v4047_v18 = vpop.eup %4046  ;;  %4058 = vpow2.f32 %v2141_v43 }
 0x36b   : > { %4060 = vpow2.f32 %v2139_v56  ;;  %v2167_v20 = vmul.f32 %v4047_v18, %v5165_v27 }
 0x36c   : > { %v2803_v52 = vpop.permute.xlu0 %2802 }
 0x36d   : > { %v2713_v19 = vpop.permute.xlu1 %2712  ;;  %2805 = vst.msk [vmem:[#allocation6] sm:$0xff] %vm771_vm4, %v2803_v52 }
 0x36e   : > { %2715 = vst.msk [vmem:[#allocation6 + $0x10] sm:$0xff] %vm672_vm2, %v2713_v19  ;;  %v4049_v15 = vpop.eup %4048 }
 0x36f   : > { %v2168_v21 = vmul.f32 %v4049_v15, %v5174_v63  ;;  %v4051_v24 = vpop.eup %4050 }
 0x370   : > { %v2851_v48 = vpop.permute.xlu0 %2850  ;;  %v4053_v54 = vpop.eup %4052  ;;  %v2156_v49 = vadd.f32 1.0, %v4051_v24 }
 0x371   : > { %v2761_v51 = vpop.permute.xlu1 %2760  ;;  %2853 = vst.msk [vmem:[#allocation6] sm:$0xff] %vm820_vm5, %v2851_v48  ;;  %v5244_v53 = vpack.c.bf16 %v2168_v21, %v2167_v20  ;;  %v2155_v39 = vadd.f32 1.0, %v4053_v54  ;;  %v3965_v48 = vld [vmem:[%s5543_s7 + $0x8] sm:$0xff]  }
 0x372   : > { %2763 = vst.msk [vmem:[#allocation6 + $0x10] sm:$0xff] %vm721_vm3, %v2761_v51  ;;  %v4055_v10 = vpop.eup %4054  ;;  %4062 = vrcp.f32 %v2156_v49  ;;  %v3966_v51 = vld [vmem:[%s5548_s12 + $0x38] sm:$0xff]   ;;  %v3967_v49 = vld [vmem:[%s5548_s12 + $0x30] sm:$0xff]  }
 0x373   : > { %v2157_v50 = vadd.f32 1.0, %v4055_v10  ;;  %v2268_v20 = vsel %vm1230_vm8, %v5244_v53, 0 }
 0x374   : > { %v2899_v23 = vpop.permute.xlu0 %2898 }
 0x375   : > { %v2809_v35 = vpop.permute.xlu1 %2808  ;;  %2901 = vst.msk [vmem:[#allocation6] sm:$0xff] %vm869_vm6, %v2899_v23  ;;  %4064 = vrcp.f32 %v2157_v50 }
 0x376   : > { %2811 = vst.msk [vmem:[#allocation6 + $0x10] sm:$0xff] %vm771_vm4, %v2809_v35  ;;  %v4057_v27 = vpop.eup %4056  ;;  %4066 = vrcp.f32 %v2155_v39  ;;  %v3969_v35 = vld [vmem:[%s5543_s7 + $0x18] sm:$0xff]  }
 0x377   : > { %v2158_v63 = vadd.f32 1.0, %v4057_v27  ;;  %v4059_v45 = vpop.eup %4058  ;;  %v3012_v39 = vld [vmem:[#allocation6 + $0x18] sm:$0xff]  ;;  %v3970_v27 = vld [vmem:[%s5548_s12 + $0x28] sm:$0xff]  }
 0x378   : > { %v2948_v32 = vpop.permute.xlu0 %2947  ;;  %v4061_v47 = vpop.eup %4060  ;;  %v2154_v38 = vadd.f32 1.0, %v4059_v45 }
 0x379   : > { %v2857_v0 = vpop.permute.xlu1 %2856  ;;  %2950 = vst.msk [vmem:[#allocation6] sm:$0xff] %vm919_vm7, %v2948_v32  ;;  %4068 = vrcp.f32 %v2158_v63  ;;  %v2153_v44 = vadd.f32 1.0, %v4061_v47  ;;  %v3010_v63 = vld [vmem:[#allocation6 + $0x8] sm:$0xff]  ;;  %v3971_v47 = vld [vmem:[%s5548_s12 + $0x20] sm:$0xff]  }
 0x37a   : > { %2859 = vst.msk [vmem:[#allocation6 + $0x10] sm:$0xff] %vm820_vm5, %v2857_v0  ;;  %4070 = vrcp.f32 %v2154_v38  ;;  %v3026_v32 = vpack.c.bf16 %v3012_v39, %v3010_v63 }
 0x37b   : > { %4072 = vrcp.f32 %v2153_v44 }
 0x37c   : > { %v2671_v40 = vpop.permute.xlu0 %2670 }
 0x37d   : > { %v2905_v55 = vpop.permute.xlu1 %2904  ;;  %2673 = vst.msk [vmem:[#allocation6 + $0x20] sm:$0xff] %vm623_vm1, %v2671_v40 }
 0x37e   : > { %2907 = vst.msk [vmem:[#allocation6 + $0x10] sm:$0xff] %vm869_vm6, %v2905_v55  ;;  %v3972_v55 = vld [vmem:[%s5548_s12 + $0x18] sm:$0xff]  }
 0x37f   : > { %v4063_v28 = vpop.eup %4062 }
 0x380   : > { %v2719_v57 = vpop.permute.xlu0 %2718  ;;  %v2172_v5 = vmul.f32 %v4063_v28, %v5205_v31 }
 0x381   : > { %v2954_v33 = vpop.permute.xlu1 %2953  ;;  %2721 = vst.msk [vmem:[#allocation6 + $0x20] sm:$0xff] %vm672_vm2, %v2719_v57 }
 0x382   : > { %2956 = vst.msk [vmem:[#allocation6 + $0x10] sm:$0xff] %vm919_vm7, %v2954_v33  ;;  %v4065_v46 = vpop.eup %4064  ;;  %v3973_v33 = vld [vmem:[%s5548_s12 + $0x10] sm:$0xff]  }
 0x383   : > { %v4067_v25 = vpop.eup %4066  ;;  %v2173_v42 = vmul.f32 %v4065_v46, %v5217_v11 }
 0x384   : > { %v2767_v3 = vpop.permute.xlu0 %2766  ;;  %v2171_v2 = vmul.f32 %v4067_v25, %v5197_v41 }
 0x385   : > { %v2677_v59 = vpop.permute.xlu1 %2676  ;;  %2769 = vst.msk [vmem:[#allocation6 + $0x20] sm:$0xff] %vm721_vm3, %v2767_v3 }
 0x386   : > { %2679 = vst.msk [vmem:[#allocation6 + $0x30] sm:$0xff] %vm623_vm1, %v2677_v59  ;;  %v4069_v26 = vpop.eup %4068  ;;  %v2185_v37 = vpack.c.bf16 %v2172_v5, %v2171_v2  ;;  %v3974_v59 = vld [vmem:[%s5548_s12 + $0x8] sm:$0xff]   ;;  %v3016_v2 = vld [vmem:[#allocation6 + $0x38] sm:$0xff] }
 0x387   : > { %v2174_v62 = vmul.f32 %v4069_v26, %v5232_v13  ;;  %v4071_v12 = vpop.eup %4070  ;;  %v3975_v26 = vld [vmem:[%s5548_s12] sm:$0xff]  }
 0x388   : > { %v2815_v60 = vpop.permute.xlu0 %2814  ;;  %v4073_v31 = vpop.eup %4072  ;;  %v2170_v41 = vmul.f32 %v4071_v12, %v5220_v22  ;;  %v2274_v43 = vsel %vm1230_vm8, %v2185_v37, 0 }
 0x389   : > { %v2725_v61 = vpop.permute.xlu1 %2724  ;;  %2817 = vst.msk [vmem:[#allocation6 + $0x20] sm:$0xff] %vm771_vm4, %v2815_v60  ;;  %v2186_v30 = vpack.c.bf16 %v2174_v62, %v2173_v42  ;;  %v2169_v13 = vmul.f32 %v4073_v31, %v5225_v36  ;;  %v3976_v42 = vld [vmem:[%s5548_s12 + $0x40] sm:$0xff]   ;;  %v3011_v62 = vld [vmem:[#allocation6 + $0x10] sm:$0xff]  ;;  %v3020_v31 = vld [vmem:[#allocation6 + $0x58] sm:$0xff] }
 0x38a   : > { %2727 = vst.msk [vmem:[#allocation6 + $0x30] sm:$0xff] %vm672_vm2, %v2725_v61 }
 0x38b   : > { %3884 = vmatprep.subr.msk.bf16.mxu1 %vm1230_vm8, %v2186_v30  ;;  %v2277_v6 = vsel %vm1230_vm8, %v2186_v30, 0  ;;  %v2184_v16 = vpack.c.bf16 %v2170_v41, %v2169_v13  ;;  %v3018_v41 = vld [vmem:[#allocation6 + $0x48] sm:$0xff] }
 0x38c   : > { %v2863_v8 = vpop.permute.xlu0 %2862  ;;  %3847 = vmatpush3.bf16.xpose.msra.mxu1 %v2277_v6  ;;  %v3009_v6 = vld [vmem:[#allocation6] sm:$0xff]  ;;  %v3030_v13 = vpack.c.bf16 %v3020_v31, %v3018_v41 }
 0x38d   : > { %v2773_v9 = vpop.permute.xlu1 %2772  ;;  %2865 = vst.msk [vmem:[#allocation6 + $0x20] sm:$0xff] %vm820_vm5, %v2863_v8  ;;  %3885 = vmatprep.subr.msk.bf16.mxu1 %vm1230_vm8, %v2185_v37  ;;  %v2271_v56 = vsel %vm1230_vm8, %v2184_v16, 0  ;;  %v3025_v8 = vpack.c.bf16 %v3011_v62, %v3009_v6 }
 0x38e   : > { %2775 = vst.msk [vmem:[#allocation6 + $0x30] sm:$0xff] %vm721_vm3, %v2773_v9  ;;  %v3014_v9 = vld [vmem:[#allocation6 + $0x28] sm:$0xff] }
 0x38f   : > { %v3028_v37 = vpack.c.bf16 %v3016_v2, %v3014_v9 }
 0x390   : > { %v2911_v11 = vpop.permute.xlu0 %2910 }
 0x391   : > { %v2821_v29 = vpop.permute.xlu1 %2820  ;;  %2913 = vst.msk [vmem:[#allocation6 + $0x20] sm:$0xff] %vm869_vm6, %v2911_v11 }
 0x392   : > { %2823 = vst.msk [vmem:[#allocation6 + $0x30] sm:$0xff] %vm771_vm4, %v2821_v29 }
 0x394   : > { %v2960_v34 = vpop.permute.xlu0 %2959  ;;  %3849 = vmatpush3.bf16.xpose.msra.mxu1 %v2274_v43 }
 0x395   : > { %v2869_v14 = vpop.permute.xlu1 %2868  ;;  %2962 = vst.msk [vmem:[#allocation6 + $0x20] sm:$0xff] %vm919_vm7, %v2960_v34  ;;  %3886 = vmatprep.subr.msk.bf16.mxu1 %vm1230_vm8, %v2184_v16  ;;  %v3022_v34 = vld [vmem:[#allocation6 + $0x68] sm:$0xff] }
 0x396   : > { %2871 = vst.msk [vmem:[#allocation6 + $0x30] sm:$0xff] %vm820_vm5, %v2869_v14  ;;  %v3024_v14 = vld [vmem:[#allocation6 + $0x78] sm:$0xff] }
 0x398   : > { %v2683_v7 = vpop.permute.xlu0 %2682 }
 0x399   : > { %v2917_v22 = vpop.permute.xlu1 %2916  ;;  %2685 = vst.msk [vmem:[#allocation6 + $0x40] sm:$0xff] %vm623_vm1, %v2683_v7  ;;  %v3032_v7 = vpack.c.bf16 %v3024_v14, %v3022_v34 }
 0x39a   : > { %2919 = vst.msk [vmem:[#allocation6 + $0x30] sm:$0xff] %vm869_vm6, %v2917_v22 }
 0x39c   : > { %v2731_v17 = vpop.permute.xlu0 %2730  ;;  %3851 = vmatpush3.bf16.xpose.msra.mxu1 %v2271_v56  ;;  %v3013_v11 = vld [vmem:[#allocation6 + $0x20] sm:$0xff] }
 0x39d   : > { %v2966_v36 = vpop.permute.xlu1 %2965  ;;  %2733 = vst.msk [vmem:[#allocation6 + $0x40] sm:$0xff] %vm672_vm2, %v2731_v17  ;;  %3887 = vmatprep.subr.msk.bf16.mxu1 %vm1230_vm8, %v5244_v53  ;;  %v3968_v53 = vld [vmem:[%s5543_s7 + $0x10] sm:$0xff]   ;;  %v3977_v56 = vld [vmem:[%s5551_s15] sm:$0xff]  }
 0x39e   : > { %2968 = vst.msk [vmem:[#allocation6 + $0x30] sm:$0xff] %vm919_vm7, %v2966_v36  ;;  %3862 = vmatprep.subr.bf16.mxu0 %v3977_v56 }
 0x39f   : > { %3863 = vmatpush3.bf16.msra.mxu0 %v3977_v56 }
 0x3a0   : > { %v2779_v18 = vpop.permute.xlu0 %2778 }
 0x3a1   : > { %v2689_v52 = vpop.permute.xlu1 %2688  ;;  %2781 = vst.msk [vmem:[#allocation6 + $0x40] sm:$0xff] %vm721_vm3, %v2779_v18 }
 0x3a2   : > { %2691 = vst.msk [vmem:[#allocation6 + $0x50] sm:$0xff] %vm623_vm1, %v2689_v52 }
 0x3a4   : > { %v2827_v19 = vpop.permute.xlu0 %2826  ;;  %3853 = vmatpush3.bf16.xpose.msra.mxu1 %v2268_v20 }
 0x3a5   : > { %v2737_v15 = vpop.permute.xlu1 %2736  ;;  %2829 = vst.msk [vmem:[#allocation6 + $0x40] sm:$0xff] %vm771_vm4, %v2827_v19  ;;  %3117 = vmatprep.subr.bf16.mxu1 %v4130_v1  ;;  %v3015_v12 = vld [vmem:[#allocation6 + $0x30] sm:$0xff] }
 0x3a6   : > { %2739 = vst.msk [vmem:[#allocation6 + $0x50] sm:$0xff] %vm672_vm2, %v2737_v15  ;;  %v3027_v29 = vpack.c.bf16 %v3015_v12, %v3013_v11 }
 0x3a8   : > { %v2875_v21 = vpop.permute.xlu0 %2874 }
 0x3a9   : > { %v2785_v24 = vpop.permute.xlu1 %2784  ;;  %2877 = vst.msk [vmem:[#allocation6 + $0x40] sm:$0xff] %vm820_vm5, %v2875_v21 }
 0x3aa   : > { %2787 = vst.msk [vmem:[#allocation6 + $0x50] sm:$0xff] %vm721_vm3, %v2785_v24 }
 0x3ab   : > { %3855 = vmatmul.mubr.msk.bf16.vlgmr.msra.gmra.mxu1 %vm1230_vm8, %v3965_v48 }
 0x3ac   : > { %v2923_v54 = vpop.permute.xlu0 %2922  ;;  %3118 = vmatpush1.bf16.msra.mxu1 %v3966_v51  ;;  %3858 = vmatprep.mubr.msk.bf16.mxu1 %vm1230_vm8, %v3968_v53  ;;  %v3713_v51 = vld [vmem:[%s5549_s13] ss:$0 sm:$0xff] }
 0x3ad   : > { %v2833_v10 = vpop.permute.xlu1 %2832  ;;  %2925 = vst.msk [vmem:[#allocation6 + $0x40] sm:$0xff] %vm869_vm6, %v2923_v54  ;;  %3119 = vmatprep.subr.bf16.mxu1 %v4130_v1  ;;  %v3714_v54 = vld [vmem:[%s5550_s14] ss:$0 sm:$0xff] }
 0x3ae   : > { %2835 = vst.msk [vmem:[#allocation6 + $0x50] sm:$0xff] %vm771_vm4, %v2833_v10 }
 0x3b0   : > { %v2972_v50 = vpop.permute.xlu0 %2971  ;;  %3120 = vmatpush1.bf16.msra.mxu1 %v3967_v49 }
 0x3b1   : > { %v2881_v23 = vpop.permute.xlu1 %2880  ;;  %2974 = vst.msk [vmem:[#allocation6 + $0x40] sm:$0xff] %vm919_vm7, %v2972_v50  ;;  %3121 = vmatprep.subr.bf16.mxu1 %v4130_v1 }
 0x3b2   : > { %2883 = vst.msk [vmem:[#allocation6 + $0x50] sm:$0xff] %vm820_vm5, %v2881_v23 }
 0x3b3   : > { %3859 = vmatmul.mubr.msk.bf16.gmra.mxu1 %vm1230_vm8, %v3969_v35 }
 0x3b4   : > { %v2695_v0 = vpop.permute.xlu0 %2694  ;;  %3122 = vmatpush1.bf16.msra.mxu1 %v3970_v27  ;;  %3709 = vmatprep.mubr.msk.bf16.mxu1 %vm595_vm0, %v3026_v32 }
 0x3b5   : > { %v2929_v45 = vpop.permute.xlu1 %2928  ;;  %2697 = vst.msk [vmem:[#allocation6 + $0x60] sm:$0xff] %vm623_vm1, %v2695_v0  ;;  %3123 = vmatprep.subr.bf16.mxu1 %v4130_v1 }
 0x3b6   : > { %2931 = vst.msk [vmem:[#allocation6 + $0x50] sm:$0xff] %vm869_vm6, %v2929_v45 }
 0x3b8   : > { %v2743_v38 = vpop.permute.xlu0 %2742  ;;  %3124 = vmatpush1.bf16.msra.mxu1 %v3971_v47  ;;  %v3017_v43 = vld [vmem:[#allocation6 + $0x40] sm:$0xff] }
 0x3b9   : > { %v2978_v40 = vpop.permute.xlu1 %2977  ;;  %2745 = vst.msk [vmem:[#allocation6 + $0x60] sm:$0xff] %vm672_vm2, %v2743_v38  ;;  %3125 = vmatprep.subr.bf16.mxu1 %v4130_v1 }
 0x3ba   : > { %2980 = vst.msk [vmem:[#allocation6 + $0x50] sm:$0xff] %vm919_vm7, %v2978_v40 }
 0x3bc   : > { %v2791_v44 = vpop.permute.xlu0 %2790  ;;  %3126 = vmatpush1.bf16.msra.mxu1 %v3972_v55 }
 0x3bd   : > { %v2701_v57 = vpop.permute.xlu1 %2700  ;;  %2793 = vst.msk [vmem:[#allocation6 + $0x60] sm:$0xff] %vm721_vm3, %v2791_v44  ;;  %3127 = vmatprep.subr.bf16.mxu1 %v4130_v1 }
 0x3be   : > { %2703 = vst.msk [vmem:[#allocation6 + $0x70] sm:$0xff] %vm623_vm1, %v2701_v57 }
 0x3c0   : > { %v2839_v28 = vpop.permute.xlu0 %2838  ;;  %3128 = vmatpush1.bf16.msra.mxu1 %v3973_v33 }
 0x3c1   : > { %v2749_v3 = vpop.permute.xlu1 %2748  ;;  %2841 = vst.msk [vmem:[#allocation6 + $0x60] sm:$0xff] %vm771_vm4, %v2839_v28  ;;  %3129 = vmatprep.subr.bf16.mxu1 %v4130_v1 }
 0x3c2   : > { %2751 = vst.msk [vmem:[#allocation6 + $0x70] sm:$0xff] %vm672_vm2, %v2749_v3 }
 0x3c4   : > { %v2887_v46 = vpop.permute.xlu0 %2886  ;;  %3130 = vmatpush1.bf16.msra.mxu1 %v3974_v59 }
 0x3c5   : > { %v2797_v25 = vpop.permute.xlu1 %2796  ;;  %2889 = vst.msk [vmem:[#allocation6 + $0x60] sm:$0xff] %vm820_vm5, %v2887_v46  ;;  %3131 = vmatprep.subr.bf16.mxu1 %v4130_v1 }
 0x3c6   : > { %2799 = vst.msk [vmem:[#allocation6 + $0x70] sm:$0xff] %vm721_vm3, %v2797_v25 }
 0x3c8   : > { %v2935_v60 = vpop.permute.xlu0 %2934  ;;  %3132 = vmatpush1.bf16.msra.mxu1 %v3975_v26 }
 0x3c9   : > { %v2845_v61 = vpop.permute.xlu1 %2844  ;;  %2937 = vst.msk [vmem:[#allocation6 + $0x60] sm:$0xff] %vm869_vm6, %v2935_v60  ;;  %3147 = vmatprep.subr.bf16.mxu1 %v4130_v1 }
 0x3ca   : > { %2847 = vst.msk [vmem:[#allocation6 + $0x70] sm:$0xff] %vm771_vm4, %v2845_v61 }
 0x3cc   : > { %v2984_v5 = vpop.permute.xlu0 %2983  ;;  %3148 = vmatpush2.bf16.msra.mxu1 %v3976_v42 }
 0x3cd   : > { %v2893_v30 = vpop.permute.xlu1 %2892  ;;  %2986 = vst.msk [vmem:[#allocation6 + $0x60] sm:$0xff] %vm919_vm7, %v2984_v5  ;;  %3872 = vmatprep.subr.bf16.mxu1 %v4138_v58 }
 0x3ce   : > { %2895 = vst.msk [vmem:[#allocation6 + $0x70] sm:$0xff] %vm820_vm5, %v2893_v30 }
 0x3cf   : > { %2944 = vst.msk [vmem:[#allocation6 + $0x70] sm:$0xff] %vm869_vm6, %v5228_v4  ;;  %3150 = vmatmul.mubr.bf16.vlgmr.msra.gmra.mxu1 %v3025_v8  ;;  %v3019_v4 = vld [vmem:[#allocation6 + $0x50] sm:$0xff] }
 0x3d0   : > { %3710 = vmatprep.mubr.msk.bf16.mxu1 %vm595_vm0, %v3028_v37  ;;  %v3029_v16 = vpack.c.bf16 %v3019_v4, %v3017_v43 }
 0x3d1   : > { %v2990_v1 = vpop.permute.xlu1 %2989 }
 0x3d2   : > { %2992 = vst.msk [vmem:[#allocation6 + $0x70] sm:$0xff] %vm919_vm7, %v2990_v1 }
 0x3d4   : > { %v3021_v17 = vld [vmem:[#allocation6 + $0x60] sm:$0xff] }
 0x3d7   : > { %3158 = vmatmul.mubr.bf16.gmra.mxu1 %v3027_v29 }
 0x3d8   : > { %3711 = vmatprep.mubr.msk.bf16.mxu1 %vm595_vm0, %v3030_v13 }
 0x3d9   : > { %v3023_v22 = vld [vmem:[#allocation6 + $0x70] sm:$0xff] }
 0x3da   : > { %v3031_v36 = vpack.c.bf16 %v3023_v22, %v3021_v17 }
 0x3df   : > { %3166 = vmatmul.mubr.bf16.gmra.mxu1 %v3029_v16 }
 0x3e0   : > { %3712 = vmatprep.mubr.msk.bf16.mxu1 %vm595_vm0, %v3032_v7 }
 0x3e7   : > { %3174 = vmatmul.mubr.bf16.gmra.mxu1 %v3031_v36 }
 0x3e8   : > { %3880 = vmatprep.mubr.msk.bf16.mxu1 %vm4139_vm13, %v4138_v58 }
 0x46b   : > { %v5367_v18 = vpop.f32.mrf.mxu1 }
 0x46d   : > { %v5369_v52 = vpop.f32.mrf.mxu1 }
 0x46f   : > { %v5371_v19 = vpop.f32.mrf.mxu1 }
 0x471   : > { %v5373_v15 = vpop.f32.mrf.mxu1 }
 0x473   : > { %v5375_v20 = vpop.f32.mrf.mxu1 }
 0x475   : > { %v5377_v21 = vpop.f32.mrf.mxu1 }
 0x477   : > { %v5379_v24 = vpop.f32.mrf.mxu1 }
 0x479   : > { %v5381_v48 = vpop.f32.mrf.mxu1 }
 0x48f   : > { %v3151_v53 = vpop.f32.mrf.mxu1 }
 0x490   : > { %v3189_v10 = vmul.f32 %v3713_v51, %v3151_v53 }
 0x491   : > { %v3153_v49 = vpop.f32.mrf.mxu1 }
 0x492   : > { %v5389_v50 = vadd.f32 %v3714_v54, %v3189_v10 }
 0x493   : > { %v3154_v23 = vpop.f32.mrf.mxu1 }
 0x494   : > { %v3212_v35 = vsub.f32 0.0, %v5389_v50  ;;  %v3190_v39 = vmul.f32 %v3713_v51, %v3154_v23 }
 0x495   : > { %v3156_v27 = vpop.f32.mrf.mxu1 }
 0x496   : > { %v3220_v63 = vmul.f32 1.442695, %v3212_v35  ;;  %v5392_v32 = vadd.f32 %v3714_v54, %v3190_v39 }
 0x497   : > { %v3159_v0 = vpop.f32.mrf.mxu1 }
 0x498   : > { %4074 = vpow2.f32 %v3220_v63  ;;  %v3213_v45 = vsub.f32 0.0, %v5392_v32  ;;  %v3191_v47 = vmul.f32 %v3713_v51, %v3159_v0 }
 0x499   : > { %v3161_v38 = vpop.f32.mrf.mxu1 }
 0x49a   : > { %v3222_v40 = vmul.f32 1.442695, %v3213_v45  ;;  %v5395_v55 = vadd.f32 %v3714_v54, %v3191_v47 }
 0x49b   : > { %v3162_v44 = vpop.f32.mrf.mxu1 }
 0x49c   : > { %4076 = vpow2.f32 %v3222_v40  ;;  %v3214_v57 = vsub.f32 0.0, %v5395_v55  ;;  %v3192_v33 = vmul.f32 %v3713_v51, %v3162_v44 }
 0x49d   : > { %v3164_v28 = vpop.f32.mrf.mxu1 }
 0x49e   : > { %v3224_v3 = vmul.f32 1.442695, %v3214_v57  ;;  %v5398_v59 = vadd.f32 %v3714_v54, %v3192_v33 }
 0x49f   : > { %v3167_v46 = vpop.f32.mrf.mxu1 }
 0x4a0   : > { %4078 = vpow2.f32 %v3224_v3  ;;  %v3215_v25 = vsub.f32 0.0, %v5398_v59  ;;  %v3193_v26 = vmul.f32 %v3713_v51, %v3167_v46 }
 0x4a1   : > { %v3169_v60 = vpop.f32.mrf.mxu1 }
 0x4a2   : > { %v3226_v61 = vmul.f32 1.442695, %v3215_v25  ;;  %v5401_v42 = vadd.f32 %v3714_v54, %v3193_v26 }
 0x4a3   : > { %v3170_v62 = vpop.f32.mrf.mxu1 }
 0x4a4   : > { %4080 = vpow2.f32 %v3226_v61  ;;  %v3216_v5 = vsub.f32 0.0, %v5401_v42  ;;  %v3194_v30 = vmul.f32 %v3713_v51, %v3170_v62 }
 0x4a5   : > { %v4075_v2 = vpop.eup %4074  ;;  %v3172_v6 = vpop.f32.mrf.mxu1 }
 0x4a6   : > { %v3236_v8 = vadd.f32 1.0, %v4075_v2  ;;  %v3228_v9 = vmul.f32 1.442695, %v3216_v5  ;;  %v3209_v37 = vadd.f32 %v3714_v54, %v3194_v30 }
 0x4a7   : > { %v3175_v1 = vpop.f32.mrf.mxu1 }
 0x4a8   : > { %v3217_v12 = vsub.f32 0.0, %v3209_v37  ;;  %v3195_v31 = vmul.f32 %v3713_v51, %v3175_v1  ;;  %4082 = vpow2.f32 %v3228_v9  ;;  %v3715_v9 = vld [vmem:[%s5552_s16] ss:$0 sm:$0xff] }
 0x4a9   : > { %v4077_v11 = vpop.eup %4076  ;;  %v3177_v29 = vpop.f32.mrf.mxu1  ;;  %4084 = vrcp.f32 %v3236_v8 }
 0x4aa   : > { %v3237_v41 = vadd.f32 1.0, %v4077_v11  ;;  %v3230_v13 = vmul.f32 1.442695, %v3217_v12  ;;  %v3210_v4 = vadd.f32 %v3714_v54, %v3195_v31 }
 0x4ab   : > { %v3178_v34 = vpop.f32.mrf.mxu1 }
 0x4ac   : > { %4086 = vrcp.f32 %v3237_v41  ;;  %v3218_v14 = vsub.f32 0.0, %v3210_v4  ;;  %v3196_v43 = vmul.f32 %v3713_v51, %v3178_v34 }
 0x4ad   : > { %v4079_v16 = vpop.eup %4078  ;;  %4088 = vpow2.f32 %v3230_v13  ;;  %v3180_v7 = vpop.f32.mrf.mxu1 }
 0x4ae   : > { %v3238_v22 = vadd.f32 1.0, %v4079_v16  ;;  %v3232_v17 = vmul.f32 1.442695, %v3218_v14  ;;  %v3211_v36 = vadd.f32 %v3714_v54, %v3196_v43 }
 0x4b0   : > { %v3219_v56 = vsub.f32 0.0, %v3211_v36  ;;  %4090 = vpow2.f32 %v3232_v17 }
 0x4b1   : > { %v4081_v53 = vpop.eup %4080  ;;  %4092 = vrcp.f32 %v3238_v22 }
 0x4b2   : > { %v3239_v10 = vadd.f32 1.0, %v4081_v53  ;;  %v3234_v49 = vmul.f32 1.442695, %v3219_v56 }
 0x4b4   : > { %4094 = vrcp.f32 %v3239_v10 }
 0x4b5   : > { %4096 = vpow2.f32 %v3234_v49  ;;  %v4083_v23 = vpop.eup %4082 }
 0x4b6   : > { %v4085_v35 = vpop.eup %4084  ;;  %v3240_v39 = vadd.f32 1.0, %v4083_v23 }
 0x4b7   : > { %v3252_v51 = vmul.f32 %v4085_v35, %v5389_v50 }
 0x4b8   : > { %4098 = vrcp.f32 %v3240_v39 }
 0x4b9   : > { %v4087_v27 = vpop.eup %4086 }
 0x4ba   : > { %v4089_v63 = vpop.eup %4088  ;;  %v3253_v0 = vmul.f32 %v4087_v27, %v5392_v32 }
 0x4bb   : > { %v3241_v45 = vadd.f32 1.0, %v4089_v63 }
 0x4bc   : > { %v3260_v54 = vpack.c.bf16 %v3253_v0, %v3252_v51  ;;  %v2187_v0 = vld [vmem:[%s5544_s8] sm:$0xff] }
 0x4bd   : > { %4100 = vrcp.f32 %v3241_v45  ;;  %v4091_v47 = vpop.eup %4090  ;;  %v2189_v45 = vld [vmem:[%s5544_s8 + $0x10] sm:$0xff] }
 0x4be   : > { %3864 = vmatprep.mubr.msk.bf16.mxu0 %vm595_vm0, %v3260_v54  ;;  %v4093_v38 = vpop.eup %4092  ;;  %v3242_v40 = vadd.f32 1.0, %v4091_v47  ;;  %v2190_v54 = vld [vmem:[%s5544_s8 + $0x18] sm:$0xff]  ;;  %v2188_v47 = vld [vmem:[%s5544_s8 + $0x8] sm:$0xff] }
 0x4bf   : > { %v3254_v33 = vmul.f32 %v4093_v38, %v5395_v55  ;;  %v2191_v38 = vld [vmem:[%s5544_s8 + $0x20] sm:$0xff] }
 0x4c0   : > { %4102 = vrcp.f32 %v3242_v40  ;;  %v2192_v40 = vld [vmem:[%s5544_s8 + $0x28] sm:$0xff] }
 0x4c1   : > { %v4095_v44 = vpop.eup %4094 }
 0x4c2   : > { %v4097_v57 = vpop.eup %4096  ;;  %v3255_v28 = vmul.f32 %v4095_v44, %v5398_v59  ;;  %v2193_v44 = vld [vmem:[%s5544_s8 + $0x30] sm:$0xff] }
 0x4c3   : > { %v3243_v3 = vadd.f32 1.0, %v4097_v57  ;;  %v2194_v57 = vld [vmem:[%s5544_s8 + $0x38] sm:$0xff] }
 0x4c4   : > { %v3261_v50 = vpack.c.bf16 %v3255_v28, %v3254_v33 }
 0x4c5   : > { %4104 = vrcp.f32 %v3243_v3  ;;  %v4099_v32 = vpop.eup %4098 }
 0x4c6   : > { %3865 = vmatmul.mubr.msk.bf16.vlgmr.msra.gmra.mxu0 %vm595_vm0, %v3261_v50  ;;  %v3256_v25 = vmul.f32 %v4099_v32, %v5401_v42 }
 0x4ca   : > { %v4101_v46 = vpop.eup %4100 }
 0x4cb   : > { %v3257_v26 = vmul.f32 %v4101_v46, %v3209_v37 }
 0x4cd   : > { %v3262_v60 = vpack.c.bf16 %v3257_v26, %v3256_v25  ;;  %v4103_v61 = vpop.eup %4102 }
 0x4ce   : > { %v3258_v5 = vmul.f32 %v4103_v61, %v3210_v4 }
 0x4cf   : > { %3868 = vmatprep.mubr.msk.bf16.mxu0 %vm595_vm0, %v3262_v60 }
 0x4d2   : > { %v4105_v62 = vpop.eup %4104 }
 0x4d3   : > { %v3259_v55 = vmul.f32 %v4105_v62, %v3211_v36 }
 0x4d5   : > { %v3263_v30 = vpack.c.bf16 %v3259_v55, %v3258_v5 }
 0x4d7   : > { %3869 = vmatmul.mubr.msk.bf16.gmra.mxu0 %vm595_vm0, %v3263_v30 }
 0x586   : > { %v3866_v59 = vpop.f32.mrf.mxu0 }
 0x587   : > { %v5422_v11 = vadd.f32 %v3866_v59, %v3715_v9 }
 0x588   : > { %v3325_v2 = vpop.f32.mrf.mxu0 }
 0x589   : > { %v3358_v16 = vmul.f32 %v5422_v11, %v5422_v11  ;;  %v5435_v7 = vadd.f32 %v3715_v9, %v3325_v2 }
 0x58a   : > { %v3867_v6 = vpop.f32.mrf.mxu0 }
 0x58b   : > { %v5437_v22 = vadd.f32 %v3867_v6, %v3715_v9  ;;  %v3356_v53 = vmul.f32 %v5435_v7, %v5435_v7  ;;  %v3371_v23 = vsel %vm3364_vm12, %v3358_v16, 0.0 }
 0x58c   : > { %v3328_v8 = vpop.f32.mrf.mxu0 }
 0x58d   : > { %v3359_v10 = vmul.f32 %v5437_v22, %v5437_v22  ;;  %v5447_v49 = vadd.f32 %v3715_v9, %v3328_v8  ;;  %v3365_v27 = vsel %vm3364_vm12, %v3356_v53, 0.0 }
 0x58f   : > { %v3357_v39 = vmul.f32 %v5447_v49, %v5447_v49  ;;  %v3374_v63 = vsel %vm3364_vm12, %v3359_v10, 0.0 }
 0x591   : > { %v3368_v51 = vsel %vm3364_vm12, %v3357_v39, 0.0 }
 0x597   : > { %v3870_v42 = vpop.f32.mrf.mxu0 }
 0x598   : > { %v5416_v37 = vadd.f32 %v3870_v42, %v3715_v9 }
 0x599   : > { %v3341_v1 = vpop.f32.mrf.mxu0 }
 0x59a   : > { %v3362_v12 = vmul.f32 %v5416_v37, %v5416_v37  ;;  %v5420_v31 = vadd.f32 %v3715_v9, %v3341_v1 }
 0x59b   : > { %v3871_v29 = vpop.f32.mrf.mxu0 }
 0x59c   : > { %v3360_v41 = vmul.f32 %v5420_v31, %v5420_v31  ;;  %v5426_v13 = vadd.f32 %v3871_v29, %v3715_v9  ;;  %v3383_v4 = vsel %vm3364_vm12, %v3362_v12, 0.0 }
 0x59d   : > { %3384 = vadd.xlane.f32.xlu0 %v3383_v4  ;;  %v3344_v34 = vpop.f32.mrf.mxu0 }
 0x59e   : > { %v3363_v14 = vmul.f32 %v5426_v13, %v5426_v13  ;;  %v5431_v43 = vadd.f32 %v3715_v9, %v3344_v34  ;;  %v3377_v56 = vsel %vm3364_vm12, %v3360_v41, 0.0 }
 0x5a0   : > { %v3361_v17 = vmul.f32 %v5431_v43, %v5431_v43  ;;  %v3386_v36 = vsel %vm3364_vm12, %v3363_v14, 0.0 }
 0x5a1   : > { %3387 = vadd.xlane.f32.xlu1 %v3386_v36  ;;  %3378 = vadd.xlane.f32.xlu0 %v3377_v56 }
 0x5a2   : > { %v3380_v35 = vsel %vm3364_vm12, %v3361_v17, 0.0 }
 0x5a5   : > { %3372 = vadd.xlane.f32.xlu1 %v3371_v23  ;;  %3381 = vadd.xlane.f32.xlu0 %v3380_v35 }
 0x5a9   : > { %3366 = vadd.xlane.f32.xlu1 %v3365_v27  ;;  %3375 = vadd.xlane.f32.xlu0 %v3374_v63 }
 0x5ad   : > { %3369 = vadd.xlane.f32.xlu0 %v3368_v51 }
 0x5ba   : > { %2197 = vperm.xlu1 %3908, %v2187_v0  }
 0x5be   : > { %2207 = vperm.xlu1 %3908, %v2189_v45  }
 0x5c2   : > { %2212 = vperm.xlu1 %3908, %v2190_v54  }
 0x5c3   : > { %2202 = vperm.xlu0 %3909, %v2188_v47  }
 0x5c6   : > { %2217 = vperm.xlu1 %3908, %v2191_v38  }
 0x5ca   : > { %2222 = vperm.xlu1 %3908, %v2192_v40  }
 0x5ce   : > { %2227 = vperm.xlu1 %3908, %v2193_v44  }
 0x5d2   : > { %2232 = vperm.xlu1 %3908, %v2194_v57  }
 0x626   : > { %v3385_v33 = vpop.xlane.xlu0 %3384 }
 0x627   : > { %v3395_v28 = vmax.f32 %v3385_v33, 1e-24 }
 0x629   : > { %4106 = vrsqrt.f32 %v3395_v28 }
 0x62a   : > { %v3388_v3 = vpop.xlane.xlu1 %3387  ;;  %v3379_v50 = vpop.xlane.xlu0 %3378 }
 0x62b   : > { %v3396_v32 = vmax.f32 %v3388_v3, 1e-24  ;;  %v3393_v46 = vmax.f32 %v3379_v50, 1e-24 }
 0x62d   : > { %4108 = vrsqrt.f32 %v3396_v32 }
 0x62e   : > { %v3373_v25 = vpop.xlane.xlu1 %3372  ;;  %v3382_v26 = vpop.xlane.xlu0 %3381  ;;  %4110 = vrsqrt.f32 %v3393_v46 }
 0x62f   : > { %v3394_v60 = vmax.f32 %v3382_v26, 1e-24  ;;  %v3391_v55 = vmax.f32 %v3373_v25, 1e-24 }
 0x631   : > { %4112 = vrsqrt.f32 %v3394_v60 }
 0x632   : > { %v3367_v61 = vpop.xlane.xlu1 %3366  ;;  %v3376_v62 = vpop.xlane.xlu0 %3375 }
 0x633   : > { %v3392_v5 = vmax.f32 %v3376_v62, 1e-24  ;;  %v3389_v41 = vmax.f32 %v3367_v61, 1e-24 }
 0x635   : > { %4114 = vrsqrt.f32 %v3392_v5 }
 0x636   : > { %v2198_v30 = vpop.permute.xlu1 %2197  ;;  %v4107_v2 = vpop.eup %4106  ;;  %4116 = vrsqrt.f32 %v3391_v55 }
 0x637   : > { %v2314_v59 = vadd.f32 %v5369_v52, %v2198_v30  ;;  %v3370_v6 = vpop.xlane.xlu0 %3369  ;;  %v3411_v12 = vmul.f32 %v4107_v2, %v5416_v37 }
 0x638   : > { %v3390_v42 = vmax.f32 %v3370_v6, 1e-24 }
 0x639   : > { %2344 = vst.msk [vmem:[%s5485_s19] sm:$0xff] %vm1230_vm8, %v2314_v59 }
 0x63a   : > { %v4109_v8 = vpop.eup %4108  ;;  %v2208_v9 = vpop.permute.xlu1 %2207  ;;  %4118 = vrsqrt.f32 %v3390_v42 }
 0x63b   : > { %v2322_v1 = vadd.f32 %v5367_v18, %v2208_v9  ;;  %v3412_v29 = vmul.f32 %v4109_v8, %v5426_v13  ;;  %v4111_v4 = vpop.eup %4110  ;;  %4120 = vrsqrt.f32 %v3389_v41 }
 0x63c   : > { %v3409_v36 = vmul.f32 %v4111_v4, %v5420_v31 }
 0x63d   : > { %2346 = vst.msk [vmem:[%s5485_s19 + $0x10] sm:$0xff] %vm1230_vm8, %v2322_v1  ;;  %v3416_v52 = vpack.c.bf16 %v3412_v29, %v3411_v12 }
 0x63e   : > { %v2213_v34 = vpop.permute.xlu1 %2212  ;;  %v2203_v14 = vpop.permute.xlu0 %2202 }
 0x63f   : > { %v4113_v16 = vpop.eup %4112  ;;  %v2325_v17 = vadd.f32 %v5371_v19, %v2213_v34  ;;  %v2317_v18 = vadd.f32 %v5373_v15, %v2203_v14  ;;  %v3431_v37 = vsel %vm3364_vm12, %v3416_v52, 0 }
 0x640   : > { %3873 = vmatpush3.bf16.xpose.msra.mxu1 %v3431_v37  ;;  %v3410_v13 = vmul.f32 %v4113_v16, %v5431_v43 }
 0x641   : > { %2347 = vst.msk [vmem:[%s5485_s19 + $0x18] sm:$0xff] %vm1230_vm8, %v2325_v17  ;;  %2345 = vst.msk [vmem:[%s5485_s19 + $0x8] sm:$0xff] %vm1230_vm8, %v2317_v18  ;;  %3874 = vmatprep.subr.bf16.mxu1 %v4138_v58 }
 0x642   : > { %v2218_v56 = vpop.permute.xlu1 %2217  ;;  %v3415_v53 = vpack.c.bf16 %v3410_v13, %v3409_v36  ;;  %v4115_v15 = vpop.eup %4114 }
 0x643   : > { %v2330_v19 = vadd.f32 %v5377_v21, %v2218_v56  ;;  %v4117_v10 = vpop.eup %4116  ;;  %v3408_v39 = vmul.f32 %v4115_v15, %v5437_v22 }
 0x644   : > { %v3428_v35 = vsel %vm3364_vm12, %v3415_v53, 0  ;;  %v3407_v21 = vmul.f32 %v4117_v10, %v5422_v11 }
 0x645   : > { %2348 = vst.msk [vmem:[%s5485_s19 + $0x20] sm:$0xff] %vm1230_vm8, %v2330_v19 }
 0x646   : > { %v2223_v43 = vpop.permute.xlu1 %2222  ;;  %v3414_v63 = vpack.c.bf16 %v3408_v39, %v3407_v21 }
 0x647   : > { %v2333_v23 = vadd.f32 %v5381_v48, %v2223_v43  ;;  %v4119_v51 = vpop.eup %4118 }
 0x648   : > { %3875 = vmatpush3.bf16.xpose.msra.mxu1 %v3428_v35  ;;  %v4121_v48 = vpop.eup %4120  ;;  %v3425_v45 = vsel %vm3364_vm12, %v3414_v63, 0  ;;  %v3406_v54 = vmul.f32 %v4119_v51, %v5447_v49 }
 0x649   : > { %2349 = vst.msk [vmem:[%s5485_s19 + $0x28] sm:$0xff] %vm1230_vm8, %v2333_v23  ;;  %3876 = vmatprep.subr.bf16.mxu1 %v4138_v58 }
 0x64a   : > { %v2228_v31 = vpop.permute.xlu1 %2227 }
 0x64b   : > { %v2338_v27 = vadd.f32 %v5375_v20, %v2228_v31  ;;  %v3405_v20 = vmul.f32 %v4121_v48, %v5435_v7 }
 0x64d   : > { %2350 = vst.msk [vmem:[%s5485_s19 + $0x30] sm:$0xff] %vm1230_vm8, %v2338_v27  ;;  %v3413_v11 = vpack.c.bf16 %v3406_v54, %v3405_v20 }
 0x64e   : > { %v2233_v0 = vpop.permute.xlu1 %2232 }
 0x64f   : > { %v2341_v22 = vadd.f32 %v5379_v24, %v2233_v0  ;;  %v3422_v47 = vsel %vm3364_vm12, %v3413_v11, 0  ;;  %v3417_v24 = vld [vmem:[%s587_s22] sm:$0xf] }
 0x650   : > { %3877 = vmatpush3.bf16.xpose.msra.mxu1 %v3425_v45 }
 0x651   : > { %2351 = vst.msk [vmem:[%s5485_s19 + $0x38] sm:$0xff] %vm1230_vm8, %v2341_v22  ;;  %3878 = vmatprep.subr.bf16.mxu1 %v4138_v58 }
 0x658   : > { %3879 = vmatpush3.bf16.xpose.msra.mxu1 %v3422_v47 }
 0x65f   : > { %3881 = vmatmul.mubr.msk.bf16.vlgmr.msra.gmra.mxu1 %vm3364_vm12, %v3417_v24 }
 0x71f   : > { %v3467_v49 = vpop.f32.mrf.mxu1 }
 0x720   : > { %v3473_v38 = vmul.f32 14.285714, %v3467_v49 }
 0x721   : > { %v3882_v40 = vpop.f32.mrf.mxu1 }
 0x722   : > { %v3474_v44 = vadd.f32 -10.0, %v3473_v38 }
 0x723   : > { %v3470_v57 = vpop.f32.mrf.mxu1 }
 0x724   : > { %3475 = vst.msk [vmem:[%s5485_s19 + $0x40] sm:$0xff] %vm1230_vm8, %v3474_v44 }
 0x725   : > { %v3883_v58 = vpop.f32.mrf.mxu1 }
 0x726 PF: > { %s28_s27 = sadd.s32 1, %s4128_s27  }
 0x727   : > { %p25_p4 = scmp.ge.s32.totalorder %s28_s27, 4  }
 0x729   :  { %27 = sbr.rel (!%p25_p4) target bundleno = 4 (0x4), region = 152 }

</bundles_post_ra>
